<compile_context>
chip_gen: v5e
topology: v5e:2x2
jax: 0.10.0
libtpu: 0.0.40
codegen_flags: <defaults>
</compile_context>

<pallas_src>
import functools

import jax
import jax.numpy as jnp
from jax.experimental import pallas as pl
from jax.experimental.pallas import tpu as pltpu


def _round_up(x, m):
    return ((x + m - 1) // m) * m


_NEG = -3.0e38        # stands in for MaxPool1d's -inf padding (never wins a max)
_CHUNK = 128          # first-conv row chunk: bounds live f32 result to 16 vregs per chunk
_DATA_OFF = 8         # sublane-aligned row where the chain activation starts in buf_ref


# --------------------------------------------------------------------------------------
# Kernel 1: one full CNN branch (first conv -> pool -> 3 conv blocks -> pool).
# --------------------------------------------------------------------------------------
def _branch_kernel(patch_ref, w0_ref, aux0_ref, wcf_ref, auxc_ref, o_ref,
                   z0_ref, buf_ref, lhs_ref, *,
                   bblk, Lc, first_relu, pool1_k, pool1_pad, pool_off,
                   Lp, K, pad_l, pool2, Lout, z0_rows):
    win_lo = _DATA_OFF - pad_l                       # left zero-pad rows of the "same" conv

    for bi in range(bblk):
        # ---- -inf-fill the pool padding rows of the first-conv scratch (before conv writes)
        if pool_off > 0:
            z0_ref[0:pool_off, :] = jnp.full((pool_off, 128), _NEG, jnp.float32)
        tail_lo = ((pool_off + Lc) // 8) * 8          # conv re-writes the real rows afterwards
        if tail_lo < z0_rows:
            z0_ref[tail_lo:z0_rows, :] = jnp.full((z0_rows - tail_lo, 128), _NEG, jnp.float32)

        # ---- first conv: chunked (rows, Kc) x (Kc, 128) MXU dots, bias + eval-BN (+ReLU) ----
        for lo in range(0, Lc, _CHUNK):
            rows = min(_CHUNK, Lc - lo)
            z = jnp.dot(patch_ref[bi, lo:lo + rows, :], w0_ref[...],
                        preferred_element_type=jnp.float32)
            z = (z + aux0_ref[0:1, :]) * aux0_ref[1:2, :] + aux0_ref[2:3, :]
            if first_relu:                            # cnn1 head: Conv -> BN -> ReLU
                z = jnp.maximum(z, 0.0)
            z0_ref[pool_off + lo:pool_off + lo + rows, :] = z

        # ---- first MaxPool1d (kernel == stride == pool1_k): strided slices + max tree ----
        base = pool_off - pool1_pad                   # tap j of window i = row base + j + i*k
        m = z0_ref[pl.ds(base, Lp, stride=pool1_k), :]
        for j in range(1, pool1_k):
            m = jnp.maximum(m, z0_ref[pl.ds(base + j, Lp, stride=pool1_k), :])
        buf_ref[...] = jnp.zeros(buf_ref.shape, jnp.float32)   # zero "same"-conv pad rows
        buf_ref[_DATA_OFF:_DATA_OFF + Lp, :] = m               # one dense (Lp,128) store

        # ---- 3x Convolution_Block: Conv1dSamePadding(K) -> ReLU -> eval BatchNorm ----
        # K taps fused into one deep-contraction dot: LHS (Lp, K*128) bf16 built from a single
        # cast of the padded window; RHS is the pre-reshaped (K*128, 128) weight.
        for layer in range(3):
            xb = buf_ref[win_lo:win_lo + Lp + K - 1, :].astype(jnp.bfloat16)   # one cast/layer
            for k in range(K):
                lhs_ref[0:Lp, k * 128:(k + 1) * 128] = xb[k:k + Lp, :]
            z = jnp.dot(lhs_ref[0:Lp, :], wcf_ref[layer],
                        preferred_element_type=jnp.float32)
            z = jnp.maximum(z + auxc_ref[layer, 0:1, :], 0.0)            # bias -> ReLU
            z = z * auxc_ref[layer, 1:2, :] + auxc_ref[layer, 2:3, :]    # folded eval BN
            buf_ref[_DATA_OFF:_DATA_OFF + Lp, :] = z

        # ---- final MaxPool1d (kernel == stride == pool2): strided slices + one dense store --
        mo = buf_ref[pl.ds(_DATA_OFF, Lout, stride=pool2), :]
        for j in range(1, pool2):
            mo = jnp.maximum(mo, buf_ref[pl.ds(_DATA_OFF + j, Lout, stride=pool2), :])
        o_ref[bi, :, :] = mo


def branch_forward(patches, w0, aux0, wcf, auxc, *, Lc, first_relu,
                   pool1_k, pool1_pad, pool2, bblk=1):
    Bp, Lc_pad, Kc = patches.shape
    assert Bp % bblk == 0
    nlayer = wcf.shape[0]
    K = wcf.shape[1] // 128
    Lp = (Lc + 2 * pool1_pad - pool1_k) // pool1_k + 1
    pad_l = (K - 1) // 2                     # Conv1dSamePadding, stride 1
    pad_r = K - 1 - pad_l
    Lout = (Lp - pool2) // pool2 + 1
    assert 0 <= pool1_pad <= 8
    pool_off = 8 if pool1_pad > 0 else 0     # aligned offset so conv stores stay sublane-aligned
    z0_rows = _round_up(max(pool_off + Lc, pool_off - pool1_pad + pool1_k * Lp), 8)
    buf_rows = _round_up(_DATA_OFF + Lp + pad_r, 8)
    lhs_rows = _round_up(Lp, 8)

    kern = functools.partial(
        _branch_kernel, bblk=bblk, Lc=Lc, first_relu=first_relu, pool1_k=pool1_k,
        pool1_pad=pool1_pad, pool_off=pool_off, Lp=Lp, K=K, pad_l=pad_l,
        pool2=pool2, Lout=Lout, z0_rows=z0_rows)

    return pl.pallas_call(
        kern,
        grid=(Bp // bblk,),
        in_specs=[
            pl.BlockSpec((bblk, Lc_pad, Kc), lambda b: (b, 0, 0)),
            pl.BlockSpec((Kc, 128), lambda b: (0, 0)),
            pl.BlockSpec((3, 128), lambda b: (0, 0)),
            pl.BlockSpec((nlayer, K * 128, 128), lambda b: (0, 0, 0)),
            pl.BlockSpec((nlayer, 3, 128), lambda b: (0, 0, 0)),
        ],
        out_specs=pl.BlockSpec((bblk, Lout, 128), lambda b: (b, 0, 0)),
        out_shape=jax.ShapeDtypeStruct((Bp, Lout, 128), jnp.float32),
        scratch_shapes=[pltpu.VMEM((z0_rows, 128), jnp.float32),        # first-conv output
                        pltpu.VMEM((buf_rows, 128), jnp.float32),       # padded chain activation
                        pltpu.VMEM((lhs_rows, K * 128), jnp.bfloat16)], # fused-tap matmul LHS
        compiler_params=pltpu.CompilerParams(dimension_semantics=("parallel",)),
    )(patches, w0, aux0, wcf, auxc)


# --------------------------------------------------------------------------------------
# Output head: concat + Linear(3072, n_classes) + Softmax.
# --------------------------------------------------------------------------------------
def _head_kernel(s_ref, g_ref, ws_ref, wg_ref, b_ref, o_ref, *, n_classes):
    z = jnp.dot(s_ref[...], ws_ref[...], preferred_element_type=jnp.float32)
    z = z + jnp.dot(g_ref[...], wg_ref[...], preferred_element_type=jnp.float32)
    z = z + b_ref[...]
    col = jax.lax.broadcasted_iota(jnp.int32, z.shape, 1)
    z = jnp.where(col < n_classes, z, -1e30)          # softmax only over the real classes
    z = z - jnp.max(z, axis=-1, keepdims=True)
    e = jnp.exp(z)
    o_ref[...] = e / jnp.sum(e, axis=-1, keepdims=True)


def _head_pallas(s_flat, g_flat, ws, wg, bias, *, n_classes, tb=8):
    """Batch-blocked Pallas head (used for B >= 8): 8-row sublane tiles, 'parallel' grid."""
    B = s_flat.shape[0]
    Bp = _round_up(B, tb)
    s_flat = jnp.pad(s_flat, ((0, Bp - B), (0, 0)))
    g_flat = jnp.pad(g_flat, ((0, Bp - B), (0, 0)))
    out = pl.pallas_call(
        functools.partial(_head_kernel, n_classes=n_classes),
        grid=(Bp // tb,),
        in_specs=[
            pl.BlockSpec((tb, s_flat.shape[1]), lambda i: (i, 0)),
            pl.BlockSpec((tb, g_flat.shape[1]), lambda i: (i, 0)),
            pl.BlockSpec(ws.shape, lambda i: (0, 0)),
            pl.BlockSpec(wg.shape, lambda i: (0, 0)),
            pl.BlockSpec(bias.shape, lambda i: (0, 0)),
        ],
        out_specs=pl.BlockSpec((tb, 128), lambda i: (i, 0)),
        out_shape=jax.ShapeDtypeStruct((Bp, 128), jnp.float32),
        compiler_params=pltpu.CompilerParams(dimension_semantics=("parallel",)),
    )(s_flat, g_flat, ws, wg, bias)
    return out[:B, :n_classes]


def _head_xla(s_flat, g_flat, ws, wg, bias, *, n_classes):
    """Tiny-batch head: one small XLA dot + softmax (a Pallas launch is pure overhead here)."""
    z = jnp.dot(s_flat, ws, preferred_element_type=jnp.float32)
    z = z + jnp.dot(g_flat, wg, preferred_element_type=jnp.float32) + bias
    return jax.nn.softmax(z[:, :n_classes], axis=-1)


def head_forward(s_flat, g_flat, ws, wg, bias, *, n_classes):
    if s_flat.shape[0] >= 8:
        return _head_pallas(s_flat, g_flat, ws, wg, bias, n_classes=n_classes)
    return _head_xla(s_flat, g_flat, ws, wg, bias, n_classes=n_classes)


# --------------------------------------------------------------------------------------
# XLA glue: im2col for the two strided first convs (tiny tensors; feeds the branch kernels).
# --------------------------------------------------------------------------------------
def _im2col(x_blc, K, stride, pad):
    """x: (B, L, C) channels-last -> patches (B, L_out, C*K) with (c, k) column order."""
    B, L, C = x_blc.shape
    L_out = (L + 2 * pad - K) // stride + 1
    xp = jnp.pad(x_blc, ((0, 0), (pad, pad), (0, 0)))
    idx = jnp.arange(L_out)[:, None] * stride + jnp.arange(K)[None, :]
    p = xp[:, idx, :]                                   # (B, L_out, K, C)
    return jnp.transpose(p, (0, 1, 3, 2)).reshape(B, L_out, C * K)


# --------------------------------------------------------------------------------------
# Parameters (deterministic, synthetic), pre-packed for the kernels.
# --------------------------------------------------------------------------------------
def init_params(key, input_dim, n_classes, fs, L):
    assert n_classes <= 128
    keys = iter(jax.random.split(key, 64))

    def randn(shape):
        return jax.random.normal(next(keys), shape, jnp.float32)

    def bn_affine(c):
        gamma = 1.0 + 0.1 * randn((c,))
        beta = 0.1 * randn((c,))
        mean = 0.1 * randn((c,))
        var = 0.5 + jax.random.uniform(next(keys), (c,), jnp.float32)
        scale = gamma / jnp.sqrt(var + 1e-5)
        shift = beta - mean * scale
        return scale, shift

    def head_conv(c_in, c_out, K, with_bn):
        """Branch first conv packed as a lane-dense (Kc, 128) bf16 matmul weight + (3,128) aux."""
        w = randn((c_out, c_in, K)) / jnp.sqrt(jnp.float32(c_in * K))
        b = 0.01 * randn((c_out,))
        if with_bn:
            scale, shift = bn_affine(c_out)
        else:
            scale = jnp.ones((c_out,), jnp.float32)
            shift = jnp.zeros((c_out,), jnp.float32)
        w2d = w.reshape(c_out, c_in * K).T                         # rows ordered (ci, k)
        Kc = _round_up(c_in * K, 128)                              # lane-dense contraction dim
        w2d = jnp.pad(w2d, ((0, Kc - c_in * K), (0, 128 - c_out)))
        aux = jnp.stack([jnp.pad(b, (0, 128 - c_out)),
                         jnp.pad(scale, (0, 128 - c_out), constant_values=1.0),
                         jnp.pad(shift, (0, 128 - c_out))])
        return w2d.astype(jnp.bfloat16), aux.astype(jnp.float32)

    def block_chain(K):
        """3 Convolution_Blocks -> fused (3, K*128, 128) bf16 deep-contraction weights + aux."""
        ws, auxs = [], []
        c_in = 64
        for _ in range(3):
            w = randn((128, c_in, K)) / jnp.sqrt(jnp.float32(c_in * K))
            b = 0.01 * randn((128,))
            scale, shift = bn_affine(128)
            wk = jnp.transpose(w, (2, 1, 0))                       # (K, C_in, C_out)
            wk = jnp.pad(wk, ((0, 0), (0, 128 - c_in), (0, 0)))    # zero-pad C_in -> 128
            ws.append(wk)
            auxs.append(jnp.stack([b, scale, shift]))
            c_in = 128
        wcf = jnp.stack(ws).reshape(3, K * 128, 128)               # row order (k, ci)
        return wcf.astype(jnp.bfloat16), jnp.stack(auxs).astype(jnp.float32)

    params = {}
    params["b1_w0"], params["b1_aux0"] = head_conv(1, 64, fs // 2, True)
    params["b1_wcf"], params["b1_auxc"] = block_chain(8)
    params["b2_w0"], params["b2_aux0"] = head_conv(input_dim, 64, 4 * fs, False)
    params["b2_wcf"], params["b2_auxc"] = block_chain(6)

    # Output head: Linear(3072, n_classes) + Softmax (PyTorch (B, C, L) flatten order).
    Lc1 = (L + 44 - fs // 2) // 6 + 1
    Lo1 = (((Lc1 + 4 - 8) // 8 + 1) - 4) // 4 + 1                  # 16 for L=3200, fs=100
    Lc2 = (L + 350 - 4 * fs) // (fs // 2) + 1
    Lo2 = (((Lc2 - 4) // 4 + 1) - 2) // 2 + 1                      # 8
    n_small, n_big = 128 * Lo1, 128 * Lo2
    assert n_small + n_big == 3072, "Linear(3072) expects L=3200 at fs=100"
    wl = randn((3072, n_classes)) / jnp.sqrt(3072.0)
    bl = 0.01 * randn((n_classes,))
    # Permute rows from torch (c*Lo + l) order to channels-last (l*128 + c) order, split, pad.
    ws_ = wl[:n_small].reshape(128, Lo1, n_classes).transpose(1, 0, 2).reshape(n_small, n_classes)
    wg_ = wl[n_small:].reshape(128, Lo2, n_classes).transpose(1, 0, 2).reshape(n_big, n_classes)
    params["lin_ws"] = jnp.pad(ws_, ((0, 0), (0, 128 - n_classes))).astype(jnp.bfloat16)
    params["lin_wg"] = jnp.pad(wg_, ((0, 0), (0, 128 - n_classes))).astype(jnp.bfloat16)
    params["lin_b"] = jnp.pad(bl, (0, 128 - n_classes)).reshape(1, 128).astype(jnp.float32)
    return params


# --------------------------------------------------------------------------------------
# Forward pass
# --------------------------------------------------------------------------------------
def deepfeature_net_forward(params, x_ncl, *, fs=100, n_classes=5):
    x = jnp.transpose(x_ncl, (0, 2, 1)).astype(jnp.float32)       # (B, L, C_in) channels-last
    B = x.shape[0]
    # One batch item per grid step at small B keeps >= 2 "parallel" steps for v7x's two
    # TensorCores; at larger B a few items per step amortize the ~0.35us/step overhead.
    bblk = 1 if B < 8 else min(4, max(1, B // 2))
    Bp = _round_up(B, bblk)

    def pad_patches(p, Kc):
        Lc = p.shape[1]
        return jnp.pad(p, ((0, Bp - B), (0, _round_up(Lc, 8) - Lc),
                           (0, Kc - p.shape[-1]))).astype(jnp.bfloat16), Lc

    # ---- branch 1 (cnn1): Conv(1,64,k=fs//2,s=6,p=22)->BN->ReLU->MaxPool(8,8,2)
    #                       -> 3x ConvBlock(K=8) -> MaxPool(4,4) ----
    p1, Lc1 = pad_patches(_im2col(x[:, :, :1], fs // 2, 6, 22), params["b1_w0"].shape[0])
    small = branch_forward(p1, params["b1_w0"], params["b1_aux0"],
                           params["b1_wcf"], params["b1_auxc"], Lc=Lc1,
                           first_relu=True, pool1_k=8, pool1_pad=2, pool2=4,
                           bblk=bblk)[:B]                                      # (B, 16, 128)

    # ---- branch 2 (cnn2): Conv(C_in,64,k=4*fs,s=fs//2,p=175)->MaxPool(4,4)
    #                       -> 3x ConvBlock(K=6) -> MaxPool(2,2) ----
    p2, Lc2 = pad_patches(_im2col(x, 4 * fs, fs // 2, 175), params["b2_w0"].shape[0])
    big = branch_forward(p2, params["b2_w0"], params["b2_aux0"],
                         params["b2_wcf"], params["b2_auxc"], Lc=Lc2,
                         first_relu=False, pool1_k=4, pool1_pad=0, pool2=2,
                         bblk=bblk)[:B]                                        # (B, 8, 128)

    # ---- concat + Linear(3072, n_classes) + Softmax ----
    # Linear weight rows were permuted in init_params to the channels-last flatten order,
    # so no activation transpose / concat materialization is needed here.
    s_flat = small.reshape(B, -1).astype(jnp.bfloat16)            # (B, 2048)
    g_flat = big.reshape(B, -1).astype(jnp.bfloat16)              # (B, 1024)
    return head_forward(s_flat, g_flat, params["lin_ws"], params["lin_wg"],
                        params["lin_b"], n_classes=n_classes)


# --------------------------------------------------------------------------------------
if __name__ == "__main__":
    B, input_dim, L = 2, 1, 3200     # L=3200 @ fs=100 makes the flattened features = 3072,
    n_classes, fs = 5, 100           # matching the hard-coded Linear(in_features=3072).
    key = jax.random.PRNGKey(0)
    kx, kp = jax.random.split(key)
    x = jax.random.normal(kx, (B, input_dim, L), jnp.float32)
    params = init_params(kp, input_dim, n_classes, fs, L)

    fwd = jax.jit(functools.partial(deepfeature_net_forward, fs=fs, n_classes=n_classes))
    y = jax.block_until_ready(fwd(params, x))
    assert y.shape == (B, n_classes)
    assert bool(jnp.all(jnp.isfinite(y)))
    assert bool(jnp.all(jnp.abs(jnp.sum(y, axis=-1) - 1.0) < 1e-3))

    # Smoke-test the batch-blocked Pallas head path (used for B >= 8) against the XLA head.
    ks, kg = jax.random.split(jax.random.PRNGKey(1))
    s8 = jax.random.normal(ks, (8, 2048), jnp.float32).astype(jnp.bfloat16)
    g8 = jax.random.normal(kg, (8, 1024), jnp.float32).astype(jnp.bfloat16)
    yp = jax.block_until_ready(
        _head_pallas(s8, g8, params["lin_ws"], params["lin_wg"], params["lin_b"],
                     n_classes=n_classes))
    yx = _head_xla(s8, g8, params["lin_ws"], params["lin_wg"], params["lin_b"],
                   n_classes=n_classes)
    assert yp.shape == (8, n_classes)
    assert bool(jnp.max(jnp.abs(yp - yx)) < 5e-3)

    # TODO(synk): training-mode Dropout / BatchNorm batch statistics are not modeled
    # (module evaluated as is_train=False; eval BN folded into a per-channel affine).
    print("KERNEL_OK")
</pallas_src>

<mosaic_0001>
module attributes {stable_mosaic.version = 11 : i64} {
  func.func @_branch_kernel(%arg0: i32, %arg1: memref<1x64x512xbf16, #tpu.memory_space<vmem>>, %arg2: memref<512x128xbf16, #tpu.memory_space<vmem>>, %arg3: memref<3x128xf32, #tpu.memory_space<vmem>>, %arg4: memref<3x768x128xbf16, #tpu.memory_space<vmem>>, %arg5: memref<3x3x128xf32, #tpu.memory_space<vmem>>, %arg6: memref<1x8x128xf32, #tpu.memory_space<vmem>>, %arg7: memref<64x128xf32, #tpu.memory_space<vmem>>, %arg8: memref<32x128xf32, #tpu.memory_space<vmem>>, %arg9: memref<16x768xbf16, #tpu.memory_space<vmem>>) attributes {dimension_semantics = [#tpu.dimension_semantics<parallel>], iteration_bounds = array<i64: 2>, scalar_prefetch = 0 : i64, scratch_operands = 3 : i64, tpu.core_type = #tpu.core_type<tc>, window_params = [{transform_indices = @transform_0, window_bounds = array<i64: 1, 64, 512>}, {pipeline_mode = #tpu.pipeline_mode<synchronous>, transform_indices = @transform_1, window_bounds = array<i64: 512, 128>}, {pipeline_mode = #tpu.pipeline_mode<synchronous>, transform_indices = @transform_2, window_bounds = array<i64: 3, 128>}, {pipeline_mode = #tpu.pipeline_mode<synchronous>, transform_indices = @transform_3, window_bounds = array<i64: 3, 768, 128>}, {pipeline_mode = #tpu.pipeline_mode<synchronous>, transform_indices = @transform_4, window_bounds = array<i64: 3, 3, 128>}, {transform_indices = @transform_5, window_bounds = array<i64: 1, 8, 128>}]} {
    %c0 = arith.constant 0 : index
    %c0_0 = arith.constant 0 : index
    %c0_1 = arith.constant 0 : index
    %0 = vector.load %arg1[%c0, %c0_0, %c0_1] : memref<1x64x512xbf16, #tpu.memory_space<vmem>>, vector<1x64x512xbf16>
    %1 = vector.shape_cast %0 : vector<1x64x512xbf16> to vector<64x512xbf16>
    %c0_2 = arith.constant 0 : index
    %c0_3 = arith.constant 0 : index
    %2 = vector.load %arg2[%c0_2, %c0_3] : memref<512x128xbf16, #tpu.memory_space<vmem>>, vector<512x128xbf16>
    %cst = arith.constant dense<0.000000e+00> : vector<64x128xf32>
    %3 = tpu.matmul %1, %2, %cst {dimension_numbers = #tpu.dot_dimension_numbers<[1], [0], [0], [1], [0, 0, 1, 1], [], []>} : vector<64x512xbf16>, vector<512x128xbf16>, vector<64x128xf32> -> vector<64x128xf32>
    %c0_4 = arith.constant 0 : index
    %c0_5 = arith.constant 0 : index
    %4 = vector.load %arg3[%c0_4, %c0_5] : memref<3x128xf32, #tpu.memory_space<vmem>>, vector<1x128xf32>
    %5 = vector.broadcast %4 : vector<1x128xf32> to vector<64x128xf32>
    %6 = arith.addf %3, %5 : vector<64x128xf32>
    %c1 = arith.constant 1 : index
    %c0_6 = arith.constant 0 : index
    %7 = vector.load %arg3[%c1, %c0_6] : memref<3x128xf32, #tpu.memory_space<vmem>>, vector<1x128xf32>
    %8 = vector.broadcast %7 : vector<1x128xf32> to vector<64x128xf32>
    %9 = arith.mulf %6, %8 : vector<64x128xf32>
    %c2 = arith.constant 2 : index
    %c0_7 = arith.constant 0 : index
    %10 = vector.load %arg3[%c2, %c0_7] : memref<3x128xf32, #tpu.memory_space<vmem>>, vector<1x128xf32>
    %11 = vector.broadcast %10 : vector<1x128xf32> to vector<64x128xf32>
    %12 = arith.addf %9, %11 : vector<64x128xf32>
    %c0_8 = arith.constant 0 : index
    %c0_9 = arith.constant 0 : index
    %13 = vector.load %arg7[%c0_8, %c0_9] : memref<64x128xf32, #tpu.memory_space<vmem>>, vector<64x128xf32>
    tpu.vector_store %arg7[%c0_8, %c0_9], %12 {strides = array<i32>} : memref<64x128xf32, #tpu.memory_space<vmem>>, vector<64x128xf32>,
    %c0_10 = arith.constant 0 : index
    %c0_11 = arith.constant 0 : index
    %14 = tpu.strided_load %arg7[%c0_10, %c0_11] {strides = array<i32: 4, 1>} : memref<64x128xf32, #tpu.memory_space<vmem>>, vector<16x128xf32>
    %c1_12 = arith.constant 1 : index
    %c0_13 = arith.constant 0 : index
    %15 = tpu.strided_load %arg7[%c1_12, %c0_13] {strides = array<i32: 4, 1>} : memref<64x128xf32, #tpu.memory_space<vmem>>, vector<16x128xf32>
    %16 = arith.maximumf %14, %15 : vector<16x128xf32>
    %c2_14 = arith.constant 2 : index
    %c0_15 = arith.constant 0 : index
    %17 = tpu.strided_load %arg7[%c2_14, %c0_15] {strides = array<i32: 4, 1>} : memref<64x128xf32, #tpu.memory_space<vmem>>, vector<16x128xf32>
    %18 = arith.maximumf %16, %17 : vector<16x128xf32>
    %c3 = arith.constant 3 : index
    %c0_16 = arith.constant 0 : index
    %19 = tpu.strided_load %arg7[%c3, %c0_16] {strides = array<i32: 4, 1>} : memref<64x128xf32, #tpu.memory_space<vmem>>, vector<16x128xf32>
    %20 = arith.maximumf %18, %19 : vector<16x128xf32>
    %cst_17 = arith.constant 0.000000e+00 : f32
    %21 = vector.broadcast %cst_17 : f32 to vector<32x128xf32>
    %c0_18 = arith.constant 0 : index
    %c0_19 = arith.constant 0 : index
    %22 = vector.load %arg8[%c0_18, %c0_19] : memref<32x128xf32, #tpu.memory_space<vmem>>, vector<32x128xf32>
    tpu.vector_store %arg8[%c0_18, %c0_19], %21 {strides = array<i32>} : memref<32x128xf32, #tpu.memory_space<vmem>>, vector<32x128xf32>,
    %c8 = arith.constant 8 : index
    %c0_20 = arith.constant 0 : index
    %23 = vector.load %arg8[%c8, %c0_20] : memref<32x128xf32, #tpu.memory_space<vmem>>, vector<16x128xf32>
    tpu.vector_store %arg8[%c8, %c0_20], %20 {strides = array<i32>} : memref<32x128xf32, #tpu.memory_space<vmem>>, vector<16x128xf32>,
    %c6 = arith.constant 6 : index
    %c0_21 = arith.constant 0 : index
    %24 = vector.load %arg8[%c6, %c0_21] : memref<32x128xf32, #tpu.memory_space<vmem>>, vector<21x128xf32>
    %25 = arith.truncf %24 : vector<21x128xf32> to vector<21x128xbf16>
    %26 = vector.extract_strided_slice %25 {offsets = [0, 0], sizes = [16, 128], strides = [1, 1]} : vector<21x128xbf16> to vector<16x128xbf16>
    %c0_22 = arith.constant 0 : index
    %c0_23 = arith.constant 0 : index
    %27 = vector.load %arg9[%c0_22, %c0_23] : memref<16x768xbf16, #tpu.memory_space<vmem>>, vector<16x128xbf16>
    tpu.vector_store %arg9[%c0_22, %c0_23], %26 {strides = array<i32>} : memref<16x768xbf16, #tpu.memory_space<vmem>>, vector<16x128xbf16>,
    %28 = vector.extract_strided_slice %25 {offsets = [1, 0], sizes = [16, 128], strides = [1, 1]} : vector<21x128xbf16> to vector<16x128xbf16>
    %c0_24 = arith.constant 0 : index
    %c128 = arith.constant 128 : index
    %29 = vector.load %arg9[%c0_24, %c128] : memref<16x768xbf16, #tpu.memory_space<vmem>>, vector<16x128xbf16>
    tpu.vector_store %arg9[%c0_24, %c128], %28 {strides = array<i32>} : memref<16x768xbf16, #tpu.memory_space<vmem>>, vector<16x128xbf16>,
    %30 = vector.extract_strided_slice %25 {offsets = [2, 0], sizes = [16, 128], strides = [1, 1]} : vector<21x128xbf16> to vector<16x128xbf16>
    %c0_25 = arith.constant 0 : index
    %c256 = arith.constant 256 : index
    %31 = vector.load %arg9[%c0_25, %c256] : memref<16x768xbf16, #tpu.memory_space<vmem>>, vector<16x128xbf16>
    tpu.vector_store %arg9[%c0_25, %c256], %30 {strides = array<i32>} : memref<16x768xbf16, #tpu.memory_space<vmem>>, vector<16x128xbf16>,
    %32 = vector.extract_strided_slice %25 {offsets = [3, 0], sizes = [16, 128], strides = [1, 1]} : vector<21x128xbf16> to vector<16x128xbf16>
    %c0_26 = arith.constant 0 : index
    %c384 = arith.constant 384 : index
    %33 = vector.load %arg9[%c0_26, %c384] : memref<16x768xbf16, #tpu.memory_space<vmem>>, vector<16x128xbf16>
    tpu.vector_store %arg9[%c0_26, %c384], %32 {strides = array<i32>} : memref<16x768xbf16, #tpu.memory_space<vmem>>, vector<16x128xbf16>,
    %34 = vector.extract_strided_slice %25 {offsets = [4, 0], sizes = [16, 128], strides = [1, 1]} : vector<21x128xbf16> to vector<16x128xbf16>
    %c0_27 = arith.constant 0 : index
    %c512 = arith.constant 512 : index
    %35 = vector.load %arg9[%c0_27, %c512] : memref<16x768xbf16, #tpu.memory_space<vmem>>, vector<16x128xbf16>
    tpu.vector_store %arg9[%c0_27, %c512], %34 {strides = array<i32>} : memref<16x768xbf16, #tpu.memory_space<vmem>>, vector<16x128xbf16>,
    %36 = vector.extract_strided_slice %25 {offsets = [5, 0], sizes = [16, 128], strides = [1, 1]} : vector<21x128xbf16> to vector<16x128xbf16>
    %c0_28 = arith.constant 0 : index
    %c640 = arith.constant 640 : index
    %37 = vector.load %arg9[%c0_28, %c640] : memref<16x768xbf16, #tpu.memory_space<vmem>>, vector<16x128xbf16>
    tpu.vector_store %arg9[%c0_28, %c640], %36 {strides = array<i32>} : memref<16x768xbf16, #tpu.memory_space<vmem>>, vector<16x128xbf16>,
    %c0_29 = arith.constant 0 : index
    %c0_30 = arith.constant 0 : index
    %38 = vector.load %arg9[%c0_29, %c0_30] : memref<16x768xbf16, #tpu.memory_space<vmem>>, vector<16x768xbf16>
    %c0_31 = arith.constant 0 : index
    %c0_32 = arith.constant 0 : index
    %c0_33 = arith.constant 0 : index
    %39 = vector.load %arg4[%c0_31, %c0_32, %c0_33] : memref<3x768x128xbf16, #tpu.memory_space<vmem>>, vector<1x768x128xbf16>
    %40 = vector.shape_cast %39 : vector<1x768x128xbf16> to vector<768x128xbf16>
    %cst_34 = arith.constant dense<0.000000e+00> : vector<16x128xf32>
    %41 = tpu.matmul %38, %40, %cst_34 {dimension_numbers = #tpu.dot_dimension_numbers<[1], [0], [0], [1], [0, 0, 1, 1], [], []>} : vector<16x768xbf16>, vector<768x128xbf16>, vector<16x128xf32> -> vector<16x128xf32>
    %c0_35 = arith.constant 0 : index
    %c0_36 = arith.constant 0 : index
    %c0_37 = arith.constant 0 : index
    %42 = vector.load %arg5[%c0_35, %c0_36, %c0_37] : memref<3x3x128xf32, #tpu.memory_space<vmem>>, vector<1x1x128xf32>
    %43 = vector.shape_cast %42 : vector<1x1x128xf32> to vector<1x128xf32>
    %44 = vector.broadcast %43 : vector<1x128xf32> to vector<16x128xf32>
    %45 = arith.addf %41, %44 : vector<16x128xf32>
    %cst_38 = arith.constant 0.000000e+00 : f32
    %46 = vector.broadcast %cst_38 : f32 to vector<16x128xf32>
    %47 = arith.maximumf %45, %46 : vector<16x128xf32>
    %c0_39 = arith.constant 0 : index
    %c1_40 = arith.constant 1 : index
    %c0_41 = arith.constant 0 : index
    %48 = vector.load %arg5[%c0_39, %c1_40, %c0_41] : memref<3x3x128xf32, #tpu.memory_space<vmem>>, vector<1x1x128xf32>
    %49 = vector.shape_cast %48 : vector<1x1x128xf32> to vector<1x128xf32>
    %50 = vector.broadcast %49 : vector<1x128xf32> to vector<16x128xf32>
    %51 = arith.mulf %47, %50 : vector<16x128xf32>
    %c0_42 = arith.constant 0 : index
    %c2_43 = arith.constant 2 : index
    %c0_44 = arith.constant 0 : index
    %52 = vector.load %arg5[%c0_42, %c2_43, %c0_44] : memref<3x3x128xf32, #tpu.memory_space<vmem>>, vector<1x1x128xf32>
    %53 = vector.shape_cast %52 : vector<1x1x128xf32> to vector<1x128xf32>
    %54 = vector.broadcast %53 : vector<1x128xf32> to vector<16x128xf32>
    %55 = arith.addf %51, %54 : vector<16x128xf32>
    %c8_45 = arith.constant 8 : index
    %c0_46 = arith.constant 0 : index
    %56 = vector.load %arg8[%c8_45, %c0_46] : memref<32x128xf32, #tpu.memory_space<vmem>>, vector<16x128xf32>
    tpu.vector_store %arg8[%c8_45, %c0_46], %55 {strides = array<i32>} : memref<32x128xf32, #tpu.memory_space<vmem>>, vector<16x128xf32>,
    %c6_47 = arith.constant 6 : index
    %c0_48 = arith.constant 0 : index
    %57 = vector.load %arg8[%c6_47, %c0_48] : memref<32x128xf32, #tpu.memory_space<vmem>>, vector<21x128xf32>
    %58 = arith.truncf %57 : vector<21x128xf32> to vector<21x128xbf16>
    %59 = vector.extract_strided_slice %58 {offsets = [0, 0], sizes = [16, 128], strides = [1, 1]} : vector<21x128xbf16> to vector<16x128xbf16>
    %c0_49 = arith.constant 0 : index
    %c0_50 = arith.constant 0 : index
    %60 = vector.load %arg9[%c0_49, %c0_50] : memref<16x768xbf16, #tpu.memory_space<vmem>>, vector<16x128xbf16>
    tpu.vector_store %arg9[%c0_49, %c0_50], %59 {strides = array<i32>} : memref<16x768xbf16, #tpu.memory_space<vmem>>, vector<16x128xbf16>,
    %61 = vector.extract_strided_slice %58 {offsets = [1, 0], sizes = [16, 128], strides = [1, 1]} : vector<21x128xbf16> to vector<16x128xbf16>
    %c0_51 = arith.constant 0 : index
    %c128_52 = arith.constant 128 : index
    %62 = vector.load %arg9[%c0_51, %c128_52] : memref<16x768xbf16, #tpu.memory_space<vmem>>, vector<16x128xbf16>
    tpu.vector_store %arg9[%c0_51, %c128_52], %61 {strides = array<i32>} : memref<16x768xbf16, #tpu.memory_space<vmem>>, vector<16x128xbf16>,
    %63 = vector.extract_strided_slice %58 {offsets = [2, 0], sizes = [16, 128], strides = [1, 1]} : vector<21x128xbf16> to vector<16x128xbf16>
    %c0_53 = arith.constant 0 : index
    %c256_54 = arith.constant 256 : index
    %64 = vector.load %arg9[%c0_53, %c256_54] : memref<16x768xbf16, #tpu.memory_space<vmem>>, vector<16x128xbf16>
    tpu.vector_store %arg9[%c0_53, %c256_54], %63 {strides = array<i32>} : memref<16x768xbf16, #tpu.memory_space<vmem>>, vector<16x128xbf16>,
    %65 = vector.extract_strided_slice %58 {offsets = [3, 0], sizes = [16, 128], strides = [1, 1]} : vector<21x128xbf16> to vector<16x128xbf16>
    %c0_55 = arith.constant 0 : index
    %c384_56 = arith.constant 384 : index
    %66 = vector.load %arg9[%c0_55, %c384_56] : memref<16x768xbf16, #tpu.memory_space<vmem>>, vector<16x128xbf16>
    tpu.vector_store %arg9[%c0_55, %c384_56], %65 {strides = array<i32>} : memref<16x768xbf16, #tpu.memory_space<vmem>>, vector<16x128xbf16>,
    %67 = vector.extract_strided_slice %58 {offsets = [4, 0], sizes = [16, 128], strides = [1, 1]} : vector<21x128xbf16> to vector<16x128xbf16>
    %c0_57 = arith.constant 0 : index
    %c512_58 = arith.constant 512 : index
    %68 = vector.load %arg9[%c0_57, %c512_58] : memref<16x768xbf16, #tpu.memory_space<vmem>>, vector<16x128xbf16>
    tpu.vector_store %arg9[%c0_57, %c512_58], %67 {strides = array<i32>} : memref<16x768xbf16, #tpu.memory_space<vmem>>, vector<16x128xbf16>,
    %69 = vector.extract_strided_slice %58 {offsets = [5, 0], sizes = [16, 128], strides = [1, 1]} : vector<21x128xbf16> to vector<16x128xbf16>
    %c0_59 = arith.constant 0 : index
    %c640_60 = arith.constant 640 : index
    %70 = vector.load %arg9[%c0_59, %c640_60] : memref<16x768xbf16, #tpu.memory_space<vmem>>, vector<16x128xbf16>
    tpu.vector_store %arg9[%c0_59, %c640_60], %69 {strides = array<i32>} : memref<16x768xbf16, #tpu.memory_space<vmem>>, vector<16x128xbf16>,
    %c0_61 = arith.constant 0 : index
    %c0_62 = arith.constant 0 : index
    %71 = vector.load %arg9[%c0_61, %c0_62] : memref<16x768xbf16, #tpu.memory_space<vmem>>, vector<16x768xbf16>
    %c1_63 = arith.constant 1 : index
    %c0_64 = arith.constant 0 : index
    %c0_65 = arith.constant 0 : index
    %72 = vector.load %arg4[%c1_63, %c0_64, %c0_65] : memref<3x768x128xbf16, #tpu.memory_space<vmem>>, vector<1x768x128xbf16>
    %73 = vector.shape_cast %72 : vector<1x768x128xbf16> to vector<768x128xbf16>
    %cst_66 = arith.constant dense<0.000000e+00> : vector<16x128xf32>
    %74 = tpu.matmul %71, %73, %cst_66 {dimension_numbers = #tpu.dot_dimension_numbers<[1], [0], [0], [1], [0, 0, 1, 1], [], []>} : vector<16x768xbf16>, vector<768x128xbf16>, vector<16x128xf32> -> vector<16x128xf32>
    %c1_67 = arith.constant 1 : index
    %c0_68 = arith.constant 0 : index
    %c0_69 = arith.constant 0 : index
    %75 = vector.load %arg5[%c1_67, %c0_68, %c0_69] : memref<3x3x128xf32, #tpu.memory_space<vmem>>, vector<1x1x128xf32>
    %76 = vector.shape_cast %75 : vector<1x1x128xf32> to vector<1x128xf32>
    %77 = vector.broadcast %76 : vector<1x128xf32> to vector<16x128xf32>
    %78 = arith.addf %74, %77 : vector<16x128xf32>
    %cst_70 = arith.constant 0.000000e+00 : f32
    %79 = vector.broadcast %cst_70 : f32 to vector<16x128xf32>
    %80 = arith.maximumf %78, %79 : vector<16x128xf32>
    %c1_71 = arith.constant 1 : index
    %c1_72 = arith.constant 1 : index
    %c0_73 = arith.constant 0 : index
    %81 = vector.load %arg5[%c1_71, %c1_72, %c0_73] : memref<3x3x128xf32, #tpu.memory_space<vmem>>, vector<1x1x128xf32>
    %82 = vector.shape_cast %81 : vector<1x1x128xf32> to vector<1x128xf32>
    %83 = vector.broadcast %82 : vector<1x128xf32> to vector<16x128xf32>
    %84 = arith.mulf %80, %83 : vector<16x128xf32>
    %c1_74 = arith.constant 1 : index
    %c2_75 = arith.constant 2 : index
    %c0_76 = arith.constant 0 : index
    %85 = vector.load %arg5[%c1_74, %c2_75, %c0_76] : memref<3x3x128xf32, #tpu.memory_space<vmem>>, vector<1x1x128xf32>
    %86 = vector.shape_cast %85 : vector<1x1x128xf32> to vector<1x128xf32>
    %87 = vector.broadcast %86 : vector<1x128xf32> to vector<16x128xf32>
    %88 = arith.addf %84, %87 : vector<16x128xf32>
    %c8_77 = arith.constant 8 : index
    %c0_78 = arith.constant 0 : index
    %89 = vector.load %arg8[%c8_77, %c0_78] : memref<32x128xf32, #tpu.memory_space<vmem>>, vector<16x128xf32>
    tpu.vector_store %arg8[%c8_77, %c0_78], %88 {strides = array<i32>} : memref<32x128xf32, #tpu.memory_space<vmem>>, vector<16x128xf32>,
    %c6_79 = arith.constant 6 : index
    %c0_80 = arith.constant 0 : index
    %90 = vector.load %arg8[%c6_79, %c0_80] : memref<32x128xf32, #tpu.memory_space<vmem>>, vector<21x128xf32>
    %91 = arith.truncf %90 : vector<21x128xf32> to vector<21x128xbf16>
    %92 = vector.extract_strided_slice %91 {offsets = [0, 0], sizes = [16, 128], strides = [1, 1]} : vector<21x128xbf16> to vector<16x128xbf16>
    %c0_81 = arith.constant 0 : index
    %c0_82 = arith.constant 0 : index
    %93 = vector.load %arg9[%c0_81, %c0_82] : memref<16x768xbf16, #tpu.memory_space<vmem>>, vector<16x128xbf16>
    tpu.vector_store %arg9[%c0_81, %c0_82], %92 {strides = array<i32>} : memref<16x768xbf16, #tpu.memory_space<vmem>>, vector<16x128xbf16>,
    %94 = vector.extract_strided_slice %91 {offsets = [1, 0], sizes = [16, 128], strides = [1, 1]} : vector<21x128xbf16> to vector<16x128xbf16>
    %c0_83 = arith.constant 0 : index
    %c128_84 = arith.constant 128 : index
    %95 = vector.load %arg9[%c0_83, %c128_84] : memref<16x768xbf16, #tpu.memory_space<vmem>>, vector<16x128xbf16>
    tpu.vector_store %arg9[%c0_83, %c128_84], %94 {strides = array<i32>} : memref<16x768xbf16, #tpu.memory_space<vmem>>, vector<16x128xbf16>,
    %96 = vector.extract_strided_slice %91 {offsets = [2, 0], sizes = [16, 128], strides = [1, 1]} : vector<21x128xbf16> to vector<16x128xbf16>
    %c0_85 = arith.constant 0 : index
    %c256_86 = arith.constant 256 : index
    %97 = vector.load %arg9[%c0_85, %c256_86] : memref<16x768xbf16, #tpu.memory_space<vmem>>, vector<16x128xbf16>
    tpu.vector_store %arg9[%c0_85, %c256_86], %96 {strides = array<i32>} : memref<16x768xbf16, #tpu.memory_space<vmem>>, vector<16x128xbf16>,
    %98 = vector.extract_strided_slice %91 {offsets = [3, 0], sizes = [16, 128], strides = [1, 1]} : vector<21x128xbf16> to vector<16x128xbf16>
    %c0_87 = arith.constant 0 : index
    %c384_88 = arith.constant 384 : index
    %99 = vector.load %arg9[%c0_87, %c384_88] : memref<16x768xbf16, #tpu.memory_space<vmem>>, vector<16x128xbf16>
    tpu.vector_store %arg9[%c0_87, %c384_88], %98 {strides = array<i32>} : memref<16x768xbf16, #tpu.memory_space<vmem>>, vector<16x128xbf16>,
    %100 = vector.extract_strided_slice %91 {offsets = [4, 0], sizes = [16, 128], strides = [1, 1]} : vector<21x128xbf16> to vector<16x128xbf16>
    %c0_89 = arith.constant 0 : index
    %c512_90 = arith.constant 512 : index
    %101 = vector.load %arg9[%c0_89, %c512_90] : memref<16x768xbf16, #tpu.memory_space<vmem>>, vector<16x128xbf16>
    tpu.vector_store %arg9[%c0_89, %c512_90], %100 {strides = array<i32>} : memref<16x768xbf16, #tpu.memory_space<vmem>>, vector<16x128xbf16>,
    %102 = vector.extract_strided_slice %91 {offsets = [5, 0], sizes = [16, 128], strides = [1, 1]} : vector<21x128xbf16> to vector<16x128xbf16>
    %c0_91 = arith.constant 0 : index
    %c640_92 = arith.constant 640 : index
    %103 = vector.load %arg9[%c0_91, %c640_92] : memref<16x768xbf16, #tpu.memory_space<vmem>>, vector<16x128xbf16>
    tpu.vector_store %arg9[%c0_91, %c640_92], %102 {strides = array<i32>} : memref<16x768xbf16, #tpu.memory_space<vmem>>, vector<16x128xbf16>,
    %c0_93 = arith.constant 0 : index
    %c0_94 = arith.constant 0 : index
    %104 = vector.load %arg9[%c0_93, %c0_94] : memref<16x768xbf16, #tpu.memory_space<vmem>>, vector<16x768xbf16>
    %c2_95 = arith.constant 2 : index
    %c0_96 = arith.constant 0 : index
    %c0_97 = arith.constant 0 : index
    %105 = vector.load %arg4[%c2_95, %c0_96, %c0_97] : memref<3x768x128xbf16, #tpu.memory_space<vmem>>, vector<1x768x128xbf16>
    %106 = vector.shape_cast %105 : vector<1x768x128xbf16> to vector<768x128xbf16>
    %cst_98 = arith.constant dense<0.000000e+00> : vector<16x128xf32>
    %107 = tpu.matmul %104, %106, %cst_98 {dimension_numbers = #tpu.dot_dimension_numbers<[1], [0], [0], [1], [0, 0, 1, 1], [], []>} : vector<16x768xbf16>, vector<768x128xbf16>, vector<16x128xf32> -> vector<16x128xf32>
    %c2_99 = arith.constant 2 : index
    %c0_100 = arith.constant 0 : index
    %c0_101 = arith.constant 0 : index
    %108 = vector.load %arg5[%c2_99, %c0_100, %c0_101] : memref<3x3x128xf32, #tpu.memory_space<vmem>>, vector<1x1x128xf32>
    %109 = vector.shape_cast %108 : vector<1x1x128xf32> to vector<1x128xf32>
    %110 = vector.broadcast %109 : vector<1x128xf32> to vector<16x128xf32>
    %111 = arith.addf %107, %110 : vector<16x128xf32>
    %cst_102 = arith.constant 0.000000e+00 : f32
    %112 = vector.broadcast %cst_102 : f32 to vector<16x128xf32>
    %113 = arith.maximumf %111, %112 : vector<16x128xf32>
    %c2_103 = arith.constant 2 : index
    %c1_104 = arith.constant 1 : index
    %c0_105 = arith.constant 0 : index
    %114 = vector.load %arg5[%c2_103, %c1_104, %c0_105] : memref<3x3x128xf32, #tpu.memory_space<vmem>>, vector<1x1x128xf32>
    %115 = vector.shape_cast %114 : vector<1x1x128xf32> to vector<1x128xf32>
    %116 = vector.broadcast %115 : vector<1x128xf32> to vector<16x128xf32>
    %117 = arith.mulf %113, %116 : vector<16x128xf32>
    %c2_106 = arith.constant 2 : index
    %c2_107 = arith.constant 2 : index
    %c0_108 = arith.constant 0 : index
    %118 = vector.load %arg5[%c2_106, %c2_107, %c0_108] : memref<3x3x128xf32, #tpu.memory_space<vmem>>, vector<1x1x128xf32>
    %119 = vector.shape_cast %118 : vector<1x1x128xf32> to vector<1x128xf32>
    %120 = vector.broadcast %119 : vector<1x128xf32> to vector<16x128xf32>
    %121 = arith.addf %117, %120 : vector<16x128xf32>
    %c8_109 = arith.constant 8 : index
    %c0_110 = arith.constant 0 : index
    %122 = vector.load %arg8[%c8_109, %c0_110] : memref<32x128xf32, #tpu.memory_space<vmem>>, vector<16x128xf32>
    tpu.vector_store %arg8[%c8_109, %c0_110], %121 {strides = array<i32>} : memref<32x128xf32, #tpu.memory_space<vmem>>, vector<16x128xf32>,
    %c8_111 = arith.constant 8 : index
    %c0_112 = arith.constant 0 : index
    %123 = tpu.strided_load %arg8[%c8_111, %c0_112] {strides = array<i32: 2, 1>} : memref<32x128xf32, #tpu.memory_space<vmem>>, vector<8x128xf32>
    %c9 = arith.constant 9 : index
    %c0_113 = arith.constant 0 : index
    %124 = tpu.strided_load %arg8[%c9, %c0_113] {strides = array<i32: 2, 1>} : memref<32x128xf32, #tpu.memory_space<vmem>>, vector<8x128xf32>
    %125 = arith.maximumf %123, %124 : vector<8x128xf32>
    %c0_114 = arith.constant 0 : index
    %c0_115 = arith.constant 0 : index
    %c0_116 = arith.constant 0 : index
    %126 = vector.load %arg6[%c0_114, %c0_115, %c0_116] : memref<1x8x128xf32, #tpu.memory_space<vmem>>, vector<1x8x128xf32>
    %127 = vector.shape_cast %126 : vector<1x8x128xf32> to vector<8x128xf32>
    %128 = vector.shape_cast %125 : vector<8x128xf32> to vector<1x8x128xf32>
    tpu.vector_store %arg6[%c0_114, %c0_115, %c0_116], %128 {strides = array<i32>} : memref<1x8x128xf32, #tpu.memory_space<vmem>>, vector<1x8x128xf32>,
    return
  }
  func.func @transform_0(%arg0: i32) -> (i32, i32, i32) {
    %c0_i32 = arith.constant 0 : i32
    %c0_i32_0 = arith.constant 0 : i32
    %c0_i32_1 = arith.constant 0 : i32
    return %arg0, %c0_i32, %c0_i32_0 : i32, i32, i32
  }
  func.func @transform_1(%arg0: i32) -> (i32, i32) {
    %c0_i32 = arith.constant 0 : i32
    %c0_i32_0 = arith.constant 0 : i32
    %c0_i32_1 = arith.constant 0 : i32
    return %c0_i32, %c0_i32_0 : i32, i32
  }
  func.func @transform_2(%arg0: i32) -> (i32, i32) {
    %c0_i32 = arith.constant 0 : i32
    %c0_i32_0 = arith.constant 0 : i32
    %c0_i32_1 = arith.constant 0 : i32
    return %c0_i32, %c0_i32_0 : i32, i32
  }
  func.func @transform_3(%arg0: i32) -> (i32, i32, i32) {
    %c0_i32 = arith.constant 0 : i32
    %c0_i32_0 = arith.constant 0 : i32
    %c0_i32_1 = arith.constant 0 : i32
    %c0_i32_2 = arith.constant 0 : i32
    return %c0_i32, %c0_i32_0, %c0_i32_1 : i32, i32, i32
  }
  func.func @transform_4(%arg0: i32) -> (i32, i32, i32) {
    %c0_i32 = arith.constant 0 : i32
    %c0_i32_0 = arith.constant 0 : i32
    %c0_i32_1 = arith.constant 0 : i32
    %c0_i32_2 = arith.constant 0 : i32
    return %c0_i32, %c0_i32_0, %c0_i32_1 : i32, i32, i32
  }
  func.func @transform_5(%arg0: i32) -> (i32, i32, i32) {
    %c0_i32 = arith.constant 0 : i32
    %c0_i32_0 = arith.constant 0 : i32
    %c0_i32_1 = arith.constant 0 : i32
    return %arg0, %c0_i32, %c0_i32_0 : i32, i32, i32
  }
}

module attributes {stable_mosaic.version = 11 : i64} {
  func.func @_branch_kernel(%arg0: i32, %arg1: memref<1x536x128xbf16, #tpu.memory_space<vmem>>, %arg2: memref<128x128xbf16, #tpu.memory_space<vmem>>, %arg3: memref<3x128xf32, #tpu.memory_space<vmem>>, %arg4: memref<3x1024x128xbf16, #tpu.memory_space<vmem>>, %arg5: memref<3x3x128xf32, #tpu.memory_space<vmem>>, %arg6: memref<1x16x128xf32, #tpu.memory_space<vmem>>, %arg7: memref<544x128xf32, #tpu.memory_space<vmem>>, %arg8: memref<80x128xf32, #tpu.memory_space<vmem>>, %arg9: memref<72x1024xbf16, #tpu.memory_space<vmem>>) attributes {dimension_semantics = [#tpu.dimension_semantics<parallel>], iteration_bounds = array<i64: 2>, scalar_prefetch = 0 : i64, scratch_operands = 3 : i64, tpu.core_type = #tpu.core_type<tc>, window_params = [{transform_indices = @transform_0, window_bounds = array<i64: 1, 536, 128>}, {pipeline_mode = #tpu.pipeline_mode<synchronous>, transform_indices = @transform_1, window_bounds = array<i64: 128, 128>}, {pipeline_mode = #tpu.pipeline_mode<synchronous>, transform_indices = @transform_2, window_bounds = array<i64: 3, 128>}, {pipeline_mode = #tpu.pipeline_mode<synchronous>, transform_indices = @transform_3, window_bounds = array<i64: 3, 1024, 128>}, {pipeline_mode = #tpu.pipeline_mode<synchronous>, transform_indices = @transform_4, window_bounds = array<i64: 3, 3, 128>}, {transform_indices = @transform_5, window_bounds = array<i64: 1, 16, 128>}]} {
    %cst = arith.constant -3.000000e+38 : f32
    %0 = vector.broadcast %cst : f32 to vector<8x128xf32>
    %c0 = arith.constant 0 : index
    %c0_0 = arith.constant 0 : index
    %1 = vector.load %arg7[%c0, %c0_0] : memref<544x128xf32, #tpu.memory_space<vmem>>, vector<8x128xf32>
    tpu.vector_store %arg7[%c0, %c0_0], %0 {strides = array<i32>} : memref<544x128xf32, #tpu.memory_space<vmem>>, vector<8x128xf32>,
    %cst_1 = arith.constant -3.000000e+38 : f32
    %2 = vector.broadcast %cst_1 : f32 to vector<8x128xf32>
    %c536 = arith.constant 536 : index
    %c0_2 = arith.constant 0 : index
    %3 = vector.load %arg7[%c536, %c0_2] : memref<544x128xf32, #tpu.memory_space<vmem>>, vector<8x128xf32>
    tpu.vector_store %arg7[%c536, %c0_2], %2 {strides = array<i32>} : memref<544x128xf32, #tpu.memory_space<vmem>>, vector<8x128xf32>,
    %c0_3 = arith.constant 0 : index
    %c0_4 = arith.constant 0 : index
    %c0_5 = arith.constant 0 : index
    %4 = vector.load %arg1[%c0_3, %c0_4, %c0_5] : memref<1x536x128xbf16, #tpu.memory_space<vmem>>, vector<1x128x128xbf16>
    %5 = vector.shape_cast %4 : vector<1x128x128xbf16> to vector<128x128xbf16>
    %c0_6 = arith.constant 0 : index
    %c0_7 = arith.constant 0 : index
    %6 = vector.load %arg2[%c0_6, %c0_7] : memref<128x128xbf16, #tpu.memory_space<vmem>>, vector<128x128xbf16>
    %cst_8 = arith.constant dense<0.000000e+00> : vector<128x128xf32>
    %7 = tpu.matmul %5, %6, %cst_8 {dimension_numbers = #tpu.dot_dimension_numbers<[1], [0], [0], [1], [0, 0, 1, 1], [], []>} : vector<128x128xbf16>, vector<128x128xbf16>, vector<128x128xf32> -> vector<128x128xf32>
    %c0_9 = arith.constant 0 : index
    %c0_10 = arith.constant 0 : index
    %8 = vector.load %arg3[%c0_9, %c0_10] : memref<3x128xf32, #tpu.memory_space<vmem>>, vector<1x128xf32>
    %9 = vector.broadcast %8 : vector<1x128xf32> to vector<128x128xf32>
    %10 = arith.addf %7, %9 : vector<128x128xf32>
    %c1 = arith.constant 1 : index
    %c0_11 = arith.constant 0 : index
    %11 = vector.load %arg3[%c1, %c0_11] : memref<3x128xf32, #tpu.memory_space<vmem>>, vector<1x128xf32>
    %12 = vector.broadcast %11 : vector<1x128xf32> to vector<128x128xf32>
    %13 = arith.mulf %10, %12 : vector<128x128xf32>
    %c2 = arith.constant 2 : index
    %c0_12 = arith.constant 0 : index
    %14 = vector.load %arg3[%c2, %c0_12] : memref<3x128xf32, #tpu.memory_space<vmem>>, vector<1x128xf32>
    %15 = vector.broadcast %14 : vector<1x128xf32> to vector<128x128xf32>
    %16 = arith.addf %13, %15 : vector<128x128xf32>
    %cst_13 = arith.constant 0.000000e+00 : f32
    %17 = vector.broadcast %cst_13 : f32 to vector<128x128xf32>
    %18 = arith.maximumf %16, %17 : vector<128x128xf32>
    %c8 = arith.constant 8 : index
    %c0_14 = arith.constant 0 : index
    %19 = vector.load %arg7[%c8, %c0_14] : memref<544x128xf32, #tpu.memory_space<vmem>>, vector<128x128xf32>
    tpu.vector_store %arg7[%c8, %c0_14], %18 {strides = array<i32>} : memref<544x128xf32, #tpu.memory_space<vmem>>, vector<128x128xf32>,
    %c0_15 = arith.constant 0 : index
    %c128 = arith.constant 128 : index
    %c0_16 = arith.constant 0 : index
    %20 = vector.load %arg1[%c0_15, %c128, %c0_16] : memref<1x536x128xbf16, #tpu.memory_space<vmem>>, vector<1x128x128xbf16>
    %21 = vector.shape_cast %20 : vector<1x128x128xbf16> to vector<128x128xbf16>
    %c0_17 = arith.constant 0 : index
    %c0_18 = arith.constant 0 : index
    %22 = vector.load %arg2[%c0_17, %c0_18] : memref<128x128xbf16, #tpu.memory_space<vmem>>, vector<128x128xbf16>
    %cst_19 = arith.constant dense<0.000000e+00> : vector<128x128xf32>
    %23 = tpu.matmul %21, %22, %cst_19 {dimension_numbers = #tpu.dot_dimension_numbers<[1], [0], [0], [1], [0, 0, 1, 1], [], []>} : vector<128x128xbf16>, vector<128x128xbf16>, vector<128x128xf32> -> vector<128x128xf32>
    %c0_20 = arith.constant 0 : index
    %c0_21 = arith.constant 0 : index
    %24 = vector.load %arg3[%c0_20, %c0_21] : memref<3x128xf32, #tpu.memory_space<vmem>>, vector<1x128xf32>
    %25 = vector.broadcast %24 : vector<1x128xf32> to vector<128x128xf32>
    %26 = arith.addf %23, %25 : vector<128x128xf32>
    %c1_22 = arith.constant 1 : index
    %c0_23 = arith.constant 0 : index
    %27 = vector.load %arg3[%c1_22, %c0_23] : memref<3x128xf32, #tpu.memory_space<vmem>>, vector<1x128xf32>
    %28 = vector.broadcast %27 : vector<1x128xf32> to vector<128x128xf32>
    %29 = arith.mulf %26, %28 : vector<128x128xf32>
    %c2_24 = arith.constant 2 : index
    %c0_25 = arith.constant 0 : index
    %30 = vector.load %arg3[%c2_24, %c0_25] : memref<3x128xf32, #tpu.memory_space<vmem>>, vector<1x128xf32>
    %31 = vector.broadcast %30 : vector<1x128xf32> to vector<128x128xf32>
    %32 = arith.addf %29, %31 : vector<128x128xf32>
    %cst_26 = arith.constant 0.000000e+00 : f32
    %33 = vector.broadcast %cst_26 : f32 to vector<128x128xf32>
    %34 = arith.maximumf %32, %33 : vector<128x128xf32>
    %c136 = arith.constant 136 : index
    %c0_27 = arith.constant 0 : index
    %35 = vector.load %arg7[%c136, %c0_27] : memref<544x128xf32, #tpu.memory_space<vmem>>, vector<128x128xf32>
    tpu.vector_store %arg7[%c136, %c0_27], %34 {strides = array<i32>} : memref<544x128xf32, #tpu.memory_space<vmem>>, vector<128x128xf32>,
    %c0_28 = arith.constant 0 : index
    %c256 = arith.constant 256 : index
    %c0_29 = arith.constant 0 : index
    %36 = vector.load %arg1[%c0_28, %c256, %c0_29] : memref<1x536x128xbf16, #tpu.memory_space<vmem>>, vector<1x128x128xbf16>
    %37 = vector.shape_cast %36 : vector<1x128x128xbf16> to vector<128x128xbf16>
    %c0_30 = arith.constant 0 : index
    %c0_31 = arith.constant 0 : index
    %38 = vector.load %arg2[%c0_30, %c0_31] : memref<128x128xbf16, #tpu.memory_space<vmem>>, vector<128x128xbf16>
    %cst_32 = arith.constant dense<0.000000e+00> : vector<128x128xf32>
    %39 = tpu.matmul %37, %38, %cst_32 {dimension_numbers = #tpu.dot_dimension_numbers<[1], [0], [0], [1], [0, 0, 1, 1], [], []>} : vector<128x128xbf16>, vector<128x128xbf16>, vector<128x128xf32> -> vector<128x128xf32>
    %c0_33 = arith.constant 0 : index
    %c0_34 = arith.constant 0 : index
    %40 = vector.load %arg3[%c0_33, %c0_34] : memref<3x128xf32, #tpu.memory_space<vmem>>, vector<1x128xf32>
    %41 = vector.broadcast %40 : vector<1x128xf32> to vector<128x128xf32>
    %42 = arith.addf %39, %41 : vector<128x128xf32>
    %c1_35 = arith.constant 1 : index
    %c0_36 = arith.constant 0 : index
    %43 = vector.load %arg3[%c1_35, %c0_36] : memref<3x128xf32, #tpu.memory_space<vmem>>, vector<1x128xf32>
    %44 = vector.broadcast %43 : vector<1x128xf32> to vector<128x128xf32>
    %45 = arith.mulf %42, %44 : vector<128x128xf32>
    %c2_37 = arith.constant 2 : index
    %c0_38 = arith.constant 0 : index
    %46 = vector.load %arg3[%c2_37, %c0_38] : memref<3x128xf32, #tpu.memory_space<vmem>>, vector<1x128xf32>
    %47 = vector.broadcast %46 : vector<1x128xf32> to vector<128x128xf32>
    %48 = arith.addf %45, %47 : vector<128x128xf32>
    %cst_39 = arith.constant 0.000000e+00 : f32
    %49 = vector.broadcast %cst_39 : f32 to vector<128x128xf32>
    %50 = arith.maximumf %48, %49 : vector<128x128xf32>
    %c264 = arith.constant 264 : index
    %c0_40 = arith.constant 0 : index
    %51 = vector.load %arg7[%c264, %c0_40] : memref<544x128xf32, #tpu.memory_space<vmem>>, vector<128x128xf32>
    tpu.vector_store %arg7[%c264, %c0_40], %50 {strides = array<i32>} : memref<544x128xf32, #tpu.memory_space<vmem>>, vector<128x128xf32>,
    %c0_41 = arith.constant 0 : index
    %c384 = arith.constant 384 : index
    %c0_42 = arith.constant 0 : index
    %52 = vector.load %arg1[%c0_41, %c384, %c0_42] : memref<1x536x128xbf16, #tpu.memory_space<vmem>>, vector<1x128x128xbf16>
    %53 = vector.shape_cast %52 : vector<1x128x128xbf16> to vector<128x128xbf16>
    %c0_43 = arith.constant 0 : index
    %c0_44 = arith.constant 0 : index
    %54 = vector.load %arg2[%c0_43, %c0_44] : memref<128x128xbf16, #tpu.memory_space<vmem>>, vector<128x128xbf16>
    %cst_45 = arith.constant dense<0.000000e+00> : vector<128x128xf32>
    %55 = tpu.matmul %53, %54, %cst_45 {dimension_numbers = #tpu.dot_dimension_numbers<[1], [0], [0], [1], [0, 0, 1, 1], [], []>} : vector<128x128xbf16>, vector<128x128xbf16>, vector<128x128xf32> -> vector<128x128xf32>
    %c0_46 = arith.constant 0 : index
    %c0_47 = arith.constant 0 : index
    %56 = vector.load %arg3[%c0_46, %c0_47] : memref<3x128xf32, #tpu.memory_space<vmem>>, vector<1x128xf32>
    %57 = vector.broadcast %56 : vector<1x128xf32> to vector<128x128xf32>
    %58 = arith.addf %55, %57 : vector<128x128xf32>
    %c1_48 = arith.constant 1 : index
    %c0_49 = arith.constant 0 : index
    %59 = vector.load %arg3[%c1_48, %c0_49] : memref<3x128xf32, #tpu.memory_space<vmem>>, vector<1x128xf32>
    %60 = vector.broadcast %59 : vector<1x128xf32> to vector<128x128xf32>
    %61 = arith.mulf %58, %60 : vector<128x128xf32>
    %c2_50 = arith.constant 2 : index
    %c0_51 = arith.constant 0 : index
    %62 = vector.load %arg3[%c2_50, %c0_51] : memref<3x128xf32, #tpu.memory_space<vmem>>, vector<1x128xf32>
    %63 = vector.broadcast %62 : vector<1x128xf32> to vector<128x128xf32>
    %64 = arith.addf %61, %63 : vector<128x128xf32>
    %cst_52 = arith.constant 0.000000e+00 : f32
    %65 = vector.broadcast %cst_52 : f32 to vector<128x128xf32>
    %66 = arith.maximumf %64, %65 : vector<128x128xf32>
    %c392 = arith.constant 392 : index
    %c0_53 = arith.constant 0 : index
    %67 = vector.load %arg7[%c392, %c0_53] : memref<544x128xf32, #tpu.memory_space<vmem>>, vector<128x128xf32>
    tpu.vector_store %arg7[%c392, %c0_53], %66 {strides = array<i32>} : memref<544x128xf32, #tpu.memory_space<vmem>>, vector<128x128xf32>,
    %c0_54 = arith.constant 0 : index
    %c512 = arith.constant 512 : index
    %c0_55 = arith.constant 0 : index
    %68 = vector.load %arg1[%c0_54, %c512, %c0_55] : memref<1x536x128xbf16, #tpu.memory_space<vmem>>, vector<1x21x128xbf16>
    %69 = vector.shape_cast %68 : vector<1x21x128xbf16> to vector<21x128xbf16>
    %c0_56 = arith.constant 0 : index
    %c0_57 = arith.constant 0 : index
    %70 = vector.load %arg2[%c0_56, %c0_57] : memref<128x128xbf16, #tpu.memory_space<vmem>>, vector<128x128xbf16>
    %cst_58 = arith.constant dense<0.000000e+00> : vector<21x128xf32>
    %71 = tpu.matmul %69, %70, %cst_58 {dimension_numbers = #tpu.dot_dimension_numbers<[1], [0], [0], [1], [0, 0, 1, 1], [], []>} : vector<21x128xbf16>, vector<128x128xbf16>, vector<21x128xf32> -> vector<21x128xf32>
    %c0_59 = arith.constant 0 : index
    %c0_60 = arith.constant 0 : index
    %72 = vector.load %arg3[%c0_59, %c0_60] : memref<3x128xf32, #tpu.memory_space<vmem>>, vector<1x128xf32>
    %73 = vector.broadcast %72 : vector<1x128xf32> to vector<21x128xf32>
    %74 = arith.addf %71, %73 : vector<21x128xf32>
    %c1_61 = arith.constant 1 : index
    %c0_62 = arith.constant 0 : index
    %75 = vector.load %arg3[%c1_61, %c0_62] : memref<3x128xf32, #tpu.memory_space<vmem>>, vector<1x128xf32>
    %76 = vector.broadcast %75 : vector<1x128xf32> to vector<21x128xf32>
    %77 = arith.mulf %74, %76 : vector<21x128xf32>
    %c2_63 = arith.constant 2 : index
    %c0_64 = arith.constant 0 : index
    %78 = vector.load %arg3[%c2_63, %c0_64] : memref<3x128xf32, #tpu.memory_space<vmem>>, vector<1x128xf32>
    %79 = vector.broadcast %78 : vector<1x128xf32> to vector<21x128xf32>
    %80 = arith.addf %77, %79 : vector<21x128xf32>
    %cst_65 = arith.constant 0.000000e+00 : f32
    %81 = vector.broadcast %cst_65 : f32 to vector<21x128xf32>
    %82 = arith.maximumf %80, %81 : vector<21x128xf32>
    %c520 = arith.constant 520 : index
    %c0_66 = arith.constant 0 : index
    %83 = vector.load %arg7[%c520, %c0_66] : memref<544x128xf32, #tpu.memory_space<vmem>>, vector<21x128xf32>
    tpu.vector_store %arg7[%c520, %c0_66], %82 {strides = array<i32>} : memref<544x128xf32, #tpu.memory_space<vmem>>, vector<21x128xf32>,
    %c6 = arith.constant 6 : index
    %c0_67 = arith.constant 0 : index
    %84 = tpu.strided_load %arg7[%c6, %c0_67] {strides = array<i32: 8, 1>} : memref<544x128xf32, #tpu.memory_space<vmem>>, vector<67x128xf32>
    %c7 = arith.constant 7 : index
    %c0_68 = arith.constant 0 : index
    %85 = tpu.strided_load %arg7[%c7, %c0_68] {strides = array<i32: 8, 1>} : memref<544x128xf32, #tpu.memory_space<vmem>>, vector<67x128xf32>
    %86 = arith.maximumf %84, %85 : vector<67x128xf32>
    %c8_69 = arith.constant 8 : index
    %c0_70 = arith.constant 0 : index
    %87 = tpu.strided_load %arg7[%c8_69, %c0_70] {strides = array<i32: 8, 1>} : memref<544x128xf32, #tpu.memory_space<vmem>>, vector<67x128xf32>
    %88 = arith.maximumf %86, %87 : vector<67x128xf32>
    %c9 = arith.constant 9 : index
    %c0_71 = arith.constant 0 : index
    %89 = tpu.strided_load %arg7[%c9, %c0_71] {strides = array<i32: 8, 1>} : memref<544x128xf32, #tpu.memory_space<vmem>>, vector<67x128xf32>
    %90 = arith.maximumf %88, %89 : vector<67x128xf32>
    %c10 = arith.constant 10 : index
    %c0_72 = arith.constant 0 : index
    %91 = tpu.strided_load %arg7[%c10, %c0_72] {strides = array<i32: 8, 1>} : memref<544x128xf32, #tpu.memory_space<vmem>>, vector<67x128xf32>
    %92 = arith.maximumf %90, %91 : vector<67x128xf32>
    %c11 = arith.constant 11 : index
    %c0_73 = arith.constant 0 : index
    %93 = tpu.strided_load %arg7[%c11, %c0_73] {strides = array<i32: 8, 1>} : memref<544x128xf32, #tpu.memory_space<vmem>>, vector<67x128xf32>
    %94 = arith.maximumf %92, %93 : vector<67x128xf32>
    %c12 = arith.constant 12 : index
    %c0_74 = arith.constant 0 : index
    %95 = tpu.strided_load %arg7[%c12, %c0_74] {strides = array<i32: 8, 1>} : memref<544x128xf32, #tpu.memory_space<vmem>>, vector<67x128xf32>
    %96 = arith.maximumf %94, %95 : vector<67x128xf32>
    %c13 = arith.constant 13 : index
    %c0_75 = arith.constant 0 : index
    %97 = tpu.strided_load %arg7[%c13, %c0_75] {strides = array<i32: 8, 1>} : memref<544x128xf32, #tpu.memory_space<vmem>>, vector<67x128xf32>
    %98 = arith.maximumf %96, %97 : vector<67x128xf32>
    %cst_76 = arith.constant 0.000000e+00 : f32
    %99 = vector.broadcast %cst_76 : f32 to vector<80x128xf32>
    %c0_77 = arith.constant 0 : index
    %c0_78 = arith.constant 0 : index
    %100 = vector.load %arg8[%c0_77, %c0_78] : memref<80x128xf32, #tpu.memory_space<vmem>>, vector<80x128xf32>
    tpu.vector_store %arg8[%c0_77, %c0_78], %99 {strides = array<i32>} : memref<80x128xf32, #tpu.memory_space<vmem>>, vector<80x128xf32>,
    %c8_79 = arith.constant 8 : index
    %c0_80 = arith.constant 0 : index
    %101 = vector.load %arg8[%c8_79, %c0_80] : memref<80x128xf32, #tpu.memory_space<vmem>>, vector<67x128xf32>
    tpu.vector_store %arg8[%c8_79, %c0_80], %98 {strides = array<i32>} : memref<80x128xf32, #tpu.memory_space<vmem>>, vector<67x128xf32>,
    %c5 = arith.constant 5 : index
    %c0_81 = arith.constant 0 : index
    %102 = vector.load %arg8[%c5, %c0_81] : memref<80x128xf32, #tpu.memory_space<vmem>>, vector<74x128xf32>
    %103 = arith.truncf %102 : vector<74x128xf32> to vector<74x128xbf16>
    %104 = vector.extract_strided_slice %103 {offsets = [0, 0], sizes = [67, 128], strides = [1, 1]} : vector<74x128xbf16> to vector<67x128xbf16>
    %c0_82 = arith.constant 0 : index
    %c0_83 = arith.constant 0 : index
    %105 = vector.load %arg9[%c0_82, %c0_83] : memref<72x1024xbf16, #tpu.memory_space<vmem>>, vector<67x128xbf16>
    tpu.vector_store %arg9[%c0_82, %c0_83], %104 {strides = array<i32>} : memref<72x1024xbf16, #tpu.memory_space<vmem>>, vector<67x128xbf16>,
    %106 = vector.extract_strided_slice %103 {offsets = [1, 0], sizes = [67, 128], strides = [1, 1]} : vector<74x128xbf16> to vector<67x128xbf16>
    %c0_84 = arith.constant 0 : index
    %c128_85 = arith.constant 128 : index
    %107 = vector.load %arg9[%c0_84, %c128_85] : memref<72x1024xbf16, #tpu.memory_space<vmem>>, vector<67x128xbf16>
    tpu.vector_store %arg9[%c0_84, %c128_85], %106 {strides = array<i32>} : memref<72x1024xbf16, #tpu.memory_space<vmem>>, vector<67x128xbf16>,
    %108 = vector.extract_strided_slice %103 {offsets = [2, 0], sizes = [67, 128], strides = [1, 1]} : vector<74x128xbf16> to vector<67x128xbf16>
    %c0_86 = arith.constant 0 : index
    %c256_87 = arith.constant 256 : index
    %109 = vector.load %arg9[%c0_86, %c256_87] : memref<72x1024xbf16, #tpu.memory_space<vmem>>, vector<67x128xbf16>
    tpu.vector_store %arg9[%c0_86, %c256_87], %108 {strides = array<i32>} : memref<72x1024xbf16, #tpu.memory_space<vmem>>, vector<67x128xbf16>,
    %110 = vector.extract_strided_slice %103 {offsets = [3, 0], sizes = [67, 128], strides = [1, 1]} : vector<74x128xbf16> to vector<67x128xbf16>
    %c0_88 = arith.constant 0 : index
    %c384_89 = arith.constant 384 : index
    %111 = vector.load %arg9[%c0_88, %c384_89] : memref<72x1024xbf16, #tpu.memory_space<vmem>>, vector<67x128xbf16>
    tpu.vector_store %arg9[%c0_88, %c384_89], %110 {strides = array<i32>} : memref<72x1024xbf16, #tpu.memory_space<vmem>>, vector<67x128xbf16>,
    %112 = vector.extract_strided_slice %103 {offsets = [4, 0], sizes = [67, 128], strides = [1, 1]} : vector<74x128xbf16> to vector<67x128xbf16>
    %c0_90 = arith.constant 0 : index
    %c512_91 = arith.constant 512 : index
    %113 = vector.load %arg9[%c0_90, %c512_91] : memref<72x1024xbf16, #tpu.memory_space<vmem>>, vector<67x128xbf16>
    tpu.vector_store %arg9[%c0_90, %c512_91], %112 {strides = array<i32>} : memref<72x1024xbf16, #tpu.memory_space<vmem>>, vector<67x128xbf16>,
    %114 = vector.extract_strided_slice %103 {offsets = [5, 0], sizes = [67, 128], strides = [1, 1]} : vector<74x128xbf16> to vector<67x128xbf16>
    %c0_92 = arith.constant 0 : index
    %c640 = arith.constant 640 : index
    %115 = vector.load %arg9[%c0_92, %c640] : memref<72x1024xbf16, #tpu.memory_space<vmem>>, vector<67x128xbf16>
    tpu.vector_store %arg9[%c0_92, %c640], %114 {strides = array<i32>} : memref<72x1024xbf16, #tpu.memory_space<vmem>>, vector<67x128xbf16>,
    %116 = vector.extract_strided_slice %103 {offsets = [6, 0], sizes = [67, 128], strides = [1, 1]} : vector<74x128xbf16> to vector<67x128xbf16>
    %c0_93 = arith.constant 0 : index
    %c768 = arith.constant 768 : index
    %117 = vector.load %arg9[%c0_93, %c768] : memref<72x1024xbf16, #tpu.memory_space<vmem>>, vector<67x128xbf16>
    tpu.vector_store %arg9[%c0_93, %c768], %116 {strides = array<i32>} : memref<72x1024xbf16, #tpu.memory_space<vmem>>, vector<67x128xbf16>,
    %118 = vector.extract_strided_slice %103 {offsets = [7, 0], sizes = [67, 128], strides = [1, 1]} : vector<74x128xbf16> to vector<67x128xbf16>
    %c0_94 = arith.constant 0 : index
    %c896 = arith.constant 896 : index
    %119 = vector.load %arg9[%c0_94, %c896] : memref<72x1024xbf16, #tpu.memory_space<vmem>>, vector<67x128xbf16>
    tpu.vector_store %arg9[%c0_94, %c896], %118 {strides = array<i32>} : memref<72x1024xbf16, #tpu.memory_space<vmem>>, vector<67x128xbf16>,
    %c0_95 = arith.constant 0 : index
    %c0_96 = arith.constant 0 : index
    %120 = vector.load %arg9[%c0_95, %c0_96] : memref<72x1024xbf16, #tpu.memory_space<vmem>>, vector<67x1024xbf16>
    %c0_97 = arith.constant 0 : index
    %c0_98 = arith.constant 0 : index
    %c0_99 = arith.constant 0 : index
    %121 = vector.load %arg4[%c0_97, %c0_98, %c0_99] : memref<3x1024x128xbf16, #tpu.memory_space<vmem>>, vector<1x1024x128xbf16>
    %122 = vector.shape_cast %121 : vector<1x1024x128xbf16> to vector<1024x128xbf16>
    %cst_100 = arith.constant dense<0.000000e+00> : vector<67x128xf32>
    %123 = tpu.matmul %120, %122, %cst_100 {dimension_numbers = #tpu.dot_dimension_numbers<[1], [0], [0], [1], [0, 0, 1, 1], [], []>} : vector<67x1024xbf16>, vector<1024x128xbf16>, vector<67x128xf32> -> vector<67x128xf32>
    %c0_101 = arith.constant 0 : index
    %c0_102 = arith.constant 0 : index
    %c0_103 = arith.constant 0 : index
    %124 = vector.load %arg5[%c0_101, %c0_102, %c0_103] : memref<3x3x128xf32, #tpu.memory_space<vmem>>, vector<1x1x128xf32>
    %125 = vector.shape_cast %124 : vector<1x1x128xf32> to vector<1x128xf32>
    %126 = vector.broadcast %125 : vector<1x128xf32> to vector<67x128xf32>
    %127 = arith.addf %123, %126 : vector<67x128xf32>
    %cst_104 = arith.constant 0.000000e+00 : f32
    %128 = vector.broadcast %cst_104 : f32 to vector<67x128xf32>
    %129 = arith.maximumf %127, %128 : vector<67x128xf32>
    %c0_105 = arith.constant 0 : index
    %c1_106 = arith.constant 1 : index
    %c0_107 = arith.constant 0 : index
    %130 = vector.load %arg5[%c0_105, %c1_106, %c0_107] : memref<3x3x128xf32, #tpu.memory_space<vmem>>, vector<1x1x128xf32>
    %131 = vector.shape_cast %130 : vector<1x1x128xf32> to vector<1x128xf32>
    %132 = vector.broadcast %131 : vector<1x128xf32> to vector<67x128xf32>
    %133 = arith.mulf %129, %132 : vector<67x128xf32>
    %c0_108 = arith.constant 0 : index
    %c2_109 = arith.constant 2 : index
    %c0_110 = arith.constant 0 : index
    %134 = vector.load %arg5[%c0_108, %c2_109, %c0_110] : memref<3x3x128xf32, #tpu.memory_space<vmem>>, vector<1x1x128xf32>
    %135 = vector.shape_cast %134 : vector<1x1x128xf32> to vector<1x128xf32>
    %136 = vector.broadcast %135 : vector<1x128xf32> to vector<67x128xf32>
    %137 = arith.addf %133, %136 : vector<67x128xf32>
    %c8_111 = arith.constant 8 : index
    %c0_112 = arith.constant 0 : index
    %138 = vector.load %arg8[%c8_111, %c0_112] : memref<80x128xf32, #tpu.memory_space<vmem>>, vector<67x128xf32>
    tpu.vector_store %arg8[%c8_111, %c0_112], %137 {strides = array<i32>} : memref<80x128xf32, #tpu.memory_space<vmem>>, vector<67x128xf32>,
    %c5_113 = arith.constant 5 : index
    %c0_114 = arith.constant 0 : index
    %139 = vector.load %arg8[%c5_113, %c0_114] : memref<80x128xf32, #tpu.memory_space<vmem>>, vector<74x128xf32>
    %140 = arith.truncf %139 : vector<74x128xf32> to vector<74x128xbf16>
    %141 = vector.extract_strided_slice %140 {offsets = [0, 0], sizes = [67, 128], strides = [1, 1]} : vector<74x128xbf16> to vector<67x128xbf16>
    %c0_115 = arith.constant 0 : index
    %c0_116 = arith.constant 0 : index
    %142 = vector.load %arg9[%c0_115, %c0_116] : memref<72x1024xbf16, #tpu.memory_space<vmem>>, vector<67x128xbf16>
    tpu.vector_store %arg9[%c0_115, %c0_116], %141 {strides = array<i32>} : memref<72x1024xbf16, #tpu.memory_space<vmem>>, vector<67x128xbf16>,
    %143 = vector.extract_strided_slice %140 {offsets = [1, 0], sizes = [67, 128], strides = [1, 1]} : vector<74x128xbf16> to vector<67x128xbf16>
    %c0_117 = arith.constant 0 : index
    %c128_118 = arith.constant 128 : index
    %144 = vector.load %arg9[%c0_117, %c128_118] : memref<72x1024xbf16, #tpu.memory_space<vmem>>, vector<67x128xbf16>
    tpu.vector_store %arg9[%c0_117, %c128_118], %143 {strides = array<i32>} : memref<72x1024xbf16, #tpu.memory_space<vmem>>, vector<67x128xbf16>,
    %145 = vector.extract_strided_slice %140 {offsets = [2, 0], sizes = [67, 128], strides = [1, 1]} : vector<74x128xbf16> to vector<67x128xbf16>
    %c0_119 = arith.constant 0 : index
    %c256_120 = arith.constant 256 : index
    %146 = vector.load %arg9[%c0_119, %c256_120] : memref<72x1024xbf16, #tpu.memory_space<vmem>>, vector<67x128xbf16>
    tpu.vector_store %arg9[%c0_119, %c256_120], %145 {strides = array<i32>} : memref<72x1024xbf16, #tpu.memory_space<vmem>>, vector<67x128xbf16>,
    %147 = vector.extract_strided_slice %140 {offsets = [3, 0], sizes = [67, 128], strides = [1, 1]} : vector<74x128xbf16> to vector<67x128xbf16>
    %c0_121 = arith.constant 0 : index
    %c384_122 = arith.constant 384 : index
    %148 = vector.load %arg9[%c0_121, %c384_122] : memref<72x1024xbf16, #tpu.memory_space<vmem>>, vector<67x128xbf16>
    tpu.vector_store %arg9[%c0_121, %c384_122], %147 {strides = array<i32>} : memref<72x1024xbf16, #tpu.memory_space<vmem>>, vector<67x128xbf16>,
    %149 = vector.extract_strided_slice %140 {offsets = [4, 0], sizes = [67, 128], strides = [1, 1]} : vector<74x128xbf16> to vector<67x128xbf16>
    %c0_123 = arith.constant 0 : index
    %c512_124 = arith.constant 512 : index
    %150 = vector.load %arg9[%c0_123, %c512_124] : memref<72x1024xbf16, #tpu.memory_space<vmem>>, vector<67x128xbf16>
    tpu.vector_store %arg9[%c0_123, %c512_124], %149 {strides = array<i32>} : memref<72x1024xbf16, #tpu.memory_space<vmem>>, vector<67x128xbf16>,
    %151 = vector.extract_strided_slice %140 {offsets = [5, 0], sizes = [67, 128], strides = [1, 1]} : vector<74x128xbf16> to vector<67x128xbf16>
    %c0_125 = arith.constant 0 : index
    %c640_126 = arith.constant 640 : index
    %152 = vector.load %arg9[%c0_125, %c640_126] : memref<72x1024xbf16, #tpu.memory_space<vmem>>, vector<67x128xbf16>
    tpu.vector_store %arg9[%c0_125, %c640_126], %151 {strides = array<i32>} : memref<72x1024xbf16, #tpu.memory_space<vmem>>, vector<67x128xbf16>,
    %153 = vector.extract_strided_slice %140 {offsets = [6, 0], sizes = [67, 128], strides = [1, 1]} : vector<74x128xbf16> to vector<67x128xbf16>
    %c0_127 = arith.constant 0 : index
    %c768_128 = arith.constant 768 : index
    %154 = vector.load %arg9[%c0_127, %c768_128] : memref<72x1024xbf16, #tpu.memory_space<vmem>>, vector<67x128xbf16>
    tpu.vector_store %arg9[%c0_127, %c768_128], %153 {strides = array<i32>} : memref<72x1024xbf16, #tpu.memory_space<vmem>>, vector<67x128xbf16>,
    %155 = vector.extract_strided_slice %140 {offsets = [7, 0], sizes = [67, 128], strides = [1, 1]} : vector<74x128xbf16> to vector<67x128xbf16>
    %c0_129 = arith.constant 0 : index
    %c896_130 = arith.constant 896 : index
    %156 = vector.load %arg9[%c0_129, %c896_130] : memref<72x1024xbf16, #tpu.memory_space<vmem>>, vector<67x128xbf16>
    tpu.vector_store %arg9[%c0_129, %c896_130], %155 {strides = array<i32>} : memref<72x1024xbf16, #tpu.memory_space<vmem>>, vector<67x128xbf16>,
    %c0_131 = arith.constant 0 : index
    %c0_132 = arith.constant 0 : index
    %157 = vector.load %arg9[%c0_131, %c0_132] : memref<72x1024xbf16, #tpu.memory_space<vmem>>, vector<67x1024xbf16>
    %c1_133 = arith.constant 1 : index
    %c0_134 = arith.constant 0 : index
    %c0_135 = arith.constant 0 : index
    %158 = vector.load %arg4[%c1_133, %c0_134, %c0_135] : memref<3x1024x128xbf16, #tpu.memory_space<vmem>>, vector<1x1024x128xbf16>
    %159 = vector.shape_cast %158 : vector<1x1024x128xbf16> to vector<1024x128xbf16>
    %cst_136 = arith.constant dense<0.000000e+00> : vector<67x128xf32>
    %160 = tpu.matmul %157, %159, %cst_136 {dimension_numbers = #tpu.dot_dimension_numbers<[1], [0], [0], [1], [0, 0, 1, 1], [], []>} : vector<67x1024xbf16>, vector<1024x128xbf16>, vector<67x128xf32> -> vector<67x128xf32>
    %c1_137 = arith.constant 1 : index
    %c0_138 = arith.constant 0 : index
    %c0_139 = arith.constant 0 : index
    %161 = vector.load %arg5[%c1_137, %c0_138, %c0_139] : memref<3x3x128xf32, #tpu.memory_space<vmem>>, vector<1x1x128xf32>
    %162 = vector.shape_cast %161 : vector<1x1x128xf32> to vector<1x128xf32>
    %163 = vector.broadcast %162 : vector<1x128xf32> to vector<67x128xf32>
    %164 = arith.addf %160, %163 : vector<67x128xf32>
    %cst_140 = arith.constant 0.000000e+00 : f32
    %165 = vector.broadcast %cst_140 : f32 to vector<67x128xf32>
    %166 = arith.maximumf %164, %165 : vector<67x128xf32>
    %c1_141 = arith.constant 1 : index
    %c1_142 = arith.constant 1 : index
    %c0_143 = arith.constant 0 : index
    %167 = vector.load %arg5[%c1_141, %c1_142, %c0_143] : memref<3x3x128xf32, #tpu.memory_space<vmem>>, vector<1x1x128xf32>
    %168 = vector.shape_cast %167 : vector<1x1x128xf32> to vector<1x128xf32>
    %169 = vector.broadcast %168 : vector<1x128xf32> to vector<67x128xf32>
    %170 = arith.mulf %166, %169 : vector<67x128xf32>
    %c1_144 = arith.constant 1 : index
    %c2_145 = arith.constant 2 : index
    %c0_146 = arith.constant 0 : index
    %171 = vector.load %arg5[%c1_144, %c2_145, %c0_146] : memref<3x3x128xf32, #tpu.memory_space<vmem>>, vector<1x1x128xf32>
    %172 = vector.shape_cast %171 : vector<1x1x128xf32> to vector<1x128xf32>
    %173 = vector.broadcast %172 : vector<1x128xf32> to vector<67x128xf32>
    %174 = arith.addf %170, %173 : vector<67x128xf32>
    %c8_147 = arith.constant 8 : index
    %c0_148 = arith.constant 0 : index
    %175 = vector.load %arg8[%c8_147, %c0_148] : memref<80x128xf32, #tpu.memory_space<vmem>>, vector<67x128xf32>
    tpu.vector_store %arg8[%c8_147, %c0_148], %174 {strides = array<i32>} : memref<80x128xf32, #tpu.memory_space<vmem>>, vector<67x128xf32>,
    %c5_149 = arith.constant 5 : index
    %c0_150 = arith.constant 0 : index
    %176 = vector.load %arg8[%c5_149, %c0_150] : memref<80x128xf32, #tpu.memory_space<vmem>>, vector<74x128xf32>
    %177 = arith.truncf %176 : vector<74x128xf32> to vector<74x128xbf16>
    %178 = vector.extract_strided_slice %177 {offsets = [0, 0], sizes = [67, 128], strides = [1, 1]} : vector<74x128xbf16> to vector<67x128xbf16>
    %c0_151 = arith.constant 0 : index
    %c0_152 = arith.constant 0 : index
    %179 = vector.load %arg9[%c0_151, %c0_152] : memref<72x1024xbf16, #tpu.memory_space<vmem>>, vector<67x128xbf16>
    tpu.vector_store %arg9[%c0_151, %c0_152], %178 {strides = array<i32>} : memref<72x1024xbf16, #tpu.memory_space<vmem>>, vector<67x128xbf16>,
    %180 = vector.extract_strided_slice %177 {offsets = [1, 0], sizes = [67, 128], strides = [1, 1]} : vector<74x128xbf16> to vector<67x128xbf16>
    %c0_153 = arith.constant 0 : index
    %c128_154 = arith.constant 128 : index
    %181 = vector.load %arg9[%c0_153, %c128_154] : memref<72x1024xbf16, #tpu.memory_space<vmem>>, vector<67x128xbf16>
    tpu.vector_store %arg9[%c0_153, %c128_154], %180 {strides = array<i32>} : memref<72x1024xbf16, #tpu.memory_space<vmem>>, vector<67x128xbf16>,
    %182 = vector.extract_strided_slice %177 {offsets = [2, 0], sizes = [67, 128], strides = [1, 1]} : vector<74x128xbf16> to vector<67x128xbf16>
    %c0_155 = arith.constant 0 : index
    %c256_156 = arith.constant 256 : index
    %183 = vector.load %arg9[%c0_155, %c256_156] : memref<72x1024xbf16, #tpu.memory_space<vmem>>, vector<67x128xbf16>
    tpu.vector_store %arg9[%c0_155, %c256_156], %182 {strides = array<i32>} : memref<72x1024xbf16, #tpu.memory_space<vmem>>, vector<67x128xbf16>,
    %184 = vector.extract_strided_slice %177 {offsets = [3, 0], sizes = [67, 128], strides = [1, 1]} : vector<74x128xbf16> to vector<67x128xbf16>
    %c0_157 = arith.constant 0 : index
    %c384_158 = arith.constant 384 : index
    %185 = vector.load %arg9[%c0_157, %c384_158] : memref<72x1024xbf16, #tpu.memory_space<vmem>>, vector<67x128xbf16>
    tpu.vector_store %arg9[%c0_157, %c384_158], %184 {strides = array<i32>} : memref<72x1024xbf16, #tpu.memory_space<vmem>>, vector<67x128xbf16>,
    %186 = vector.extract_strided_slice %177 {offsets = [4, 0], sizes = [67, 128], strides = [1, 1]} : vector<74x128xbf16> to vector<67x128xbf16>
    %c0_159 = arith.constant 0 : index
    %c512_160 = arith.constant 512 : index
    %187 = vector.load %arg9[%c0_159, %c512_160] : memref<72x1024xbf16, #tpu.memory_space<vmem>>, vector<67x128xbf16>
    tpu.vector_store %arg9[%c0_159, %c512_160], %186 {strides = array<i32>} : memref<72x1024xbf16, #tpu.memory_space<vmem>>, vector<67x128xbf16>,
    %188 = vector.extract_strided_slice %177 {offsets = [5, 0], sizes = [67, 128], strides = [1, 1]} : vector<74x128xbf16> to vector<67x128xbf16>
    %c0_161 = arith.constant 0 : index
    %c640_162 = arith.constant 640 : index
    %189 = vector.load %arg9[%c0_161, %c640_162] : memref<72x1024xbf16, #tpu.memory_space<vmem>>, vector<67x128xbf16>
    tpu.vector_store %arg9[%c0_161, %c640_162], %188 {strides = array<i32>} : memref<72x1024xbf16, #tpu.memory_space<vmem>>, vector<67x128xbf16>,
    %190 = vector.extract_strided_slice %177 {offsets = [6, 0], sizes = [67, 128], strides = [1, 1]} : vector<74x128xbf16> to vector<67x128xbf16>
    %c0_163 = arith.constant 0 : index
    %c768_164 = arith.constant 768 : index
    %191 = vector.load %arg9[%c0_163, %c768_164] : memref<72x1024xbf16, #tpu.memory_space<vmem>>, vector<67x128xbf16>
    tpu.vector_store %arg9[%c0_163, %c768_164], %190 {strides = array<i32>} : memref<72x1024xbf16, #tpu.memory_space<vmem>>, vector<67x128xbf16>,
    %192 = vector.extract_strided_slice %177 {offsets = [7, 0], sizes = [67, 128], strides = [1, 1]} : vector<74x128xbf16> to vector<67x128xbf16>
    %c0_165 = arith.constant 0 : index
    %c896_166 = arith.constant 896 : index
    %193 = vector.load %arg9[%c0_165, %c896_166] : memref<72x1024xbf16, #tpu.memory_space<vmem>>, vector<67x128xbf16>
    tpu.vector_store %arg9[%c0_165, %c896_166], %192 {strides = array<i32>} : memref<72x1024xbf16, #tpu.memory_space<vmem>>, vector<67x128xbf16>,
    %c0_167 = arith.constant 0 : index
    %c0_168 = arith.constant 0 : index
    %194 = vector.load %arg9[%c0_167, %c0_168] : memref<72x1024xbf16, #tpu.memory_space<vmem>>, vector<67x1024xbf16>
    %c2_169 = arith.constant 2 : index
    %c0_170 = arith.constant 0 : index
    %c0_171 = arith.constant 0 : index
    %195 = vector.load %arg4[%c2_169, %c0_170, %c0_171] : memref<3x1024x128xbf16, #tpu.memory_space<vmem>>, vector<1x1024x128xbf16>
    %196 = vector.shape_cast %195 : vector<1x1024x128xbf16> to vector<1024x128xbf16>
    %cst_172 = arith.constant dense<0.000000e+00> : vector<67x128xf32>
    %197 = tpu.matmul %194, %196, %cst_172 {dimension_numbers = #tpu.dot_dimension_numbers<[1], [0], [0], [1], [0, 0, 1, 1], [], []>} : vector<67x1024xbf16>, vector<1024x128xbf16>, vector<67x128xf32> -> vector<67x128xf32>
    %c2_173 = arith.constant 2 : index
    %c0_174 = arith.constant 0 : index
    %c0_175 = arith.constant 0 : index
    %198 = vector.load %arg5[%c2_173, %c0_174, %c0_175] : memref<3x3x128xf32, #tpu.memory_space<vmem>>, vector<1x1x128xf32>
    %199 = vector.shape_cast %198 : vector<1x1x128xf32> to vector<1x128xf32>
    %200 = vector.broadcast %199 : vector<1x128xf32> to vector<67x128xf32>
    %201 = arith.addf %197, %200 : vector<67x128xf32>
    %cst_176 = arith.constant 0.000000e+00 : f32
    %202 = vector.broadcast %cst_176 : f32 to vector<67x128xf32>
    %203 = arith.maximumf %201, %202 : vector<67x128xf32>
    %c2_177 = arith.constant 2 : index
    %c1_178 = arith.constant 1 : index
    %c0_179 = arith.constant 0 : index
    %204 = vector.load %arg5[%c2_177, %c1_178, %c0_179] : memref<3x3x128xf32, #tpu.memory_space<vmem>>, vector<1x1x128xf32>
    %205 = vector.shape_cast %204 : vector<1x1x128xf32> to vector<1x128xf32>
    %206 = vector.broadcast %205 : vector<1x128xf32> to vector<67x128xf32>
    %207 = arith.mulf %203, %206 : vector<67x128xf32>
    %c2_180 = arith.constant 2 : index
    %c2_181 = arith.constant 2 : index
    %c0_182 = arith.constant 0 : index
    %208 = vector.load %arg5[%c2_180, %c2_181, %c0_182] : memref<3x3x128xf32, #tpu.memory_space<vmem>>, vector<1x1x128xf32>
    %209 = vector.shape_cast %208 : vector<1x1x128xf32> to vector<1x128xf32>
    %210 = vector.broadcast %209 : vector<1x128xf32> to vector<67x128xf32>
    %211 = arith.addf %207, %210 : vector<67x128xf32>
    %c8_183 = arith.constant 8 : index
    %c0_184 = arith.constant 0 : index
    %212 = vector.load %arg8[%c8_183, %c0_184] : memref<80x128xf32, #tpu.memory_space<vmem>>, vector<67x128xf32>
    tpu.vector_store %arg8[%c8_183, %c0_184], %211 {strides = array<i32>} : memref<80x128xf32, #tpu.memory_space<vmem>>, vector<67x128xf32>,
    %c8_185 = arith.constant 8 : index
    %c0_186 = arith.constant 0 : index
    %213 = tpu.strided_load %arg8[%c8_185, %c0_186] {strides = array<i32: 4, 1>} : memref<80x128xf32, #tpu.memory_space<vmem>>, vector<16x128xf32>
    %c9_187 = arith.constant 9 : index
    %c0_188 = arith.constant 0 : index
    %214 = tpu.strided_load %arg8[%c9_187, %c0_188] {strides = array<i32: 4, 1>} : memref<80x128xf32, #tpu.memory_space<vmem>>, vector<16x128xf32>
    %215 = arith.maximumf %213, %214 : vector<16x128xf32>
    %c10_189 = arith.constant 10 : index
    %c0_190 = arith.constant 0 : index
    %216 = tpu.strided_load %arg8[%c10_189, %c0_190] {strides = array<i32: 4, 1>} : memref<80x128xf32, #tpu.memory_space<vmem>>, vector<16x128xf32>
    %217 = arith.maximumf %215, %216 : vector<16x128xf32>
    %c11_191 = arith.constant 11 : index
    %c0_192 = arith.constant 0 : index
    %218 = tpu.strided_load %arg8[%c11_191, %c0_192] {strides = array<i32: 4, 1>} : memref<80x128xf32, #tpu.memory_space<vmem>>, vector<16x128xf32>
    %219 = arith.maximumf %217, %218 : vector<16x128xf32>
    %c0_193 = arith.constant 0 : index
    %c0_194 = arith.constant 0 : index
    %c0_195 = arith.constant 0 : index
    %220 = vector.load %arg6[%c0_193, %c0_194, %c0_195] : memref<1x16x128xf32, #tpu.memory_space<vmem>>, vector<1x16x128xf32>
    %221 = vector.shape_cast %220 : vector<1x16x128xf32> to vector<16x128xf32>
    %222 = vector.shape_cast %219 : vector<16x128xf32> to vector<1x16x128xf32>
    tpu.vector_store %arg6[%c0_193, %c0_194, %c0_195], %222 {strides = array<i32>} : memref<1x16x128xf32, #tpu.memory_space<vmem>>, vector<1x16x128xf32>,
    return
  }
  func.func @transform_0(%arg0: i32) -> (i32, i32, i32) {
    %c0_i32 = arith.constant 0 : i32
    %c0_i32_0 = arith.constant 0 : i32
    %c0_i32_1 = arith.constant 0 : i32
    return %arg0, %c0_i32, %c0_i32_0 : i32, i32, i32
  }
  func.func @transform_1(%arg0: i32) -> (i32, i32) {
    %c0_i32 = arith.constant 0 : i32
    %c0_i32_0 = arith.constant 0 : i32
    %c0_i32_1 = arith.constant 0 : i32
    return %c0_i32, %c0_i32_0 : i32, i32
  }
  func.func @transform_2(%arg0: i32) -> (i32, i32) {
    %c0_i32 = arith.constant 0 : i32
    %c0_i32_0 = arith.constant 0 : i32
    %c0_i32_1 = arith.constant 0 : i32
    return %c0_i32, %c0_i32_0 : i32, i32
  }
  func.func @transform_3(%arg0: i32) -> (i32, i32, i32) {
    %c0_i32 = arith.constant 0 : i32
    %c0_i32_0 = arith.constant 0 : i32
    %c0_i32_1 = arith.constant 0 : i32
    %c0_i32_2 = arith.constant 0 : i32
    return %c0_i32, %c0_i32_0, %c0_i32_1 : i32, i32, i32
  }
  func.func @transform_4(%arg0: i32) -> (i32, i32, i32) {
    %c0_i32 = arith.constant 0 : i32
    %c0_i32_0 = arith.constant 0 : i32
    %c0_i32_1 = arith.constant 0 : i32
    %c0_i32_2 = arith.constant 0 : i32
    return %c0_i32, %c0_i32_0, %c0_i32_1 : i32, i32, i32
  }
  func.func @transform_5(%arg0: i32) -> (i32, i32, i32) {
    %c0_i32 = arith.constant 0 : i32
    %c0_i32_0 = arith.constant 0 : i32
    %c0_i32_1 = arith.constant 0 : i32
    return %arg0, %c0_i32, %c0_i32_0 : i32, i32, i32
  }
}

</mosaic_0001>

<bundles_post_ra>
// kernel: deepfeature_net_forward.3
= control target key start
LH: loop header
LB: loop body
LE: loop exit
PB: predicated region body
PF: predicated region fallthrough
CT: control target
= control target key end

     0   :  { %s3996_s18 = smov 0   ;;  %s4749_s0 = inlined_call_operand.vmem [shape: bf16[2,64,512], index: 0, kind: input, shape index: {}]   ;;  %s4750_s1 = inlined_call_operand.vmem [shape: bf16[512,128], index: 1, kind: input, shape index: {}]   ;;  %s4751_s2 = inlined_call_operand.vmem [shape: f32[3,128], index: 2, kind: input, shape index: {}]   ;;  %s4752_s3 = inlined_call_operand.vmem [shape: bf16[3,768,128], index: 3, kind: input, shape index: {}]   ;;  %s4753_s4 = inlined_call_operand.vmem [shape: f32[3,3,128], index: 4, kind: input, shape index: {}]   ;;  %s4754_s5 = inlined_call_operand.vmem [shape: f32[2,8,128], index: 5, kind: output, shape index: {}]  }
   0x1 LB: > { %s2671_s19 = sadd.s32 4294967295, %s3963_s18   ;;  %p2675_p0 = scmp.ge.s32.totalorder %s3963_s18, 1  ;;  %s3963_s18 = sphi %s3996_s18, %s15_s18  }
   0x2   : > { %p187_p1 = scmp.lt.s32.totalorder %s3963_s18, 3 }
   0x4   : > { %p188_p2 = pnand %p2675_p0, %p187_p1 }
   0x5   : > { %p214_p3 = scmp.lt.s32.totalorder (!%p188_p2), %s2671_s19, 1 }
   0x6   : > { %191 = sbr.rel (%p188_p2) target bundleno = 833 (0x341), region = 40 }
   0xb   : > { %v3749_v0 = vld [vmem:[%s4750_s1 + $0x38] sm:$0xff]  ;;  %v3748_v4 = vld [vmem:[%s4750_s1 + $0x30] sm:$0xff]  ;;  %v3747_v8 = vld [vmem:[%s4750_s1 + $0x28] sm:$0xff]  ;;  %s4766_s19 = smov (!%p214_p3, %s2671_s19), 1  ;;  %vm790_vm0 = vcmask 1042432   ;;  %vm791_vm1 = vcmask 1046532  }
   0xc   : > { %v3757_v1 = vld [vmem:[%s4750_s1 + $0x78] sm:$0xff]  ;;  %577 = vmatpush.bf16.msra.mxu0 %v3749_v0  ;;  %v3756_v5 = vld [vmem:[%s4750_s1 + $0x70] sm:$0xff]  ;;  %v3755_v9 = vld [vmem:[%s4750_s1 + $0x68] sm:$0xff]  ;;  %s3725_s22 = sshll.u32 %s4766_s19, 7  ;;  %vm756_vm2 = vsmask.f32 3328 }
   0xd   : > { %v3765_v2 = vld [vmem:[%s4750_s1 + $0xb8] sm:$0xff]  ;;  %606 = vmatpush.bf16.msra.mxu1 %v3757_v1  ;;  %v3764_v6 = vld [vmem:[%s4750_s1 + $0xb0] sm:$0xff]  ;;  %v3763_v10 = vld [vmem:[%s4750_s1 + $0xa8] sm:$0xff]  ;;  %s4092_s29 = scalar_lea.vmem %s4749_s0, %s3725_s22  ;;  %vm757_vm3 = vsmask.f32 7440  ;;  %vm826_vm4 = vcmask 1041408  }
   0xe   : > { %v3773_v3 = vld [vmem:[%s4750_s1 + $0xf8] sm:$0xff]  ;;  %635 = vmatpush.bf16.msra.mxu2 %v3765_v2  ;;  %v3772_v7 = vld [vmem:[%s4750_s1 + $0xf0] sm:$0xff]  ;;  %v3771_v11 = vld [vmem:[%s4750_s1 + $0xe8] sm:$0xff]  ;;  %vm827_vm5 = vcmask 1045508   ;;  %vm804_vm6 = vsmask.f32 2304 }
   0xf   : > { %664 = vmatpush.bf16.msra.mxu3 %v3773_v3  ;;  %v3746_v12 = vld [vmem:[%s4750_s1 + $0x20] sm:$0xff]  ;;  %v3745_v16 = vld [vmem:[%s4750_s1 + $0x18] sm:$0xff]  ;;  %v3744_v20 = vld [vmem:[%s4750_s1 + $0x10] sm:$0xff]  ;;  %vm805_vm7 = vsmask.f32 6416  ;;  %s2678_s7 = sshll.u32 %s4766_s19, 3 }
  0x10   : > { %578 = vmatpush.bf16.msra.mxu0 %v3748_v4  ;;  %v3754_v13 = vld [vmem:[%s4750_s1 + $0x60] sm:$0xff]  ;;  %v3753_v17 = vld [vmem:[%s4750_s1 + $0x58] sm:$0xff]  ;;  %v3752_v21 = vld [vmem:[%s4750_s1 + $0x50] sm:$0xff]  ;;  %vm840_vm9 = vsmask.f32 1280  ;;  %s222_s10 = scalar_lea.vmem %s4754_s5, %s2678_s7 }
  0x11   : > { %607 = vmatpush.bf16.msra.mxu1 %v3756_v5  ;;  %v3762_v14 = vld [vmem:[%s4750_s1 + $0xa0] sm:$0xff]  ;;  %v3761_v18 = vld [vmem:[%s4750_s1 + $0x98] sm:$0xff]  ;;  %v3760_v22 = vld [vmem:[%s4750_s1 + $0x90] sm:$0xff]  ;;  %vm841_vm10 = vsmask.f32 5392 }
  0x12   : > { %636 = vmatpush.bf16.msra.mxu2 %v3764_v6  ;;  %v3770_v15 = vld [vmem:[%s4750_s1 + $0xe0] sm:$0xff]  ;;  %v3769_v19 = vld [vmem:[%s4750_s1 + $0xd8] sm:$0xff]  ;;  %v3768_v23 = vld [vmem:[%s4750_s1 + $0xd0] sm:$0xff] }
  0x13   : > { %665 = vmatpush.bf16.msra.mxu3 %v3772_v7  ;;  %v3743_v24 = vld [vmem:[%s4750_s1 + $0x8] sm:$0xff]  ;;  %v3742_v28 = vld [vmem:[%s4750_s1] sm:$0xff]  ;;  %v3728_v33 = vld [vmem:[%s4092_s29 + $0xc] sm:$0xf0] }
  0x14   : > { %579 = vmatpush.bf16.msra.mxu0 %v3747_v8  ;;  %v3751_v25 = vld [vmem:[%s4750_s1 + $0x48] sm:$0xff]  ;;  %v3750_v29 = vld [vmem:[%s4750_s1 + $0x40] sm:$0xff]  ;;  %v2683_v35 = vld [vmem:[%s4092_s29 + $0x10] sm:$0xf0] }
  0x15   : > { %608 = vmatpush.bf16.msra.mxu1 %v3755_v9  ;;  %v3759_v26 = vld [vmem:[%s4750_s1 + $0x88] sm:$0xff]  ;;  %v3758_v30 = vld [vmem:[%s4750_s1 + $0x80] sm:$0xff]  ;;  %v3729_v37 = vld [vmem:[%s4092_s29 + $0x14] sm:$0xf0] }
  0x16   : > { %637 = vmatpush.bf16.msra.mxu2 %v3763_v10  ;;  %v3767_v27 = vld [vmem:[%s4750_s1 + $0xc8] sm:$0xff]  ;;  %v3766_v31 = vld [vmem:[%s4750_s1 + $0xc0] sm:$0xff]  ;;  %v2691_v39 = vld [vmem:[%s4092_s29 + $0x18] sm:$0xf0] }
  0x17   : > { %666 = vmatpush.bf16.msra.mxu3 %v3771_v11  ;;  %v2681_v32 = vld [vmem:[%s4092_s29] sm:$0xf]  ;;  %v3726_v34 = vld [vmem:[%s4092_s29 + $0x4] sm:$0xf]  ;;  %v2689_v36 = vld [vmem:[%s4092_s29 + $0x8] sm:$0xf] }
  0x18   : > { %580 = vmatpush.bf16.msra.mxu0 %v3746_v12  ;;  %v3727_v38 = vld [vmem:[%s4092_s29 + $0xc] sm:$0xf]  ;;  %v2682_v40 = vor.u32 %v3728_v33, %v2681_v32  ;;  %v2686_v41 = vor.u32 %v3726_v34, %v2683_v35  ;;  %v2690_v42 = vor.u32 %v3729_v37, %v2689_v36  ;;  %v2697_v44 = vld [vmem:[%s4092_s29 + $0x20] sm:$0xf]  ;;  %v3732_v45 = vld [vmem:[%s4092_s29 + $0x2c] sm:$0xf0] }
  0x19   : > { %609 = vmatpush.bf16.msra.mxu1 %v3754_v13  ;;  %v2694_v43 = vor.u32 %v3727_v38, %v2691_v39  ;;  %v3730_v46 = vld [vmem:[%s4092_s29 + $0x24] sm:$0xf]  ;;  %v2699_v47 = vld [vmem:[%s4092_s29 + $0x30] sm:$0xf0]  ;;  %v2705_v48 = vld [vmem:[%s4092_s29 + $0x28] sm:$0xf]  ;;  %v2698_v52 = vor.u32 %v3732_v45, %v2697_v44 }
  0x1a   : > { %638 = vmatpush.bf16.msra.mxu2 %v3762_v14  ;;  %v3733_v49 = vld [vmem:[%s4092_s29 + $0x34] sm:$0xf0]  ;;  %v3731_v50 = vld [vmem:[%s4092_s29 + $0x2c] sm:$0xf]  ;;  %v2707_v51 = vld [vmem:[%s4092_s29 + $0x38] sm:$0xf0]  ;;  %v2702_v53 = vor.u32 %v3730_v46, %v2699_v47 }
  0x1b   : > { %667 = vmatpush.bf16.msra.mxu3 %v3770_v15  ;;  %v2706_v54 = vor.u32 %v3733_v49, %v2705_v48  ;;  %v2710_v55 = vor.u32 %v3731_v50, %v2707_v51  ;;  %v2713_v56 = vld [vmem:[%s4092_s29 + $0x40] sm:$0xf]  ;;  %v3736_v57 = vld [vmem:[%s4092_s29 + $0x4c] sm:$0xf0]  ;;  %v3734_v58 = vld [vmem:[%s4092_s29 + $0x44] sm:$0xf] }
  0x1c   : > { %581 = vmatpush.bf16.msra.mxu0 %v3745_v16  ;;  %v2715_v59 = vld [vmem:[%s4092_s29 + $0x50] sm:$0xf0]  ;;  %v2721_v60 = vld [vmem:[%s4092_s29 + $0x48] sm:$0xf]  ;;  %v3737_v61 = vld [vmem:[%s4092_s29 + $0x54] sm:$0xf0]  ;;  %v2714_v0 = vor.u32 %v3736_v57, %v2713_v56 }
  0x1d   : > { %610 = vmatpush.bf16.msra.mxu1 %v3753_v17  ;;  %v3735_v62 = vld [vmem:[%s4092_s29 + $0x4c] sm:$0xf]  ;;  %v2723_v63 = vld [vmem:[%s4092_s29 + $0x58] sm:$0xf0]  ;;  %v2718_v1 = vor.u32 %v3734_v58, %v2715_v59  ;;  %v2722_v2 = vor.u32 %v3737_v61, %v2721_v60  ;;  %v2729_v4 = vld [vmem:[%s4092_s29 + $0x60] sm:$0xf] }
  0x1e   : > { %639 = vmatpush.bf16.msra.mxu2 %v3761_v18  ;;  %v2726_v3 = vor.u32 %v3735_v62, %v2723_v63  ;;  %v3740_v5 = vld [vmem:[%s4092_s29 + $0x6c] sm:$0xf0]  ;;  %v3738_v6 = vld [vmem:[%s4092_s29 + $0x64] sm:$0xf]  ;;  %v2731_v7 = vld [vmem:[%s4092_s29 + $0x70] sm:$0xf0] }
  0x1f   : > { %668 = vmatpush.bf16.msra.mxu3 %v3769_v19  ;;  %v2737_v8 = vld [vmem:[%s4092_s29 + $0x68] sm:$0xf]  ;;  %v3741_v9 = vld [vmem:[%s4092_s29 + $0x74] sm:$0xf0]  ;;  %v3739_v10 = vld [vmem:[%s4092_s29 + $0x6c] sm:$0xf]  ;;  %v2730_v12 = vor.u32 %v3740_v5, %v2729_v4  ;;  %v2734_v13 = vor.u32 %v3738_v6, %v2731_v7 }
  0x20   : > { %582 = vmatpush.bf16.msra.mxu0 %v3744_v20  ;;  %v2739_v11 = vld [vmem:[%s4092_s29 + $0x78] sm:$0xf0]  ;;  %v2738_v14 = vor.u32 %v3741_v9, %v2737_v8  ;;  %v4147_v16 = vld [vmem:[%s4751_s2] ss:$0 sm:$0xff]  ;;  %v3786_v62 = vld [vmem:[%s4752_s3 + $0x30] sm:$0xff] }
  0x21   : > { %611 = vmatpush.bf16.msra.mxu1 %v3752_v21  ;;  %v2742_v15 = vor.u32 %v3739_v10, %v2739_v11  ;;  %v3787_v49 = vld [vmem:[%s4752_s3 + $0x38] sm:$0xff]  ;;  %v3785_v5 = vld [vmem:[%s4752_s3 + $0x28] sm:$0xff]  ;;  %vm4338_vm8 = vmor %vm790_vm0, %vm791_vm1 }
  0x22   : > { %640 = vmatpush.bf16.msra.mxu2 %v3760_v22  ;;  %v3795_v50 = vld [vmem:[%s4752_s3 + $0x78] sm:$0xff]  ;;  %vm4345_vm11 = vmor %vm756_vm2, %vm757_vm3 }
  0x23   : > { %669 = vmatpush.bf16.msra.mxu3 %v3768_v23  ;;  %v3803_v61 = vld [vmem:[%s4752_s3 + $0xb8] sm:$0xff]  ;;  %vm4353_vm12 = vmor %vm826_vm4, %vm827_vm5 }
  0x24   : > { %583 = vmatpush.bf16.msra.mxu0 %v3743_v24  ;;  %v4153_v24 = vld [vmem:[%s4751_s2 + $0x1] ss:$0 sm:$0xff]  ;;  %v3811_v63 = vld [vmem:[%s4752_s3 + $0xf8] sm:$0xff]  ;;  %vm4363_vm13 = vmor %vm804_vm6, %vm805_vm7 }
  0x25   : > { %612 = vmatpush.bf16.msra.mxu1 %v3751_v25  ;;  %vm4373_vm14 = vmor %vm840_vm9, %vm841_vm10 }
  0x26   : > { %641 = vmatpush.bf16.msra.mxu2 %v3759_v26 }
  0x27   : > { %670 = vmatpush.bf16.msra.mxu3 %v3767_v27 }
  0x28   : > { %584 = vmatpush.bf16.msra.mxu0 %v3742_v28  ;;  %v4158_v28 = vld [vmem:[%s4751_s2 + $0x2] ss:$0 sm:$0xff] }
  0x29   : > { %613 = vmatpush.bf16.msra.mxu1 %v3750_v29 }
  0x2a   : > { %642 = vmatpush.bf16.msra.mxu2 %v3758_v30 }
  0x2b   : > { %671 = vmatpush.bf16.msra.mxu3 %v3766_v31  ;;  %585 = vmatmul.bf16.vlgmr.msra.gmra.mxu0 %v2682_v40 }
  0x2c   : > { %614 = vmatmul.bf16.vlgmr.msra.gmra.mxu1 %v2686_v41  ;;  %1282 = vmatpush.bf16.msrb.mxu0 %v3787_v49 }
  0x2d   : > { %643 = vmatmul.bf16.vlgmr.msra.gmra.mxu2 %v2690_v42  ;;  %v3965_v42 = vmov 0.0   ;;  %1296 = vmatpush.bf16.msrb.mxu1 %v3795_v50 }
  0x2e   : > { %672 = vmatmul.bf16.vlgmr.msra.gmra.mxu3 %v2694_v43  ;;  %742 = vst [vmem:[#allocation3] sm:$0xff] %v3965_v42  ;;  %1310 = vmatpush.bf16.msrb.mxu2 %v3803_v61 }
  0x2f   : > { %745 = vst [vmem:[#allocation3 + $0x18] sm:$0xff] %v3965_v42  ;;  %1324 = vmatpush.bf16.msrb.mxu3 %v3811_v63  ;;  %v3781_v42 = vld [vmem:[%s4752_s3 + $0x8] sm:$0xff] }
  0x30   : > { %1283 = vmatpush.bf16.msrb.mxu0 %v3786_v62  ;;  %v3799_v62 = vld [vmem:[%s4752_s3 + $0x98] sm:$0xff] }
  0x34   : > { %1284 = vmatpush.bf16.msrb.mxu0 %v3785_v5  ;;  %v3807_v5 = vld [vmem:[%s4752_s3 + $0xd8] sm:$0xff] }
  0x3b   : > { %590 = vmatmul.bf16.gmra.mxu0 %v2698_v52 }
  0x3c   : > { %619 = vmatmul.bf16.gmra.mxu1 %v2702_v53 }
  0x3d   : > { %648 = vmatmul.bf16.gmra.mxu2 %v2706_v54 }
  0x3e   : > { %677 = vmatmul.bf16.gmra.mxu3 %v2710_v55 }
  0x4b   : > { %595 = vmatmul.bf16.gmra.mxu0 %v2714_v0 }
  0x4c   : > { %624 = vmatmul.bf16.gmra.mxu1 %v2718_v1  ;;  %v3794_v1 = vld [vmem:[%s4752_s3 + $0x70] sm:$0xff] }
  0x4d   : > { %653 = vmatmul.bf16.gmra.mxu2 %v2722_v2  ;;  %1297 = vmatpush.bf16.msrb.mxu1 %v3794_v1 }
  0x4e   : > { %682 = vmatmul.bf16.gmra.mxu3 %v2726_v3 }
  0x5b   : > { %600 = vmatmul.bf16.gmra.mxu0 %v2730_v12  ;;  %v3784_v12 = vld [vmem:[%s4752_s3 + $0x20] sm:$0xff] }
  0x5c   : > { %629 = vmatmul.bf16.gmra.mxu1 %v2734_v13  ;;  %1285 = vmatpush.bf16.msrb.mxu0 %v3784_v12 }
  0x5d   : > { %658 = vmatmul.bf16.gmra.mxu2 %v2738_v14 }
  0x5e   : > { %687 = vmatmul.bf16.gmra.mxu3 %v2742_v15 }
  0xa8   : > { %v586_v17 = vpop.f32.mrf.mxu0 }
  0xa9   : > { %v615_v18 = vpop.f32.mrf.mxu1  ;;  %v587_v19 = vadd.f32 %v4147_v16, %v586_v17  ;;  %v3783_v17 = vld [vmem:[%s4752_s3 + $0x18] sm:$0xff] }
  0xaa   : > { %1286 = vmatpush.bf16.msrb.mxu0 %v3783_v17 }
  0xab   : > { %v616_v20 = vadd.f32 %v615_v18, %v587_v19 }
  0xb0   : > { %v644_v21 = vpop.f32.mrf.mxu2  ;;  %v588_v25 = vpop.f32.mrf.mxu0 }
  0xb1   : > { %v673_v22 = vpop.f32.mrf.mxu3  ;;  %v645_v23 = vadd.f32 %v644_v21, %v616_v20  ;;  %v617_v26 = vpop.f32.mrf.mxu1  ;;  %v589_v29 = vadd.f32 %v4147_v16, %v588_v25  ;;  %v3793_v20 = vld [vmem:[%s4752_s3 + $0x68] sm:$0xff] }
  0xb2   : > { %1298 = vmatpush.bf16.msrb.mxu1 %v3793_v20  ;;  %v3825_v20 = vld [vmem:[%s4752_s3 + $0x168] sm:$0xff] }
  0xb3   : > { %v674_v27 = vadd.f32 %v673_v22, %v645_v23  ;;  %v618_v32 = vadd.f32 %v617_v26, %v589_v29 }
  0xb5   : > { %v695_v30 = vmul.f32 %v4153_v24, %v674_v27 }
  0xb7   : > { %v705_v31 = vadd.f32 %v4158_v28, %v695_v30 }
  0xb8   : > { %v646_v33 = vpop.f32.mrf.mxu2  ;;  %v591_v36 = vpop.f32.mrf.mxu0 }
  0xb9   : > { %v675_v34 = vpop.f32.mrf.mxu3  ;;  %713 = vst [vmem:[#allocation2] sm:$0xff] %v705_v31  ;;  %v647_v35 = vadd.f32 %v646_v33, %v618_v32  ;;  %v620_v37 = vpop.f32.mrf.mxu1  ;;  %v592_v38 = vadd.f32 %v4147_v16, %v591_v36  ;;  %v3782_v32 = vld [vmem:[%s4752_s3 + $0x10] sm:$0xff] }
  0xba   : > { %1287 = vmatpush.bf16.msrb.mxu0 %v3782_v32 }
  0xbb   : > { %v676_v39 = vadd.f32 %v675_v34, %v647_v35  ;;  %v621_v41 = vadd.f32 %v620_v37, %v592_v38  ;;  %v3792_v35 = vld [vmem:[%s4752_s3 + $0x60] sm:$0xff]  ;;  %v3802_v38 = vld [vmem:[%s4752_s3 + $0xb0] sm:$0xff] }
  0xbc   : > { %1299 = vmatpush.bf16.msrb.mxu1 %v3792_v35  ;;  %1311 = vmatpush.bf16.msrb.mxu2 %v3802_v38  ;;  %v3822_v38 = vld [vmem:[%s4752_s3 + $0x150] sm:$0xff] }
  0xbd   : > { %v696_v40 = vmul.f32 %v4153_v24, %v676_v39 }
  0xbe   : > { %1288 = vmatpush.bf16.msrb.mxu0 %v3781_v42 }
  0xbf   : > { %v706_v43 = vadd.f32 %v4158_v28, %v696_v40 }
  0xc0   : > { %v649_v44 = vpop.f32.mrf.mxu2  ;;  %v593_v47 = vpop.f32.mrf.mxu0 }
  0xc1   : > { %v678_v45 = vpop.f32.mrf.mxu3  ;;  %714 = vst [vmem:[#allocation2 + $0x8] sm:$0xff] %v706_v43  ;;  %v650_v46 = vadd.f32 %v649_v44, %v621_v41  ;;  %v622_v48 = vpop.f32.mrf.mxu1  ;;  %v594_v52 = vadd.f32 %v4147_v16, %v593_v47  ;;  %v3810_v44 = vld [vmem:[%s4752_s3 + $0xf0] sm:$0xff] }
  0xc2   : > { %1325 = vmatpush.bf16.msrb.mxu3 %v3810_v44 }
  0xc3   : > { %v679_v51 = vadd.f32 %v678_v45, %v650_v46  ;;  %v623_v55 = vadd.f32 %v622_v48, %v594_v52  ;;  %v3801_v45 = vld [vmem:[%s4752_s3 + $0xa8] sm:$0xff]  ;;  %v3791_v48 = vld [vmem:[%s4752_s3 + $0x58] sm:$0xff]  ;;  %v3780_v52 = vld [vmem:[%s4752_s3] sm:$0xff] }
  0xc4   : > { %1312 = vmatpush.bf16.msrb.mxu2 %v3801_v45  ;;  %1300 = vmatpush.bf16.msrb.mxu1 %v3791_v48  ;;  %v3821_v45 = vld [vmem:[%s4752_s3 + $0x148] sm:$0xff] }
  0xc5   : > { %v697_v53 = vmul.f32 %v4153_v24, %v679_v51  ;;  %v3809_v51 = vld [vmem:[%s4752_s3 + $0xe8] sm:$0xff]  ;;  %1289 = vmatpush.bf16.msrb.mxu0 %v3780_v52 }
  0xc6   : > { %1326 = vmatpush.bf16.msrb.mxu3 %v3809_v51 }
  0xc7   : > { %v707_v54 = vadd.f32 %v4158_v28, %v697_v53  ;;  %v3800_v53 = vld [vmem:[%s4752_s3 + $0xa0] sm:$0xff] }
  0xc8   : > { %v651_v56 = vpop.f32.mrf.mxu2  ;;  %v596_v59 = vpop.f32.mrf.mxu0  ;;  %1313 = vmatpush.bf16.msrb.mxu2 %v3800_v53 }
  0xc9   : > { %v680_v57 = vpop.f32.mrf.mxu3  ;;  %715 = vst [vmem:[#allocation2 + $0x10] sm:$0xff] %v707_v54  ;;  %v652_v58 = vadd.f32 %v651_v56, %v623_v55  ;;  %v625_v60 = vpop.f32.mrf.mxu1  ;;  %v597_v0 = vadd.f32 %v4147_v16, %v596_v59  ;;  %v3790_v54 = vld [vmem:[%s4752_s3 + $0x50] sm:$0xff]  ;;  %v3819_v55 = vld [vmem:[%s4752_s3 + $0x138] sm:$0xff]  ;;  %v3808_v59 = vld [vmem:[%s4752_s3 + $0xe0] sm:$0xff] }
  0xca   : > { %1338 = vmatpush.bf16.msra.mxu0 %v3819_v55  ;;  %1301 = vmatpush.bf16.msrb.mxu1 %v3790_v54  ;;  %v3820_v55 = vld [vmem:[%s4752_s3 + $0x140] sm:$0xff] }
  0xcb   : > { %v681_v2 = vadd.f32 %v680_v57, %v652_v58  ;;  %v626_v4 = vadd.f32 %v625_v60, %v597_v0  ;;  %v3818_v60 = vld [vmem:[%s4752_s3 + $0x130] sm:$0xff]  ;;  %1327 = vmatpush.bf16.msrb.mxu3 %v3808_v59 }
  0xcc   : > { %1314 = vmatpush.bf16.msrb.mxu2 %v3799_v62 }
  0xcd   : > { %v698_v3 = vmul.f32 %v4153_v24, %v681_v2 }
  0xce   : > { %1339 = vmatpush.bf16.msra.mxu0 %v3818_v60 }
  0xcf   : > { %v708_v6 = vadd.f32 %v4158_v28, %v698_v3  ;;  %1328 = vmatpush.bf16.msrb.mxu3 %v3807_v5 }
  0xd0   : > { %v654_v7 = vpop.f32.mrf.mxu2  ;;  %v598_v10 = vpop.f32.mrf.mxu0 }
  0xd1   : > { %v683_v8 = vpop.f32.mrf.mxu3  ;;  %716 = vst [vmem:[#allocation2 + $0x18] sm:$0xff] %v708_v6  ;;  %v655_v9 = vadd.f32 %v654_v7, %v626_v4  ;;  %v627_v11 = vpop.f32.mrf.mxu1  ;;  %v599_v14 = vadd.f32 %v4147_v16, %v598_v10  ;;  %v3817_v6 = vld [vmem:[%s4752_s3 + $0x128] sm:$0xff] }
  0xd2   : > { %1340 = vmatpush.bf16.msra.mxu0 %v3817_v6 }
  0xd3   : > { %v684_v13 = vadd.f32 %v683_v8, %v655_v9  ;;  %v628_v19 = vadd.f32 %v627_v11, %v599_v14  ;;  %v3798_v8 = vld [vmem:[%s4752_s3 + $0x90] sm:$0xff]  ;;  %v3788_v9 = vld [vmem:[%s4752_s3 + $0x40] sm:$0xff]  ;;  %v3827_v11 = vld [vmem:[%s4752_s3 + $0x178] sm:$0xff] }
  0xd4   : > { %v3816_v14 = vld [vmem:[%s4752_s3 + $0x120] sm:$0xff]  ;;  %1315 = vmatpush.bf16.msrb.mxu2 %v3798_v8 }
  0xd5   : > { %v699_v15 = vmul.f32 %v4153_v24, %v684_v13  ;;  %v3806_v13 = vld [vmem:[%s4752_s3 + $0xd0] sm:$0xff] }
  0xd6   : > { %1329 = vmatpush.bf16.msrb.mxu3 %v3806_v13  ;;  %1341 = vmatpush.bf16.msra.mxu0 %v3816_v14 }
  0xd7   : > { %v709_v18 = vadd.f32 %v4158_v28, %v699_v15  ;;  %v3797_v15 = vld [vmem:[%s4752_s3 + $0x88] sm:$0xff] }
  0xd8   : > { %v721_v21 = vld [vmem:[#allocation2] ss:$4 sm:$0xff]  ;;  %v725_v22 = vld [vmem:[#allocation2 + $0x1] ss:$4 sm:$0xff]  ;;  %v656_v23 = vpop.f32.mrf.mxu2  ;;  %v601_v29 = vpop.f32.mrf.mxu0  ;;  %v731_v30 = vld [vmem:[#allocation2 + $0x2] ss:$4 sm:$0xff]  ;;  %1316 = vmatpush.bf16.msrb.mxu2 %v3797_v15 }
  0xd9   : > { %v685_v25 = vpop.f32.mrf.mxu3  ;;  %v728_v26 = vmax.f32 %v721_v21, %v725_v22  ;;  %717 = vst [vmem:[#allocation2 + $0x20] sm:$0xff] %v709_v18  ;;  %v657_v27 = vadd.f32 %v656_v23, %v628_v19  ;;  %v602_v31 = vadd.f32 %v4147_v16, %v601_v29  ;;  %v737_v36 = vld [vmem:[#allocation2 + $0x3] ss:$4 sm:$0xff]  ;;  %v630_v37 = vpop.f32.mrf.mxu1 }
  0xda   : > { %v3805_v18 = vld [vmem:[%s4752_s3 + $0xc8] sm:$0xff]  ;;  %v3815_v19 = vld [vmem:[%s4752_s3 + $0x118] sm:$0xff]  ;;  %v3814_v21 = vld [vmem:[%s4752_s3 + $0x110] sm:$0xff] }
  0xdb   : > { %v734_v33 = vmax.f32 %v728_v26, %v731_v30  ;;  %v686_v34 = vadd.f32 %v685_v25, %v657_v27  ;;  %v631_v41 = vadd.f32 %v630_v37, %v602_v31  ;;  %1330 = vmatpush.bf16.msrb.mxu3 %v3805_v18  ;;  %1342 = vmatpush.bf16.msra.mxu0 %v3815_v19  ;;  %v3804_v26 = vld [vmem:[%s4752_s3 + $0xc0] sm:$0xff] }
  0xdc   : > { %v3824_v27 = vld [vmem:[%s4752_s3 + $0x160] sm:$0xff] }
  0xdd   : > { %v740_v39 = vmax.f32 %v734_v33, %v737_v36  ;;  %v700_v40 = vmul.f32 %v4153_v24, %v686_v34  ;;  %v3813_v34 = vld [vmem:[%s4752_s3 + $0x108] sm:$0xff]  ;;  %v3823_v36 = vld [vmem:[%s4752_s3 + $0x158] sm:$0xff]  ;;  %v3812_v37 = vld [vmem:[%s4752_s3 + $0x100] sm:$0xff] }
  0xdf   : > { %746 = vst [vmem:[#allocation3 + $0x8] sm:$0xff] %v740_v39  ;;  %v710_v43 = vadd.f32 %v4158_v28, %v700_v40  ;;  %1343 = vmatpush.bf16.msra.mxu0 %v3814_v21  ;;  %1331 = vmatpush.bf16.msrb.mxu3 %v3804_v26 }
  0xe0   : > { %v659_v46 = vpop.f32.mrf.mxu2  ;;  %v603_v50 = vpop.f32.mrf.mxu0 }
  0xe1   : > { %v688_v47 = vpop.f32.mrf.mxu3  ;;  %718 = vst [vmem:[#allocation2 + $0x28] sm:$0xff] %v710_v43  ;;  %v660_v49 = vadd.f32 %v659_v46, %v631_v41  ;;  %v604_v57 = vadd.f32 %v4147_v16, %v603_v50  ;;  %v632_v61 = vpop.f32.mrf.mxu1  ;;  %v3789_v16 = vld [vmem:[%s4752_s3 + $0x48] sm:$0xff] }
  0xe2   : > { %1302 = vmatpush.bf16.msrb.mxu1 %v3789_v16 }
  0xe3   : > { %v689_v56 = vadd.f32 %v688_v47, %v660_v49  ;;  %v633_v1 = vadd.f32 %v632_v61, %v604_v57  ;;  %1344 = vmatpush.bf16.msra.mxu0 %v3813_v34 }
  0xe5   : > { %v701_v58 = vmul.f32 %v4153_v24, %v689_v56 }
  0xe6   : > { %v748_v63 = vld [vmem:[#allocation3 + $0x6] sm:$0xff]  ;;  %1303 = vmatpush.bf16.msrb.mxu1 %v3788_v9 }
  0xe7   : > { %v711_v0 = vadd.f32 %v4158_v28, %v701_v58  ;;  %v4259_v2 = vpack.c.bf16 %v748_v63, %v748_v63  ;;  %1345 = vmatpush.bf16.msra.mxu0 %v3812_v37 }
  0xe8   : > { %v661_v3 = vpop.f32.mrf.mxu2 }
  0xe9   : > { %719 = vst [vmem:[#allocation2 + $0x30] sm:$0xff] %v711_v0  ;;  %v662_v4 = vadd.f32 %v661_v3, %v633_v1  ;;  %v690_v7 = vpop.f32.mrf.mxu3  ;;  %v760_v32 = vshrl.u32 %v4259_v2, 16  ;;  %v763_v33 = vshll.u32 %v4259_v2, 16  ;;  %v2871_v46 = vrot.slane %v4259_v2, 9 }
  0xea   : > { %754 = vst [vmem:[#allocation4] sm:$0xf] %v4259_v2  ;;  %1352 = vmatpush.bf16.msra.mxu1 %v3827_v11  ;;  %v2872_v52 = vrot.slane %v4259_v2, 10 }
  0xeb   : > { %v691_v10 = vadd.f32 %v690_v7, %v662_v4  ;;  %v762_v39 = vrot.slane %v760_v32, 4  ;;  %v765_v40 = vrot.slane %v763_v33, 5  ;;  %v807_v41 = vrot.slane %v760_v32, 5 }
  0xec   : > { %v808_v42 = vrot.slane %v763_v33, 6  ;;  %v843_v43 = vrot.slane %v760_v32, 6  ;;  %v844_v44 = vrot.slane %v763_v33, 7 }
  0xed   : > { %v702_v12 = vmul.f32 %v4153_v24, %v691_v10  ;;  %v3826_v24 = vld [vmem:[%s4752_s3 + $0x170] sm:$0xff]  ;;  %v766_v47 = vor.u32 %v765_v40, %v762_v39 }
  0xee   : > { %1353 = vmatpush.bf16.msra.mxu1 %v3826_v24  ;;  %v809_v48 = vor.u32 %v808_v42, %v807_v41  ;;  %v4330_v49 = vor.u32 %v844_v44, %v843_v43 }
  0xef   : > { %v712_v17 = vadd.f32 %v4158_v28, %v702_v12  ;;  %v3796_v28 = vld [vmem:[%s4752_s3 + $0x80] sm:$0xff]  ;;  %v767_v57 = vrot.slane %v766_v47, 4 }
  0xf0   : > { %1317 = vmatpush.bf16.msrb.mxu2 %v3796_v28  ;;  %v810_v58 = vrot.slane %v809_v48, 4  ;;  %v846_v62 = vrot.slane %v4330_v49, 4 }
  0xf1   : > { %720 = vst [vmem:[#allocation2 + $0x38] sm:$0xff] %v712_v17  ;;  %v2875_v24 = vld [vmem:[#allocation4] sm:$0xf] }
  0xf2   : > { %1354 = vmatpush.bf16.msra.mxu1 %v3825_v20 }
  0xf6   : > { %1355 = vmatpush.bf16.msra.mxu1 %v3824_v27 }
  0xf8   : > { %v723_v22 = vld [vmem:[#allocation2 + $0x20] ss:$4 sm:$0xff]  ;;  %v727_v23 = vld [vmem:[#allocation2 + $0x21] ss:$4 sm:$0xff]  ;;  %v733_v29 = vld [vmem:[#allocation2 + $0x22] ss:$4 sm:$0xff] }
  0xf9   : > { %v729_v25 = vmax.f32 %v723_v22, %v727_v23  ;;  %v739_v31 = vld [vmem:[#allocation2 + $0x23] ss:$4 sm:$0xff] }
  0xfa   : > { %1356 = vmatpush.bf16.msra.mxu1 %v3823_v36 }
  0xfb   : > { %v735_v30 = vmax.f32 %v729_v25, %v733_v29 }
  0xfd   : > { %v741_v35 = vmax.f32 %v735_v30, %v739_v31 }
  0xfe   : > { %1357 = vmatpush.bf16.msra.mxu1 %v3822_v38 }
  0xff   : > { %747 = vst [vmem:[#allocation3 + $0x10] sm:$0xff] %v741_v35 }
 0x102   : > { %1358 = vmatpush.bf16.msra.mxu1 %v3821_v45 }
 0x106   : > { %v749_v50 = vld [vmem:[#allocation3 + $0xe] sm:$0xff]  ;;  %v750_v51 = vld [vmem:[#allocation3 + $0x16] sm:$0x1f]  ;;  %1359 = vmatpush.bf16.msra.mxu1 %v3820_v55 }
 0x107   : > { %v752_v53 = vpack.c.bf16 %v749_v50, %v749_v50  ;;  %v753_v54 = vpack.c.bf16 %v750_v51, %v750_v51 }
 0x109   : > { %755 = vst [vmem:[#allocation4 + $0x18] sm:$0xf] %v752_v53  ;;  %v795_v59 = vrot.slane %v752_v53, 5  ;;  %v769_v60 = vshll.u32 %v752_v53, 16  ;;  %v773_v61 = vshrl.u32 %v752_v53, 16  ;;  %v798_v16 = vrot.slane %v753_v54, 5 }
 0x10a   : > { %v779_v0 = vshll.u32 %v753_v54, 16  ;;  %v816_v1 = vshrl.u32 %v753_v54, 16  ;;  %v831_v2 = vrot.slane %v752_v53, 6  ;;  %v834_v11 = vrot.slane %v753_v54, 6 }
 0x10b   : > { %v796_v3 = vsel %vm4338_vm8, %v2871_v46, %v795_v59  ;;  %v797_v4 = vrot.slane %v795_v59, 4  ;;  %v771_v5 = vrot.slane %v769_v60, 5  ;;  %v775_v6 = vrot.slane %v773_v61, 4  ;;  %v3840_v59 = vld [vmem:[%s4752_s3 + $0x1b0] sm:$0xff] }
 0x10c   : > { %802 = vst [vmem:[#allocation4 + $0x8] sm:$0xf] %v796_v3  ;;  %v811_v8 = vrot.slane %v773_v61, 5  ;;  %v812_v9 = vrot.slane %v769_v60, 6  ;;  %v818_v10 = vrot.slane %v816_v1, 5  ;;  %v819_v17 = vrot.slane %v779_v0, 6 }
 0x10d   : > { %v799_v12 = vsel %vm4338_vm8, %v797_v4, %v798_v16  ;;  %v772_v13 = vsel %vm4345_vm11, %v767_v57, %v771_v5  ;;  %v776_v14 = vor.u32 %v775_v6, %v771_v5  ;;  %v832_v19 = vsel %vm4353_vm12, %v2872_v52, %v831_v2  ;;  %v3838_v16 = vld [vmem:[%s4752_s3 + $0x1a0] sm:$0xff]  ;;  %v3857_v4 = vld [vmem:[%s4752_s3 + $0x238] sm:$0xff] }
 0x10e   : > { %803 = vst [vmem:[#allocation4 + $0x20] sm:$0xf] %v799_v12  ;;  %v813_v18 = vor.u32 %v812_v9, %v811_v8  ;;  %v833_v28 = vrot.slane %v831_v2, 4  ;;  %v847_v20 = vrot.slane %v773_v61, 6  ;;  %v781_v22 = vrot.slane %v779_v0, 5  ;;  %v3849_v61 = vld [vmem:[%s4752_s3 + $0x1f8] sm:$0xff] }
 0x10f   : > { %v777_v21 = vrot.slane %v776_v14, 4  ;;  %785 = vst [vmem:[#allocation4 + $0x4] sm:$0xf] %v772_v13  ;;  %v848_v23 = vrot.slane %v769_v60, 7  ;;  %v852_v25 = vrot.slane %v816_v1, 6  ;;  %v820_v30 = vor.u32 %v819_v17, %v818_v10  ;;  %v3839_v60 = vld [vmem:[%s4752_s3 + $0x1a8] sm:$0xff]  ;;  %1913 = vmatpush.bf16.msra.mxu3 %v3849_v61 }
 0x110   : > { %v3777_v26 = vld [vmem:[#allocation4 + $0x14] sm:$0xf0]  ;;  %v814_v27 = vsel %vm4363_vm13, %v810_v58, %v813_v18  ;;  %v815_v29 = vrot.slane %v813_v18, 4  ;;  %838 = vst [vmem:[#allocation4 + $0x10] sm:$0xf] %v832_v19  ;;  %v853_v32 = vrot.slane %v779_v0, 7  ;;  %v835_v35 = vsel %vm4353_vm12, %v833_v28, %v834_v11 }
 0x111   : > { %v2876_v33 = vor.u32 %v3777_v26, %v2875_v24  ;;  %v782_v34 = vsel %vm4345_vm11, %v777_v21, %v781_v22  ;;  %824 = vst [vmem:[#allocation4 + $0xc] sm:$0xf] %v814_v27  ;;  %v849_v36 = vor.u32 %v848_v23, %v847_v20  ;;  %v3841_v58 = vld [vmem:[%s4752_s3 + $0x1b8] sm:$0xff]  ;;  %v3848_v0 = vld [vmem:[%s4752_s3 + $0x1f0] sm:$0xff]  ;;  %v3847_v2 = vld [vmem:[%s4752_s3 + $0x1e8] sm:$0xff] }
 0x112   : > { %786 = vst [vmem:[#allocation4 + $0x1c] sm:$0xf] %v782_v34  ;;  %v821_v37 = vsel %vm4363_vm13, %v815_v29, %v820_v30  ;;  %v854_v40 = vor.u32 %v853_v32, %v852_v25  ;;  %1899 = vmatpush.bf16.msra.mxu2 %v3841_v58  ;;  %v3837_v1 = vld [vmem:[%s4752_s3 + $0x198] sm:$0xff]  ;;  %v3948_v3 = vld [vmem:[%s4753_s4] ss:$0 sm:$0xff]  ;;  %v3836_v8 = vld [vmem:[%s4752_s3 + $0x190] sm:$0xff] }
 0x113   : > { %1290 = vmatmul.bf16.vlgmr.msrb.gmra.mxu0 %v2876_v33  ;;  %825 = vst [vmem:[#allocation4 + $0x24] sm:$0xf] %v821_v37  ;;  %v850_v38 = vsel %vm4373_vm14, %v846_v62, %v849_v36  ;;  %v851_v39 = vrot.slane %v849_v36, 4  ;;  %v2883_v41 = vld [vmem:[#allocation4 + $0x8] sm:$0xf]  ;;  %1914 = vmatpush.bf16.msra.mxu3 %v3848_v0  ;;  %v3846_v9 = vld [vmem:[%s4752_s3 + $0x1e0] sm:$0xff] }
 0x114   : > { %839 = vst [vmem:[#allocation4 + $0x28] sm:$0xf] %v835_v35  ;;  %1927 = vmatpush.bf16.msrb.mxu0 %v3857_v4  ;;  %v3856_v11 = vld [vmem:[%s4752_s3 + $0x230] sm:$0xff]  ;;  %v3865_v12 = vld [vmem:[%s4752_s3 + $0x278] sm:$0xff]  ;;  %v3835_v17 = vld [vmem:[%s4752_s3 + $0x188] sm:$0xff] }
 0x115   : > { %v3778_v42 = vld [vmem:[#allocation4 + $0x1c] sm:$0xf0]  ;;  %v855_v43 = vsel %vm4373_vm14, %v851_v39, %v854_v40  ;;  %858 = vst [vmem:[#allocation4 + $0x14] sm:$0xf] %v850_v38  ;;  %v3845_v24 = vld [vmem:[%s4752_s3 + $0x1d8] sm:$0xff]  ;;  %v3855_v19 = vld [vmem:[%s4752_s3 + $0x228] sm:$0xff] }
 0x116   : > { %v2884_v44 = vor.u32 %v3778_v42, %v2883_v41  ;;  %859 = vst [vmem:[#allocation4 + $0x2c] sm:$0xf] %v855_v43  ;;  %v3774_v45 = vld [vmem:[#allocation4 + $0x4] sm:$0xf]  ;;  %1900 = vmatpush.bf16.msra.mxu2 %v3840_v59  ;;  %v3864_v28 = vld [vmem:[%s4752_s3 + $0x270] sm:$0xff]  ;;  %v3873_v26 = vld [vmem:[%s4752_s3 + $0x2b8] sm:$0xff] }
 0x117   : > { %v2891_v52 = vld [vmem:[#allocation4 + $0x10] sm:$0xf]  ;;  %1915 = vmatpush.bf16.msra.mxu3 %v3847_v2  ;;  %v3834_v22 = vld [vmem:[%s4752_s3 + $0x180] sm:$0xff]  ;;  %v3863_v32 = vld [vmem:[%s4752_s3 + $0x268] sm:$0xff] }
 0x118   : > { %1318 = vmatmul.bf16.vlgmr.msrb.gmra.mxu2 %v2884_v44  ;;  %v3775_v48 = vld [vmem:[#allocation4 + $0xc] sm:$0xf]  ;;  %1928 = vmatpush.bf16.msrb.mxu0 %v3856_v11  ;;  %v3844_v25 = vld [vmem:[%s4752_s3 + $0x1d0] sm:$0xff]  ;;  %v3854_v30 = vld [vmem:[%s4752_s3 + $0x220] sm:$0xff] }
 0x119   : > { %v2877_v46 = vld [vmem:[#allocation4 + $0x18] sm:$0xf0]  ;;  %v3843_v33 = vld [vmem:[%s4752_s3 + $0x1c8] sm:$0xff]  ;;  %v3872_v34 = vld [vmem:[%s4752_s3 + $0x2b0] sm:$0xff] }
 0x11a   : > { %v2880_v47 = vor.u32 %v3774_v45, %v2877_v46  ;;  %v2885_v49 = vld [vmem:[#allocation4 + $0x20] sm:$0xf0]  ;;  %1901 = vmatpush.bf16.msra.mxu2 %v3839_v60  ;;  %v3853_v36 = vld [vmem:[%s4752_s3 + $0x218] sm:$0xff]  ;;  %v3871_v43 = vld [vmem:[%s4752_s3 + $0x2a8] sm:$0xff] }
 0x11b   : > { %v2888_v50 = vor.u32 %v3775_v48, %v2885_v49  ;;  %v3779_v51 = vld [vmem:[#allocation4 + $0x24] sm:$0xf0]  ;;  %1916 = vmatpush.bf16.msra.mxu3 %v3846_v9  ;;  %v3862_v37 = vld [vmem:[%s4752_s3 + $0x260] sm:$0xff]  ;;  %v3861_v48 = vld [vmem:[%s4752_s3 + $0x258] sm:$0xff] }
 0x11c   : > { %1304 = vmatmul.bf16.vlgmr.msrb.gmra.mxu1 %v2880_v47  ;;  %v2892_v53 = vor.u32 %v3779_v51, %v2891_v52  ;;  %v3776_v55 = vld [vmem:[#allocation4 + $0x14] sm:$0xf]  ;;  %1929 = vmatpush.bf16.msrb.mxu0 %v3855_v19  ;;  %v3842_v42 = vld [vmem:[%s4752_s3 + $0x1c0] sm:$0xff]  ;;  %v3881_v49 = vld [vmem:[%s4752_s3 + $0x2f8] sm:$0xff] }
 0x11d   : > { %1332 = vmatmul.bf16.vlgmr.msrb.gmra.mxu3 %v2888_v50  ;;  %v2893_v54 = vld [vmem:[#allocation4 + $0x28] sm:$0xf0]  ;;  %1941 = vmatpush.bf16.msrb.mxu1 %v3865_v12  ;;  %v3949_v46 = vld [vmem:[%s4753_s4 + $0x1] ss:$0 sm:$0xff]  ;;  %v3852_v47 = vld [vmem:[%s4752_s3 + $0x210] sm:$0xff] }
 0x11e   : > { %v2896_v57 = vor.u32 %v3776_v55, %v2893_v54  ;;  %1902 = vmatpush.bf16.msra.mxu2 %v3838_v16  ;;  %v3950_v52 = vld [vmem:[%s4753_s4 + $0x2] ss:$0 sm:$0xff]  ;;  %v3860_v58 = vld [vmem:[%s4752_s3 + $0x250] sm:$0xff]  ;;  %v3869_v16 = vld [vmem:[%s4752_s3 + $0x298] sm:$0xff] }
 0x11f   : > { %1917 = vmatpush.bf16.msra.mxu3 %v3845_v24  ;;  %v3870_v54 = vld [vmem:[%s4752_s3 + $0x2a0] sm:$0xff]  ;;  %v3880_v59 = vld [vmem:[%s4752_s3 + $0x2f0] sm:$0xff]  ;;  %v3859_v2 = vld [vmem:[%s4752_s3 + $0x248] sm:$0xff] }
 0x120   : > { %1930 = vmatpush.bf16.msrb.mxu0 %v3854_v30  ;;  %v3878_v9 = vld [vmem:[%s4752_s3 + $0x2e0] sm:$0xff]  ;;  %v3867_v12 = vld [vmem:[%s4752_s3 + $0x288] sm:$0xff] }
 0x121   : > { %1942 = vmatpush.bf16.msrb.mxu1 %v3864_v28 }
 0x122   : > { %1903 = vmatpush.bf16.msra.mxu2 %v3837_v1  ;;  %v3850_v1 = vld [vmem:[%s4752_s3 + $0x200] sm:$0xff] }
 0x123   : > { %1346 = vmatmul.bf16.vlgmr.msra.gmra.mxu0 %v2892_v53  ;;  %1918 = vmatpush.bf16.msra.mxu3 %v3844_v25 }
 0x124   : > { %1931 = vmatpush.bf16.msrb.mxu0 %v3853_v36 }
 0x125   : > { %1943 = vmatpush.bf16.msrb.mxu1 %v3863_v32 }
 0x126   : > { %1904 = vmatpush.bf16.msra.mxu2 %v3836_v8  ;;  %v3858_v8 = vld [vmem:[%s4752_s3 + $0x240] sm:$0xff] }
 0x127   : > { %1919 = vmatpush.bf16.msra.mxu3 %v3843_v33 }
 0x128   : > { %1932 = vmatpush.bf16.msrb.mxu0 %v3852_v47 }
 0x129   : > { %1944 = vmatpush.bf16.msrb.mxu1 %v3862_v37 }
 0x12a   : > { %1905 = vmatpush.bf16.msra.mxu2 %v3835_v17 }
 0x12b   : > { %1920 = vmatpush.bf16.msra.mxu3 %v3842_v42 }
 0x12c   : > { %1360 = vmatmul.bf16.vlgmr.msra.gmra.mxu1 %v2896_v57  ;;  %v3851_v57 = vld [vmem:[%s4752_s3 + $0x208] sm:$0xff] }
 0x12d   : > { %1945 = vmatpush.bf16.msrb.mxu1 %v3861_v48  ;;  %1933 = vmatpush.bf16.msrb.mxu0 %v3851_v57 }
 0x12e   : > { %1906 = vmatpush.bf16.msra.mxu2 %v3834_v22  ;;  %v3876_v22 = vld [vmem:[%s4752_s3 + $0x2d0] sm:$0xff] }
 0x12f   : > { %1969 = vmatpush.bf16.msrb.mxu3 %v3881_v49 }
 0x131   : > { %1946 = vmatpush.bf16.msrb.mxu1 %v3860_v58  ;;  %1934 = vmatpush.bf16.msrb.mxu0 %v3850_v1 }
 0x132   : > { %1955 = vmatpush.bf16.msrb.mxu2 %v3873_v26 }
 0x133   : > { %1970 = vmatpush.bf16.msrb.mxu3 %v3880_v59 }
 0x135   : > { %1947 = vmatpush.bf16.msrb.mxu1 %v3859_v2 }
 0x136   : > { %1956 = vmatpush.bf16.msrb.mxu2 %v3872_v34 }
 0x139   : > { %1948 = vmatpush.bf16.msrb.mxu1 %v3858_v8 }
 0x13a   : > { %1957 = vmatpush.bf16.msrb.mxu2 %v3871_v43 }
 0x13e   : > { %1958 = vmatpush.bf16.msrb.mxu2 %v3870_v54 }
 0x142   : > { %1959 = vmatpush.bf16.msrb.mxu2 %v3869_v16 }
 0x190   : > { %v1291_v62 = vpop.f32.mrf.mxu0 }
 0x191   : > { %v1292_v10 = vadd.f32 %v3948_v3, %v1291_v62 }
 0x198   : > { %v1293_v5 = vpop.f32.mrf.mxu0 }
 0x199   : > { %v1305_v6 = vpop.f32.mrf.mxu1  ;;  %v1294_v27 = vadd.f32 %v3948_v3, %v1293_v5  ;;  %v3879_v3 = vld [vmem:[%s4752_s3 + $0x2e8] sm:$0xff]  ;;  %v3868_v5 = vld [vmem:[%s4752_s3 + $0x290] sm:$0xff] }
 0x19a   : > { %v1306_v14 = vadd.f32 %v1305_v6, %v1292_v10  ;;  %1971 = vmatpush.bf16.msrb.mxu3 %v3879_v3  ;;  %1960 = vmatpush.bf16.msrb.mxu2 %v3868_v5 }
 0x19b   : > { %v1319_v13 = vpop.f32.mrf.mxu2 }
 0x19c   : > { %v1320_v21 = vadd.f32 %v1319_v13, %v1306_v14  ;;  %v3877_v14 = vld [vmem:[%s4752_s3 + $0x2d8] sm:$0xff] }
 0x19e   : > { %1972 = vmatpush.bf16.msrb.mxu3 %v3878_v9  ;;  %1961 = vmatpush.bf16.msrb.mxu2 %v3867_v12 }
 0x1a0   : > { %v1333_v18 = vpop.f32.mrf.mxu3  ;;  %v1347_v23 = vpop.f32.mrf.mxu0 }
 0x1a1   : > { %v1307_v20 = vpop.f32.mrf.mxu1  ;;  %v1334_v29 = vadd.f32 %v1333_v18, %v1320_v21  ;;  %v3866_v18 = vld [vmem:[%s4752_s3 + $0x280] sm:$0xff] }
 0x1a2   : > { %v1308_v35 = vadd.f32 %v1307_v20, %v1294_v27  ;;  %1973 = vmatpush.bf16.msrb.mxu3 %v3877_v14  ;;  %1962 = vmatpush.bf16.msrb.mxu2 %v3866_v18 }
 0x1a3   : > { %v1321_v38 = vpop.f32.mrf.mxu2  ;;  %v1348_v39 = vadd.f32 %v1347_v23, %v1334_v29 }
 0x1a4   : > { %v1322_v44 = vadd.f32 %v1321_v38, %v1308_v35 }
 0x1a6   : > { %1974 = vmatpush.bf16.msrb.mxu3 %v3876_v22 }
 0x1a8   : > { %v1335_v40 = vpop.f32.mrf.mxu3  ;;  %v1349_v53 = vpop.f32.mrf.mxu0 }
 0x1a9   : > { %v1361_v41 = vpop.f32.mrf.mxu1  ;;  %v1336_v50 = vadd.f32 %v1335_v40, %v1322_v44 }
 0x1aa   : > { %v1362_v45 = vadd.f32 %v1361_v41, %v1348_v39  ;;  %v3875_v39 = vld [vmem:[%s4752_s3 + $0x2c8] sm:$0xff] }
 0x1ab   : > { %v1350_v60 = vadd.f32 %v1349_v53, %v1336_v50  ;;  %1975 = vmatpush.bf16.msrb.mxu3 %v3875_v39 }
 0x1ac   : > { %v1366_v51 = vmax.f32 %v1362_v45, 0.0 }
 0x1ae   : > { %v1370_v55 = vmul.f32 %v3949_v46, %v1366_v51 }
 0x1b0   : > { %v1374_v61 = vadd.f32 %v3950_v52, %v1370_v55 }
 0x1b1   : > { %v1363_v62 = vpop.f32.mrf.mxu1 }
 0x1b2   : > { %1376 = vst [vmem:[#allocation3 + $0x8] sm:$0xff] %v1374_v61  ;;  %v1364_v0 = vadd.f32 %v1363_v62, %v1350_v60 }
 0x1b4   : > { %v1367_v4 = vmax.f32 %v1364_v0, 0.0 }
 0x1b6   : > { %v1371_v6 = vmul.f32 %v3949_v46, %v1367_v4 }
 0x1b8   : > { %v1375_v10 = vadd.f32 %v3950_v52, %v1371_v6  ;;  %v3874_v52 = vld [vmem:[%s4752_s3 + $0x2c0] sm:$0xff] }
 0x1b9   : > { %v1378_v11 = vld [vmem:[#allocation3 + $0x6] sm:$0xff]  ;;  %1976 = vmatpush.bf16.msrb.mxu3 %v3874_v52 }
 0x1ba   : > { %v1381_v13 = vpack.c.bf16 %v1378_v11, %v1378_v11  ;;  %1377 = vst [vmem:[#allocation3 + $0x10] sm:$0xff] %v1375_v10 }
 0x1bc   : > { %1384 = vst [vmem:[#allocation4] sm:$0xf] %v1381_v13  ;;  %v1387_v17 = vshrl.u32 %v1381_v13, 16  ;;  %v1390_v24 = vshll.u32 %v1381_v13, 16  ;;  %v3089_v35 = vrot.slane %v1381_v13, 9  ;;  %v3090_v38 = vrot.slane %v1381_v13, 10 }
 0x1be   : > { %v1389_v19 = vrot.slane %v1387_v17, 4  ;;  %v1392_v28 = vrot.slane %v1390_v24, 5  ;;  %v1428_v20 = vrot.slane %v1387_v17, 5  ;;  %v1429_v21 = vrot.slane %v1390_v24, 6 }
 0x1bf   : > { %v1458_v23 = vrot.slane %v1387_v17, 6  ;;  %v1459_v25 = vrot.slane %v1390_v24, 7 }
 0x1c0   : > { %v1393_v26 = vor.u32 %v1392_v28, %v1389_v19  ;;  %v1430_v27 = vor.u32 %v1429_v21, %v1428_v20 }
 0x1c1   : > { %v1379_v29 = vld [vmem:[#allocation3 + $0xe] sm:$0xff]  ;;  %v1380_v30 = vld [vmem:[#allocation3 + $0x16] sm:$0x1f]  ;;  %v1460_v32 = vor.u32 %v1459_v25, %v1458_v23 }
 0x1c2   : > { %v1382_v33 = vpack.c.bf16 %v1379_v29, %v1379_v29  ;;  %v1383_v34 = vpack.c.bf16 %v1380_v30, %v1380_v30  ;;  %v1394_v36 = vrot.slane %v1393_v26, 4  ;;  %v1431_v37 = vrot.slane %v1430_v27, 4 }
 0x1c3   : > { %v1461_v43 = vrot.slane %v1460_v32, 4  ;;  %v3190_v62 = vld [vmem:[#allocation4] sm:$0xf] }
 0x1c4   : > { %1385 = vst [vmem:[#allocation4 + $0x18] sm:$0xf] %v1382_v33  ;;  %v1419_v40 = vrot.slane %v1382_v33, 5  ;;  %v1396_v41 = vshll.u32 %v1382_v33, 16  ;;  %v1400_v42 = vshrl.u32 %v1382_v33, 16  ;;  %v1422_v44 = vrot.slane %v1383_v34, 5 }
 0x1c5   : > { %v1406_v45 = vshll.u32 %v1383_v34, 16  ;;  %v1437_v46 = vshrl.u32 %v1383_v34, 16  ;;  %v1449_v47 = vrot.slane %v1382_v33, 6  ;;  %v1452_v57 = vrot.slane %v1383_v34, 6 }
 0x1c6   : > { %v1420_v48 = vsel %vm4338_vm8, %v3089_v35, %v1419_v40  ;;  %v1421_v49 = vrot.slane %v1419_v40, 4  ;;  %v1398_v50 = vrot.slane %v1396_v41, 5  ;;  %v1402_v51 = vrot.slane %v1400_v42, 4  ;;  %v3895_v40 = vld [vmem:[%s4752_s3 + $0x338] sm:$0xff] }
 0x1c7   : > { %1426 = vst [vmem:[#allocation4 + $0x8] sm:$0xf] %v1420_v48  ;;  %v1432_v53 = vrot.slane %v1400_v42, 5  ;;  %v1433_v54 = vrot.slane %v1396_v41, 6  ;;  %v1439_v55 = vrot.slane %v1437_v46, 5  ;;  %v1440_v61 = vrot.slane %v1406_v45, 6  ;;  %2516 = vmatpush.bf16.msra.mxu0 %v3895_v40 }
 0x1c8   : > { %v1423_v58 = vsel %vm4338_vm8, %v1421_v49, %v1422_v44  ;;  %v1399_v59 = vsel %vm4345_vm11, %v1394_v36, %v1398_v50  ;;  %v1403_v60 = vor.u32 %v1402_v51, %v1398_v50  ;;  %v1450_v0 = vsel %vm4353_vm12, %v3090_v38, %v1449_v47  ;;  %v3891_v48 = vld [vmem:[%s4752_s3 + $0x318] sm:$0xff]  ;;  %v3901_v49 = vld [vmem:[%s4752_s3 + $0x368] sm:$0xff]  ;;  %v3914_v40 = vld [vmem:[%s4752_s3 + $0x3d0] sm:$0xff] }
 0x1c9   : > { %1427 = vst [vmem:[#allocation4 + $0x20] sm:$0xf] %v1423_v58  ;;  %v1434_v16 = vor.u32 %v1433_v54, %v1432_v53  ;;  %v1451_v1 = vrot.slane %v1449_v47, 4  ;;  %v1462_v2 = vrot.slane %v1400_v42, 6  ;;  %v1408_v4 = vrot.slane %v1406_v45, 5  ;;  %v3893_v42 = vld [vmem:[%s4752_s3 + $0x328] sm:$0xff] }
 0x1ca   : > { %v1404_v3 = vrot.slane %v1403_v60, 4  ;;  %1412 = vst [vmem:[#allocation4 + $0x4] sm:$0xf] %v1399_v59  ;;  %v1463_v5 = vrot.slane %v1396_v41, 7  ;;  %v1467_v6 = vrot.slane %v1437_v46, 6  ;;  %v1441_v11 = vor.u32 %v1440_v61, %v1439_v55  ;;  %v3894_v41 = vld [vmem:[%s4752_s3 + $0x330] sm:$0xff] }
 0x1cb   : > { %v3831_v8 = vld [vmem:[#allocation4 + $0x14] sm:$0xf0]  ;;  %v1435_v9 = vsel %vm4363_vm13, %v1431_v37, %v1434_v16  ;;  %v1436_v10 = vrot.slane %v1434_v16, 4  ;;  %1456 = vst [vmem:[#allocation4 + $0x10] sm:$0xf] %v1450_v0  ;;  %v1468_v12 = vrot.slane %v1406_v45, 7  ;;  %v1453_v17 = vsel %vm4353_vm12, %v1451_v1, %v1452_v57  ;;  %2517 = vmatpush.bf16.msra.mxu0 %v3894_v41 }
 0x1cc   : > { %v3191_v13 = vor.u32 %v3831_v8, %v3190_v62  ;;  %v1409_v14 = vsel %vm4345_vm11, %v1404_v3, %v1408_v4  ;;  %1445 = vst [vmem:[#allocation4 + $0xc] sm:$0xf] %v1435_v9  ;;  %v1464_v24 = vor.u32 %v1463_v5, %v1462_v2  ;;  %v3892_v45 = vld [vmem:[%s4752_s3 + $0x320] sm:$0xff]  ;;  %v3902_v46 = vld [vmem:[%s4752_s3 + $0x370] sm:$0xff]  ;;  %v3911_v50 = vld [vmem:[%s4752_s3 + $0x3b8] sm:$0xff] }
 0x1cd   : > { %1413 = vst [vmem:[#allocation4 + $0x1c] sm:$0xf] %v1409_v14  ;;  %v1442_v18 = vsel %vm4363_vm13, %v1436_v10, %v1441_v11  ;;  %v1469_v20 = vor.u32 %v1468_v12, %v1467_v6  ;;  %v3951_v47 = vld [vmem:[%s4753_s4 + $0x4] ss:$0 sm:$0xff]  ;;  %v3890_v54 = vld [vmem:[%s4752_s3 + $0x310] sm:$0xff]  ;;  %v3919_v59 = vld [vmem:[%s4752_s3 + $0x3f8] sm:$0xff] }
 0x1ce   : > { %1907 = vmatmul.bf16.vlgmr.msra.gmra.mxu2 %v3191_v13  ;;  %1446 = vst [vmem:[#allocation4 + $0x24] sm:$0xf] %v1442_v18  ;;  %v1465_v19 = vsel %vm4373_vm14, %v1461_v43, %v1464_v24  ;;  %v1466_v28 = vrot.slane %v1464_v24, 4  ;;  %v3198_v21 = vld [vmem:[#allocation4 + $0x8] sm:$0xf]  ;;  %v3903_v43 = vld [vmem:[%s4752_s3 + $0x378] sm:$0xff] }
 0x1cf   : > { %1457 = vst [vmem:[#allocation4 + $0x28] sm:$0xf] %v1453_v17  ;;  %2518 = vmatpush.bf16.msra.mxu0 %v3893_v42  ;;  %2530 = vmatpush.bf16.msra.mxu1 %v3903_v43  ;;  %v3900_v55 = vld [vmem:[%s4752_s3 + $0x360] sm:$0xff]  ;;  %v3910_v58 = vld [vmem:[%s4752_s3 + $0x3b0] sm:$0xff]  ;;  %v3889_v61 = vld [vmem:[%s4752_s3 + $0x308] sm:$0xff] }
 0x1d0   : > { %v3832_v22 = vld [vmem:[#allocation4 + $0x1c] sm:$0xf0]  ;;  %v1470_v23 = vsel %vm4373_vm14, %v1466_v28, %v1469_v20  ;;  %1473 = vst [vmem:[#allocation4 + $0x14] sm:$0xf] %v1465_v19  ;;  %2544 = vmatpush.bf16.msra.mxu2 %v3911_v50  ;;  %v3899_v62 = vld [vmem:[%s4752_s3 + $0x358] sm:$0xff]  ;;  %v3909_v0 = vld [vmem:[%s4752_s3 + $0x3a8] sm:$0xff] }
 0x1d1   : > { %v3199_v25 = vor.u32 %v3832_v22, %v3198_v21  ;;  %1474 = vst [vmem:[#allocation4 + $0x2c] sm:$0xf] %v1470_v23  ;;  %v3828_v26 = vld [vmem:[#allocation4 + $0x4] sm:$0xf]  ;;  %v3918_v1 = vld [vmem:[%s4752_s3 + $0x3f0] sm:$0xff]  ;;  %v3927_v8 = vld [vmem:[%s4752_s3 + $0x438] sm:$0xff] }
 0x1d2   : > { %v3206_v35 = vld [vmem:[#allocation4 + $0x10] sm:$0xf]  ;;  %v3888_v5 = vld [vmem:[%s4752_s3 + $0x300] sm:$0xff]  ;;  %v3917_v11 = vld [vmem:[%s4752_s3 + $0x3e8] sm:$0xff] }
 0x1d3   : > { %1935 = vmatmul.bf16.vlgmr.msrb.gmra.mxu0 %v3199_v25  ;;  %v3829_v30 = vld [vmem:[#allocation4 + $0xc] sm:$0xf]  ;;  %2531 = vmatpush.bf16.msra.mxu1 %v3902_v46  ;;  %v3898_v6 = vld [vmem:[%s4752_s3 + $0x350] sm:$0xff]  ;;  %v3908_v10 = vld [vmem:[%s4752_s3 + $0x3a0] sm:$0xff] }
 0x1d4   : > { %v3192_v27 = vld [vmem:[#allocation4 + $0x18] sm:$0xf0]  ;;  %2519 = vmatpush.bf16.msra.mxu0 %v3892_v45  ;;  %2545 = vmatpush.bf16.msra.mxu2 %v3910_v58  ;;  %v3897_v14 = vld [vmem:[%s4752_s3 + $0x348] sm:$0xff]  ;;  %v3926_v17 = vld [vmem:[%s4752_s3 + $0x430] sm:$0xff] }
 0x1d5   : > { %v3195_v29 = vor.u32 %v3828_v26, %v3192_v27  ;;  %v3200_v32 = vld [vmem:[#allocation4 + $0x20] sm:$0xf0]  ;;  %v3907_v24 = vld [vmem:[%s4752_s3 + $0x398] sm:$0xff]  ;;  %v3925_v23 = vld [vmem:[%s4752_s3 + $0x428] sm:$0xff] }
 0x1d6   : > { %v3203_v33 = vor.u32 %v3829_v30, %v3200_v32  ;;  %v3833_v34 = vld [vmem:[#allocation4 + $0x24] sm:$0xf0]  ;;  %v3916_v18 = vld [vmem:[%s4752_s3 + $0x3e0] sm:$0xff]  ;;  %v3906_v27 = vld [vmem:[%s4752_s3 + $0x390] sm:$0xff] }
 0x1d7   : > { %1921 = vmatmul.bf16.vlgmr.msra.gmra.mxu3 %v3195_v29  ;;  %v3207_v36 = vor.u32 %v3833_v34, %v3206_v35  ;;  %v3830_v38 = vld [vmem:[#allocation4 + $0x14] sm:$0xf]  ;;  %2532 = vmatpush.bf16.msra.mxu1 %v3901_v49  ;;  %v3896_v22 = vld [vmem:[%s4752_s3 + $0x340] sm:$0xff]  ;;  %v3915_v29 = vld [vmem:[%s4752_s3 + $0x3d8] sm:$0xff] }
 0x1d8   : > { %1949 = vmatmul.bf16.vlgmr.msrb.gmra.mxu1 %v3203_v33  ;;  %v3208_v37 = vld [vmem:[#allocation4 + $0x28] sm:$0xf0]  ;;  %2520 = vmatpush.bf16.msra.mxu0 %v3891_v48  ;;  %v3952_v26 = vld [vmem:[%s4753_s4 + $0x5] ss:$0 sm:$0xff]  ;;  %v3935_v32 = vld [vmem:[%s4752_s3 + $0x478] sm:$0xff] }
 0x1d9   : > { %v3211_v39 = vor.u32 %v3830_v38, %v3208_v37  ;;  %2558 = vmatpush.bf16.msra.mxu3 %v3919_v59  ;;  %2546 = vmatpush.bf16.msra.mxu2 %v3909_v0  ;;  %v3953_v35 = vld [vmem:[%s4753_s4 + $0x6] ss:$0 sm:$0xff]  ;;  %v3934_v41 = vld [vmem:[%s4752_s3 + $0x470] sm:$0xff]  ;;  %v3923_v45 = vld [vmem:[%s4752_s3 + $0x418] sm:$0xff] }
 0x1da   : > { %v3924_v37 = vld [vmem:[%s4752_s3 + $0x420] sm:$0xff]  ;;  %v3913_v48 = vld [vmem:[%s4752_s3 + $0x3c8] sm:$0xff] }
 0x1db   : > { %2533 = vmatpush.bf16.msra.mxu1 %v3900_v55  ;;  %v3933_v49 = vld [vmem:[%s4752_s3 + $0x468] sm:$0xff] }
 0x1dc   : > { %2521 = vmatpush.bf16.msra.mxu0 %v3890_v54  ;;  %v3932_v54 = vld [vmem:[%s4752_s3 + $0x460] sm:$0xff]  ;;  %v3921_v58 = vld [vmem:[%s4752_s3 + $0x408] sm:$0xff] }
 0x1dd   : > { %2559 = vmatpush.bf16.msra.mxu3 %v3918_v1  ;;  %2547 = vmatpush.bf16.msra.mxu2 %v3908_v10 }
 0x1de   : > { %1963 = vmatmul.bf16.vlgmr.msrb.gmra.mxu2 %v3207_v36 }
 0x1df   : > { %2534 = vmatpush.bf16.msra.mxu1 %v3899_v62 }
 0x1e0   : > { %2522 = vmatpush.bf16.msra.mxu0 %v3889_v61 }
 0x1e1   : > { %2560 = vmatpush.bf16.msra.mxu3 %v3917_v11  ;;  %2548 = vmatpush.bf16.msra.mxu2 %v3907_v24 }
 0x1e3   : > { %2535 = vmatpush.bf16.msra.mxu1 %v3898_v6 }
 0x1e4   : > { %2523 = vmatpush.bf16.msra.mxu0 %v3888_v5 }
 0x1e5   : > { %2561 = vmatpush.bf16.msra.mxu3 %v3916_v18  ;;  %2549 = vmatpush.bf16.msra.mxu2 %v3906_v27 }
 0x1e7   : > { %1977 = vmatmul.bf16.vlgmr.msrb.gmra.mxu3 %v3211_v39  ;;  %2536 = vmatpush.bf16.msra.mxu1 %v3897_v14  ;;  %v3905_v39 = vld [vmem:[%s4752_s3 + $0x388] sm:$0xff] }
 0x1e8   : > { %2572 = vmatpush.bf16.msrb.mxu0 %v3927_v8 }
 0x1e9   : > { %2562 = vmatpush.bf16.msra.mxu3 %v3915_v29  ;;  %2550 = vmatpush.bf16.msra.mxu2 %v3905_v39 }
 0x1eb   : > { %2537 = vmatpush.bf16.msra.mxu1 %v3896_v22 }
 0x1ec   : > { %2573 = vmatpush.bf16.msrb.mxu0 %v3926_v17 }
 0x1ed   : > { %2563 = vmatpush.bf16.msra.mxu3 %v3914_v40 }
 0x1ef   : > { %2586 = vmatpush.bf16.msrb.mxu1 %v3935_v32 }
 0x1f0   : > { %2574 = vmatpush.bf16.msrb.mxu0 %v3925_v23 }
 0x1f1   : > { %2564 = vmatpush.bf16.msra.mxu3 %v3913_v48 }
 0x1f3   : > { %2587 = vmatpush.bf16.msrb.mxu1 %v3934_v41 }
 0x1f4   : > { %2575 = vmatpush.bf16.msrb.mxu0 %v3924_v37 }
 0x1f7   : > { %2588 = vmatpush.bf16.msrb.mxu1 %v3933_v49 }
 0x1f8   : > { %2576 = vmatpush.bf16.msrb.mxu0 %v3923_v45 }
 0x1fb   : > { %2589 = vmatpush.bf16.msrb.mxu1 %v3932_v54 }
 0x250   : > { %v1936_v60 = vpop.f32.mrf.mxu0 }
 0x251   : > { %v1908_v44 = vpop.f32.mrf.mxu2 }
 0x252   : > { %v1909_v53 = vadd.f32 %v3951_v47, %v1908_v44 }
 0x255   : > { %v1950_v2 = vpop.f32.mrf.mxu1 }
 0x258   : > { %v1938_v19 = vpop.f32.mrf.mxu0 }
 0x259   : > { %v1910_v51 = vpop.f32.mrf.mxu2 }
 0x25a   : > { %v1922_v52 = vpop.f32.mrf.mxu3  ;;  %v1911_v4 = vadd.f32 %v3951_v47, %v1910_v51  ;;  %v3904_v47 = vld [vmem:[%s4752_s3 + $0x380] sm:$0xff]  ;;  %v3922_v51 = vld [vmem:[%s4752_s3 + $0x410] sm:$0xff] }
 0x25b   : > { %v1923_v57 = vadd.f32 %v1922_v52, %v1909_v53  ;;  %2551 = vmatpush.bf16.msra.mxu2 %v3904_v47  ;;  %v3912_v53 = vld [vmem:[%s4752_s3 + $0x3c0] sm:$0xff]  ;;  %2577 = vmatpush.bf16.msrb.mxu0 %v3922_v51 }
 0x25c   : > { %2565 = vmatpush.bf16.msra.mxu3 %v3912_v53 }
 0x25d   : > { %v1937_v16 = vadd.f32 %v1936_v60, %v1923_v57  ;;  %v1952_v30 = vpop.f32.mrf.mxu1  ;;  %v3931_v60 = vld [vmem:[%s4752_s3 + $0x458] sm:$0xff] }
 0x25e   : > { %2590 = vmatpush.bf16.msrb.mxu1 %v3931_v60 }
 0x25f   : > { %v1951_v12 = vadd.f32 %v1950_v2, %v1937_v16  ;;  %2578 = vmatpush.bf16.msrb.mxu0 %v3921_v58  ;;  %v3920_v16 = vld [vmem:[%s4752_s3 + $0x400] sm:$0xff] }
 0x261   : > { %v1964_v9 = vpop.f32.mrf.mxu2 }
 0x262   : > { %v1924_v3 = vpop.f32.mrf.mxu3  ;;  %v1965_v28 = vadd.f32 %v1964_v9, %v1951_v12 }
 0x263   : > { %v1925_v13 = vadd.f32 %v1924_v3, %v1911_v4  ;;  %v3930_v4 = vld [vmem:[%s4752_s3 + $0x450] sm:$0xff]  ;;  %2579 = vmatpush.bf16.msrb.mxu0 %v3920_v16 }
 0x264   : > { %2591 = vmatpush.bf16.msrb.mxu1 %v3930_v4 }
 0x265   : > { %v1939_v20 = vadd.f32 %v1938_v19, %v1925_v13 }
 0x267   : > { %v1953_v33 = vadd.f32 %v1952_v30, %v1939_v20 }
 0x269   : > { %v1966_v36 = vpop.f32.mrf.mxu2 }
 0x26a   : > { %v1978_v21 = vpop.f32.mrf.mxu3  ;;  %v1967_v42 = vadd.f32 %v1966_v36, %v1953_v33 }
 0x26b   : > { %v1979_v25 = vadd.f32 %v1978_v21, %v1965_v28  ;;  %v3929_v28 = vld [vmem:[%s4752_s3 + $0x448] sm:$0xff] }
 0x26c   : > { %2592 = vmatpush.bf16.msrb.mxu1 %v3929_v28 }
 0x26d   : > { %v1983_v34 = vmax.f32 %v1979_v25, 0.0 }
 0x26f   : > { %v1987_v38 = vmul.f32 %v3952_v26, %v1983_v34 }
 0x271   : > { %v1991_v43 = vadd.f32 %v3953_v35, %v1987_v38 }
 0x272   : > { %v1980_v44 = vpop.f32.mrf.mxu3 }
 0x273   : > { %1993 = vst [vmem:[#allocation3 + $0x8] sm:$0xff] %v1991_v43  ;;  %v1981_v46 = vadd.f32 %v1980_v44, %v1967_v42 }
 0x275   : > { %v1984_v50 = vmax.f32 %v1981_v46, 0.0 }
 0x277   : > { %v1988_v52 = vmul.f32 %v3952_v26, %v1984_v50 }
 0x279   : > { %v1992_v55 = vadd.f32 %v3953_v35, %v1988_v52  ;;  %v3928_v35 = vld [vmem:[%s4752_s3 + $0x440] sm:$0xff] }
 0x27a   : > { %v1995_v57 = vld [vmem:[#allocation3 + $0x6] sm:$0xff]  ;;  %2593 = vmatpush.bf16.msrb.mxu1 %v3928_v35 }
 0x27b   : > { %1994 = vst [vmem:[#allocation3 + $0x10] sm:$0xff] %v1992_v55  ;;  %v1998_v59 = vpack.c.bf16 %v1995_v57, %v1995_v57 }
 0x27d   : > { %2001 = vst [vmem:[#allocation4] sm:$0xf] %v1998_v59  ;;  %v2004_v61 = vshrl.u32 %v1998_v59, 16  ;;  %v2007_v62 = vshll.u32 %v1998_v59, 16  ;;  %v3406_v17 = vrot.slane %v1998_v59, 9  ;;  %v3407_v19 = vrot.slane %v1998_v59, 10 }
 0x27f   : > { %v2006_v0 = vrot.slane %v2004_v61, 4  ;;  %v2009_v1 = vrot.slane %v2007_v62, 5  ;;  %v2045_v2 = vrot.slane %v2004_v61, 5  ;;  %v2046_v3 = vrot.slane %v2007_v62, 6 }
 0x280   : > { %v2075_v5 = vrot.slane %v2004_v61, 6  ;;  %v2076_v6 = vrot.slane %v2007_v62, 7 }
 0x281   : > { %v2010_v8 = vor.u32 %v2009_v1, %v2006_v0  ;;  %v2047_v9 = vor.u32 %v2046_v3, %v2045_v2 }
 0x282   : > { %v1996_v10 = vld [vmem:[#allocation3 + $0xe] sm:$0xff]  ;;  %v1997_v11 = vld [vmem:[#allocation3 + $0x16] sm:$0x1f]  ;;  %v2077_v12 = vor.u32 %v2076_v6, %v2075_v5 }
 0x283   : > { %v2000_v13 = vpack.c.bf16 %v1997_v11, %v1997_v11  ;;  %v1999_v14 = vpack.c.bf16 %v1996_v10, %v1996_v10  ;;  %v2011_v24 = vrot.slane %v2010_v8, 4  ;;  %v2048_v18 = vrot.slane %v2047_v9, 4 }
 0x284   : > { %v2078_v23 = vrot.slane %v2077_v12, 4  ;;  %v3507_v44 = vld [vmem:[#allocation4] sm:$0xf] }
 0x285   : > { %2002 = vst [vmem:[#allocation4 + $0x18] sm:$0xf] %v1999_v14  ;;  %v2036_v20 = vrot.slane %v1999_v14, 5  ;;  %v2013_v21 = vshll.u32 %v1999_v14, 16  ;;  %v2017_v22 = vshrl.u32 %v1999_v14, 16  ;;  %v2039_v25 = vrot.slane %v2000_v13, 5 }
 0x286   : > { %v2023_v26 = vshll.u32 %v2000_v13, 16  ;;  %v2054_v27 = vshrl.u32 %v2000_v13, 16  ;;  %v2066_v29 = vrot.slane %v1999_v14, 6  ;;  %v2069_v39 = vrot.slane %v2000_v13, 6 }
 0x287   : > { %v2037_v30 = vsel %vm4338_vm8, %v3406_v17, %v2036_v20  ;;  %v2038_v32 = vrot.slane %v2036_v20, 4  ;;  %v2015_v33 = vrot.slane %v2013_v21, 5  ;;  %v2019_v34 = vrot.slane %v2017_v22, 4 }
 0x288   : > { %2043 = vst [vmem:[#allocation4 + $0x8] sm:$0xf] %v2037_v30  ;;  %v2049_v36 = vrot.slane %v2017_v22, 5  ;;  %v2050_v37 = vrot.slane %v2013_v21, 6  ;;  %v2056_v38 = vrot.slane %v2054_v27, 5  ;;  %v2057_v43 = vrot.slane %v2023_v26, 6 }
 0x289   : > { %v2040_v40 = vsel %vm4338_vm8, %v2038_v32, %v2039_v25  ;;  %v2016_v41 = vsel %vm4345_vm11, %v2011_v24, %v2015_v33  ;;  %v2020_v42 = vor.u32 %v2019_v34, %v2015_v33  ;;  %v2067_v46 = vsel %vm4353_vm12, %v3407_v19, %v2066_v29  ;;  %v3954_v24 = vld [vmem:[%s4753_s4 + $0x8] ss:$0 sm:$0xff] }
 0x28a   : > { %2044 = vst [vmem:[#allocation4 + $0x20] sm:$0xf] %v2040_v40  ;;  %v2051_v45 = vor.u32 %v2050_v37, %v2049_v36  ;;  %v2068_v47 = vrot.slane %v2066_v29, 4  ;;  %v2079_v48 = vrot.slane %v2017_v22, 6  ;;  %v2025_v50 = vrot.slane %v2023_v26, 5 }
 0x28b   : > { %v2021_v49 = vrot.slane %v2020_v42, 4  ;;  %2029 = vst [vmem:[#allocation4 + $0x4] sm:$0xf] %v2016_v41  ;;  %v2080_v51 = vrot.slane %v2013_v21, 7  ;;  %v2084_v52 = vrot.slane %v2054_v27, 6  ;;  %v2058_v55 = vor.u32 %v2057_v43, %v2056_v38 }
 0x28c   : > { %v3885_v56 = vld [vmem:[#allocation4 + $0x14] sm:$0xf0]  ;;  %v2052_v53 = vsel %vm4363_vm13, %v2048_v18, %v2051_v45  ;;  %v2053_v54 = vrot.slane %v2051_v45, 4  ;;  %2073 = vst [vmem:[#allocation4 + $0x10] sm:$0xf] %v2067_v46  ;;  %v2085_v57 = vrot.slane %v2023_v26, 7  ;;  %v2070_v60 = vsel %vm4353_vm12, %v2068_v47, %v2069_v39 }
 0x28d   : > { %v3508_v58 = vor.u32 %v3885_v56, %v3507_v44  ;;  %v2026_v59 = vsel %vm4345_vm11, %v2021_v49, %v2025_v50  ;;  %2062 = vst [vmem:[#allocation4 + $0xc] sm:$0xf] %v2052_v53  ;;  %v2081_v61 = vor.u32 %v2080_v51, %v2079_v48  ;;  %v3955_v38 = vld [vmem:[%s4753_s4 + $0x9] ss:$0 sm:$0xff]  ;;  %v3956_v41 = vld [vmem:[%s4753_s4 + $0xa] ss:$0 sm:$0xff] }
 0x28e   : > { %2030 = vst [vmem:[#allocation4 + $0x1c] sm:$0xf] %v2026_v59  ;;  %v2059_v62 = vsel %vm4363_vm13, %v2053_v54, %v2058_v55  ;;  %v2086_v1 = vor.u32 %v2085_v57, %v2084_v52 }
 0x28f   : > { %2524 = vmatmul.bf16.vlgmr.msra.gmra.mxu0 %v3508_v58  ;;  %2063 = vst [vmem:[#allocation4 + $0x24] sm:$0xf] %v2059_v62  ;;  %v2082_v16 = vsel %vm4373_vm14, %v2078_v23, %v2081_v61  ;;  %v2083_v0 = vrot.slane %v2081_v61, 4  ;;  %v3515_v2 = vld [vmem:[#allocation4 + $0x8] sm:$0xf] }
 0x290   : > { %2074 = vst [vmem:[#allocation4 + $0x28] sm:$0xf] %v2070_v60 }
 0x291   : > { %v3886_v63 = vld [vmem:[#allocation4 + $0x1c] sm:$0xf0]  ;;  %v2087_v3 = vsel %vm4373_vm14, %v2083_v0, %v2086_v1  ;;  %2090 = vst [vmem:[#allocation4 + $0x14] sm:$0xf] %v2082_v16 }
 0x292   : > { %v3516_v7 = vor.u32 %v3886_v63, %v3515_v2  ;;  %2091 = vst [vmem:[#allocation4 + $0x2c] sm:$0xf] %v2087_v3  ;;  %v3882_v4 = vld [vmem:[#allocation4 + $0x4] sm:$0xf] }
 0x293   : > { %v3523_v11 = vld [vmem:[#allocation4 + $0x10] sm:$0xf] }
 0x294   : > { %2552 = vmatmul.bf16.vlgmr.msra.gmra.mxu2 %v3516_v7  ;;  %v3883_v6 = vld [vmem:[#allocation4 + $0xc] sm:$0xf] }
 0x295   : > { %v3509_v15 = vld [vmem:[#allocation4 + $0x18] sm:$0xf0] }
 0x296   : > { %v3512_v5 = vor.u32 %v3882_v4, %v3509_v15  ;;  %v3517_v8 = vld [vmem:[#allocation4 + $0x20] sm:$0xf0] }
 0x297   : > { %v3520_v9 = vor.u32 %v3883_v6, %v3517_v8  ;;  %v3887_v10 = vld [vmem:[#allocation4 + $0x24] sm:$0xf0] }
 0x298   : > { %2538 = vmatmul.bf16.vlgmr.msra.gmra.mxu1 %v3512_v5  ;;  %v3524_v12 = vor.u32 %v3887_v10, %v3523_v11  ;;  %v3884_v14 = vld [vmem:[#allocation4 + $0x14] sm:$0xf] }
 0x299   : > { %2566 = vmatmul.bf16.vlgmr.msra.gmra.mxu3 %v3520_v9  ;;  %v3525_v13 = vld [vmem:[#allocation4 + $0x28] sm:$0xf0] }
 0x29a   : > { %v3528_v31 = vor.u32 %v3884_v14, %v3525_v13 }
 0x29f   : > { %2580 = vmatmul.bf16.vlgmr.msrb.gmra.mxu0 %v3524_v12 }
 0x2a8   : > { %2594 = vmatmul.bf16.vlgmr.msrb.gmra.mxu1 %v3528_v31 }
 0x30c   : > { %v2525_v17 = vpop.f32.mrf.mxu0 }
 0x30d   : > { %v2526_v28 = vadd.f32 %v3954_v24, %v2525_v17 }
 0x314   : > { %v2527_v18 = vpop.f32.mrf.mxu0 }
 0x315   : > { %v2539_v19 = vpop.f32.mrf.mxu1  ;;  %v2528_v27 = vadd.f32 %v3954_v24, %v2527_v18 }
 0x316   : > { %v2540_v21 = vadd.f32 %v2539_v19, %v2526_v28 }
 0x317   : > { %v2553_v20 = vpop.f32.mrf.mxu2 }
 0x318   : > { %v2554_v25 = vadd.f32 %v2553_v20, %v2540_v21 }
 0x31c   : > { %v2567_v22 = vpop.f32.mrf.mxu3  ;;  %v2581_v26 = vpop.f32.mrf.mxu0 }
 0x31d   : > { %v2541_v23 = vpop.f32.mrf.mxu1  ;;  %v2568_v29 = vadd.f32 %v2567_v22, %v2554_v25 }
 0x31e   : > { %v2542_v30 = vadd.f32 %v2541_v23, %v2528_v27 }
 0x31f   : > { %v2555_v32 = vpop.f32.mrf.mxu2  ;;  %v2582_v33 = vadd.f32 %v2581_v26, %v2568_v29 }
 0x320   : > { %v2556_v36 = vadd.f32 %v2555_v32, %v2542_v30 }
 0x324   : > { %v2569_v34 = vpop.f32.mrf.mxu3  ;;  %v2583_v42 = vpop.f32.mrf.mxu0 }
 0x325   : > { %v2595_v35 = vpop.f32.mrf.mxu1  ;;  %v2570_v39 = vadd.f32 %v2569_v34, %v2556_v36 }
 0x326   : > { %v2596_v37 = vadd.f32 %v2595_v35, %v2582_v33 }
 0x327   : > { %v2584_v44 = vadd.f32 %v2583_v42, %v2570_v39 }
 0x328   : > { %v2600_v40 = vmax.f32 %v2596_v37, 0.0 }
 0x32a   : > { %v2604_v43 = vmul.f32 %v3955_v38, %v2600_v40 }
 0x32c   : > { %v2608_v45 = vadd.f32 %v3956_v41, %v2604_v43 }
 0x32d   : > { %v2597_v46 = vpop.f32.mrf.mxu1 }
 0x32e   : > { %2610 = vst [vmem:[#allocation3 + $0x8] sm:$0xff] %v2608_v45  ;;  %v2598_v47 = vadd.f32 %v2597_v46, %v2584_v44 }
 0x330   : > { %v2601_v48 = vmax.f32 %v2598_v47, 0.0 }
 0x332   : > { %v2605_v49 = vmul.f32 %v3955_v38, %v2601_v48 }
 0x334   : > { %v2609_v50 = vadd.f32 %v3956_v41, %v2605_v49 }
 0x336   : > { %2611 = vst [vmem:[#allocation3 + $0x10] sm:$0xff] %v2609_v50 }
 0x33d   : > { %v2613_v51 = vld [vmem:[#allocation3 + $0x8] ss:$2 sm:$0xff]  ;;  %v2615_v52 = vld [vmem:[#allocation3 + $0x9] ss:$2 sm:$0xff] }
 0x33e   : > { %v2616_v56 = vmax.f32 %v2613_v51, %v2615_v52 }
 0x340   : > { %2617 = vst [vmem:[%s222_s10] sm:$0xff] %v2616_v56 }
 0x341 PF: > { %s15_s18 = sadd.s32 1, %s3963_s18  }
 0x342   : > { %p12_p4 = scmp.ge.s32.totalorder %s15_s18, 4  }
 0x344   :  { %14 = sbr.rel (!%p12_p4) target bundleno = 1 (0x1), region = 83 }

// kernel: deepfeature_net_forward.2
= control target key start
LH: loop header
LB: loop body
LE: loop exit
PB: predicated region body
PF: predicated region fallthrough
CT: control target
= control target key end

     0   :  { %s8526_s18 = smov 0   ;;  %s11124_s0 = inlined_call_operand.vmem [shape: bf16[2,536,128], index: 0, kind: input, shape index: {}]   ;;  %s11125_s1 = inlined_call_operand.vmem [shape: bf16[128,128], index: 1, kind: input, shape index: {}]   ;;  %s11126_s2 = inlined_call_operand.vmem [shape: f32[3,128], index: 2, kind: input, shape index: {}]   ;;  %s11127_s3 = inlined_call_operand.vmem [shape: bf16[3,1024,128], index: 3, kind: input, shape index: {}]   ;;  %s11128_s4 = inlined_call_operand.vmem [shape: f32[3,3,128], index: 4, kind: input, shape index: {}]   ;;  %s11129_s5 = inlined_call_operand.vmem [shape: f32[2,16,128], index: 5, kind: output, shape index: {}]  }
   0x1 LB: > { %s6353_s19 = sadd.s32 4294967295, %s8492_s18   ;;  %p6357_p0 = scmp.ge.s32.totalorder %s8492_s18, 1  ;;  %s8492_s18 = sphi %s8526_s18, %s15_s18  }
   0x2   : > { %p187_p1 = scmp.lt.s32.totalorder %s8492_s18, 3 }
   0x4   : > { %p188_p2 = pnand %p6357_p0, %p187_p1 }
   0x6   : > { %191 = sbr.rel (%p188_p2) target bundleno = 1219 (0x4c3), region = 40 }
   0xb   : > { %v8097_v0 = vld [vmem:[%s11125_s1 + $0x38] sm:$0xff]  ;;  %v8096_v4 = vld [vmem:[%s11125_s1 + $0x30] sm:$0xff]  ;;  %v8095_v8 = vld [vmem:[%s11125_s1 + $0x28] sm:$0xff]  ;;  %p215_p3 = scmp.lt.s32.totalorder %s6353_s19, 1  ;;  %vm1837_vm0 = vcmask 1042432   ;;  %vm1838_vm1 = vcmask 1046532  }
   0xc   : > { %v8113_v1 = vld [vmem:[%s11125_s1 + $0x38] sm:$0xff]  ;;  %357 = vmatpush.bf16.msra.mxu0 %v8097_v0  ;;  %v8112_v5 = vld [vmem:[%s11125_s1 + $0x30] sm:$0xff]  ;;  %v8111_v9 = vld [vmem:[%s11125_s1 + $0x28] sm:$0xff]  ;;  %vm1716_vm2 = vsmask.f32 3328  ;;  %vm1710_vm9 = vcmask 1041408  }
   0xd   : > { %v8129_v2 = vld [vmem:[%s11125_s1 + $0x38] sm:$0xff]  ;;  %604 = vmatpush.bf16.msra.mxu1 %v8113_v1  ;;  %v8128_v6 = vld [vmem:[%s11125_s1 + $0x30] sm:$0xff]  ;;  %v8127_v10 = vld [vmem:[%s11125_s1 + $0x28] sm:$0xff]  ;;  %s11161_s19 = smov (!%p215_p3, %s6353_s19), 1  ;;  %vm1717_vm3 = vsmask.f32 7440 }
   0xe   : > { %v8145_v3 = vld [vmem:[%s11125_s1 + $0x38] sm:$0xff]  ;;  %851 = vmatpush.bf16.msra.mxu2 %v8129_v2  ;;  %v8144_v7 = vld [vmem:[%s11125_s1 + $0x30] sm:$0xff]  ;;  %v8143_v11 = vld [vmem:[%s11125_s1 + $0x28] sm:$0xff]  ;;  %s8451_s26 = smul.u32 268, %s11161_s19  ;;  %vm1886_vm4 = vsmask.f32 2304 }
   0xf   : > { %1098 = vmatpush.bf16.msra.mxu3 %v8145_v3  ;;  %v8094_v12 = vld [vmem:[%s11125_s1 + $0x20] sm:$0xff]  ;;  %v8093_v16 = vld [vmem:[%s11125_s1 + $0x18] sm:$0xff]  ;;  %v8092_v20 = vld [vmem:[%s11125_s1 + $0x10] sm:$0xff]  ;;  %vm1887_vm5 = vsmask.f32 6416  ;;  %vm1953_vm12 = vcmask 1045508  }
  0x10   : > { %358 = vmatpush.bf16.msra.mxu0 %v8096_v4  ;;  %v8110_v13 = vld [vmem:[%s11125_s1 + $0x20] sm:$0xff]  ;;  %v8109_v17 = vld [vmem:[%s11125_s1 + $0x18] sm:$0xff]  ;;  %v8108_v21 = vld [vmem:[%s11125_s1 + $0x10] sm:$0xff]  ;;  %s8634_s12 = scalar_lea.vmem %s11124_s0, %s8451_s26  ;;  %vm1711_vm10 = vsmask.f32 1280  ;;  %vm2068_vm14 = vcmask 1040384  }
  0x11   : > { %605 = vmatpush.bf16.msra.mxu1 %v8112_v5  ;;  %v8126_v14 = vld [vmem:[%s11125_s1 + $0x20] sm:$0xff]  ;;  %v8125_v18 = vld [vmem:[%s11125_s1 + $0x18] sm:$0xff]  ;;  %v8124_v22 = vld [vmem:[%s11125_s1 + $0x10] sm:$0xff]  ;;  %vm2069_vm15 = vcmask 1044484   ;;  %s8081_s6 = sshll.u32 %s11161_s19, 4 }
  0x12   : > { %852 = vmatpush.bf16.msra.mxu2 %v8128_v6  ;;  %v8142_v15 = vld [vmem:[%s11125_s1 + $0x20] sm:$0xff]  ;;  %v8141_v19 = vld [vmem:[%s11125_s1 + $0x18] sm:$0xff]  ;;  %v8140_v23 = vld [vmem:[%s11125_s1 + $0x10] sm:$0xff]  ;;  %s11108_s9 = scalar_lea.vmem %s11129_s5, %s8081_s6 }
  0x13   : > { %1099 = vmatpush.bf16.msra.mxu3 %v8144_v7  ;;  %v8091_v24 = vld [vmem:[%s11125_s1 + $0x8] sm:$0xff]  ;;  %v8090_v28 = vld [vmem:[%s11125_s1] sm:$0xff]  ;;  %v8154_v32 = vld [vmem:[%s11125_s1 + $0x38] sm:$0xff] }
  0x14   : > { %359 = vmatpush.bf16.msra.mxu0 %v8095_v8  ;;  %v8107_v25 = vld [vmem:[%s11125_s1 + $0x8] sm:$0xff]  ;;  %v8106_v29 = vld [vmem:[%s11125_s1] sm:$0xff]  ;;  %v8153_v37 = vld [vmem:[%s11125_s1 + $0x30] sm:$0xff] }
  0x15   : > { %606 = vmatpush.bf16.msra.mxu1 %v8111_v9  ;;  %v8123_v26 = vld [vmem:[%s11125_s1 + $0x8] sm:$0xff]  ;;  %v8122_v30 = vld [vmem:[%s11125_s1] sm:$0xff]  ;;  %v8084_v43 = vld [vmem:[%s8634_s12 + $0x10] sm:$0xff] }
  0x16   : > { %853 = vmatpush.bf16.msra.mxu2 %v8127_v10  ;;  %v8139_v27 = vld [vmem:[%s11125_s1 + $0x8] sm:$0xff]  ;;  %v8138_v31 = vld [vmem:[%s11125_s1] sm:$0xff]  ;;  %v8100_v44 = vld [vmem:[%s8634_s12 + $0x50] sm:$0xff] }
  0x17   : > { %1100 = vmatpush.bf16.msra.mxu3 %v8143_v11  ;;  %v8082_v33 = vld [vmem:[%s8634_s12] sm:$0xff]  ;;  %v8083_v38 = vld [vmem:[%s8634_s12 + $0x8] sm:$0xff]  ;;  %v8116_v45 = vld [vmem:[%s8634_s12 + $0x90] sm:$0xff] }
  0x18   : > { %360 = vmatpush.bf16.msra.mxu0 %v8094_v12  ;;  %v8098_v34 = vld [vmem:[%s8634_s12 + $0x40] sm:$0xff]  ;;  %v8099_v39 = vld [vmem:[%s8634_s12 + $0x48] sm:$0xff]  ;;  %v8132_v46 = vld [vmem:[%s8634_s12 + $0xd0] sm:$0xff] }
  0x19   : > { %607 = vmatpush.bf16.msra.mxu1 %v8110_v13  ;;  %v8114_v35 = vld [vmem:[%s8634_s12 + $0x80] sm:$0xff]  ;;  %v8115_v40 = vld [vmem:[%s8634_s12 + $0x88] sm:$0xff]  ;;  %v8085_v48 = vld [vmem:[%s8634_s12 + $0x18] sm:$0xff] }
  0x1a   : > { %854 = vmatpush.bf16.msra.mxu2 %v8126_v14  ;;  %v8130_v36 = vld [vmem:[%s8634_s12 + $0xc0] sm:$0xff]  ;;  %v8131_v41 = vld [vmem:[%s8634_s12 + $0xc8] sm:$0xff]  ;;  %v8101_v49 = vld [vmem:[%s8634_s12 + $0x58] sm:$0xff] }
  0x1b   : > { %1101 = vmatpush.bf16.msra.mxu3 %v8142_v15  ;;  %v8152_v42 = vld [vmem:[%s11125_s1 + $0x28] sm:$0xff]  ;;  %v8151_v47 = vld [vmem:[%s11125_s1 + $0x20] sm:$0xff]  ;;  %v8117_v50 = vld [vmem:[%s8634_s12 + $0x98] sm:$0xff] }
  0x1c   : > { %361 = vmatpush.bf16.msra.mxu0 %v8093_v16  ;;  %v8133_v51 = vld [vmem:[%s8634_s12 + $0xd8] sm:$0xff]  ;;  %v8086_v53 = vld [vmem:[%s8634_s12 + $0x20] sm:$0xff]  ;;  %v8149_v57 = vld [vmem:[%s11125_s1 + $0x10] sm:$0xff] }
  0x1d   : > { %608 = vmatpush.bf16.msra.mxu1 %v8109_v17  ;;  %v8150_v52 = vld [vmem:[%s11125_s1 + $0x18] sm:$0xff]  ;;  %v8102_v54 = vld [vmem:[%s8634_s12 + $0x60] sm:$0xff]  ;;  %v8087_v58 = vld [vmem:[%s8634_s12 + $0x28] sm:$0xff] }
  0x1e   : > { %855 = vmatpush.bf16.msra.mxu2 %v8125_v18  ;;  %v8118_v55 = vld [vmem:[%s8634_s12 + $0xa0] sm:$0xff]  ;;  %v8103_v59 = vld [vmem:[%s8634_s12 + $0x68] sm:$0xff]  ;;  %v8088_v63 = vld [vmem:[%s8634_s12 + $0x30] sm:$0xff] }
  0x1f   : > { %1102 = vmatpush.bf16.msra.mxu3 %v8141_v19  ;;  %v8134_v56 = vld [vmem:[%s8634_s12 + $0xe0] sm:$0xff]  ;;  %v8119_v60 = vld [vmem:[%s8634_s12 + $0xa8] sm:$0xff]  ;;  %v8104_v0 = vld [vmem:[%s8634_s12 + $0x70] sm:$0xff] }
  0x20   : > { %362 = vmatpush.bf16.msra.mxu0 %v8092_v20  ;;  %v8135_v61 = vld [vmem:[%s8634_s12 + $0xe8] sm:$0xff]  ;;  %v8147_v1 = vld [vmem:[%s11125_s1] sm:$0xff]  ;;  %v8120_v2 = vld [vmem:[%s8634_s12 + $0xb0] sm:$0xff] }
  0x21   : > { %609 = vmatpush.bf16.msra.mxu1 %v8108_v21  ;;  %v8148_v62 = vld [vmem:[%s11125_s1 + $0x8] sm:$0xff]  ;;  %v8136_v3 = vld [vmem:[%s8634_s12 + $0xf0] sm:$0xff]  ;;  %v8089_v4 = vld [vmem:[%s8634_s12 + $0x38] sm:$0xff] }
  0x22   : > { %856 = vmatpush.bf16.msra.mxu2 %v8124_v22  ;;  %v8105_v5 = vld [vmem:[%s8634_s12 + $0x78] sm:$0xff]  ;;  %v8701_v8 = vld [vmem:[%s11126_s2] ss:$0 sm:$0xff]  ;;  %v8711_v10 = vld [vmem:[%s11126_s2 + $0x1] ss:$0 sm:$0xff] }
  0x23   : > { %1103 = vmatpush.bf16.msra.mxu3 %v8140_v23  ;;  %v8121_v6 = vld [vmem:[%s8634_s12 + $0xb8] sm:$0xff]  ;;  %v8706_v9 = vld [vmem:[%s11126_s2] ss:$0 sm:$0xff]  ;;  %v8716_v11 = vld [vmem:[%s11126_s2 + $0x1] ss:$0 sm:$0xff] }
  0x24   : > { %363 = vmatpush.bf16.msra.mxu0 %v8091_v24  ;;  %v8137_v7 = vld [vmem:[%s8634_s12 + $0xf8] sm:$0xff]  ;;  %v8146_v12 = vld [vmem:[%s8634_s12 + $0x100] sm:$0xff]  ;;  %vm9270_vm6 = vmor %vm1837_vm0, %vm1838_vm1  ;;  %vm2001_vm1 = vsmask.f32 5392 }
  0x25   : > { %610 = vmatpush.bf16.msra.mxu1 %v8107_v25  ;;  %v8723_v16 = vld [vmem:[%s11126_s2 + $0x2] ss:$0 sm:$0xff]  ;;  %v8736_v21 = vld [vmem:[%s11126_s2] ss:$0 sm:$0xff]  ;;  %v8748_v25 = vld [vmem:[%s11126_s2 + $0x1] ss:$0 sm:$0xff] }
  0x26   : > { %857 = vmatpush.bf16.msra.mxu2 %v8123_v26  ;;  %v8729_v18 = vld [vmem:[%s11126_s2 + $0x2] ss:$0 sm:$0xff]  ;;  %v8741_v22 = vld [vmem:[%s11126_s2] ss:$0 sm:$0xff]  ;;  %v8753_v26 = vld [vmem:[%s11126_s2 + $0x1] ss:$0 sm:$0xff] }
  0x27   : > { %1104 = vmatpush.bf16.msra.mxu3 %v8139_v27  ;;  %vm9315_vm7 = vmor %vm1716_vm2, %vm1717_vm3  ;;  %vm2119_vm3 = vsmask.f32 256 }
  0x28   : > { %364 = vmatpush.bf16.msra.mxu0 %v8090_v28  ;;  %vm9344_vm8 = vmor %vm1886_vm4, %vm1887_vm5  ;;  %vm2120_vm4 = vsmask.f32 4368 }
  0x29   : > { %611 = vmatpush.bf16.msra.mxu1 %v8106_v29  ;;  %vm9530_vm11 = vmand %vm1710_vm9, %vm1711_vm10 }
  0x2a   : > { %858 = vmatpush.bf16.msra.mxu2 %v8122_v30  ;;  %vm9555_vm13 = vmor %vm1710_vm9, %vm1953_vm12 }
  0x2b   : > { %1105 = vmatpush.bf16.msra.mxu3 %v8138_v31  ;;  %365 = vmatmul.bf16.vlgmr.msra.gmra.mxu0 %v8082_v33  ;;  %vm9587_vm0 = vmor %vm2068_vm14, %vm2069_vm15 }
  0x2c   : > { %1294 = vmatpush.bf16.msrb.mxu0 %v8154_v32  ;;  %612 = vmatmul.bf16.vlgmr.msra.gmra.mxu1 %v8098_v34  ;;  %v8759_v32 = vld [vmem:[%s11126_s2 + $0x2] ss:$0 sm:$0xff]  ;;  %vm9602_vm2 = vmor %vm1711_vm10, %vm2001_vm1 }
  0x2d   : > { %859 = vmatmul.bf16.vlgmr.msra.gmra.mxu2 %v8114_v35  ;;  %v8765_v34 = vld [vmem:[%s11126_s2 + $0x2] ss:$0 sm:$0xff]  ;;  %vm9617_vm5 = vmor %vm2119_vm3, %vm2120_vm4 }
  0x2e   : > { %1106 = vmatmul.bf16.vlgmr.msra.gmra.mxu3 %v8130_v36 }
  0x30   : > { %1295 = vmatpush.bf16.msrb.mxu0 %v8153_v37  ;;  %v1217_v37 = vld [vmem:[%s8634_s12 + $0x108] sm:$0x7] }
  0x34   : > { %1296 = vmatpush.bf16.msrb.mxu0 %v8152_v42 }
  0x38   : > { %1297 = vmatpush.bf16.msrb.mxu0 %v8151_v47 }
  0x3b   : > { %370 = vmatmul.bf16.gmra.mxu0 %v8083_v38 }
  0x3c   : > { %617 = vmatmul.bf16.gmra.mxu1 %v8099_v39  ;;  %1298 = vmatpush.bf16.msrb.mxu0 %v8150_v52 }
  0x3d   : > { %864 = vmatmul.bf16.gmra.mxu2 %v8115_v40 }
  0x3e   : > { %1111 = vmatmul.bf16.gmra.mxu3 %v8131_v41 }
  0x40   : > { %1299 = vmatpush.bf16.msrb.mxu0 %v8149_v57 }
  0x44   : > { %1300 = vmatpush.bf16.msrb.mxu0 %v8148_v62 }
  0x48   : > { %1301 = vmatpush.bf16.msrb.mxu0 %v8147_v1 }
  0x4b   : > { %375 = vmatmul.bf16.gmra.mxu0 %v8084_v43 }
  0x4c   : > { %622 = vmatmul.bf16.gmra.mxu1 %v8100_v44  ;;  %v1241_v44 = vunpack.c.l.b16 %v1217_v37 }
  0x4d   : > { %869 = vmatmul.bf16.gmra.mxu2 %v8116_v45 }
  0x4e   : > { %1116 = vmatmul.bf16.gmra.mxu3 %v8132_v46 }
  0x5b   : > { %380 = vmatmul.bf16.gmra.mxu0 %v8085_v48 }
  0x5c   : > { %627 = vmatmul.bf16.gmra.mxu1 %v8101_v49 }
  0x5d   : > { %874 = vmatmul.bf16.gmra.mxu2 %v8117_v50 }
  0x5e   : > { %1121 = vmatmul.bf16.gmra.mxu3 %v8133_v51 }
  0x6b   : > { %385 = vmatmul.bf16.gmra.mxu0 %v8086_v53 }
  0x6c   : > { %632 = vmatmul.bf16.gmra.mxu1 %v8102_v54 }
  0x6d   : > { %879 = vmatmul.bf16.gmra.mxu2 %v8118_v55  ;;  %v1243_v55 = vpack.c.b16 %v1241_v44, %v1241_v44 }
  0x6e   : > { %1126 = vmatmul.bf16.gmra.mxu3 %v8134_v56  ;;  %v8494_v56 = vmov -3e+38  }
  0x6f   : > { %225 = vst [vmem:[#allocation2] sm:$0xff] %v8494_v56 }
  0x70   : > { %226 = vst [vmem:[#allocation2 + $0x218] sm:$0xff] %v8494_v56 }
  0x7b   : > { %390 = vmatmul.bf16.gmra.mxu0 %v8087_v58 }
  0x7c   : > { %637 = vmatmul.bf16.gmra.mxu1 %v8103_v59 }
  0x7d   : > { %884 = vmatmul.bf16.gmra.mxu2 %v8119_v60 }
  0x7e   : > { %1131 = vmatmul.bf16.gmra.mxu3 %v8135_v61 }
  0x8b   : > { %395 = vmatmul.bf16.gmra.mxu0 %v8088_v63 }
  0x8c   : > { %642 = vmatmul.bf16.gmra.mxu1 %v8104_v0 }
  0x8d   : > { %889 = vmatmul.bf16.gmra.mxu2 %v8120_v2 }
  0x8e   : > { %1136 = vmatmul.bf16.gmra.mxu3 %v8136_v3 }
  0x9b   : > { %400 = vmatmul.bf16.gmra.mxu0 %v8089_v4 }
  0x9c   : > { %647 = vmatmul.bf16.gmra.mxu1 %v8105_v5 }
  0x9d   : > { %894 = vmatmul.bf16.gmra.mxu2 %v8121_v6 }
  0x9e   : > { %1141 = vmatmul.bf16.gmra.mxu3 %v8137_v7 }
  0xa8   : > { %v366_v13 = vpop.f32.mrf.mxu0 }
  0xa9   : > { %v613_v14 = vpop.f32.mrf.mxu1  ;;  %v367_v15 = vadd.f32 %v8701_v8, %v366_v13 }
  0xaa   : > { %v614_v17 = vadd.f32 %v8706_v9, %v613_v14 }
  0xab   : > { %v408_v19 = vmul.f32 %v8711_v10, %v367_v15  ;;  %1302 = vmatmul.bf16.vlgmr.msrb.gmra.mxu0 %v8146_v12 }
  0xac   : > { %v655_v20 = vmul.f32 %v8716_v11, %v614_v17 }
  0xad   : > { %v426_v23 = vadd.f32 %v8723_v16, %v408_v19 }
  0xae   : > { %v673_v24 = vadd.f32 %v8729_v18, %v655_v20 }
  0xaf   : > { %v442_v27 = vmax.f32 %v426_v23, 0.0 }
  0xb0   : > { %v689_v28 = vmax.f32 %v673_v24, 0.0  ;;  %v860_v29 = vpop.f32.mrf.mxu2  ;;  %v368_v35 = vpop.f32.mrf.mxu0 }
  0xb1   : > { %v1107_v30 = vpop.f32.mrf.mxu3  ;;  %v861_v31 = vadd.f32 %v8736_v21, %v860_v29  ;;  %v615_v36 = vpop.f32.mrf.mxu1  ;;  %458 = vst [vmem:[#allocation2 + $0x8] sm:$0xff] %v442_v27  ;;  %v369_v38 = vadd.f32 %v8701_v8, %v368_v35 }
  0xb2   : > { %v1108_v33 = vadd.f32 %v8741_v22, %v1107_v30  ;;  %v616_v39 = vadd.f32 %v8706_v9, %v615_v36  ;;  %705 = vst [vmem:[#allocation2 + $0x88] sm:$0xff] %v689_v28 }
  0xb3   : > { %v902_v40 = vmul.f32 %v8748_v25, %v861_v31  ;;  %v409_v42 = vmul.f32 %v8711_v10, %v369_v38 }
  0xb4   : > { %v1149_v41 = vmul.f32 %v8753_v26, %v1108_v33  ;;  %v656_v43 = vmul.f32 %v8716_v11, %v616_v39 }
  0xb5   : > { %v920_v45 = vadd.f32 %v8759_v32, %v902_v40  ;;  %v427_v47 = vadd.f32 %v8723_v16, %v409_v42 }
  0xb6   : > { %v1167_v46 = vadd.f32 %v8765_v34, %v1149_v41  ;;  %v674_v48 = vadd.f32 %v8729_v18, %v656_v43 }
  0xb7   : > { %v936_v49 = vmax.f32 %v920_v45, 0.0  ;;  %v443_v51 = vmax.f32 %v427_v47, 0.0 }
  0xb8   : > { %v1183_v50 = vmax.f32 %v1167_v46, 0.0  ;;  %v690_v52 = vmax.f32 %v674_v48, 0.0  ;;  %v862_v53 = vpop.f32.mrf.mxu2  ;;  %v371_v59 = vpop.f32.mrf.mxu0 }
  0xb9   : > { %v1109_v54 = vpop.f32.mrf.mxu3  ;;  %952 = vst [vmem:[#allocation2 + $0x108] sm:$0xff] %v936_v49  ;;  %v863_v57 = vadd.f32 %v8736_v21, %v862_v53  ;;  %v618_v60 = vpop.f32.mrf.mxu1  ;;  %v372_v61 = vadd.f32 %v8701_v8, %v371_v59 }
  0xba   : > { %v1110_v58 = vadd.f32 %v8741_v22, %v1109_v54  ;;  %1199 = vst [vmem:[#allocation2 + $0x188] sm:$0xff] %v1183_v50  ;;  %v619_v62 = vadd.f32 %v8706_v9, %v618_v60 }
  0xbb   : > { %459 = vst [vmem:[#allocation2 + $0x10] sm:$0xff] %v443_v51  ;;  %v903_v63 = vmul.f32 %v8748_v25, %v863_v57  ;;  %v410_v1 = vmul.f32 %v8711_v10, %v372_v61  ;;  %1307 = vmatmul.bf16.gmra.mxu0 %v1243_v55  ;;  %v8202_v55 = vld [vmem:[%s11127_s3 + $0x78] sm:$0xff] }
  0xbc   : > { %v1150_v0 = vmul.f32 %v8753_v26, %v1110_v58  ;;  %706 = vst [vmem:[#allocation2 + $0x90] sm:$0xff] %v690_v52  ;;  %v657_v2 = vmul.f32 %v8716_v11, %v619_v62  ;;  %2955 = vmatpush.bf16.msrb.mxu2 %v8202_v55 }
  0xbd   : > { %v921_v3 = vadd.f32 %v8759_v32, %v903_v63  ;;  %v428_v5 = vadd.f32 %v8723_v16, %v410_v1 }
  0xbe   : > { %v1168_v4 = vadd.f32 %v8765_v34, %v1150_v0  ;;  %v675_v6 = vadd.f32 %v8729_v18, %v657_v2  ;;  %v8210_v0 = vld [vmem:[%s11127_s3 + $0xb8] sm:$0xff] }
  0xbf   : > { %v937_v7 = vmax.f32 %v921_v3, 0.0  ;;  %v444_v13 = vmax.f32 %v428_v5, 0.0  ;;  %2988 = vmatpush.bf16.msrb.mxu3 %v8210_v0 }
  0xc0   : > { %v1184_v12 = vmax.f32 %v1168_v4, 0.0  ;;  %v691_v14 = vmax.f32 %v675_v6, 0.0  ;;  %v865_v15 = vpop.f32.mrf.mxu2  ;;  %v373_v23 = vpop.f32.mrf.mxu0 }
  0xc1   : > { %v1112_v17 = vpop.f32.mrf.mxu3  ;;  %953 = vst [vmem:[#allocation2 + $0x110] sm:$0xff] %v937_v7  ;;  %v866_v19 = vadd.f32 %v8736_v21, %v865_v15  ;;  %v620_v24 = vpop.f32.mrf.mxu1  ;;  %v374_v27 = vadd.f32 %v8701_v8, %v373_v23 }
  0xc2   : > { %v1113_v20 = vadd.f32 %v8741_v22, %v1112_v17  ;;  %1200 = vst [vmem:[#allocation2 + $0x190] sm:$0xff] %v1184_v12  ;;  %v621_v28 = vadd.f32 %v8706_v9, %v620_v24 }
  0xc3   : > { %460 = vst [vmem:[#allocation2 + $0x18] sm:$0xff] %v444_v13  ;;  %v904_v29 = vmul.f32 %v8748_v25, %v866_v19  ;;  %v411_v31 = vmul.f32 %v8711_v10, %v374_v27 }
  0xc4   : > { %v1151_v30 = vmul.f32 %v8753_v26, %v1113_v20  ;;  %707 = vst [vmem:[#allocation2 + $0x98] sm:$0xff] %v691_v14  ;;  %v658_v33 = vmul.f32 %v8716_v11, %v621_v28 }
  0xc5   : > { %v922_v35 = vadd.f32 %v8759_v32, %v904_v29  ;;  %v429_v37 = vadd.f32 %v8723_v16, %v411_v31 }
  0xc6   : > { %v1169_v36 = vadd.f32 %v8765_v34, %v1151_v30  ;;  %v676_v38 = vadd.f32 %v8729_v18, %v658_v33 }
  0xc7   : > { %v938_v39 = vmax.f32 %v922_v35, 0.0  ;;  %v445_v41 = vmax.f32 %v429_v37, 0.0 }
  0xc8   : > { %v1185_v40 = vmax.f32 %v1169_v36, 0.0  ;;  %v692_v42 = vmax.f32 %v676_v38, 0.0  ;;  %v867_v43 = vpop.f32.mrf.mxu2  ;;  %v376_v46 = vpop.f32.mrf.mxu0 }
  0xc9   : > { %v1114_v44 = vpop.f32.mrf.mxu3  ;;  %954 = vst [vmem:[#allocation2 + $0x118] sm:$0xff] %v938_v39  ;;  %v868_v45 = vadd.f32 %v8736_v21, %v867_v43  ;;  %v623_v47 = vpop.f32.mrf.mxu1  ;;  %v377_v50 = vadd.f32 %v8701_v8, %v376_v46 }
  0xca   : > { %1201 = vst [vmem:[#allocation2 + $0x198] sm:$0xff] %v1185_v40  ;;  %v1115_v49 = vadd.f32 %v8741_v22, %v1114_v44  ;;  %v624_v52 = vadd.f32 %v8706_v9, %v623_v47  ;;  %v8194_v40 = vld [vmem:[%s11127_s3 + $0x38] sm:$0xff] }
  0xcb   : > { %461 = vst [vmem:[#allocation2 + $0x20] sm:$0xff] %v445_v41  ;;  %v905_v48 = vmul.f32 %v8748_v25, %v868_v45  ;;  %v412_v56 = vmul.f32 %v8711_v10, %v377_v50  ;;  %2922 = vmatpush.bf16.msrb.mxu1 %v8194_v40 }
  0xcc   : > { %708 = vst [vmem:[#allocation2 + $0xa0] sm:$0xff] %v692_v42  ;;  %v1152_v54 = vmul.f32 %v8753_v26, %v1115_v49  ;;  %v659_v59 = vmul.f32 %v8716_v11, %v624_v52 }
  0xcd   : > { %v923_v51 = vadd.f32 %v8759_v32, %v905_v48  ;;  %v430_v6 = vadd.f32 %v8723_v16, %v412_v56 }
  0xce   : > { %v1170_v3 = vadd.f32 %v8765_v34, %v1152_v54  ;;  %v677_v12 = vadd.f32 %v8729_v18, %v659_v59 }
  0xcf   : > { %v939_v53 = vmax.f32 %v923_v51, 0.0  ;;  %v446_v20 = vmax.f32 %v430_v6, 0.0 }
  0xd0   : > { %v870_v57 = vpop.f32.mrf.mxu2  ;;  %v378_v62 = vpop.f32.mrf.mxu0  ;;  %v1186_v14 = vmax.f32 %v1170_v3, 0.0  ;;  %v693_v27 = vmax.f32 %v677_v12, 0.0  ;;  %v8201_v12 = vld [vmem:[%s11127_s3 + $0x70] sm:$0xff] }
  0xd1   : > { %v1117_v58 = vpop.f32.mrf.mxu3  ;;  %955 = vst [vmem:[#allocation2 + $0x120] sm:$0xff] %v939_v53  ;;  %v871_v60 = vadd.f32 %v8736_v21, %v870_v57  ;;  %v625_v63 = vpop.f32.mrf.mxu1  ;;  %v379_v1 = vadd.f32 %v8701_v8, %v378_v62  ;;  %2956 = vmatpush.bf16.msrb.mxu2 %v8201_v12 }
  0xd2   : > { %v1118_v61 = vadd.f32 %v8741_v22, %v1117_v58  ;;  %v626_v2 = vadd.f32 %v8706_v9, %v625_v63  ;;  %1202 = vst [vmem:[#allocation2 + $0x1a0] sm:$0xff] %v1186_v14  ;;  %v8193_v14 = vld [vmem:[%s11127_s3 + $0x30] sm:$0xff] }
  0xd3   : > { %v906_v4 = vmul.f32 %v8748_v25, %v871_v60  ;;  %v413_v7 = vmul.f32 %v8711_v10, %v379_v1  ;;  %462 = vst [vmem:[#allocation2 + $0x28] sm:$0xff] %v446_v20  ;;  %2923 = vmatpush.bf16.msrb.mxu1 %v8193_v14 }
  0xd4   : > { %v1153_v5 = vmul.f32 %v8753_v26, %v1118_v61  ;;  %v660_v13 = vmul.f32 %v8716_v11, %v626_v2  ;;  %709 = vst [vmem:[#allocation2 + $0xa8] sm:$0xff] %v693_v27 }
  0xd5   : > { %v924_v15 = vadd.f32 %v8759_v32, %v906_v4  ;;  %v431_v19 = vadd.f32 %v8723_v16, %v413_v7 }
  0xd6   : > { %v1171_v17 = vadd.f32 %v8765_v34, %v1153_v5  ;;  %v678_v28 = vadd.f32 %v8729_v18, %v660_v13  ;;  %v8209_v13 = vld [vmem:[%s11127_s3 + $0xb0] sm:$0xff] }
  0xd7   : > { %v940_v37 = vmax.f32 %v924_v15, 0.0  ;;  %v447_v39 = vmax.f32 %v431_v19, 0.0  ;;  %2989 = vmatpush.bf16.msrb.mxu3 %v8209_v13 }
  0xd8   : > { %v872_v23 = vpop.f32.mrf.mxu2  ;;  %v381_v31 = vpop.f32.mrf.mxu0  ;;  %v1187_v38 = vmax.f32 %v1171_v17, 0.0  ;;  %v694_v45 = vmax.f32 %v678_v28, 0.0 }
  0xd9   : > { %v1119_v24 = vpop.f32.mrf.mxu3  ;;  %v873_v29 = vadd.f32 %v8736_v21, %v872_v23  ;;  %v628_v33 = vpop.f32.mrf.mxu1  ;;  %v382_v35 = vadd.f32 %v8701_v8, %v381_v31  ;;  %956 = vst [vmem:[#allocation2 + $0x128] sm:$0xff] %v940_v37 }
  0xda   : > { %v1120_v30 = vadd.f32 %v8741_v22, %v1119_v24  ;;  %v629_v36 = vadd.f32 %v8706_v9, %v628_v33  ;;  %1203 = vst [vmem:[#allocation2 + $0x1a8] sm:$0xff] %v1187_v38 }
  0xdb   : > { %v907_v41 = vmul.f32 %v8748_v25, %v873_v29  ;;  %v414_v43 = vmul.f32 %v8711_v10, %v382_v35  ;;  %463 = vst [vmem:[#allocation2 + $0x30] sm:$0xff] %v447_v39 }
  0xdc   : > { %v1154_v42 = vmul.f32 %v8753_v26, %v1120_v30  ;;  %v661_v44 = vmul.f32 %v8716_v11, %v629_v36  ;;  %710 = vst [vmem:[#allocation2 + $0xb0] sm:$0xff] %v694_v45 }
  0xdd   : > { %v925_v46 = vadd.f32 %v8759_v32, %v907_v41  ;;  %v432_v48 = vadd.f32 %v8723_v16, %v414_v43 }
  0xde   : > { %v1172_v47 = vadd.f32 %v8765_v34, %v1154_v42  ;;  %v679_v49 = vadd.f32 %v8729_v18, %v661_v44 }
  0xdf   : > { %v941_v52 = vmax.f32 %v925_v46, 0.0  ;;  %v448_v60 = vmax.f32 %v432_v48, 0.0 }
  0xe0   : > { %v875_v50 = vpop.f32.mrf.mxu2  ;;  %v383_v55 = vpop.f32.mrf.mxu0  ;;  %v1188_v57 = vmax.f32 %v1172_v47, 0.0  ;;  %v695_v63 = vmax.f32 %v679_v49, 0.0 }
  0xe1   : > { %v1122_v51 = vpop.f32.mrf.mxu3  ;;  %v876_v53 = vadd.f32 %v8736_v21, %v875_v50  ;;  %v630_v56 = vpop.f32.mrf.mxu1  ;;  %v384_v58 = vadd.f32 %v8701_v8, %v383_v55  ;;  %957 = vst [vmem:[#allocation2 + $0x130] sm:$0xff] %v941_v52 }
  0xe2   : > { %v1123_v54 = vadd.f32 %v8741_v22, %v1122_v51  ;;  %v631_v59 = vadd.f32 %v8706_v9, %v630_v56  ;;  %1204 = vst [vmem:[#allocation2 + $0x1b0] sm:$0xff] %v1188_v57 }
  0xe3   : > { %v908_v61 = vmul.f32 %v8748_v25, %v876_v53  ;;  %v415_v0 = vmul.f32 %v8711_v10, %v384_v58  ;;  %464 = vst [vmem:[#allocation2 + $0x38] sm:$0xff] %v448_v60  ;;  %v8208_v60 = vld [vmem:[%s11127_s3 + $0xa8] sm:$0xff] }
  0xe4   : > { %v1155_v62 = vmul.f32 %v8753_v26, %v1123_v54  ;;  %v662_v1 = vmul.f32 %v8716_v11, %v631_v59  ;;  %711 = vst [vmem:[#allocation2 + $0xb8] sm:$0xff] %v695_v63  ;;  %v8200_v59 = vld [vmem:[%s11127_s3 + $0x68] sm:$0xff]  ;;  %2990 = vmatpush.bf16.msrb.mxu3 %v8208_v60 }
  0xe5   : > { %v926_v2 = vadd.f32 %v8759_v32, %v908_v61  ;;  %v433_v4 = vadd.f32 %v8723_v16, %v415_v0  ;;  %2957 = vmatpush.bf16.msrb.mxu2 %v8200_v59 }
  0xe6   : > { %v1173_v3 = vadd.f32 %v8765_v34, %v1155_v62  ;;  %v680_v5 = vadd.f32 %v8729_v18, %v662_v1 }
  0xe7   : > { %v942_v6 = vmax.f32 %v926_v2, 0.0  ;;  %v449_v15 = vmax.f32 %v433_v4, 0.0 }
  0xe8   : > { %v1189_v7 = vmax.f32 %v1173_v3, 0.0  ;;  %v696_v17 = vmax.f32 %v680_v5, 0.0  ;;  %v877_v19 = vpop.f32.mrf.mxu2  ;;  %v386_v23 = vpop.f32.mrf.mxu0  ;;  %v8192_v5 = vld [vmem:[%s11127_s3 + $0x28] sm:$0xff] }
  0xe9   : > { %v1124_v20 = vpop.f32.mrf.mxu3  ;;  %958 = vst [vmem:[#allocation2 + $0x138] sm:$0xff] %v942_v6  ;;  %v633_v24 = vpop.f32.mrf.mxu1  ;;  %v878_v27 = vadd.f32 %v8736_v21, %v877_v19  ;;  %v387_v29 = vadd.f32 %v8701_v8, %v386_v23  ;;  %2924 = vmatpush.bf16.msrb.mxu1 %v8192_v5 }
  0xea   : > { %1205 = vst [vmem:[#allocation2 + $0x1b8] sm:$0xff] %v1189_v7  ;;  %v1125_v28 = vadd.f32 %v8741_v22, %v1124_v20  ;;  %v634_v30 = vadd.f32 %v8706_v9, %v633_v24 }
  0xeb   : > { %465 = vst [vmem:[#allocation2 + $0x40] sm:$0xff] %v449_v15  ;;  %v909_v31 = vmul.f32 %v8748_v25, %v878_v27  ;;  %v416_v37 = vmul.f32 %v8711_v10, %v387_v29 }
  0xec   : > { %712 = vst [vmem:[#allocation2 + $0xc0] sm:$0xff] %v696_v17  ;;  %v1156_v33 = vmul.f32 %v8753_v26, %v1125_v28  ;;  %v663_v38 = vmul.f32 %v8716_v11, %v634_v30 }
  0xed   : > { %v927_v46 = vadd.f32 %v8759_v32, %v909_v31  ;;  %v434_v49 = vadd.f32 %v8723_v16, %v416_v37 }
  0xee   : > { %v1174_v47 = vadd.f32 %v8765_v34, %v1156_v33  ;;  %v681_v50 = vadd.f32 %v8729_v18, %v663_v38 }
  0xef   : > { %v943_v54 = vmax.f32 %v927_v46, 0.0  ;;  %v450_v61 = vmax.f32 %v434_v49, 0.0 }
  0xf0   : > { %v880_v35 = vpop.f32.mrf.mxu2  ;;  %v388_v41 = vpop.f32.mrf.mxu0  ;;  %v1190_v55 = vmax.f32 %v1174_v47, 0.0  ;;  %v697_v62 = vmax.f32 %v681_v50, 0.0 }
  0xf1   : > { %v1127_v36 = vpop.f32.mrf.mxu3  ;;  %v881_v39 = vadd.f32 %v8736_v21, %v880_v35  ;;  %v635_v42 = vpop.f32.mrf.mxu1  ;;  %v389_v43 = vadd.f32 %v8701_v8, %v388_v41  ;;  %959 = vst [vmem:[#allocation2 + $0x140] sm:$0xff] %v943_v54 }
  0xf2   : > { %v1128_v40 = vadd.f32 %v8741_v22, %v1127_v36  ;;  %v636_v51 = vadd.f32 %v8706_v9, %v635_v42  ;;  %1206 = vst [vmem:[#allocation2 + $0x1c0] sm:$0xff] %v1190_v55 }
  0xf3   : > { %v910_v44 = vmul.f32 %v8748_v25, %v881_v39  ;;  %v417_v48 = vmul.f32 %v8711_v10, %v389_v43  ;;  %466 = vst [vmem:[#allocation2 + $0x48] sm:$0xff] %v450_v61 }
  0xf4   : > { %v1157_v45 = vmul.f32 %v8753_v26, %v1128_v40  ;;  %v664_v63 = vmul.f32 %v8716_v11, %v636_v51  ;;  %713 = vst [vmem:[#allocation2 + $0xc8] sm:$0xff] %v697_v62 }
  0xf5   : > { %v928_v52 = vadd.f32 %v8759_v32, %v910_v44  ;;  %v435_v56 = vadd.f32 %v8723_v16, %v417_v48 }
  0xf6   : > { %v1175_v53 = vadd.f32 %v8765_v34, %v1157_v45  ;;  %v682_v17 = vadd.f32 %v8729_v18, %v664_v63 }
  0xf7   : > { %v944_v2 = vmax.f32 %v928_v52, 0.0  ;;  %v451_v13 = vmax.f32 %v435_v56, 0.0  ;;  %v8199_v52 = vld [vmem:[%s11127_s3 + $0x60] sm:$0xff] }
  0xf8   : > { %v882_v57 = vpop.f32.mrf.mxu2  ;;  %v391_v0 = vpop.f32.mrf.mxu0  ;;  %v1191_v6 = vmax.f32 %v1175_v53, 0.0  ;;  %v698_v35 = vmax.f32 %v682_v17, 0.0  ;;  %v8207_v53 = vld [vmem:[%s11127_s3 + $0xa0] sm:$0xff]  ;;  %2958 = vmatpush.bf16.msrb.mxu2 %v8199_v52 }
  0xf9   : > { %v1129_v58 = vpop.f32.mrf.mxu3  ;;  %v638_v1 = vpop.f32.mrf.mxu1  ;;  %v883_v3 = vadd.f32 %v8736_v21, %v882_v57  ;;  %v392_v7 = vadd.f32 %v8701_v8, %v391_v0  ;;  %960 = vst [vmem:[#allocation2 + $0x148] sm:$0xff] %v944_v2  ;;  %v8191_v57 = vld [vmem:[%s11127_s3 + $0x20] sm:$0xff]  ;;  %2991 = vmatpush.bf16.msrb.mxu3 %v8207_v53 }
  0xfa   : > { %v1130_v4 = vadd.f32 %v8741_v22, %v1129_v58  ;;  %v639_v12 = vadd.f32 %v8706_v9, %v638_v1  ;;  %1207 = vst [vmem:[#allocation2 + $0x1c8] sm:$0xff] %v1191_v6  ;;  %2925 = vmatpush.bf16.msrb.mxu1 %v8191_v57  ;;  %v1364_v52 = vld [vmem:[#allocation2 + $0x7] ss:$8 sm:$0xf0] }
  0xfb   : > { %v911_v14 = vmul.f32 %v8748_v25, %v883_v3  ;;  %v418_v19 = vmul.f32 %v8711_v10, %v392_v7  ;;  %467 = vst [vmem:[#allocation2 + $0x50] sm:$0xff] %v451_v13  ;;  %v8495_v7 = vmov 0.0   ;;  %v1329_v57 = vld [vmem:[#allocation2 + $0x6] ss:$8 sm:$0xf] }
  0xfc   : > { %v1158_v15 = vmul.f32 %v8753_v26, %v1130_v4  ;;  %v665_v20 = vmul.f32 %v8716_v11, %v639_v12  ;;  %714 = vst [vmem:[#allocation2 + $0xd0] sm:$0xff] %v698_v35 }
  0xfd   : > { %v929_v23 = vadd.f32 %v8759_v32, %v911_v14  ;;  %v436_v38 = vadd.f32 %v8723_v16, %v418_v19  ;;  %1663 = vst [vmem:[#allocation3] sm:$0xff] %v8495_v7 }
  0xfe   : > { %v1176_v28 = vadd.f32 %v8765_v34, %v1158_v15  ;;  %v683_v39 = vadd.f32 %v8729_v18, %v665_v20  ;;  %1672 = vst [vmem:[#allocation3 + $0x48] sm:$0xff] %v8495_v7 }
  0xff   : > { %v945_v42 = vmax.f32 %v929_v23, 0.0  ;;  %v452_v49 = vmax.f32 %v436_v38, 0.0 }
 0x100   : > { %v885_v24 = vpop.f32.mrf.mxu2  ;;  %v393_v31 = vpop.f32.mrf.mxu0  ;;  %v1192_v45 = vmax.f32 %v1176_v28, 0.0  ;;  %v699_v50 = vmax.f32 %v683_v39, 0.0 }
 0x101   : > { %v1132_v27 = vpop.f32.mrf.mxu3  ;;  %v886_v29 = vadd.f32 %v8736_v21, %v885_v24  ;;  %v640_v33 = vpop.f32.mrf.mxu1  ;;  %v394_v36 = vadd.f32 %v8701_v8, %v393_v31  ;;  %961 = vst [vmem:[#allocation2 + $0x150] sm:$0xff] %v945_v42 }
 0x102   : > { %v1133_v30 = vadd.f32 %v8741_v22, %v1132_v27  ;;  %v641_v37 = vadd.f32 %v8706_v9, %v640_v33  ;;  %1208 = vst [vmem:[#allocation2 + $0x1d0] sm:$0xff] %v1192_v45 }
 0x103   : > { %v912_v40 = vmul.f32 %v8748_v25, %v886_v29  ;;  %v419_v43 = vmul.f32 %v8711_v10, %v394_v36  ;;  %468 = vst [vmem:[#allocation2 + $0x58] sm:$0xff] %v452_v49 }
 0x104   : > { %v1159_v41 = vmul.f32 %v8753_v26, %v1133_v30  ;;  %v666_v44 = vmul.f32 %v8716_v11, %v641_v37  ;;  %715 = vst [vmem:[#allocation2 + $0xd8] sm:$0xff] %v699_v50 }
 0x105   : > { %v930_v46 = vadd.f32 %v8759_v32, %v912_v40  ;;  %v437_v48 = vadd.f32 %v8723_v16, %v419_v43 }
 0x106   : > { %v1177_v47 = vadd.f32 %v8765_v34, %v1159_v41  ;;  %v684_v51 = vadd.f32 %v8729_v18, %v666_v44 }
 0x107   : > { %v946_v54 = vmax.f32 %v930_v46, 0.0  ;;  %v453_v61 = vmax.f32 %v437_v48, 0.0  ;;  %v1330_v48 = vld [vmem:[#allocation2 + $0x6] ss:$8 sm:$0xf0] }
 0x108   : > { %v887_v55 = vpop.f32.mrf.mxu2  ;;  %v1193_v58 = vmax.f32 %v1177_v47, 0.0  ;;  %v396_v59 = vpop.f32.mrf.mxu0  ;;  %v700_v62 = vmax.f32 %v684_v51, 0.0  ;;  %v8198_v51 = vld [vmem:[%s11127_s3 + $0x58] sm:$0xff] }
 0x109   : > { %v1134_v56 = vpop.f32.mrf.mxu3  ;;  %v643_v60 = vpop.f32.mrf.mxu1  ;;  %v888_v63 = vadd.f32 %v8736_v21, %v887_v55  ;;  %962 = vst [vmem:[#allocation2 + $0x158] sm:$0xff] %v946_v54  ;;  %v397_v1 = vadd.f32 %v8701_v8, %v396_v59  ;;  %2959 = vmatpush.bf16.msrb.mxu2 %v8198_v51  ;;  %v1492_v51 = vld [vmem:[#allocation2 + $0xa] ss:$8 sm:$0xf] }
 0x10a   : > { %v1135_v0 = vadd.f32 %v8741_v22, %v1134_v56  ;;  %1209 = vst [vmem:[#allocation2 + $0x1d8] sm:$0xff] %v1193_v58  ;;  %v644_v2 = vadd.f32 %v8706_v9, %v643_v60  ;;  %v8206_v56 = vld [vmem:[%s11127_s3 + $0x98] sm:$0xff] }
 0x10b   : > { %469 = vst [vmem:[#allocation2 + $0x60] sm:$0xff] %v453_v61  ;;  %v913_v3 = vmul.f32 %v8748_v25, %v888_v63  ;;  %v420_v12 = vmul.f32 %v8711_v10, %v397_v1  ;;  %v1363_v60 = vld [vmem:[#allocation2 + $0x7] ss:$8 sm:$0xf]  ;;  %2992 = vmatpush.bf16.msrb.mxu3 %v8206_v56 }
 0x10c   : > { %716 = vst [vmem:[#allocation2 + $0xe0] sm:$0xff] %v700_v62  ;;  %v1160_v4 = vmul.f32 %v8753_v26, %v1135_v0  ;;  %v667_v19 = vmul.f32 %v8716_v11, %v644_v2  ;;  %v1407_v61 = vld [vmem:[#allocation2 + $0x8] ss:$8 sm:$0xf0]  ;;  %v1331_v0 = vor.u32 %v1330_v48, %v1329_v57  ;;  %v1365_v1 = vor.u32 %v1364_v52, %v1363_v60 }
 0x10d   : > { %v931_v23 = vadd.f32 %v8759_v32, %v913_v3  ;;  %v438_v29 = vadd.f32 %v8723_v16, %v420_v12  ;;  %v1406_v2 = vld [vmem:[#allocation2 + $0x8] ss:$8 sm:$0xf]  ;;  %v1535_v56 = vld [vmem:[#allocation2 + $0xb] ss:$8 sm:$0xf] }
 0x10e   : > { %v1178_v27 = vadd.f32 %v8765_v34, %v1160_v4  ;;  %v685_v31 = vadd.f32 %v8729_v18, %v667_v19  ;;  %v1408_v12 = vor.u32 %v1407_v61, %v1406_v2  ;;  %v8992_v57 = vld [vmem:[#allocation2 + $0xc] ss:$8 sm:$0xf0]  ;;  %v8998_v60 = vld [vmem:[#allocation2 + $0x88] ss:$8 sm:$0xf0] }
 0x10f   : > { %v947_v33 = vmax.f32 %v931_v23, 0.0  ;;  %v454_v41 = vmax.f32 %v438_v29, 0.0  ;;  %v9000_v61 = vld [vmem:[#allocation2 + $0x89] ss:$8 sm:$0xf0] }
 0x110   : > { %v890_v5 = vpop.f32.mrf.mxu2  ;;  %v398_v15 = vpop.f32.mrf.mxu0  ;;  %v1194_v36 = vmax.f32 %v1178_v27, 0.0  ;;  %v701_v46 = vmax.f32 %v685_v31, 0.0  ;;  %v1450_v31 = vld [vmem:[#allocation2 + $0x9] ss:$8 sm:$0xf0] }
 0x111   : > { %v1137_v6 = vpop.f32.mrf.mxu3  ;;  %v891_v13 = vadd.f32 %v8736_v21, %v890_v5  ;;  %v645_v17 = vpop.f32.mrf.mxu1  ;;  %v399_v20 = vadd.f32 %v8701_v8, %v398_v15  ;;  %963 = vst [vmem:[#allocation2 + $0x160] sm:$0xff] %v947_v33  ;;  %v9009_v2 = vld [vmem:[#allocation2 + $0x8b] ss:$8 sm:$0xf0] }
 0x112   : > { %v1138_v14 = vadd.f32 %v8741_v22, %v1137_v6  ;;  %v646_v38 = vadd.f32 %v8706_v9, %v645_v17  ;;  %1210 = vst [vmem:[#allocation2 + $0x1e0] sm:$0xff] %v1194_v36 }
 0x113   : > { %v914_v24 = vmul.f32 %v8748_v25, %v891_v13  ;;  %v421_v30 = vmul.f32 %v8711_v10, %v399_v20  ;;  %470 = vst [vmem:[#allocation2 + $0x68] sm:$0xff] %v454_v41 }
 0x114   : > { %v1161_v28 = vmul.f32 %v8753_v26, %v1138_v14  ;;  %v668_v54 = vmul.f32 %v8716_v11, %v646_v38  ;;  %717 = vst [vmem:[#allocation2 + $0xe8] sm:$0xff] %v701_v46 }
 0x115   : > { %v932_v35 = vadd.f32 %v8759_v32, %v914_v24  ;;  %v439_v42 = vadd.f32 %v8723_v16, %v421_v30  ;;  %v1396_v30 = vmax.f32 %v1331_v0, %v1365_v1  ;;  %v9007_v0 = vld [vmem:[%s11126_s2] ss:$0 sm:$0xff] }
 0x116   : > { %v1179_v37 = vadd.f32 %v8765_v34, %v1161_v28  ;;  %v686_v3 = vadd.f32 %v8729_v18, %v668_v54  ;;  %v1536_v54 = vld [vmem:[#allocation2 + $0xb] ss:$8 sm:$0xf0] }
 0x117   : > { %v948_v49 = vmax.f32 %v932_v35, 0.0  ;;  %v455_v58 = vmax.f32 %v439_v42, 0.0 }
 0x118   : > { %v892_v39 = vpop.f32.mrf.mxu2  ;;  %v401_v44 = vpop.f32.mrf.mxu0  ;;  %v1195_v53 = vmax.f32 %v1179_v37, 0.0  ;;  %v702_v33 = vmax.f32 %v686_v3, 0.0  ;;  %v9013_v3 = vld [vmem:[#allocation2 + $0xd] ss:$8 sm:$0xf] }
 0x119   : > { %v1139_v40 = vpop.f32.mrf.mxu3  ;;  %v893_v43 = vadd.f32 %v8736_v21, %v892_v39  ;;  %v648_v45 = vpop.f32.mrf.mxu1  ;;  %v402_v50 = vadd.f32 %v8701_v8, %v401_v44  ;;  %964 = vst [vmem:[#allocation2 + $0x168] sm:$0xff] %v948_v49  ;;  %v1439_v39 = vmax.f32 %v1396_v30, %v1408_v12  ;;  %v1537_v12 = vor.u32 %v1536_v54, %v1535_v56  ;;  %v1333_v30 = vld [vmem:[#allocation2 + $0x46] ss:$8 sm:$0xf] }
 0x11a   : > { %v1140_v47 = vadd.f32 %v8741_v22, %v1139_v40  ;;  %v649_v55 = vadd.f32 %v8706_v9, %v648_v45  ;;  %1211 = vst [vmem:[#allocation2 + $0x1e8] sm:$0xff] %v1195_v53  ;;  %v1493_v45 = vld [vmem:[#allocation2 + $0xa] ss:$8 sm:$0xf0] }
 0x11b   : > { %v915_v59 = vmul.f32 %v8748_v25, %v893_v43  ;;  %v422_v63 = vmul.f32 %v8711_v10, %v402_v50  ;;  %471 = vst [vmem:[#allocation2 + $0x70] sm:$0xff] %v455_v58  ;;  %v1494_v53 = vor.u32 %v1493_v45, %v1492_v51  ;;  %v1341_v51 = vld [vmem:[#allocation2 + $0xc6] ss:$8 sm:$0xf] }
 0x11c   : > { %v1162_v62 = vmul.f32 %v8753_v26, %v1140_v47  ;;  %v669_v4 = vmul.f32 %v8716_v11, %v649_v55  ;;  %718 = vst [vmem:[#allocation2 + $0xf0] sm:$0xff] %v702_v33 }
 0x11d   : > { %v933_v13 = vadd.f32 %v8759_v32, %v915_v59  ;;  %v440_v27 = vadd.f32 %v8723_v16, %v422_v63  ;;  %v8996_v59 = vld [vmem:[#allocation2 + $0xd] ss:$8 sm:$0xf0] }
 0x11e   : > { %v1180_v20 = vadd.f32 %v8765_v34, %v1162_v62  ;;  %v687_v35 = vadd.f32 %v8729_v18, %v669_v4  ;;  %v9002_v62 = vld [vmem:[#allocation2 + $0x8a] ss:$8 sm:$0xf0]  ;;  %v9015_v4 = vld [vmem:[#allocation2 + $0x88] ss:$8 sm:$0xf] }
 0x11f   : > { %v949_v37 = vmax.f32 %v933_v13, 0.0  ;;  %v456_v43 = vmax.f32 %v440_v27, 0.0  ;;  %v9021_v13 = vld [vmem:[#allocation2 + $0x8d] ss:$8 sm:$0xf0] }
 0x120   : > { %v895_v5 = vpop.f32.mrf.mxu2  ;;  %v403_v17 = vpop.f32.mrf.mxu0  ;;  %v1196_v40 = vmax.f32 %v1180_v20, 0.0  ;;  %v703_v46 = vmax.f32 %v687_v35, 0.0  ;;  %v9031_v20 = vld [vmem:[#allocation2 + $0x109] ss:$8 sm:$0xf0] }
 0x121   : > { %v1142_v6 = vpop.f32.mrf.mxu3  ;;  %v896_v14 = vadd.f32 %v8736_v21, %v895_v5  ;;  %v650_v19 = vpop.f32.mrf.mxu1  ;;  %v404_v23 = vadd.f32 %v8701_v8, %v403_v17  ;;  %965 = vst [vmem:[#allocation2 + $0x170] sm:$0xff] %v949_v37  ;;  %v9017_v5 = vld [vmem:[#allocation2 + $0x89] ss:$8 sm:$0xf]  ;;  %v1623_v37 = vor.u32 %v8996_v59, %v9013_v3 }
 0x122   : > { %v1143_v15 = vadd.f32 %v8741_v22, %v1142_v6  ;;  %v651_v24 = vadd.f32 %v8706_v9, %v650_v19  ;;  %v1449_v9 = vld [vmem:[#allocation2 + $0x9] ss:$8 sm:$0xf]  ;;  %1212 = vst [vmem:[#allocation2 + $0x1f0] sm:$0xff] %v1196_v40 }
 0x123   : > { %v916_v28 = vmul.f32 %v8748_v25, %v896_v14  ;;  %v423_v36 = vmul.f32 %v8711_v10, %v404_v23  ;;  %v1451_v42 = vor.u32 %v1450_v31, %v1449_v9  ;;  %472 = vst [vmem:[#allocation2 + $0x78] sm:$0xff] %v456_v43  ;;  %v9019_v6 = vld [vmem:[#allocation2 + $0x8a] ss:$8 sm:$0xf]  ;;  %v9045_v35 = vld [vmem:[%s11126_s2 + $0x1] ss:$0 sm:$0xff] }
 0x124   : > { %v1163_v29 = vmul.f32 %v8753_v26, %v1143_v15  ;;  %v670_v8 = vmul.f32 %v8716_v11, %v651_v24  ;;  %719 = vst [vmem:[#allocation2 + $0xf8] sm:$0xff] %v703_v46  ;;  %v9023_v14 = vld [vmem:[#allocation2 + $0x8b] ss:$8 sm:$0xf] }
 0x125   : > { %v934_v38 = vadd.f32 %v8759_v32, %v916_v28  ;;  %v441_v44 = vadd.f32 %v8723_v16, %v423_v36  ;;  %v1482_v11 = vmax.f32 %v1439_v39, %v1451_v42  ;;  %v8190_v16 = vld [vmem:[%s11127_s3 + $0x18] sm:$0xff] }
 0x126   : > { %v1181_v41 = vadd.f32 %v8765_v34, %v1163_v29  ;;  %v688_v48 = vadd.f32 %v8729_v18, %v670_v8  ;;  %2926 = vmatpush.bf16.msrb.mxu1 %v8190_v16  ;;  %v9025_v15 = vld [vmem:[#allocation2 + $0x8c] ss:$8 sm:$0xf]  ;;  %v9027_v17 = vld [vmem:[#allocation2 + $0x8d] ss:$8 sm:$0xf] }
 0x127   : > { %v950_v10 = vmax.f32 %v934_v38, 0.0  ;;  %v457_v55 = vmax.f32 %v441_v44, 0.0  ;;  %v1525_v1 = vmax.f32 %v1482_v11, %v1494_v53  ;;  %v9029_v19 = vld [vmem:[#allocation2 + $0x108] ss:$8 sm:$0xf0]  ;;  %v1416_v38 = vor.u32 %v8998_v60, %v9015_v4 }
 0x128   : > { %v897_v47 = vpop.f32.mrf.mxu2  ;;  %v1303_v50 = vpop.f32.mrf.mxu0  ;;  %v1197_v52 = vmax.f32 %v1181_v41, 0.0  ;;  %v704_v63 = vmax.f32 %v688_v48, 0.0  ;;  %v9037_v28 = vld [vmem:[#allocation2 + $0x10a] ss:$8 sm:$0xf0] }
 0x129   : > { %v1144_v49 = vpop.f32.mrf.mxu3  ;;  %v898_v18 = vadd.f32 %v8736_v21, %v897_v47  ;;  %966 = vst [vmem:[#allocation2 + $0x178] sm:$0xff] %v950_v10  ;;  %v1578_v21 = vld [vmem:[#allocation2 + $0xc] ss:$8 sm:$0xf]  ;;  %v1304_v33 = vadd.f32 %v9007_v0, %v1303_v50 }
 0x12a   : > { %v1145_v58 = vadd.f32 %v8741_v22, %v1144_v49  ;;  %v9011_v22 = vld [vmem:[#allocation2 + $0x8c] ss:$8 sm:$0xf0]  ;;  %1213 = vst [vmem:[#allocation2 + $0x1f8] sm:$0xff] %v1197_v52  ;;  %v1580_v27 = vor.u32 %v8992_v57, %v1578_v21 }
 0x12b   : > { %473 = vst [vmem:[#allocation2 + $0x80] sm:$0xff] %v457_v55  ;;  %v917_v23 = vmul.f32 %v8748_v25, %v898_v18  ;;  %v9039_v29 = vld [vmem:[#allocation2 + $0x10b] ss:$8 sm:$0xf0]  ;;  %v1568_v25 = vmax.f32 %v1525_v1, %v1537_v12  ;;  %v1314_v59 = vmul.f32 %v9045_v35, %v1304_v33 }
 0x12c   : > { %v1164_v24 = vmul.f32 %v8753_v26, %v1145_v58  ;;  %v1367_v31 = vld [vmem:[#allocation2 + $0x47] ss:$8 sm:$0xf]  ;;  %720 = vst [vmem:[#allocation2 + $0x100] sm:$0xff] %v704_v63  ;;  %v9090_v63 = vld [vmem:[%s11126_s2 + $0x2] ss:$0 sm:$0xff] }
 0x12d   : > { %v9047_v36 = vld [vmem:[#allocation2 + $0x108] ss:$8 sm:$0xf]  ;;  %v9049_v26 = vld [vmem:[#allocation2 + $0x109] ss:$8 sm:$0xf]  ;;  %v9075_v55 = vadd.f32 %v8759_v32, %v917_v23  ;;  %v1611_v32 = vmax.f32 %v1568_v25, %v1580_v27 }
 0x12e   : > { %v9059_v9 = vld [vmem:[#allocation2 + $0x10c] ss:$8 sm:$0xf0]  ;;  %v1334_v40 = vld [vmem:[#allocation2 + $0x46] ss:$8 sm:$0xf0]  ;;  %v9078_v16 = vadd.f32 %v8765_v34, %v1164_v24 }
 0x12f   : > { %v1368_v41 = vld [vmem:[#allocation2 + $0x47] ss:$8 sm:$0xf0]  ;;  %v9061_v42 = vld [vmem:[#allocation2 + $0x10a] ss:$8 sm:$0xf]  ;;  %v1335_v53 = vor.u32 %v1334_v40, %v1333_v30 }
 0x130   : > { %v1305_v7 = vpop.f32.mrf.mxu0  ;;  %v9063_v43 = vld [vmem:[#allocation2 + $0x10b] ss:$8 sm:$0xf]  ;;  %v1342_v47 = vld [vmem:[#allocation2 + $0xc6] ss:$8 sm:$0xf0]  ;;  %v1369_v54 = vor.u32 %v1368_v41, %v1367_v31 }
 0x131   : > { %v1376_v10 = vld [vmem:[#allocation2 + $0xc7] ss:$8 sm:$0xf0]  ;;  %v1306_v48 = vadd.f32 %v9007_v0, %v1305_v7  ;;  %v9072_v49 = vld [vmem:[#allocation2 + $0x10c] ss:$8 sm:$0xf]  ;;  %v1343_v3 = vor.u32 %v1342_v47, %v1341_v51 }
 0x132   : > { %11131 = vst [vmem:[#allocation5_spill] sm:$0xff] %v9072_v49  ;;  %v1338_v50 = vld [vmem:[#allocation2 + $0x86] ss:$8 sm:$0xf0]  ;;  %v1397_v34 = vmax.f32 %v1335_v53, %v1369_v54  ;;  %v951_v47 = vmax.f32 %v9075_v55, 0.0  ;;  %v1654_v53 = vmax.f32 %v1611_v32, %v1623_v37 }
 0x133   : > { %v1372_v11 = vld [vmem:[#allocation2 + $0x87] ss:$8 sm:$0xf0]  ;;  %v1410_v18 = vld [vmem:[#allocation2 + $0x48] ss:$8 sm:$0xf]  ;;  %v1315_v25 = vmul.f32 %v9045_v35, %v1306_v48  ;;  %v9108_v48 = vadd.f32 %v9090_v63, %v1314_v59 }
 0x134   : > { %v1375_v52 = vld [vmem:[#allocation2 + $0xc7] ss:$8 sm:$0xf]  ;;  %v9084_v58 = vld [vmem:[#allocation2 + $0x146] ss:$8 sm:$0xf0] }
 0x135   : > { %v9096_v21 = vld [vmem:[#allocation2 + $0x146] ss:$8 sm:$0xf]  ;;  %v1377_v12 = vor.u32 %v1376_v10, %v1375_v52  ;;  %v1371_v24 = vld [vmem:[#allocation2 + $0x87] ss:$8 sm:$0xf]  ;;  %v1320_v37 = vadd.f32 %v9090_v63, %v1315_v25 }
 0x136   : > { %v1337_v23 = vld [vmem:[#allocation2 + $0x86] ss:$8 sm:$0xf]  ;;  %v1453_v31 = vld [vmem:[#allocation2 + $0x49] ss:$8 sm:$0xf]  ;;  %v1373_v7 = vor.u32 %v1372_v11, %v1371_v24 }
 0x137   : > { %v1339_v33 = vor.u32 %v1338_v50, %v1337_v23  ;;  %v1411_v40 = vld [vmem:[#allocation2 + $0x48] ss:$8 sm:$0xf0]  ;;  %v1454_v27 = vld [vmem:[#allocation2 + $0x49] ss:$8 sm:$0xf0]  ;;  %v1399_v55 = vmax.f32 %v1343_v3, %v1377_v12 }
 0x138   : > { %v1346_v41 = vld [vmem:[#allocation2 + $0x106] ss:$8 sm:$0xf0]  ;;  %v1380_v46 = vld [vmem:[#allocation2 + $0x107] ss:$8 sm:$0xf0]  ;;  %v1412_v1 = vor.u32 %v1411_v40, %v1410_v18  ;;  %v1308_v24 = vpop.f32.mrf.mxu0 }
 0x139   : > { %v1497_v45 = vld [vmem:[#allocation2 + $0x4a] ss:$8 sm:$0xf0]  ;;  %v1198_v10 = vmax.f32 %v9078_v16, 0.0  ;;  %v1398_v50 = vmax.f32 %v1339_v33, %v1373_v7  ;;  %v1455_v16 = vor.u32 %v1454_v27, %v1453_v31  ;;  %v1309_v56 = vadd.f32 %v9007_v0, %v1308_v24  ;;  %967 = vst [vmem:[#allocation2 + $0x180] sm:$0xff] %v951_v47 }
 0x13a   : > { %v1496_v51 = vld [vmem:[#allocation2 + $0x4a] ss:$8 sm:$0xf]  ;;  %v1418_v52 = vld [vmem:[#allocation2 + $0xc8] ss:$8 sm:$0xf]  ;;  %v1440_v40 = vmax.f32 %v1397_v34, %v1412_v1  ;;  %v11132_v0 = vor.u32 %v9000_v61, %v9017_v5 }
 0x13b   : > { %v1540_v11 = vld [vmem:[#allocation2 + $0x4b] ss:$8 sm:$0xf0]  ;;  %v9105_v23 = vld [vmem:[#allocation2 + $0x4c] ss:$8 sm:$0xf0]  ;;  %v1441_v33 = vmax.f32 %v1398_v50, %v1416_v38  ;;  %v1498_v3 = vor.u32 %v1497_v45, %v1496_v51  ;;  %v1316_v12 = vmul.f32 %v9045_v35, %v1309_v56 }
 0x13c   : > { %v1539_v54 = vld [vmem:[#allocation2 + $0x4b] ss:$8 sm:$0xf]  ;;  %v9110_v18 = vld [vmem:[#allocation2 + $0x4c] ss:$8 sm:$0xf]  ;;  %v1483_v49 = vmax.f32 %v1440_v40, %v1455_v16  ;;  %v11136_v40 = vor.u32 %v9031_v20, %v9049_v26 }
 0x13d   : > { %v1345_v57 = vld [vmem:[#allocation2 + $0x106] ss:$8 sm:$0xf]  ;;  %v1379_v44 = vld [vmem:[#allocation2 + $0x107] ss:$8 sm:$0xf]  ;;  %v1484_v31 = vmax.f32 %v1441_v33, %v11132_v0  ;;  %v1541_v27 = vor.u32 %v1540_v11, %v1539_v54  ;;  %v1584_v60 = vor.u32 %v9105_v23, %v9110_v18  ;;  %v11135_v54 = vor.u32 %v9009_v2, %v9023_v14 }
 0x13e   : > { %v1461_v30 = vld [vmem:[#allocation2 + $0xc9] ss:$8 sm:$0xf]  ;;  %v1347_v7 = vor.u32 %v1346_v41, %v1345_v57  ;;  %v1381_v59 = vor.u32 %v1380_v46, %v1379_v44  ;;  %v1419_v39 = vld [vmem:[#allocation2 + $0xc8] ss:$8 sm:$0xf0]  ;;  %v1526_v25 = vmax.f32 %v1483_v49, %v1498_v3  ;;  %v11133_v49 = vor.u32 %v9002_v62, %v9019_v6 }
 0x13f   : > { %v1462_v8 = vld [vmem:[#allocation2 + $0xc9] ss:$8 sm:$0xf0]  ;;  %v1504_v32 = vld [vmem:[#allocation2 + $0xca] ss:$8 sm:$0xf]  ;;  %v1420_v34 = vor.u32 %v1419_v39, %v1418_v52 }
 0x140   : > { %v1505_v1 = vld [vmem:[#allocation2 + $0xca] ss:$8 sm:$0xf0]  ;;  %v1626_v4 = vld [vmem:[#allocation2 + $0x4d] ss:$8 sm:$0xf0]  ;;  %v1400_v38 = vmax.f32 %v1347_v7, %v1381_v59  ;;  %v1463_v39 = vor.u32 %v1462_v8, %v1461_v30  ;;  %v1527_v51 = vmax.f32 %v1484_v31, %v11133_v49  ;;  %v11134_v8 = vor.u32 %v9029_v19, %v9047_v36  ;;  %v1310_v7 = vpop.f32.mrf.mxu0 }
 0x141   : > { %v1548_v44 = vld [vmem:[#allocation2 + $0xcb] ss:$8 sm:$0xf0]  ;;  %v1625_v46 = vld [vmem:[#allocation2 + $0x4d] ss:$8 sm:$0xf]  ;;  %v1442_v45 = vmax.f32 %v1399_v55, %v1420_v34  ;;  %v1506_v41 = vor.u32 %v1505_v1, %v1504_v32  ;;  %v1569_v62 = vmax.f32 %v1526_v25, %v1541_v27  ;;  %v1321_v19 = vadd.f32 %v9090_v63, %v1316_v12 }
 0x142   : > { %v9123_v57 = vld [vmem:[#allocation2 + $0x147] ss:$8 sm:$0xf0]  ;;  %v1547_v56 = vld [vmem:[#allocation2 + $0xcb] ss:$8 sm:$0xf]  ;;  %v1443_v30 = vmax.f32 %v1400_v38, %v11134_v8  ;;  %v1570_v18 = vmax.f32 %v1527_v51, %v11135_v54  ;;  %v1627_v55 = vor.u32 %v1626_v4, %v1625_v46  ;;  %v11137_v27 = vor.u32 %v9011_v22, %v9025_v15 }
 0x143   : > { %v8197_v61 = vld [vmem:[%s11127_s3 + $0x50] sm:$0xff]  ;;  %1214 = vst [vmem:[#allocation2 + $0x200] sm:$0xff] %v1198_v10  ;;  %v1322_v47 = vmax.f32 %v9108_v48, 0.0  ;;  %v1323_v52 = vmax.f32 %v1320_v37, 0.0  ;;  %v8218_v50 = vld [vmem:[%s11127_s3 + $0xf8] sm:$0xff]  ;;  %v1485_v6 = vmax.f32 %v1442_v45, %v1463_v39  ;;  %v8196_v36 = vld [vmem:[%s11127_s3 + $0x48] sm:$0xff]  ;;  %v1612_v20 = vmax.f32 %v1569_v62, %v1584_v60 }
 0x144   : > { %v8205_v5 = vld [vmem:[%s11127_s3 + $0x90] sm:$0xff]  ;;  %2960 = vmatpush.bf16.msrb.mxu2 %v8197_v61  ;;  %1673 = vst [vmem:[#allocation3 + $0x8] sm:$0xff] %v1654_v53  ;;  %v8204_v10 = vld [vmem:[%s11127_s3 + $0x88] sm:$0xff]  ;;  %v1486_v16 = vmax.f32 %v1443_v30, %v11136_v40  ;;  %3021 = vmatpush.bf16.msra.mxu0 %v8218_v50  ;;  %v1549_v37 = vor.u32 %v1548_v44, %v1547_v56  ;;  %v1324_v32 = vmax.f32 %v1321_v19, 0.0  ;;  %v8195_v22 = vld [vmem:[%s11127_s3 + $0x40] sm:$0xff] }
 0x145   : > { %v8189_v35 = vld [vmem:[%s11127_s3 + $0x10] sm:$0xff]  ;;  %2993 = vmatpush.bf16.msrb.mxu3 %v8205_v5  ;;  %1325 = vst [vmem:[#allocation2 + $0x208] sm:$0xff] %v1322_v47  ;;  %v8188_v53 = vld [vmem:[%s11127_s3 + $0x8] sm:$0xff]  ;;  %v1528_v26 = vmax.f32 %v1485_v6, %v1506_v41  ;;  %v1613_v4 = vmax.f32 %v1570_v18, %v11137_v27  ;;  %v11138_v60 = vor.u32 %v9037_v28, %v9061_v42  ;;  %v8203_v15 = vld [vmem:[%s11127_s3 + $0x80] sm:$0xff] }
 0x146   : > { %v9144_v11 = vld [vmem:[#allocation2 + $0x147] ss:$8 sm:$0xf]  ;;  %v9146_v23 = vld [vmem:[#allocation2 + $0x1c6] ss:$8 sm:$0xf]  ;;  %2927 = vmatpush.bf16.msrb.mxu1 %v8189_v35  ;;  %v1655_v45 = vmax.f32 %v1612_v20, %v1627_v55  ;;  %v11139_v5 = vor.u32 %v9021_v13, %v9027_v17  ;;  %v11140_v56 = vor.u32 %v9039_v29, %v9063_v43 }
 0x147   : > { %v9148_v24 = vld [vmem:[#allocation2 + $0x1c6] ss:$8 sm:$0xf0]  ;;  %v1590_v48 = vld [vmem:[#allocation2 + $0xcc] ss:$8 sm:$0xf]  ;;  %v1385_v0 = vor.u32 %v9123_v57, %v9144_v11  ;;  %v1529_v38 = vmax.f32 %v1486_v16, %v11138_v60  ;;  %v1571_v39 = vmax.f32 %v1528_v26, %v1549_v37 }
 0x148   : > { %v1591_v63 = vld [vmem:[#allocation2 + $0xcc] ss:$8 sm:$0xf0]  ;;  %v9169_v2 = vld [vmem:[#allocation2 + $0x10d] ss:$8 sm:$0xf0]  ;;  %v1359_v31 = vor.u32 %v9148_v24, %v9146_v23  ;;  %2961 = vmatpush.bf16.msrb.mxu2 %v8196_v36  ;;  %v1656_v35 = vmax.f32 %v1613_v4, %v11139_v5  ;;  %v11141_v36 = vor.u32 %v9084_v58, %v9096_v21 }
 0x149   : > { %v8217_v33 = vld [vmem:[%s11127_s3 + $0xf0] sm:$0xff]  ;;  %1326 = vst [vmem:[#allocation2 + $0x210] sm:$0xff] %v1323_v52  ;;  %v1592_v41 = vor.u32 %v1591_v63, %v1590_v48  ;;  %2994 = vmatpush.bf16.msrb.mxu3 %v8204_v10  ;;  %v8216_v57 = vld [vmem:[%s11127_s3 + $0xe8] sm:$0xff]  ;;  %v1572_v49 = vmax.f32 %v1529_v38, %v11140_v56  ;;  %v8187_v13 = vld [vmem:[%s11127_s3] sm:$0xff] }
 0x14a   : > { %v9171_v14 = vld [vmem:[#allocation2 + $0x1c7] ss:$8 sm:$0xf]  ;;  %v1354_v3 = vld [vmem:[#allocation2 + $0x186] ss:$8 sm:$0xf0]  ;;  %2928 = vmatpush.bf16.msrb.mxu1 %v8188_v53  ;;  %3022 = vmatpush.bf16.msra.mxu0 %v8217_v33  ;;  %v1401_v10 = vmax.f32 %v11141_v36, %v1385_v0 }
 0x14b   : > { %v9173_v59 = vld [vmem:[#allocation2 + $0x1c7] ss:$8 sm:$0xf0]  ;;  %v9175_v1 = vld [vmem:[#allocation2 + $0x188] ss:$8 sm:$0xf0]  ;;  %v1614_v47 = vmax.f32 %v1571_v39, %v1592_v41 }
 0x14c   : > { %v1388_v34 = vld [vmem:[#allocation2 + $0x187] ss:$8 sm:$0xf0]  ;;  %v1633_v12 = vld [vmem:[#allocation2 + $0xcd] ss:$8 sm:$0xf]  ;;  %v1393_v61 = vor.u32 %v9173_v59, %v9171_v14  ;;  %2962 = vmatpush.bf16.msrb.mxu2 %v8195_v22 }
 0x14d   : > { %v1634_v44 = vld [vmem:[#allocation2 + $0xcd] ss:$8 sm:$0xf0]  ;;  %v1426_v25 = vld [vmem:[#allocation2 + $0x148] ss:$8 sm:$0xf]  ;;  %2995 = vmatpush.bf16.msrb.mxu3 %v8203_v15 }
 0x14e   : > { %v1637_v46 = vld [vmem:[#allocation2 + $0x10d] ss:$8 sm:$0xf]  ;;  %1327 = vst [vmem:[#allocation2 + $0x218] sm:$0x1f] %v1324_v32  ;;  %v1635_v52 = vor.u32 %v1634_v44, %v1633_v12  ;;  %3023 = vmatpush.bf16.msra.mxu0 %v8216_v57  ;;  %v1403_v0 = vmax.f32 %v1359_v31, %v1393_v61  ;;  %2929 = vmatpush.bf16.msrb.mxu1 %v8187_v13 }
 0x14f   : > { %v1430_v28 = vld [vmem:[#allocation2 + $0x188] ss:$8 sm:$0xf]  ;;  %v9196_v42 = vld [vmem:[#allocation2 + $0x189] ss:$8 sm:$0xf0]  ;;  %v1639_v6 = vor.u32 %v9169_v2, %v1637_v46 }
 0x150   : > { %v1353_v51 = vld [vmem:[#allocation2 + $0x186] ss:$8 sm:$0xf]  ;;  %v1387_v8 = vld [vmem:[#allocation2 + $0x187] ss:$8 sm:$0xf]  ;;  %v1432_v16 = vor.u32 %v9175_v1, %v1430_v28  ;;  %v1657_v33 = vmax.f32 %v1614_v47, %v1635_v52 }
 0x151   : > { %v1469_v30 = vld [vmem:[#allocation2 + $0x149] ss:$8 sm:$0xf]  ;;  %1674 = vst [vmem:[#allocation3 + $0x10] sm:$0xff] %v1655_v45  ;;  %v1355_v50 = vor.u32 %v1354_v3, %v1353_v51  ;;  %v1389_v11 = vor.u32 %v1388_v34, %v1387_v8 }
 0x152   : > { %v1427_v62 = vld [vmem:[#allocation2 + $0x148] ss:$8 sm:$0xf0]  ;;  %v1473_v17 = vld [vmem:[#allocation2 + $0x189] ss:$8 sm:$0xf] }
 0x153   : > { %v9210_v29 = vld [vmem:[#allocation2 + $0x18a] ss:$8 sm:$0xf0]  ;;  %v9212_v43 = vld [vmem:[#allocation2 + $0x18b] ss:$8 sm:$0xf0]  ;;  %v1428_v55 = vor.u32 %v1427_v62, %v1426_v25  ;;  %v1402_v7 = vmax.f32 %v1355_v50, %v1389_v11  ;;  %v1475_v34 = vor.u32 %v9196_v42, %v1473_v17 }
 0x154   : > { %v9214_v19 = vld [vmem:[#allocation2 + $0x18c] ss:$8 sm:$0xf0]  ;;  %1675 = vst [vmem:[#allocation3 + $0x18] sm:$0xff] %v1656_v35 }
 0x155   : > { %v11142_v48 = vld [vmem:[#allocation5_spill] sm:$0xff]  ;;  %v8215_v14 = vld [vmem:[%s11127_s3 + $0xe0] sm:$0xff]  ;;  %v1444_v26 = vmax.f32 %v1401_v10, %v1428_v55  ;;  %1676 = vst [vmem:[#allocation3 + $0x20] sm:$0xff] %v1657_v33  ;;  %v1445_v27 = vmax.f32 %v1402_v7, %v1432_v16  ;;  %v8214_v39 = vld [vmem:[%s11127_s3 + $0xd8] sm:$0xff] }
 0x156   : > { %v11143_v54 = vor.u32 %v9059_v9, %v11142_v48  ;;  %v1470_v40 = vld [vmem:[#allocation2 + $0x149] ss:$8 sm:$0xf0]  ;;  %v1512_v63 = vld [vmem:[#allocation2 + $0x14a] ss:$8 sm:$0xf]  ;;  %3024 = vmatpush.bf16.msra.mxu0 %v8215_v14 }
 0x157   : > { %v1434_v53 = vld [vmem:[#allocation2 + $0x1c8] ss:$8 sm:$0xf]  ;;  %v1513_v2 = vld [vmem:[#allocation2 + $0x14a] ss:$8 sm:$0xf0]  ;;  %v1471_v37 = vor.u32 %v1470_v40, %v1469_v30  ;;  %v1488_v22 = vmax.f32 %v1445_v27, %v1475_v34 }
 0x158   : > { %v1615_v18 = vmax.f32 %v1572_v49, %v11143_v54  ;;  %v1516_v58 = vld [vmem:[#allocation2 + $0x18a] ss:$8 sm:$0xf]  ;;  %v1559_v21 = vld [vmem:[#allocation2 + $0x18b] ss:$8 sm:$0xf]  ;;  %v1514_v46 = vor.u32 %v1513_v2, %v1512_v63 }
 0x159   : > { %v9226_v59 = vld [vmem:[#allocation2 + $0x18c] ss:$8 sm:$0xf]  ;;  %v9228_v9 = vld [vmem:[#allocation2 + $0x18d] ss:$8 sm:$0xf0]  ;;  %v1487_v44 = vmax.f32 %v1444_v26, %v1471_v37  ;;  %v1518_v23 = vor.u32 %v9210_v29, %v1516_v58  ;;  %v1561_v24 = vor.u32 %v9212_v43, %v1559_v21 }
 0x15a   : > { %v1658_v20 = vmax.f32 %v1615_v18, %v1639_v6  ;;  %v1556_v32 = vld [vmem:[#allocation2 + $0x14b] ss:$8 sm:$0xf0]  ;;  %v1599_v3 = vld [vmem:[#allocation2 + $0x14c] ss:$8 sm:$0xf0]  ;;  %v1604_v31 = vor.u32 %v9214_v19, %v9226_v59  ;;  %3025 = vmatpush.bf16.msra.mxu0 %v8214_v39 }
 0x15b   : > { %v1555_v1 = vld [vmem:[#allocation2 + $0x14b] ss:$8 sm:$0xf]  ;;  %v1477_v12 = vld [vmem:[#allocation2 + $0x1c9] ss:$8 sm:$0xf]  ;;  %v1530_v5 = vmax.f32 %v1487_v44, %v1514_v46  ;;  %v1531_v52 = vmax.f32 %v1488_v22, %v1518_v23 }
 0x15c   : > { %v1435_v4 = vld [vmem:[#allocation2 + $0x1c8] ss:$8 sm:$0xf0]  ;;  %v9234_v60 = vld [vmem:[#allocation2 + $0x18d] ss:$8 sm:$0xf]  ;;  %v1557_v35 = vor.u32 %v1556_v32, %v1555_v1 }
 0x15d   : > { %v1598_v38 = vld [vmem:[#allocation2 + $0x14c] ss:$8 sm:$0xf]  ;;  %1677 = vst [vmem:[#allocation3 + $0x28] sm:$0xff] %v1658_v20  ;;  %v1436_v25 = vor.u32 %v1435_v4, %v1434_v53  ;;  %v1647_v30 = vor.u32 %v9228_v9, %v9234_v60  ;;  %v1574_v48 = vmax.f32 %v1531_v52, %v1561_v24 }
 0x15e   : > { %v1478_v45 = vld [vmem:[#allocation2 + $0x1c9] ss:$8 sm:$0xf0]  ;;  %v1520_v57 = vld [vmem:[#allocation2 + $0x1ca] ss:$8 sm:$0xf]  ;;  %v1600_v50 = vor.u32 %v1599_v3, %v1598_v38  ;;  %v1573_v6 = vmax.f32 %v1530_v5, %v1557_v35 }
 0x15f   : > { %v1682_v41 = vld [vmem:[#allocation3 + $0x5] sm:$0xff]  ;;  %v1446_v56 = vmax.f32 %v1403_v0, %v1436_v25  ;;  %v1479_v49 = vor.u32 %v1478_v45, %v1477_v12  ;;  %v8213_v7 = vld [vmem:[%s11127_s3 + $0xd0] sm:$0xff]  ;;  %v1617_v2 = vmax.f32 %v1574_v48, %v1604_v31  ;;  %v8234_v34 = vld [vmem:[%s11127_s3 + $0x178] sm:$0xff] }
 0x160   : > { %v1642_v15 = vld [vmem:[#allocation2 + $0x14d] ss:$8 sm:$0xf0]  ;;  %v1521_v28 = vld [vmem:[#allocation2 + $0x1ca] ss:$8 sm:$0xf0]  ;;  %v9245_v13 = vpack.c.bf16 %v1682_v41, %v1682_v41  ;;  %v1616_v40 = vmax.f32 %v1573_v6, %v1600_v50  ;;  %3026 = vmatpush.bf16.msra.mxu0 %v8213_v7  ;;  %3087 = vmatpush.bf16.msra.mxu2 %v8234_v34 }
 0x161   : > { %v1641_v42 = vld [vmem:[#allocation2 + $0x14d] ss:$8 sm:$0xf]  ;;  %v1563_v61 = vld [vmem:[#allocation2 + $0x1cb] ss:$8 sm:$0xf]  ;;  %v1489_v29 = vmax.f32 %v1446_v56, %v1479_v49  ;;  %v1522_v43 = vor.u32 %v1521_v28, %v1520_v57  ;;  %v1660_v0 = vmax.f32 %v1617_v2, %v1647_v30 }
 0x162   : > { %v1564_v51 = vld [vmem:[#allocation2 + $0x1cb] ss:$8 sm:$0xf0]  ;;  %v1607_v8 = vld [vmem:[#allocation2 + $0x1cc] ss:$8 sm:$0xf0]  ;;  %v1643_v54 = vor.u32 %v1642_v15, %v1641_v42 }
 0x163   : > { %v1606_v47 = vld [vmem:[#allocation2 + $0x1cc] ss:$8 sm:$0xf]  ;;  %v1361_v11 = vld [vmem:[#allocation2 + $0x206] ss:$8 sm:$0x7]  ;;  %v1565_v18 = vor.u32 %v1564_v51, %v1563_v61  ;;  %v1532_v16 = vmax.f32 %v1489_v29, %v1522_v43 }
 0x164   : > { %v1395_v62 = vld [vmem:[#allocation2 + $0x207] ss:$8 sm:$0x7]  ;;  %v1649_v17 = vld [vmem:[#allocation2 + $0x1cd] ss:$8 sm:$0xf]  ;;  %v1608_v63 = vor.u32 %v1607_v8, %v1606_v47  ;;  %v1659_v26 = vmax.f32 %v1616_v40, %v1643_v54 }
 0x165   : > { %v1650_v19 = vld [vmem:[#allocation2 + $0x1cd] ss:$8 sm:$0xf0]  ;;  %v1404_v36 = vmax.f32 %v1361_v11, %v1395_v62  ;;  %v1438_v10 = vld [vmem:[#allocation2 + $0x208] ss:$8 sm:$0x7]  ;;  %v1575_v37 = vmax.f32 %v1532_v16, %v1565_v18 }
 0x166   : > { %v1481_v55 = vld [vmem:[#allocation2 + $0x209] ss:$8 sm:$0x7]  ;;  %v1524_v33 = vld [vmem:[#allocation2 + $0x20a] ss:$8 sm:$0x7]  ;;  %v1651_v14 = vor.u32 %v1650_v19, %v1649_v17 }
 0x167   : > { %v1447_v53 = vmax.f32 %v1404_v36, %v1438_v10  ;;  %v1567_v58 = vld [vmem:[#allocation2 + $0x20b] ss:$8 sm:$0x7]  ;;  %1702 = vst [vmem:[#allocation4] sm:$0xf] %v9245_v13  ;;  %v6653_v9 = vrot.slane %v9245_v13, 9  ;;  %v1618_v46 = vmax.f32 %v1575_v37, %v1608_v63 }
 0x168   : > { %v1683_v21 = vld [vmem:[#allocation3 + $0xd] sm:$0xff]  ;;  %v1684_v59 = vld [vmem:[#allocation3 + $0x15] sm:$0xff]  ;;  %v9253_v20 = vshrl.u32 %v9245_v13, 16  ;;  %v9276_v44 = vshll.u32 %v9245_v13, 16  ;;  %1678 = vst [vmem:[#allocation3 + $0x30] sm:$0xff] %v1659_v26  ;;  %v8211_v49 = vld [vmem:[%s11127_s3 + $0xc0] sm:$0xff] }
 0x169   : > { %v1490_v32 = vmax.f32 %v1447_v53, %v1481_v55  ;;  %v9255_v3 = vpack.c.bf16 %v1683_v21, %v1683_v21  ;;  %v8242_v1 = vld [vmem:[%s11127_s3 + $0x1b8] sm:$0xff]  ;;  %v9266_v4 = vpack.c.bf16 %v1684_v59, %v1684_v59  ;;  %v8212_v45 = vld [vmem:[%s11127_s3 + $0xc8] sm:$0xff]  ;;  %v8233_v23 = vld [vmem:[%s11127_s3 + $0x170] sm:$0xff]  ;;  %1679 = vst [vmem:[#allocation3 + $0x38] sm:$0xff] %v1660_v0  ;;  %v1661_v42 = vmax.f32 %v1618_v46, %v1651_v14 }
 0x16a   : > { %v8226_v12 = vld [vmem:[%s11127_s3 + $0x138] sm:$0xff]  ;;  %v1722_v38 = vrot.slane %v9253_v20, 4  ;;  %v8241_v24 = vld [vmem:[%s11127_s3 + $0x1b0] sm:$0xff]  ;;  %v1725_v57 = vrot.slane %v9276_v44, 5  ;;  %3120 = vmatpush.bf16.msra.mxu3 %v8242_v1  ;;  %3027 = vmatpush.bf16.msra.mxu0 %v8212_v45  ;;  %v1889_v17 = vrot.slane %v9253_v20, 5  ;;  %v1890_v36 = vrot.slane %v9276_v44, 6 }
 0x16b   : > { %v1610_v27 = vld [vmem:[#allocation2 + $0x20c] ss:$8 sm:$0x7]  ;;  %v1533_v25 = vmax.f32 %v1490_v32, %v1524_v33  ;;  %v1842_v39 = vrot.slane %v9255_v3, 5  ;;  %v9283_v41 = vshll.u32 %v9255_v3, 16  ;;  %v1845_v31 = vrot.slane %v9266_v4, 5  ;;  %3054 = vmatpush.bf16.msra.mxu1 %v8226_v12  ;;  %3088 = vmatpush.bf16.msra.mxu2 %v8233_v23 }
 0x16c   : > { %v9294_v22 = vshrl.u32 %v9255_v3, 16  ;;  %v9297_v15 = vshll.u32 %v9266_v4, 16  ;;  %v8225_v28 = vld [vmem:[%s11127_s3 + $0x130] sm:$0xff]  ;;  %1703 = vst [vmem:[#allocation4 + $0x20] sm:$0xf] %v9255_v3  ;;  %v1726_v51 = vor.u32 %v1725_v57, %v1722_v38  ;;  %v9320_v62 = vshrl.u32 %v9266_v4, 16 }
 0x16d   : > { %v1576_v61 = vmax.f32 %v1533_v25, %v1567_v58  ;;  %v1653_v5 = vld [vmem:[#allocation2 + $0x20d] ss:$8 sm:$0x7]  ;;  %v1843_v35 = vsel %vm9270_vm6, %v6653_v9, %v1842_v39  ;;  %v1844_v56 = vrot.slane %v1842_v39, 4  ;;  %v1731_v8 = vrot.slane %v9283_v41, 5  ;;  %1680 = vst [vmem:[#allocation3 + $0x40] sm:$0xff] %v1661_v42 }
 0x16e   : > { %1875 = vst [vmem:[#allocation4 + $0x8] sm:$0xf] %v1843_v35  ;;  %v1735_v30 = vrot.slane %v9294_v22, 4  ;;  %v1741_v47 = vrot.slane %v9297_v15, 5  ;;  %v1685_v6 = vld [vmem:[#allocation3 + $0x1d] sm:$0xff]  ;;  %v1727_v43 = vrot.slane %v1726_v51, 4  ;;  %3121 = vmatpush.bf16.msra.mxu3 %v8241_v24  ;;  %v1891_v33 = vor.u32 %v1890_v36, %v1889_v17  ;;  %3028 = vmatpush.bf16.msra.mxu0 %v8211_v49 }
 0x16f   : > { %v1619_v52 = vmax.f32 %v1576_v61, %v1610_v27  ;;  %v1846_v50 = vsel %vm9270_vm6, %v1844_v56, %v1845_v31  ;;  %v8250_v29 = vld [vmem:[%s11127_s3 + $0x1f8] sm:$0xff]  ;;  %v1893_v10 = vrot.slane %v9294_v22, 5  ;;  %v1686_v48 = vld [vmem:[#allocation3 + $0x25] sm:$0xff]  ;;  %3055 = vmatpush.bf16.msra.mxu1 %v8225_v28  ;;  %1704 = vst [vmem:[#allocation4 + $0x40] sm:$0xf] %v9266_v4  ;;  %v1894_v18 = vrot.slane %v9283_v41, 6 }
 0x170   : > { %1876 = vst [vmem:[#allocation4 + $0x28] sm:$0xf] %v1846_v50  ;;  %v1736_v19 = vor.u32 %v1735_v30, %v1731_v8  ;;  %v1898_v55 = vrot.slane %v9320_v62, 5  ;;  %v1899_v40 = vrot.slane %v9297_v15, 6  ;;  %v6659_v16 = vld [vmem:[#allocation4] sm:$0xf]  ;;  %v1732_v63 = vsel %vm9315_vm7, %v1727_v43, %v1731_v8 }
 0x171   : > { %v1662_v54 = vmax.f32 %v1619_v52, %v1653_v5  ;;  %v9334_v7 = vpack.c.bf16 %v1685_v6, %v1685_v6  ;;  %v8232_v2 = vld [vmem:[%s11127_s3 + $0x168] sm:$0xff]  ;;  %v1895_v21 = vor.u32 %v1894_v18, %v1893_v10  ;;  %v9350_v9 = vpack.c.bf16 %v1686_v48, %v1686_v48  ;;  %v8249_v37 = vld [vmem:[%s11127_s3 + $0x1f0] sm:$0xff]  ;;  %1817 = vst [vmem:[#allocation4 + $0x4] sm:$0xf] %v1732_v63 }
 0x172   : > { %v1737_v53 = vrot.slane %v1736_v19, 4  ;;  %v8240_v14 = vld [vmem:[%s11127_s3 + $0x1a8] sm:$0xff]  ;;  %v9348_v59 = vor.u32 %v1899_v40, %v1898_v55  ;;  %v1847_v26 = vrot.slane %v1845_v31, 4  ;;  %v1892_v12 = vrot.slane %v1891_v33, 4  ;;  %3153 = vmatpush.bf16.msrb.mxu0 %v8250_v29  ;;  %3089 = vmatpush.bf16.msra.mxu2 %v8232_v2  ;;  %v1688_v55 = vld [vmem:[#allocation3 + $0x35] sm:$0xff]  ;;  %v8231_v33 = vld [vmem:[%s11127_s3 + $0x160] sm:$0xff] }
 0x173   : > { %1681 = vst [vmem:[#allocation3 + $0x48] sm:$0x7] %v1662_v54  ;;  %v1687_v32 = vld [vmem:[#allocation3 + $0x2d] sm:$0xff]  ;;  %v1848_v0 = vrot.slane %v9334_v7, 5  ;;  %v1897_v38 = vrot.slane %v1895_v21, 4  ;;  %v1851_v46 = vrot.slane %v9350_v9, 5  ;;  %3122 = vmatpush.bf16.msra.mxu3 %v8240_v14  ;;  %v9403_v63 = vpack.c.bf16 %v1688_v55, %v1688_v55 }
 0x174   : > { %v8159_v34 = vld [vmem:[#allocation4 + $0x1c] sm:$0xf0]  ;;  %v1742_v1 = vsel %vm9315_vm7, %v1737_v53, %v1741_v47  ;;  %v1896_v45 = vsel %vm9344_vm8, %v1892_v12, %v1895_v21  ;;  %1705 = vst [vmem:[#allocation4 + $0x60] sm:$0xf] %v9334_v7  ;;  %v1745_v24 = vrot.slane %v9320_v62, 4  ;;  %v9371_v28 = vshll.u32 %v9334_v7, 16 }
 0x175   : > { %v6660_v27 = vor.u32 %v8159_v34, %v6659_v16  ;;  %1818 = vst [vmem:[#allocation4 + $0x24] sm:$0xf] %v1742_v1  ;;  %v6667_v25 = vld [vmem:[#allocation4 + $0x8] sm:$0xf]  ;;  %v1849_v39 = vsel %vm9270_vm6, %v1847_v26, %v1848_v0  ;;  %v1850_v23 = vrot.slane %v1848_v0, 4  ;;  %v1901_v57 = vsel %vm9344_vm8, %v1897_v38, %v9348_v59  ;;  %v8224_v51 = vld [vmem:[%s11127_s3 + $0x128] sm:$0xff] }
 0x176   : > { %1942 = vst [vmem:[#allocation4 + $0xc] sm:$0xf] %v1896_v45  ;;  %v9374_v42 = vshrl.u32 %v9334_v7, 16  ;;  %v9376_v61 = vpack.c.bf16 %v1687_v32, %v1687_v32  ;;  %v1746_v56 = vor.u32 %v1745_v24, %v1741_v47  ;;  %v9383_v49 = vshll.u32 %v9350_v9, 16  ;;  %3154 = vmatpush.bf16.msrb.mxu0 %v8249_v37  ;;  %3056 = vmatpush.bf16.msra.mxu1 %v8224_v51  ;;  %v8248_v37 = vld [vmem:[%s11127_s3 + $0x1e8] sm:$0xff] }
 0x177   : > { %2930 = vmatmul.bf16.vlgmr.msrb.gmra.mxu1 %v6660_v27  ;;  %v8160_v31 = vld [vmem:[#allocation4 + $0x24] sm:$0xf0]  ;;  %1943 = vst [vmem:[#allocation4 + $0x2c] sm:$0xf] %v1901_v57  ;;  %v1852_v35 = vsel %vm9270_vm6, %v1850_v23, %v1851_v46  ;;  %v1751_v8 = vrot.slane %v9371_v28, 5  ;;  %v9391_v52 = vshrl.u32 %v9350_v9, 16  ;;  %3090 = vmatpush.bf16.msra.mxu2 %v8231_v33 }
 0x178   : > { %v6668_v5 = vor.u32 %v8160_v31, %v6667_v25  ;;  %1877 = vst [vmem:[#allocation4 + $0x48] sm:$0xf] %v1849_v39  ;;  %v1755_v30 = vrot.slane %v9374_v42, 4  ;;  %v1747_v50 = vrot.slane %v1746_v56, 4  ;;  %v1902_v47 = vrot.slane %v9348_v59, 4  ;;  %v8230_v33 = vld [vmem:[%s11127_s3 + $0x158] sm:$0xff] }
 0x179   : > { %1878 = vst [vmem:[#allocation4 + $0x68] sm:$0xf] %v1852_v35  ;;  %v1903_v17 = vrot.slane %v9374_v42, 5  ;;  %v1904_v6 = vrot.slane %v9371_v28, 6  ;;  %v8155_v29 = vld [vmem:[#allocation4 + $0x4] sm:$0xf] }
 0x17a   : > { %2996 = vmatmul.bf16.vlgmr.msrb.gmra.mxu3 %v6668_v5  ;;  %1706 = vst [vmem:[#allocation4 + $0x80] sm:$0xf] %v9350_v9  ;;  %v1756_v43 = vor.u32 %v1755_v30, %v1751_v8  ;;  %v1908_v19 = vrot.slane %v9391_v52, 5  ;;  %v1909_v36 = vrot.slane %v9383_v49, 6  ;;  %v1752_v48 = vsel %vm9315_vm7, %v1747_v50, %v1751_v8  ;;  %v6691_v0 = vld [vmem:[#allocation4 + $0x40] sm:$0xf]  ;;  %3155 = vmatpush.bf16.msrb.mxu0 %v8248_v37 }
 0x17b   : > { %v1761_v54 = vrot.slane %v9383_v49, 5  ;;  %v1905_v18 = vor.u32 %v1904_v6, %v1903_v17  ;;  %1707 = vst [vmem:[#allocation4 + $0xa0] sm:$0xf] %v9376_v61  ;;  %v1853_v53 = vrot.slane %v1851_v46, 4  ;;  %v1854_v26 = vrot.slane %v9376_v61, 5  ;;  %3091 = vmatpush.bf16.msra.mxu2 %v8230_v33 }
 0x17c   : > { %v6661_v10 = vld [vmem:[#allocation4 + $0x20] sm:$0xf0]  ;;  %v1757_v16 = vrot.slane %v1756_v43, 4  ;;  %1819 = vst [vmem:[#allocation4 + $0x44] sm:$0xf] %v1752_v48  ;;  %v9410_v59 = vor.u32 %v1909_v36, %v1908_v19  ;;  %v1857_v1 = vrot.slane %v9403_v63, 5 }
 0x17d   : > { %v6664_v40 = vor.u32 %v8155_v29, %v6661_v10  ;;  %v8156_v2 = vld [vmem:[#allocation4 + $0xc] sm:$0xf]  ;;  %v1906_v14 = vsel %vm9344_vm8, %v1902_v47, %v1905_v18  ;;  %v1907_v21 = vrot.slane %v1905_v18, 4  ;;  %v1855_v38 = vsel %vm9270_vm6, %v1853_v53, %v1854_v26  ;;  %v8167_v25 = vld [vmem:[#allocation4 + $0x5c] sm:$0xf0]  ;;  %v8239_v29 = vld [vmem:[%s11127_s3 + $0x1a0] sm:$0xff] }
 0x17e   : > { %v6669_v32 = vld [vmem:[#allocation4 + $0x28] sm:$0xf0]  ;;  %v1762_v34 = vsel %vm9315_vm7, %v1757_v16, %v1761_v54  ;;  %1944 = vst [vmem:[#allocation4 + $0x4c] sm:$0xf] %v1906_v14  ;;  %v1856_v46 = vrot.slane %v1854_v26, 4  ;;  %v1765_v45 = vrot.slane %v9391_v52, 4  ;;  %v6692_v8 = vor.u32 %v8167_v25, %v6691_v0  ;;  %3123 = vmatpush.bf16.msra.mxu3 %v8239_v29 }
 0x17f   : > { %2963 = vmatmul.bf16.vlgmr.msrb.gmra.mxu2 %v6664_v40  ;;  %v6672_v12 = vor.u32 %v8156_v2, %v6669_v32  ;;  %1820 = vst [vmem:[#allocation4 + $0x64] sm:$0xf] %v1762_v34  ;;  %v1911_v27 = vsel %vm9344_vm8, %v1907_v21, %v9410_v59  ;;  %v9426_v39 = vshll.u32 %v9376_v61, 16  ;;  %v6699_v23 = vld [vmem:[#allocation4 + $0x48] sm:$0xf]  ;;  %v9431_v31 = vshrl.u32 %v9376_v61, 16 }
 0x180   : > { %1945 = vst [vmem:[#allocation4 + $0x6c] sm:$0xf] %v1911_v27  ;;  %v1858_v24 = vsel %vm9270_vm6, %v1856_v46, %v1857_v1  ;;  %v9434_v57 = vshll.u32 %v9403_v63, 16  ;;  %v8168_v5 = vld [vmem:[#allocation4 + $0x64] sm:$0xf0]  ;;  %v1766_v35 = vor.u32 %v1765_v45, %v1761_v54  ;;  %v9438_v51 = vshrl.u32 %v9403_v63, 16 }
 0x181   : > { %3029 = vmatmul.bf16.vlgmr.msra.gmra.mxu0 %v6672_v12  ;;  %1879 = vst [vmem:[#allocation4 + $0x88] sm:$0xf] %v1855_v38  ;;  %v1771_v56 = vrot.slane %v9426_v39, 5  ;;  %v1775_v30 = vrot.slane %v9431_v31, 4  ;;  %v1913_v47 = vrot.slane %v9431_v31, 5  ;;  %v1914_v17 = vrot.slane %v9426_v39, 6 }
 0x182   : > { %1880 = vst [vmem:[#allocation4 + $0xa8] sm:$0xf] %v1858_v24  ;;  %v1767_v50 = vrot.slane %v1766_v35, 4  ;;  %v1918_v6 = vrot.slane %v9438_v51, 5  ;;  %v8223_v43 = vld [vmem:[%s11127_s3 + $0x120] sm:$0xff]  ;;  %v6700_v19 = vor.u32 %v8168_v5, %v6699_v23  ;;  %v1919_v48 = vrot.slane %v9434_v57, 6 }
 0x183   : > { %1708 = vst [vmem:[#allocation4 + $0xc0] sm:$0xf] %v9403_v63  ;;  %v8163_v36 = vld [vmem:[#allocation4 + $0x44] sm:$0xf]  ;;  %v1776_v10 = vor.u32 %v1775_v30, %v1771_v56  ;;  %v1689_v54 = vld [vmem:[#allocation3 + $0x3d] sm:$0xff]  ;;  %v1912_v55 = vrot.slane %v9410_v59, 4  ;;  %v1915_v16 = vor.u32 %v1914_v17, %v1913_v47  ;;  %3057 = vmatpush.bf16.msra.mxu1 %v8223_v43 }
 0x184   : > { %v1772_v40 = vsel %vm9315_vm7, %v1767_v50, %v1771_v56  ;;  %v9455_v53 = vpack.c.bf16 %v1689_v54, %v1689_v54  ;;  %v8247_v2 = vld [vmem:[%s11127_s3 + $0x1e0] sm:$0xff]  ;;  %v1781_v21 = vrot.slane %v9434_v57, 5  ;;  %v9464_v59 = vor.u32 %v1919_v48, %v1918_v6  ;;  %v8238_v26 = vld [vmem:[%s11127_s3 + $0x198] sm:$0xff] }
 0x185   : > { %v1777_v14 = vrot.slane %v1776_v10, 4  ;;  %1821 = vst [vmem:[#allocation4 + $0x84] sm:$0xf] %v1772_v40  ;;  %v1859_v37 = vrot.slane %v1857_v1, 4  ;;  %v1916_v32 = vsel %vm9344_vm8, %v1912_v55, %v1915_v16  ;;  %v1917_v34 = vrot.slane %v1915_v16, 4  ;;  %3156 = vmatpush.bf16.msrb.mxu0 %v8247_v2  ;;  %v1690_v12 = vld [vmem:[#allocation3 + $0x45] sm:$0xff]  ;;  %3124 = vmatpush.bf16.msra.mxu3 %v8238_v26 }
 0x186   : > { %v6693_v18 = vld [vmem:[#allocation4 + $0x60] sm:$0xf0]  ;;  %1709 = vst [vmem:[#allocation4 + $0xe0] sm:$0xf] %v9455_v53  ;;  %v9474_v27 = vpack.c.bf16 %v1690_v12, %v1690_v12  ;;  %v1860_v38 = vrot.slane %v9455_v53, 5  ;;  %v8222_v1 = vld [vmem:[%s11127_s3 + $0x118] sm:$0xff] }
 0x187   : > { %2935 = vmatmul.bf16.gmra.mxu1 %v6692_v8  ;;  %v1782_v0 = vsel %vm9315_vm7, %v1777_v14, %v1781_v21  ;;  %1946 = vst [vmem:[#allocation4 + $0x8c] sm:$0xf] %v1916_v32  ;;  %v6696_v46 = vor.u32 %v8163_v36, %v6693_v18  ;;  %v8164_v25 = vld [vmem:[#allocation4 + $0x4c] sm:$0xf]  ;;  %v1921_v23 = vsel %vm9344_vm8, %v1917_v34, %v9464_v59  ;;  %v1785_v24 = vrot.slane %v9438_v51, 4 }
 0x188   : > { %v6701_v45 = vld [vmem:[#allocation4 + $0x68] sm:$0xf0]  ;;  %1822 = vst [vmem:[#allocation4 + $0xa4] sm:$0xf] %v1782_v0  ;;  %v9485_v5 = vshll.u32 %v9455_v53, 16  ;;  %v1861_v35 = vsel %vm9270_vm6, %v1859_v37, %v1860_v38  ;;  %v1862_v56 = vrot.slane %v1860_v38, 4  ;;  %3058 = vmatpush.bf16.msra.mxu1 %v8222_v1 }
 0x189   : > { %1947 = vst [vmem:[#allocation4 + $0xac] sm:$0xf] %v1921_v23  ;;  %v1863_v8 = vrot.slane %v9474_v27, 5  ;;  %v9491_v30 = vshrl.u32 %v9455_v53, 16  ;;  %v1786_v50 = vor.u32 %v1785_v24, %v1781_v21  ;;  %v9495_v17 = vshll.u32 %v9474_v27, 16  ;;  %v8229_v0 = vld [vmem:[%s11127_s3 + $0x150] sm:$0xff] }
 0x18a   : > { %3001 = vmatmul.bf16.gmra.mxu3 %v6700_v19  ;;  %1881 = vst [vmem:[#allocation4 + $0xc8] sm:$0xf] %v1861_v35  ;;  %v1791_v47 = vrot.slane %v9485_v5, 5  ;;  %v9498_v6 = vshrl.u32 %v9474_v27, 16  ;;  %v6704_v10 = vor.u32 %v8164_v25, %v6701_v45  ;;  %v1922_v40 = vrot.slane %v9464_v59, 4  ;;  %v8246_v59 = vld [vmem:[%s11127_s3 + $0x1d8] sm:$0xff]  ;;  %3092 = vmatpush.bf16.msra.mxu2 %v8229_v0 }
 0x18b   : > { %v1864_v29 = vsel %vm9270_vm6, %v1862_v56, %v1863_v8  ;;  %v1795_v43 = vrot.slane %v9491_v30, 4  ;;  %v1787_v19 = vrot.slane %v1786_v50, 4  ;;  %v1801_v36 = vrot.slane %v9495_v17, 5  ;;  %v6723_v2 = vld [vmem:[#allocation4 + $0x80] sm:$0xf]  ;;  %3157 = vmatpush.bf16.msrb.mxu0 %v8246_v59  ;;  %v8220_v59 = vld [vmem:[%s11127_s3 + $0x108] sm:$0xff] }
 0x18c   : > { %1882 = vst [vmem:[#allocation4 + $0xe8] sm:$0xf] %v1864_v29  ;;  %v1805_v54 = vrot.slane %v9498_v6, 4  ;;  %v1923_v18 = vrot.slane %v9491_v30, 5  ;;  %v1924_v16 = vrot.slane %v9485_v5, 6  ;;  %v1928_v33 = vrot.slane %v9498_v6, 5 }
 0x18d   : > { %v1796_v48 = vor.u32 %v1795_v43, %v1791_v47  ;;  %v1792_v55 = vsel %vm9315_vm7, %v1787_v19, %v1791_v47  ;;  %v8175_v14 = vld [vmem:[#allocation4 + $0x9c] sm:$0xf0]  ;;  %v1929_v37 = vrot.slane %v9495_v17, 6  ;;  %v8176_v32 = vld [vmem:[#allocation4 + $0xa4] sm:$0xf0]  ;;  %v1865_v34 = vrot.slane %v1863_v8, 4 }
 0x18e   : > { %v1806_v26 = vor.u32 %v1805_v54, %v1801_v36  ;;  %1823 = vst [vmem:[#allocation4 + $0xc4] sm:$0xf] %v1792_v55  ;;  %v1925_v12 = vor.u32 %v1924_v16, %v1923_v18  ;;  %v8237_v25 = vld [vmem:[%s11127_s3 + $0x190] sm:$0xff]  ;;  %v6724_v23 = vor.u32 %v8175_v14, %v6723_v2  ;;  %v6731_v50 = vld [vmem:[#allocation4 + $0x88] sm:$0xf]  ;;  %v8228_v16 = vld [vmem:[%s11127_s3 + $0x148] sm:$0xff] }
 0x18f   : > { %2968 = vmatmul.bf16.gmra.mxu2 %v6696_v46  ;;  %v1797_v21 = vrot.slane %v1796_v48, 4  ;;  %v1930_v46 = vor.u32 %v1929_v37, %v1928_v33  ;;  %v8221_v45 = vld [vmem:[%s11127_s3 + $0x110] sm:$0xff]  ;;  %3125 = vmatpush.bf16.msra.mxu3 %v8237_v25  ;;  %v1950_v18 = vld [vmem:[#allocation4 + $0x10c] sm:$0x3]  ;;  %v8236_v2 = vld [vmem:[%s11127_s3 + $0x188] sm:$0xff] }
 0x190   : > { %v1807_v1 = vrot.slane %v1806_v26, 4  ;;  %v1926_v24 = vsel %vm9344_vm8, %v1922_v40, %v1925_v12  ;;  %v1927_v35 = vrot.slane %v1925_v12, 4  ;;  %v1713_v8 = vld [vmem:[#allocation4 + $0x100] sm:$0x3]  ;;  %3059 = vmatpush.bf16.msra.mxu1 %v8221_v45  ;;  %v1825_v19 = vld [vmem:[#allocation4 + $0x104] sm:$0x3]  ;;  %3093 = vmatpush.bf16.msra.mxu2 %v8228_v16 }
 0x191   : > { %3034 = vmatmul.bf16.gmra.mxu0 %v6704_v10  ;;  %v1802_v38 = vsel %vm9315_vm7, %v1797_v21, %v1801_v36  ;;  %v1932_v47 = vrot.slane %v1930_v46, 4  ;;  %1948 = vst [vmem:[#allocation4 + $0xcc] sm:$0xf] %v1926_v24  ;;  %v1714_v29 = vsel %vm9530_vm11, %v9474_v27, %v1713_v8  ;;  %v1883_v36 = vld [vmem:[#allocation4 + $0x108] sm:$0x3]  ;;  %v6732_v10 = vor.u32 %v8176_v32, %v6731_v50  ;;  %v8245_v33 = vld [vmem:[%s11127_s3 + $0x1d0] sm:$0xff] }
 0x192   : > { %1824 = vst [vmem:[#allocation4 + $0xe4] sm:$0xf] %v1802_v38  ;;  %v1931_v43 = vsel %vm9344_vm8, %v1927_v35, %v1930_v46  ;;  %v1826_v48 = vsel %vm9530_vm11, %v1807_v1, %v1825_v19  ;;  %v1884_v54 = vsel %vm9530_vm11, %v1865_v34, %v1883_v36  ;;  %v6725_v55 = vld [vmem:[#allocation4 + $0xa0] sm:$0xf0]  ;;  %3158 = vmatpush.bf16.msrb.mxu0 %v8245_v33  ;;  %v6733_v26 = vld [vmem:[#allocation4 + $0xa8] sm:$0xf0] }
 0x193   : > { %1715 = vst [vmem:[#allocation4 + $0x100] sm:$0x3] %v1714_v29  ;;  %v1951_v40 = vsel %vm9530_vm11, %v1932_v47, %v1950_v18  ;;  %v8171_v14 = vld [vmem:[#allocation4 + $0x84] sm:$0xf]  ;;  %3126 = vmatpush.bf16.msra.mxu3 %v8236_v2  ;;  %v8172_v37 = vld [vmem:[#allocation4 + $0x8c] sm:$0xf] }
 0x194   : > { %1949 = vst [vmem:[#allocation4 + $0xec] sm:$0xf] %v1931_v43  ;;  %v6728_v21 = vor.u32 %v8171_v14, %v6725_v55  ;;  %v6736_v32 = vor.u32 %v8172_v37, %v6733_v26  ;;  %v6755_v34 = vld [vmem:[#allocation4 + $0xc0] sm:$0xf]  ;;  %v6654_v38 = vrot.slane %v9245_v13, 10  ;;  %v1957_v1 = vrot.slane %v9255_v3, 6  ;;  %3060 = vmatpush.bf16.msra.mxu1 %v8220_v59 }
 0x195   : > { %1827 = vst [vmem:[#allocation4 + $0x104] sm:$0x3] %v1826_v48  ;;  %v8183_v0 = vld [vmem:[#allocation4 + $0xdc] sm:$0xf0]  ;;  %v1960_v46 = vrot.slane %v9266_v4, 6  ;;  %v8227_v25 = vld [vmem:[%s11127_s3 + $0x140] sm:$0xff] }
 0x196   : > { %1885 = vst [vmem:[#allocation4 + $0x108] sm:$0x3] %v1884_v54  ;;  %v8244_v45 = vld [vmem:[%s11127_s3 + $0x1c8] sm:$0xff]  ;;  %v1958_v24 = vsel %vm9555_vm13, %v6654_v38, %v1957_v1  ;;  %v1959_v35 = vrot.slane %v1957_v1, 4  ;;  %v2003_v8 = vrot.slane %v9253_v20, 6  ;;  %v2004_v50 = vrot.slane %v9276_v44, 7  ;;  %3094 = vmatpush.bf16.msra.mxu2 %v8227_v25 }
 0x197   : > { %2940 = vmatmul.bf16.gmra.mxu1 %v6724_v23  ;;  %1952 = vst [vmem:[#allocation4 + $0x10c] sm:$0x3] %v1951_v40  ;;  %v8219_v23 = vld [vmem:[%s11127_s3 + $0x100] sm:$0xff]  ;;  %v6756_v47 = vor.u32 %v8183_v0, %v6755_v34  ;;  %v8184_v29 = vld [vmem:[#allocation4 + $0xe4] sm:$0xf0]  ;;  %3159 = vmatpush.bf16.msrb.mxu0 %v8244_v45  ;;  %v6655_v43 = vrot.slane %v9245_v13, 11 }
 0x198   : > { %1990 = vst [vmem:[#allocation4 + $0x10] sm:$0xf] %v1958_v24  ;;  %v1961_v19 = vsel %vm9555_vm13, %v1959_v35, %v1960_v46  ;;  %v2073_v36 = vrot.slane %v9255_v3, 7  ;;  %v8235_v44 = vld [vmem:[%s11127_s3 + $0x180] sm:$0xff]  ;;  %v2076_v13 = vrot.slane %v9266_v4, 7  ;;  %3061 = vmatpush.bf16.msra.mxu1 %v8219_v23  ;;  %v2005_v3 = vor.u32 %v2004_v50, %v2003_v8 }
 0x199   : > { %1991 = vst [vmem:[#allocation4 + $0x30] sm:$0xf] %v1961_v19  ;;  %v6757_v40 = vld [vmem:[#allocation4 + $0xe0] sm:$0xf0]  ;;  %3127 = vmatpush.bf16.msra.mxu3 %v8235_v44  ;;  %v8243_v33 = vld [vmem:[%s11127_s3 + $0x1c0] sm:$0xff]  ;;  %v2007_v2 = vrot.slane %v9294_v22, 6 }
 0x19a   : > { %3006 = vmatmul.bf16.gmra.mxu3 %v6732_v10  ;;  %v6763_v10 = vld [vmem:[#allocation4 + $0xc8] sm:$0xf]  ;;  %v2074_v18 = vsel %vm9587_vm0, %v6655_v43, %v2073_v36  ;;  %v2075_v55 = vrot.slane %v2073_v36, 4  ;;  %v2008_v14 = vrot.slane %v9283_v41, 7  ;;  %v2012_v26 = vrot.slane %v9320_v62, 6 }
 0x19b   : > { %v6764_v54 = vor.u32 %v8184_v29, %v6763_v10  ;;  %2108 = vst [vmem:[#allocation4 + $0x18] sm:$0xf] %v2074_v18  ;;  %v2013_v37 = vrot.slane %v9297_v15, 7  ;;  %3160 = vmatpush.bf16.msrb.mxu0 %v8243_v33  ;;  %v2006_v34 = vrot.slane %v2005_v3, 4  ;;  %v6765_v38 = vld [vmem:[#allocation4 + $0xe8] sm:$0xf0] }
 0x19c   : > { %v2077_v16 = vsel %vm9587_vm0, %v2075_v55, %v2076_v13  ;;  %v2009_v0 = vor.u32 %v2008_v14, %v2007_v2  ;;  %v8180_v25 = vld [vmem:[#allocation4 + $0xcc] sm:$0xf]  ;;  %v2216_v45 = vld [vmem:[#allocation4 + $0x100] sm:$0x33]  ;;  %v2124_v50 = vrot.slane %v9294_v22, 7  ;;  %v6656_v36 = vrot.slane %v9253_v20, 11 }
 0x19d   : > { %2109 = vst [vmem:[#allocation4 + $0x38] sm:$0xf] %v2077_v16  ;;  %v9608_v1 = vor.u32 %v2013_v37, %v2012_v26  ;;  %v6768_v35 = vor.u32 %v8180_v25, %v6765_v38  ;;  %v2450_v29 = vunpack.c.l.b16 %v2216_v45  ;;  %v1962_v22 = vrot.slane %v1960_v46, 4 }
 0x19e   : > { %v2010_v23 = vsel %vm9602_vm2, %v2006_v34, %v2009_v0  ;;  %v2011_v24 = vrot.slane %v2009_v0, 4  ;;  %v2217_v43 = vld [vmem:[#allocation4 + $0x108] sm:$0x33]  ;;  %v2125_v10 = vor.u32 %v2124_v50, %v9283_v41  ;;  %v2127_v44 = vrot.slane %v2124_v50, 4 }
 0x19f   : > { %2973 = vmatmul.bf16.gmra.mxu2 %v6728_v21  ;;  %2056 = vst [vmem:[#allocation4 + $0x14] sm:$0xf] %v2010_v23  ;;  %v2452_v18 = vunpack.c.l.b16 %v2217_v43  ;;  %v2078_v46 = vrot.slane %v2076_v13, 4  ;;  %v2079_v16 = vrot.slane %v9334_v7, 7  ;;  %v2451_v2 = vunpack.c.h.b16 %v2216_v45 }
 0x1a0   : > { %v2015_v8 = vsel %vm9602_vm2, %v2011_v24, %v9608_v1  ;;  %v2126_v55 = vsel %vm9617_vm5, %v6656_v36, %v2125_v10  ;;  %v2082_v37 = vrot.slane %v9350_v9, 7  ;;  %v2017_v34 = vrot.slane %v9374_v42, 6 }
 0x1a1   : > { %3039 = vmatmul.bf16.gmra.mxu0 %v6736_v32  ;;  %v8179_v32 = vld [vmem:[#allocation4 + $0xc4] sm:$0xf]  ;;  %2057 = vst [vmem:[#allocation4 + $0x34] sm:$0xf] %v2015_v8  ;;  %v2492_v33 = vpack.c.b16 %v2452_v18, %v2452_v18  ;;  %v2080_v14 = vsel %vm9587_vm0, %v2078_v46, %v2079_v16  ;;  %v2081_v26 = vrot.slane %v2079_v16, 4  ;;  %v2018_v0 = vrot.slane %v9371_v28, 7 }
 0x1a2   : > { %v6760_v59 = vor.u32 %v8179_v32, %v6757_v40  ;;  %v2490_v40 = vpack.c.b16 %v2450_v29, %v2450_v29  ;;  %2173 = vst [vmem:[#allocation4 + $0x1c] sm:$0xf] %v2126_v55  ;;  %v2016_v32 = vrot.slane %v9608_v1, 4  ;;  %v2022_v13 = vrot.slane %v9391_v52, 6 }
 0x1a3   : > { %2110 = vst [vmem:[#allocation4 + $0x58] sm:$0xf] %v2080_v14  ;;  %v2132_v38 = vrot.slane %v9374_v42, 7  ;;  %v2136_v25 = vrot.slane %v9391_v52, 7  ;;  %v2453_v45 = vunpack.c.h.b16 %v2217_v43  ;;  %v2019_v23 = vor.u32 %v2018_v0, %v2017_v34 }
 0x1a4   : > { %v1969_v42 = vrot.slane %v9376_v61, 6  ;;  %v2085_v18 = vrot.slane %v9376_v61, 7  ;;  %v2088_v55 = vrot.slane %v9403_v63, 7  ;;  %v2032_v61 = vrot.slane %v9438_v51, 6 }
 0x1a5   : > { %v2133_v24 = vor.u32 %v2132_v38, %v9371_v28  ;;  %v2137_v8 = vor.u32 %v2136_v25, %v9383_v49  ;;  %v2020_v29 = vsel %vm9602_vm2, %v2016_v32, %v2019_v23  ;;  %v2021_v36 = vrot.slane %v2019_v23, 4 }
 0x1a6   : > { %2058 = vst [vmem:[#allocation4 + $0x54] sm:$0xf] %v2020_v29  ;;  %v1972_v28 = vrot.slane %v9403_v63, 6  ;;  %v2493_v43 = vpack.c.b16 %v2453_v45, %v2453_v45  ;;  %v2087_v16 = vrot.slane %v2085_v18, 4  ;;  %v2139_v14 = vrot.slane %v2136_v25, 4 }
 0x1a7   : > { %2945 = vmatmul.bf16.gmra.mxu1 %v6756_v47  ;;  %v2128_v47 = vrot.slane %v9320_v62, 7  ;;  %v1963_v62 = vrot.slane %v9334_v7, 6  ;;  %v2083_v7 = vsel %vm9587_vm0, %v2081_v26, %v2082_v37  ;;  %v2144_v32 = vrot.slane %v9438_v51, 7  ;;  %v8157_v29 = vld [vmem:[#allocation4 + $0x14] sm:$0xf] }
 0x1a8   : > { %2111 = vst [vmem:[#allocation4 + $0x78] sm:$0xf] %v2083_v7  ;;  %v2089_v26 = vsel %vm9587_vm0, %v2087_v16, %v2088_v55  ;;  %v1974_v34 = vrot.slane %v1972_v28, 4 }
 0x1a9   : > { %v1964_v20 = vsel %vm9555_vm13, %v1962_v22, %v1963_v62  ;;  %v1965_v41 = vrot.slane %v1963_v62, 4  ;;  %v2131_v1 = vrot.slane %v2128_v47, 4  ;;  %v1971_v22 = vrot.slane %v1969_v42, 4  ;;  %2113 = vst [vmem:[#allocation4 + $0xb8] sm:$0xf] %v2089_v26 }
 0x1aa   : > { %3011 = vmatmul.bf16.gmra.mxu3 %v6764_v54  ;;  %v2129_v54 = vor.u32 %v2128_v47, %v9297_v15  ;;  %v1966_v15 = vrot.slane %v9350_v9, 6  ;;  %1992 = vst [vmem:[#allocation4 + $0x50] sm:$0xf] %v1964_v20  ;;  %v2491_v9 = vpack.c.b16 %v2451_v2, %v2451_v2  ;;  %v2084_v62 = vrot.slane %v2082_v37, 4  ;;  %v6715_v26 = vld [vmem:[#allocation4 + $0x58] sm:$0xf] }
 0x1ab   : > { %v2134_v52 = vsel %vm9617_vm5, %v2131_v1, %v2133_v24  ;;  %v2027_v20 = vrot.slane %v9431_v31, 6  ;;  %v2033_v2 = vrot.slane %v9434_v57, 7  ;;  %v2140_v37 = vrot.slane %v9431_v31, 7 }
 0x1ac   : > { %v2130_v3 = vsel %vm9617_vm5, %v2127_v44, %v2129_v54  ;;  %v1967_v4 = vsel %vm9555_vm13, %v1965_v41, %v1966_v15  ;;  %v1968_v50 = vrot.slane %v1966_v15, 4  ;;  %2175 = vst [vmem:[#allocation4 + $0x5c] sm:$0xf] %v2134_v52  ;;  %v2028_v41 = vrot.slane %v9426_v39, 7 }
 0x1ad   : > { %2174 = vst [vmem:[#allocation4 + $0x3c] sm:$0xf] %v2130_v3  ;;  %v6675_v3 = vld [vmem:[#allocation4 + $0x10] sm:$0xf]  ;;  %v2086_v46 = vsel %vm9587_vm0, %v2084_v62, %v2085_v18  ;;  %v2034_v7 = vor.u32 %v2033_v2, %v2032_v61  ;;  %v2141_v25 = vor.u32 %v2140_v37, %v9426_v39  ;;  %v2145_v45 = vor.u32 %v2144_v32, %v9434_v57 }
 0x1ae   : > { %1993 = vst [vmem:[#allocation4 + $0x70] sm:$0xf] %v1967_v4  ;;  %v1970_v54 = vsel %vm9555_vm13, %v1968_v50, %v1969_v42  ;;  %v8162_v4 = vld [vmem:[#allocation4 + $0x34] sm:$0xf0]  ;;  %v2090_v31 = vrot.slane %v2088_v55, 4  ;;  %v2091_v1 = vrot.slane %v9455_v53, 7 }
 0x1af   : > { %2978 = vmatmul.bf16.gmra.mxu2 %v6760_v59  ;;  %v2023_v59 = vrot.slane %v9383_v49, 7  ;;  %v8161_v49 = vld [vmem:[#allocation4 + $0x2c] sm:$0xf0]  ;;  %1994 = vst [vmem:[#allocation4 + $0x90] sm:$0xf] %v1970_v54  ;;  %v2142_v24 = vsel %vm9617_vm5, %v2139_v14, %v2141_v25  ;;  %v2037_v50 = vrot.slane %v9491_v30, 6 }
 0x1b0   : > { %v6676_v15 = vor.u32 %v8161_v49, %v6675_v3  ;;  %2112 = vst [vmem:[#allocation4 + $0x98] sm:$0xf] %v2086_v46  ;;  %v2092_v57 = vsel %vm9587_vm0, %v2090_v31, %v2091_v1  ;;  %v1978_v42 = vrot.slane %v9474_v27, 6  ;;  %v2093_v52 = vrot.slane %v2091_v1, 4  ;;  %v8158_v54 = vld [vmem:[#allocation4 + $0x1c] sm:$0xf] }
 0x1b1   : > { %3044 = vmatmul.bf16.gmra.mxu0 %v6768_v35  ;;  %v2135_v35 = vrot.slane %v2132_v38, 4  ;;  %v2024_v10 = vor.u32 %v2023_v59, %v2022_v13  ;;  %v1975_v59 = vrot.slane %v9455_v53, 6  ;;  %v6683_v38 = vld [vmem:[#allocation4 + $0x18] sm:$0xf]  ;;  %2177 = vst [vmem:[#allocation4 + $0x9c] sm:$0xf] %v2142_v24 }
 0x1b2   : > { %v6684_v23 = vor.u32 %v8162_v4, %v6683_v38  ;;  %v2036_v53 = vrot.slane %v2034_v7, 4  ;;  %2114 = vst [vmem:[#allocation4 + $0xd8] sm:$0xf] %v2092_v57  ;;  %v2147_v18 = vrot.slane %v2144_v32, 4  ;;  %v1980_v55 = vrot.slane %v1978_v42, 4 }
 0x1b3   : > { %v2138_v47 = vsel %vm9617_vm5, %v2135_v35, %v2137_v8  ;;  %v2025_v44 = vsel %vm9602_vm2, %v2021_v36, %v2024_v10  ;;  %v2026_v63 = vrot.slane %v2024_v10, 4  ;;  %v1976_v39 = vsel %vm9555_vm13, %v1974_v34, %v1975_v59  ;;  %v6677_v8 = vld [vmem:[#allocation4 + $0x30] sm:$0xf0]  ;;  %v1998_v2 = vld [vmem:[#allocation4 + $0x110] sm:$0x3] }
 0x1b4   : > { %2059 = vst [vmem:[#allocation4 + $0x74] sm:$0xf] %v2025_v44  ;;  %v2038_v36 = vrot.slane %v9485_v5, 7  ;;  %v1977_v10 = vrot.slane %v1975_v59, 4  ;;  %v2148_v44 = vrot.slane %v9491_v30, 7  ;;  %v2042_v3 = vrot.slane %v9498_v6, 6 }
 0x1b5   : > { %2176 = vst [vmem:[#allocation4 + $0x7c] sm:$0xf] %v2138_v47  ;;  %v2094_v47 = vrot.slane %v9474_v27, 7  ;;  %v2043_v30 = vrot.slane %v9495_v17, 7  ;;  %v2152_v46 = vrot.slane %v9498_v6, 7 }
 0x1b6   : > { %1996 = vst [vmem:[#allocation4 + $0xd0] sm:$0xf] %v1976_v39  ;;  %v2039_v49 = vor.u32 %v2038_v36, %v2037_v50  ;;  %v8169_v16 = vld [vmem:[#allocation4 + $0x6c] sm:$0xf0]  ;;  %v8170_v34 = vld [vmem:[#allocation4 + $0x74] sm:$0xf0] }
 0x1b7   : > { %2950 = vmatmul.bf16.gmra.mxu1 %v2490_v40  ;;  %v1973_v40 = vsel %vm9555_vm13, %v1971_v22, %v1972_v28  ;;  %v6680_v28 = vor.u32 %v8157_v29, %v6677_v8  ;;  %v1979_v22 = vsel %vm9555_vm13, %v1977_v10, %v1978_v42  ;;  %v2095_v62 = vsel %vm9587_vm0, %v2093_v52, %v2094_v47  ;;  %v2064_v38 = vld [vmem:[#allocation4 + $0x114] sm:$0x3]  ;;  %v2116_v25 = vld [vmem:[#allocation4 + $0x118] sm:$0x3]  ;;  %v2181_v57 = vld [vmem:[#allocation4 + $0x11c] sm:$0x3] }
 0x1b8   : > { %1995 = vst [vmem:[#allocation4 + $0xb0] sm:$0xf] %v1973_v40  ;;  %v2040_v27 = vsel %vm9602_vm2, %v2036_v53, %v2039_v49  ;;  %v1691_v40 = vld [vmem:[#allocation3 + $0x4d] sm:$0x3]  ;;  %v2096_v4 = vrot.slane %v2094_v47, 4  ;;  %v2041_v61 = vrot.slane %v2039_v49, 4  ;;  %v2153_v32 = vor.u32 %v2152_v46, %v9495_v17 }
 0x1b9   : > { %1997 = vst [vmem:[#allocation4 + $0xf0] sm:$0xf] %v1979_v22  ;;  %v1701_v14 = vpack.c.bf16 %v1691_v40, %v1691_v40  ;;  %v2155_v1 = vrot.slane %v2152_v46, 4  ;;  %v8166_v53 = vld [vmem:[#allocation4 + $0x5c] sm:$0xf] }
 0x1ba   : > { %3016 = vmatmul.bf16.gmra.mxu3 %v2492_v33  ;;  %v2029_v33 = vor.u32 %v2028_v41, %v2027_v20  ;;  %2115 = vst [vmem:[#allocation4 + $0xf8] sm:$0xf] %v2095_v62  ;;  %v2149_v41 = vor.u32 %v2148_v44, %v9485_v5  ;;  %v1999_v5 = vsel %vm9530_vm11, %v1980_v55, %v1998_v2  ;;  %v6739_v47 = vld [vmem:[#allocation4 + $0x90] sm:$0xf]  ;;  %v6747_v49 = vld [vmem:[#allocation4 + $0x98] sm:$0xf] }
 0x1bb   : > { %2062 = vst [vmem:[#allocation4 + $0xd4] sm:$0xf] %v2040_v27  ;;  %v2160_v31 = vshll.u32 %v1701_v14, 16  ;;  %v6709_v39 = vld [vmem:[#allocation4 + $0x70] sm:$0xf0] }
 0x1bc   : > { %v2030_v0 = vsel %vm9602_vm2, %v2026_v63, %v2029_v33  ;;  %v2031_v13 = vrot.slane %v2029_v33, 4  ;;  %v2044_v63 = vor.u32 %v2043_v30, %v2042_v3  ;;  %v2150_v33 = vsel %vm9617_vm5, %v2147_v18, %v2149_v41  ;;  %2000 = vst [vmem:[#allocation4 + $0x110] sm:$0x3] %v1999_v5  ;;  %v6717_v36 = vld [vmem:[#allocation4 + $0x78] sm:$0xf0] }
 0x1bd   : > { %2060 = vst [vmem:[#allocation4 + $0x94] sm:$0xf] %v2030_v0  ;;  %v6720_v42 = vor.u32 %v8166_v53, %v6717_v36  ;;  %v8174_v55 = vld [vmem:[#allocation4 + $0x9c] sm:$0xf] }
 0x1be   : > { %v2035_v51 = vsel %vm9602_vm2, %v2031_v13, %v2034_v7  ;;  %2179 = vst [vmem:[#allocation4 + $0xdc] sm:$0xf] %v2150_v33  ;;  %v2045_v6 = vsel %vm9602_vm2, %v2041_v61, %v2044_v63  ;;  %v2046_v0 = vrot.slane %v2044_v63, 4  ;;  %v2097_v13 = vrot.slane %v1701_v14, 7  ;;  %v9732_v63 = vld [vmem:[%s11128_s4] ss:$0 sm:$0xff] }
 0x1bf   : > { %2983 = vmatmul.bf16.gmra.mxu2 %v2491_v9  ;;  %v2143_v9 = vrot.slane %v2140_v37, 4  ;;  %2061 = vst [vmem:[#allocation4 + $0xb4] sm:$0xf] %v2035_v51  ;;  %v2151_v37 = vrot.slane %v2148_v44, 4  ;;  %v6716_v51 = vor.u32 %v8170_v34, %v6715_v26  ;;  %v8177_v52 = vld [vmem:[#allocation4 + $0xac] sm:$0xf0] }
 0x1c0   : > { %2063 = vst [vmem:[#allocation4 + $0xf4] sm:$0xf] %v2045_v6  ;;  %v2065_v17 = vsel %vm9530_vm11, %v2046_v0, %v2064_v38  ;;  %v8185_v3 = vld [vmem:[#allocation4 + $0xec] sm:$0xf0] }
 0x1c1   : > { %3049 = vmatmul.bf16.gmra.mxu0 %v2493_v43  ;;  %v2146_v35 = vsel %vm9617_vm5, %v2143_v9, %v2145_v45  ;;  %v6685_v43 = vld [vmem:[#allocation4 + $0x38] sm:$0xf0]  ;;  %v2154_v59 = vsel %vm9617_vm5, %v2151_v37, %v2153_v32  ;;  %v2098_v9 = vsel %vm9587_vm0, %v2096_v4, %v2097_v13  ;;  %v2157_v45 = vshrl.u32 %v1701_v14, 16  ;;  %2066 = vst [vmem:[#allocation4 + $0x114] sm:$0x3] %v2065_v17 }
 0x1c2   : > { %2178 = vst [vmem:[#allocation4 + $0xbc] sm:$0xf] %v2146_v35  ;;  %v6688_v20 = vor.u32 %v8158_v54, %v6685_v43  ;;  %v8165_v35 = vld [vmem:[#allocation4 + $0x54] sm:$0xf]  ;;  %v8178_v43 = vld [vmem:[#allocation4 + $0xb4] sm:$0xf0] }
 0x1c3   : > { %2180 = vst [vmem:[#allocation4 + $0xfc] sm:$0xf] %v2154_v59  ;;  %v2159_v24 = vrot.slane %v2157_v45, 7  ;;  %v6712_v29 = vor.u32 %v8165_v35, %v6709_v39  ;;  %v6748_v44 = vor.u32 %v8178_v43, %v6747_v49  ;;  %v8186_v41 = vld [vmem:[#allocation4 + $0xf4] sm:$0xf0] }
 0x1c4   : > { %v8173_v22 = vld [vmem:[#allocation4 + $0x94] sm:$0xf] }
 0x1c5   : > { %v2162_v8 = vor.u32 %v2160_v31, %v2159_v24  ;;  %v8181_v61 = vld [vmem:[#allocation4 + $0xd4] sm:$0xf]  ;;  %v8182_v32 = vld [vmem:[#allocation4 + $0xdc] sm:$0xf] }
 0x1c6   : > { %v6741_v54 = vld [vmem:[#allocation4 + $0xb0] sm:$0xf0] }
 0x1c7   : > { %3062 = vmatmul.bf16.vlgmr.msra.gmra.mxu1 %v6676_v15  ;;  %v6707_v15 = vld [vmem:[#allocation4 + $0x50] sm:$0xf]  ;;  %v2163_v50 = vsel %vm9617_vm5, %v2155_v1, %v2162_v8  ;;  %v6744_v62 = vor.u32 %v8173_v22, %v6741_v54  ;;  %v6773_v46 = vld [vmem:[#allocation4 + $0xf0] sm:$0xf0]  ;;  %v8290_v22 = vld [vmem:[%s11127_s3 + $0x238] sm:$0xff] }
 0x1c8   : > { %v6708_v7 = vor.u32 %v8169_v16, %v6707_v15  ;;  %v2182_v10 = vsel %vm9530_vm11, %v2163_v50, %v2181_v57  ;;  %v6779_v15 = vld [vmem:[#allocation4 + $0xd8] sm:$0xf]  ;;  %v6776_v2 = vor.u32 %v8181_v61, %v6773_v46  ;;  %v2218_v26 = vld [vmem:[#allocation4 + $0x110] sm:$0x33]  ;;  %4446 = vmatpush.bf16.msrb.mxu1 %v8290_v22  ;;  %v8289_v46 = vld [vmem:[%s11127_s3 + $0x230] sm:$0xff] }
 0x1c9   : > { %2183 = vst [vmem:[#allocation4 + $0x11c] sm:$0x3] %v2182_v10  ;;  %v6749_v18 = vld [vmem:[#allocation4 + $0xb8] sm:$0xf0]  ;;  %v6780_v4 = vor.u32 %v8186_v41, %v6779_v15  ;;  %v2454_v6 = vunpack.c.l.b16 %v2218_v26 }
 0x1ca   : > { %3128 = vmatmul.bf16.vlgmr.msra.gmra.mxu3 %v6684_v23  ;;  %v2117_v23 = vsel %vm9530_vm11, %v2098_v9, %v2116_v25  ;;  %v6752_v27 = vor.u32 %v8174_v55, %v6749_v18  ;;  %v6781_v14 = vld [vmem:[#allocation4 + $0xf8] sm:$0xf0] }
 0x1cb   : > { %2118 = vst [vmem:[#allocation4 + $0x118] sm:$0x3] %v2117_v23  ;;  %v6784_v5 = vor.u32 %v8182_v32, %v6781_v14  ;;  %v2494_v9 = vpack.c.b16 %v2454_v6, %v2454_v6  ;;  %v2455_v23 = vunpack.c.h.b16 %v2218_v26  ;;  %v8296_v26 = vld [vmem:[%s11127_s3 + $0x268] sm:$0xff] }
 0x1cc   : > { %4447 = vmatpush.bf16.msrb.mxu1 %v8289_v46  ;;  %v8304_v32 = vld [vmem:[%s11127_s3 + $0x2a8] sm:$0xff] }
 0x1cd   : > { %v2495_v39 = vpack.c.b16 %v2455_v23, %v2455_v23 }
 0x1cf   : > { %3095 = vmatmul.bf16.vlgmr.msra.gmra.mxu2 %v6680_v28  ;;  %v6740_v28 = vor.u32 %v8177_v52, %v6739_v47  ;;  %v8298_v47 = vld [vmem:[%s11127_s3 + $0x278] sm:$0xff] }
 0x1d0   : > { %4479 = vmatpush.bf16.msrb.mxu2 %v8298_v47  ;;  %v8295_v47 = vld [vmem:[%s11127_s3 + $0x260] sm:$0xff] }
 0x1d1   : > { %3161 = vmatmul.bf16.vlgmr.msrb.gmra.mxu0 %v6688_v20  ;;  %v6771_v20 = vld [vmem:[#allocation4 + $0xd0] sm:$0xf] }
 0x1d2   : > { %v6772_v30 = vor.u32 %v8185_v3, %v6771_v20  ;;  %v2219_v0 = vld [vmem:[#allocation4 + $0x118] sm:$0x33]  ;;  %v8297_v20 = vld [vmem:[%s11127_s3 + $0x270] sm:$0xff] }
 0x1d3   : > { %v2456_v38 = vunpack.c.l.b16 %v2219_v0  ;;  %v2457_v24 = vunpack.c.h.b16 %v2219_v0 }
 0x1d4   : > { %4480 = vmatpush.bf16.msrb.mxu2 %v8297_v20  ;;  %v8287_v20 = vld [vmem:[%s11127_s3 + $0x220] sm:$0xff] }
 0x1d5   : > { %v2496_v31 = vpack.c.b16 %v2456_v38, %v2456_v38  ;;  %v2497_v57 = vpack.c.b16 %v2457_v24, %v2457_v24 }
 0x1d7   : > { %3067 = vmatmul.bf16.gmra.mxu1 %v6708_v7 }
 0x1d8   : > { %4481 = vmatpush.bf16.msrb.mxu2 %v8296_v26 }
 0x1da   : > { %3133 = vmatmul.bf16.gmra.mxu3 %v6716_v51 }
 0x1dc   : > { %4482 = vmatpush.bf16.msrb.mxu2 %v8295_v47 }
 0x1df   : > { %3100 = vmatmul.bf16.gmra.mxu2 %v6712_v29 }
 0x1e1   : > { %3166 = vmatmul.bf16.gmra.mxu0 %v6720_v42 }
 0x1e7   : > { %3072 = vmatmul.bf16.gmra.mxu1 %v6740_v28 }
 0x1ea   : > { %3138 = vmatmul.bf16.gmra.mxu3 %v6748_v44  ;;  %v8306_v44 = vld [vmem:[%s11127_s3 + $0x2b8] sm:$0xff] }
 0x1eb   : > { %4512 = vmatpush.bf16.msrb.mxu3 %v8306_v44  ;;  %v8303_v44 = vld [vmem:[%s11127_s3 + $0x2a0] sm:$0xff] }
 0x1ef   : > { %3105 = vmatmul.bf16.gmra.mxu2 %v6744_v62 }
 0x1f1   : > { %3171 = vmatmul.bf16.gmra.mxu0 %v6752_v27 }
 0x1f4   : > { %v2931_v40 = vpop.f32.mrf.mxu1 }
 0x1f5   : > { %v2932_v34 = vadd.f32 %v9732_v63, %v2931_v40 }
 0x1f7   : > { %3077 = vmatmul.bf16.gmra.mxu1 %v6772_v30  ;;  %v8314_v30 = vld [vmem:[%s11127_s3 + $0x2f8] sm:$0xff] }
 0x1f8   : > { %4545 = vmatpush.bf16.msra.mxu0 %v8314_v30  ;;  %v8294_v30 = vld [vmem:[%s11127_s3 + $0x258] sm:$0xff] }
 0x1f9   : > { %4483 = vmatpush.bf16.msrb.mxu2 %v8294_v30 }
 0x1fa   : > { %3143 = vmatmul.bf16.gmra.mxu3 %v6780_v4  ;;  %v8305_v4 = vld [vmem:[%s11127_s3 + $0x2b0] sm:$0xff] }
 0x1fb   : > { %4513 = vmatpush.bf16.msrb.mxu3 %v8305_v4  ;;  %v8311_v4 = vld [vmem:[%s11127_s3 + $0x2e0] sm:$0xff] }
 0x1fc   : > { %v9727_v16 = vpop.f32.mrf.mxu1 }
 0x1fd   : > { %v2997_v33 = vpop.f32.mrf.mxu3 }
 0x1fe   : > { %v3030_v37 = vpop.f32.mrf.mxu0 }
 0x1ff   : > { %3110 = vmatmul.bf16.gmra.mxu2 %v6776_v2  ;;  %4514 = vmatpush.bf16.msrb.mxu3 %v8304_v32 }
 0x201   : > { %3176 = vmatmul.bf16.gmra.mxu0 %v6784_v5  ;;  %v8288_v5 = vld [vmem:[%s11127_s3 + $0x228] sm:$0xff] }
 0x202   : > { %v2964_v13 = vpop.f32.mrf.mxu2  ;;  %4448 = vmatpush.bf16.msrb.mxu1 %v8288_v5  ;;  %v9843_v5 = vld [vmem:[%s11128_s4 + $0x1] ss:$0 sm:$0xff] }
 0x203   : > { %v2965_v7 = vadd.f32 %v2964_v13, %v2932_v34  ;;  %4515 = vmatpush.bf16.msrb.mxu3 %v8303_v44 }
 0x204   : > { %v2936_v59 = vpop.f32.mrf.mxu1 }
 0x205   : > { %v2998_v25 = vadd.f32 %v2997_v33, %v2965_v7  ;;  %v9735_v17 = vpop.f32.mrf.mxu3  ;;  %v2937_v50 = vadd.f32 %v9732_v63, %v2936_v59 }
 0x206   : > { %v9737_v45 = vpop.f32.mrf.mxu0  ;;  %4449 = vmatpush.bf16.msrb.mxu1 %v8287_v20 }
 0x207   : > { %3082 = vmatmul.bf16.gmra.mxu1 %v2494_v9  ;;  %v3031_v41 = vadd.f32 %v3030_v37, %v2998_v25  ;;  %v8313_v37 = vld [vmem:[%s11127_s3 + $0x2f0] sm:$0xff] }
 0x208   : > { %4546 = vmatpush.bf16.msra.mxu0 %v8313_v37 }
 0x20a   : > { %v9739_v51 = vpop.f32.mrf.mxu2  ;;  %3148 = vmatmul.bf16.gmra.mxu3 %v2496_v31 }
 0x20c   : > { %v9741_v1 = vpop.f32.mrf.mxu1 }
 0x20d   : > { %v3002_v35 = vpop.f32.mrf.mxu3 }
 0x20e   : > { %v9743_v8 = vpop.f32.mrf.mxu0 }
 0x20f   : > { %3115 = vmatmul.bf16.gmra.mxu2 %v2495_v39 }
 0x211   : > { %3181 = vmatmul.bf16.gmra.mxu0 %v2497_v57 }
 0x212   : > { %v2969_v29 = vpop.f32.mrf.mxu2 }
 0x213   : > { %v2970_v53 = vadd.f32 %v2969_v29, %v2937_v50 }
 0x214   : > { %v2941_v36 = vpop.f32.mrf.mxu1 }
 0x215   : > { %v3003_v10 = vadd.f32 %v3002_v35, %v2970_v53  ;;  %v9746_v42 = vpop.f32.mrf.mxu3  ;;  %v2942_v62 = vadd.f32 %v9732_v63, %v2941_v36 }
 0x216   : > { %v9748_v52 = vpop.f32.mrf.mxu0 }
 0x217   : > { %v3036_v36 = vadd.f32 %v9743_v8, %v3003_v10  ;;  %v2934_v8 = vadd.f32 %v9732_v63, %v9727_v16 }
 0x21a   : > { %v9753_v28 = vpop.f32.mrf.mxu2 }
 0x21c   : > { %v9755_v43 = vpop.f32.mrf.mxu1 }
 0x21d   : > { %v3007_v49 = vpop.f32.mrf.mxu3 }
 0x21e   : > { %v9760_v54 = vpop.f32.mrf.mxu0 }
 0x222   : > { %v2974_v18 = vpop.f32.mrf.mxu2 }
 0x223   : > { %v2975_v55 = vadd.f32 %v2974_v18, %v2942_v62  ;;  %v2967_v18 = vadd.f32 %v9739_v51, %v2934_v8 }
 0x224   : > { %v2946_v27 = vpop.f32.mrf.mxu1 }
 0x225   : > { %v9766_v3 = vadd.f32 %v3007_v49, %v2975_v55  ;;  %v9768_v40 = vpop.f32.mrf.mxu3  ;;  %v2947_v34 = vadd.f32 %v9732_v63, %v2946_v27  ;;  %v8312_v49 = vld [vmem:[%s11127_s3 + $0x2e8] sm:$0xff]  ;;  %v3000_v16 = vadd.f32 %v9735_v17, %v2967_v18  ;;  %v9848_v17 = vld [vmem:[%s11128_s4 + $0x2] ss:$0 sm:$0xff] }
 0x226   : > { %v9776_v15 = vpop.f32.mrf.mxu0  ;;  %4547 = vmatpush.bf16.msra.mxu0 %v8312_v49  ;;  %v8301_v49 = vld [vmem:[%s11127_s3 + $0x290] sm:$0xff] }
 0x227   : > { %v3033_v37 = vadd.f32 %v9737_v45, %v3000_v16  ;;  %v9855_v45 = vadd.f32 %v9760_v54, %v9766_v3  ;;  %v8293_v54 = vld [vmem:[%s11127_s3 + $0x250] sm:$0xff]  ;;  %v8310_v3 = vld [vmem:[%s11127_s3 + $0x2d8] sm:$0xff] }
 0x228   : > { %4484 = vmatpush.bf16.msrb.mxu2 %v8293_v54 }
 0x22a   : > { %v9784_v61 = vpop.f32.mrf.mxu2  ;;  %4548 = vmatpush.bf16.msra.mxu0 %v8311_v4 }
 0x22c   : > { %v9786_v33 = vpop.f32.mrf.mxu1 }
 0x22d   : > { %v3012_v2 = vpop.f32.mrf.mxu3 }
 0x22e   : > { %v9788_v14 = vpop.f32.mrf.mxu0  ;;  %4549 = vmatpush.bf16.msra.mxu0 %v8310_v3 }
 0x232   : > { %v2979_v6 = vpop.f32.mrf.mxu2 }
 0x233   : > { %v2980_v0 = vadd.f32 %v2979_v6, %v2947_v34 }
 0x234   : > { %v2951_v13 = vpop.f32.mrf.mxu1 }
 0x235   : > { %v9803_v7 = vadd.f32 %v3012_v2, %v2980_v0  ;;  %v2952_v59 = vadd.f32 %v9732_v63, %v2951_v13  ;;  %v9806_v38 = vpop.f32.mrf.mxu3  ;;  %v8302_v13 = vld [vmem:[%s11127_s3 + $0x298] sm:$0xff] }
 0x236   : > { %v9808_v25 = vpop.f32.mrf.mxu0  ;;  %4516 = vmatpush.bf16.msrb.mxu3 %v8302_v13  ;;  %v8283_v13 = vld [vmem:[%s11127_s3 + $0x200] sm:$0xff] }
 0x23a   : > { %v9810_v9 = vpop.f32.mrf.mxu2  ;;  %4517 = vmatpush.bf16.msrb.mxu3 %v8301_v49  ;;  %v8299_v49 = vld [vmem:[%s11127_s3 + $0x280] sm:$0xff] }
 0x23c   : > { %v2953_v31 = vpop.f32.mrf.mxu1 }
 0x23d   : > { %v3017_v23 = vpop.f32.mrf.mxu3 }
 0x23e   : > { %v9812_v24 = vpop.f32.mrf.mxu0 }
 0x242   : > { %v2984_v35 = vpop.f32.mrf.mxu2 }
 0x243   : > { %v2985_v39 = vadd.f32 %v2984_v35, %v2952_v59  ;;  %v8286_v59 = vld [vmem:[%s11127_s3 + $0x218] sm:$0xff] }
 0x244   : > { %v3063_v57 = vpop.f32.mrf.mxu1  ;;  %4450 = vmatpush.bf16.msrb.mxu1 %v8286_v59  ;;  %v2944_v59 = vadd.f32 %v9732_v63, %v9755_v43 }
 0x245   : > { %v9814_v50 = vadd.f32 %v3017_v23, %v2985_v39  ;;  %v3019_v29 = vpop.f32.mrf.mxu3  ;;  %v3064_v27 = vadd.f32 %v3063_v57, %v3031_v41  ;;  %v2939_v57 = vadd.f32 %v9732_v63, %v9741_v1 }
 0x246   : > { %v3052_v53 = vpop.f32.mrf.mxu0 }
 0x247   : > { %v2972_v44 = vadd.f32 %v9753_v28, %v2939_v57  ;;  %v2977_v57 = vadd.f32 %v9784_v61, %v2944_v59 }
 0x24a   : > { %v2986_v22 = vpop.f32.mrf.mxu2 }
 0x24c   : > { %v3065_v62 = vpop.f32.mrf.mxu1 }
 0x24d   : > { %v3129_v10 = vpop.f32.mrf.mxu3  ;;  %v3066_v6 = vadd.f32 %v3065_v62, %v3033_v37  ;;  %v8285_v62 = vld [vmem:[%s11127_s3 + $0x210] sm:$0xff]  ;;  %v9886_v37 = vadd.f32 %v9788_v14, %v9803_v7 }
 0x24e   : > { %v3162_v55 = vpop.f32.mrf.mxu0  ;;  %4451 = vmatpush.bf16.msrb.mxu1 %v8285_v62 }
 0x252   : > { %v3096_v46 = vpop.f32.mrf.mxu2 }
 0x253   : > { %v3097_v2 = vadd.f32 %v3096_v46, %v3064_v27 }
 0x254   : > { %v3068_v51 = vpop.f32.mrf.mxu1 }
 0x255   : > { %v3130_v41 = vadd.f32 %v3129_v10, %v3097_v2  ;;  %v3131_v26 = vpop.f32.mrf.mxu3  ;;  %v3069_v8 = vadd.f32 %v3068_v51, %v3036_v36 }
 0x256   : > { %v3164_v34 = vpop.f32.mrf.mxu0 }
 0x257   : > { %v3163_v32 = vadd.f32 %v3162_v55, %v3130_v41  ;;  %v3005_v55 = vadd.f32 %v9746_v42, %v2972_v44 }
 0x259   : > { %v3186_v0 = vmax.f32 %v3163_v32, 0.0  ;;  %v3038_v36 = vadd.f32 %v9748_v52, %v3005_v55  ;;  %v8284_v32 = vld [vmem:[%s11127_s3 + $0x208] sm:$0xff]  ;;  %v8309_v52 = vld [vmem:[%s11127_s3 + $0x2d0] sm:$0xff] }
 0x25a   : > { %v3098_v31 = vpop.f32.mrf.mxu2  ;;  %4452 = vmatpush.bf16.msrb.mxu1 %v8284_v32  ;;  %4550 = vmatpush.bf16.msra.mxu0 %v8309_v52 }
 0x25b   : > { %v3197_v23 = vmul.f32 %v9843_v5, %v3186_v0  ;;  %v3099_v35 = vadd.f32 %v3098_v31, %v3066_v6  ;;  %v8300_v0 = vld [vmem:[%s11127_s3 + $0x288] sm:$0xff] }
 0x25c   : > { %v3070_v39 = vpop.f32.mrf.mxu1  ;;  %4518 = vmatpush.bf16.msrb.mxu3 %v8300_v0 }
 0x25d   : > { %v3208_v29 = vadd.f32 %v9848_v17, %v3197_v23  ;;  %v3132_v53 = vadd.f32 %v3131_v26, %v3099_v35  ;;  %v3134_v47 = vpop.f32.mrf.mxu3  ;;  %v3071_v26 = vadd.f32 %v3070_v39, %v3038_v36 }
 0x25e   : > { %v3167_v22 = vpop.f32.mrf.mxu0  ;;  %4453 = vmatpush.bf16.msrb.mxu1 %v8283_v13 }
 0x25f   : > { %3217 = vst [vmem:[#allocation3 + $0x8] sm:$0xff] %v3208_v29  ;;  %v3165_v1 = vadd.f32 %v3164_v34, %v3132_v53  ;;  %v8292_v34 = vld [vmem:[%s11127_s3 + $0x248] sm:$0xff]  ;;  %v8291_v53 = vld [vmem:[%s11127_s3 + $0x240] sm:$0xff] }
 0x260   : > { %4485 = vmatpush.bf16.msrb.mxu2 %v8292_v34  ;;  %4519 = vmatpush.bf16.msrb.mxu3 %v8299_v49 }
 0x261   : > { %v3187_v10 = vmax.f32 %v3165_v1, 0.0  ;;  %v3010_v1 = vadd.f32 %v9768_v40, %v2977_v57 }
 0x262   : > { %v3101_v18 = vpop.f32.mrf.mxu2 }
 0x263   : > { %v3198_v27 = vmul.f32 %v9843_v5, %v3187_v10  ;;  %v3102_v20 = vadd.f32 %v3101_v18, %v3069_v8 }
 0x264   : > { %v3073_v28 = vpop.f32.mrf.mxu1  ;;  %4486 = vmatpush.bf16.msrb.mxu2 %v8291_v53 }
 0x265   : > { %v3209_v30 = vadd.f32 %v9848_v17, %v3198_v27  ;;  %v3135_v4 = vadd.f32 %v3134_v47, %v3102_v20  ;;  %v3136_v46 = vpop.f32.mrf.mxu3  ;;  %v8308_v47 = vld [vmem:[%s11127_s3 + $0x2c8] sm:$0xff]  ;;  %v3074_v61 = vadd.f32 %v3073_v28, %v9855_v45  ;;  %v3043_v45 = vadd.f32 %v9776_v15, %v3010_v1 }
 0x266   : > { %v3226_v16 = vld [vmem:[#allocation3 + $0x5] sm:$0xff]  ;;  %v3169_v41 = vpop.f32.mrf.mxu0  ;;  %4551 = vmatpush.bf16.msra.mxu0 %v8308_v47 }
 0x267   : > { %v9880_v2 = vpack.c.bf16 %v3226_v16, %v3226_v16  ;;  %3218 = vst [vmem:[#allocation3 + $0x10] sm:$0xff] %v3209_v30  ;;  %v3168_v51 = vadd.f32 %v3167_v22, %v3135_v4  ;;  %v2949_v22 = vadd.f32 %v9732_v63, %v9786_v33 }
 0x269   : > { %3246 = vst [vmem:[#allocation4] sm:$0xf] %v9880_v2  ;;  %v3188_v42 = vmax.f32 %v3168_v51, 0.0  ;;  %v2982_v18 = vadd.f32 %v9810_v9, %v2949_v22  ;;  %v7041_v15 = vrot.slane %v9880_v2, 9  ;;  %v9948_v52 = vshrl.u32 %v9880_v2, 16 }
 0x26a   : > { %v3103_v6 = vpop.f32.mrf.mxu2 }
 0x26b   : > { %v3199_v14 = vmul.f32 %v9843_v5, %v3188_v42  ;;  %v3104_v7 = vadd.f32 %v3103_v6, %v3071_v26  ;;  %v9931_v63 = vadd.f32 %v9806_v38, %v2982_v18  ;;  %v8307_v26 = vld [vmem:[%s11127_s3 + $0x2c0] sm:$0xff]  ;;  %v8330_v38 = vld [vmem:[%s11127_s3 + $0x378] sm:$0xff] }
 0x26c   : > { %v3075_v31 = vpop.f32.mrf.mxu1  ;;  %4552 = vmatpush.bf16.msra.mxu0 %v8307_v26  ;;  %4611 = vmatpush.bf16.msra.mxu2 %v8330_v38 }
 0x26d   : > { %v3210_v23 = vadd.f32 %v9848_v17, %v3199_v14  ;;  %v3137_v35 = vadd.f32 %v3136_v46, %v3104_v7  ;;  %v3139_v39 = vpop.f32.mrf.mxu3  ;;  %v3076_v33 = vadd.f32 %v3075_v31, %v3043_v45  ;;  %v3260_v31 = vrot.slane %v9948_v52, 4 }
 0x26e   : > { %v3227_v29 = vld [vmem:[#allocation3 + $0xd] sm:$0xff]  ;;  %v3172_v3 = vpop.f32.mrf.mxu0 }
 0x26f   : > { %v9914_v54 = vpack.c.bf16 %v3227_v29, %v3227_v29  ;;  %3219 = vst [vmem:[#allocation3 + $0x18] sm:$0xff] %v3210_v23  ;;  %v3170_v43 = vadd.f32 %v3169_v41, %v3137_v35  ;;  %v9936_v41 = vadd.f32 %v9812_v24, %v9814_v50  ;;  %v9951_v24 = vshll.u32 %v9880_v2, 16 }
 0x270   : > { %v7176_v16 = vld [vmem:[#allocation4] sm:$0xf] }
 0x271   : > { %3247 = vst [vmem:[#allocation4 + $0x20] sm:$0xf] %v9914_v54  ;;  %v3189_v44 = vmax.f32 %v3170_v43, 0.0  ;;  %v3377_v32 = vrot.slane %v9914_v54, 5  ;;  %v9955_v0 = vshll.u32 %v9914_v54, 16  ;;  %v9958_v14 = vshrl.u32 %v9914_v54, 16 }
 0x272   : > { %v3106_v62 = vpop.f32.mrf.mxu2  ;;  %v3263_v23 = vrot.slane %v9951_v24, 5 }
 0x273   : > { %v3200_v8 = vmul.f32 %v9843_v5, %v3189_v44  ;;  %v3107_v10 = vadd.f32 %v3106_v62, %v3074_v61  ;;  %v3378_v13 = vsel %vm9270_vm6, %v7041_v15, %v3377_v32  ;;  %v3379_v59 = vrot.slane %v3377_v32, 4  ;;  %v8322_v61 = vld [vmem:[%s11127_s3 + $0x338] sm:$0xff] }
 0x274   : > { %v3078_v55 = vpop.f32.mrf.mxu1  ;;  %3410 = vst [vmem:[#allocation4 + $0x8] sm:$0xf] %v3378_v13  ;;  %v3269_v53 = vrot.slane %v9955_v0, 5  ;;  %v3264_v43 = vor.u32 %v3263_v23, %v3260_v31  ;;  %4578 = vmatpush.bf16.msra.mxu1 %v8322_v61  ;;  %v3426_v45 = vrot.slane %v9955_v0, 6  ;;  %v3048_v13 = vadd.f32 %v9808_v25, %v9931_v63  ;;  %v8329_v25 = vld [vmem:[%s11127_s3 + $0x370] sm:$0xff]  ;;  %v8346_v63 = vld [vmem:[%s11127_s3 + $0x3f8] sm:$0xff] }
 0x275   : > { %v3211_v27 = vadd.f32 %v9848_v17, %v3200_v8  ;;  %v3140_v20 = vadd.f32 %v3139_v39, %v3107_v10  ;;  %v3141_v30 = vpop.f32.mrf.mxu3  ;;  %v3079_v39 = vadd.f32 %v3078_v55, %v9886_v37  ;;  %v8338_v37 = vld [vmem:[%s11127_s3 + $0x3b8] sm:$0xff]  ;;  %v3421_v8 = vrot.slane %v9948_v52, 5  ;;  %4612 = vmatpush.bf16.msra.mxu2 %v8329_v25  ;;  %4677 = vmatpush.bf16.msrb.mxu0 %v8346_v63  ;;  %v8320_v63 = vld [vmem:[%s11127_s3 + $0x328] sm:$0xff] }
 0x276   : > { %v3228_v4 = vld [vmem:[#allocation3 + $0x15] sm:$0xff]  ;;  %v3174_v46 = vpop.f32.mrf.mxu0  ;;  %v3422_v10 = vrot.slane %v9951_v24, 6  ;;  %v3265_v18 = vrot.slane %v3264_v43, 4  ;;  %4644 = vmatpush.bf16.msra.mxu3 %v8338_v37 }
 0x277   : > { %v9928_v28 = vpack.c.bf16 %v3228_v4, %v3228_v4  ;;  %3220 = vst [vmem:[#allocation3 + $0x20] sm:$0xff] %v3211_v27  ;;  %v3173_v40 = vadd.f32 %v3172_v3, %v3140_v20  ;;  %v3273_v3 = vrot.slane %v9958_v14, 4  ;;  %v3425_v20 = vrot.slane %v9958_v14, 5 }
 0x278   : > { %v8255_v36 = vld [vmem:[#allocation4 + $0x1c] sm:$0xf0]  ;;  %v3423_v4 = vor.u32 %v3422_v10, %v3421_v8 }
 0x279   : > { %3248 = vst [vmem:[#allocation4 + $0x40] sm:$0xf] %v9928_v28  ;;  %v3190_v9 = vmax.f32 %v3173_v40, 0.0  ;;  %v7177_v51 = vor.u32 %v8255_v36, %v7176_v16  ;;  %v3380_v34 = vrot.slane %v9928_v28, 5  ;;  %v9973_v49 = vshll.u32 %v9928_v28, 16 }
 0x27a   : > { %v3108_v42 = vpop.f32.mrf.mxu2  ;;  %v9982_v62 = vshrl.u32 %v9928_v28, 16  ;;  %v3274_v55 = vor.u32 %v3273_v3, %v3269_v53  ;;  %v3424_v26 = vrot.slane %v3423_v4, 4  ;;  %v3427_v38 = vor.u32 %v3426_v45, %v3425_v20 }
 0x27b   : > { %v3201_v50 = vmul.f32 %v9843_v5, %v3190_v9  ;;  %v3109_v6 = vadd.f32 %v3108_v42, %v3076_v33  ;;  %4454 = vmatmul.bf16.vlgmr.msrb.gmra.mxu1 %v7177_v51  ;;  %v3381_v47 = vsel %vm9270_vm6, %v3379_v59, %v3380_v34  ;;  %v3279_v27 = vrot.slane %v9973_v49, 5 }
 0x27c   : > { %v3080_v7 = vpop.f32.mrf.mxu1  ;;  %3411 = vst [vmem:[#allocation4 + $0x28] sm:$0xf] %v3381_v47  ;;  %v3430_v40 = vrot.slane %v9982_v62, 5  ;;  %v3270_v33 = vsel %vm9315_vm7, %v3265_v18, %v3269_v53  ;;  %v3275_v16 = vrot.slane %v3274_v55, 4  ;;  %v3431_v36 = vrot.slane %v9973_v49, 6 }
 0x27d   : > { %v3212_v35 = vadd.f32 %v9848_v17, %v3201_v50  ;;  %v3142_v57 = vadd.f32 %v3141_v30, %v3109_v6  ;;  %v3144_v29 = vpop.f32.mrf.mxu3  ;;  %3355 = vst [vmem:[#allocation4 + $0x4] sm:$0xf] %v3270_v33  ;;  %v3428_v23 = vsel %vm9344_vm8, %v3424_v26, %v3427_v38  ;;  %v3081_v47 = vadd.f32 %v3080_v7, %v3048_v13  ;;  %v8337_v7 = vld [vmem:[%s11127_s3 + $0x3b0] sm:$0xff] }
 0x27e   : > { %v3229_v44 = vld [vmem:[#allocation3 + $0x1d] sm:$0xff]  ;;  %v3177_v22 = vpop.f32.mrf.mxu0  ;;  %v3280_v32 = vsel %vm9315_vm7, %v3275_v16, %v3279_v27  ;;  %v10002_v50 = vor.u32 %v3431_v36, %v3430_v40  ;;  %3474 = vst [vmem:[#allocation4 + $0xc] sm:$0xf] %v3428_v23  ;;  %v3283_v8 = vrot.slane %v9982_v62, 4  ;;  %4645 = vmatpush.bf16.msra.mxu3 %v8337_v7 }
 0x27f   : > { %3221 = vst [vmem:[#allocation3 + $0x28] sm:$0xff] %v3212_v35  ;;  %v3175_v1 = vadd.f32 %v3174_v46, %v3142_v57  ;;  %v9993_v9 = vpack.c.bf16 %v3229_v44, %v3229_v44  ;;  %v3429_v57 = vrot.slane %v3427_v38, 4 }
 0x280   : > { %3356 = vst [vmem:[#allocation4 + $0x24] sm:$0xf] %v3280_v32  ;;  %v7208_v18 = vld [vmem:[#allocation4 + $0x40] sm:$0xf]  ;;  %v3284_v33 = vor.u32 %v3283_v8, %v3279_v27 }
 0x281   : > { %v3191_v30 = vmax.f32 %v3175_v1, 0.0  ;;  %3249 = vst [vmem:[#allocation4 + $0x60] sm:$0xf] %v9993_v9  ;;  %v3433_v44 = vsel %vm9344_vm8, %v3429_v57, %v10002_v50  ;;  %v3383_v1 = vrot.slane %v9993_v9, 5  ;;  %v10037_v20 = vshll.u32 %v9993_v9, 16 }
 0x282   : > { %v3111_v46 = vpop.f32.mrf.mxu2  ;;  %3475 = vst [vmem:[#allocation4 + $0x2c] sm:$0xf] %v3433_v44  ;;  %v3285_v27 = vrot.slane %v3284_v33, 4 }
 0x283   : > { %v3202_v51 = vmul.f32 %v9843_v5, %v3191_v30  ;;  %v3112_v15 = vadd.f32 %v3111_v46, %v3079_v39  ;;  %v7184_v39 = vld [vmem:[#allocation4 + $0x8] sm:$0xf]  ;;  %v10040_v30 = vshrl.u32 %v9993_v9, 16  ;;  %v3385_v46 = vrot.slane %v3383_v1, 4 }
 0x284   : > { %v9996_v42 = vpop.f32.mrf.mxu1  ;;  %v8256_v37 = vld [vmem:[#allocation4 + $0x24] sm:$0xf0]  ;;  %v8251_v4 = vld [vmem:[#allocation4 + $0x4] sm:$0xf]  ;;  %v3289_v26 = vrot.slane %v10037_v20, 5 }
 0x285   : > { %v3213_v6 = vadd.f32 %v9848_v17, %v3202_v51  ;;  %v3145_v59 = vadd.f32 %v3144_v29, %v3112_v15  ;;  %v3146_v31 = vpop.f32.mrf.mxu3  ;;  %v3382_v29 = vrot.slane %v3380_v34, 4  ;;  %v7185_v61 = vor.u32 %v8256_v37, %v7184_v39  ;;  %v8328_v34 = vld [vmem:[%s11127_s3 + $0x368] sm:$0xff]  ;;  %v8252_v33 = vld [vmem:[#allocation4 + $0xc] sm:$0xf] }
 0x286   : > { %v3230_v35 = vld [vmem:[#allocation3 + $0x25] sm:$0xff]  ;;  %v3179_v3 = vpop.f32.mrf.mxu0  ;;  %v3293_v38 = vrot.slane %v10040_v30, 4  ;;  %v3290_v44 = vsel %vm9315_vm7, %v3285_v27, %v3289_v26  ;;  %4613 = vmatpush.bf16.msra.mxu2 %v8328_v34  ;;  %v3434_v34 = vrot.slane %v10002_v50, 4 }
 0x287   : > { %v10010_v53 = vpack.c.bf16 %v3230_v35, %v3230_v35  ;;  %3222 = vst [vmem:[#allocation3 + $0x30] sm:$0xff] %v3213_v6  ;;  %v3178_v43 = vadd.f32 %v3177_v22, %v3145_v59  ;;  %v8321_v22 = vld [vmem:[%s11127_s3 + $0x330] sm:$0xff]  ;;  %4520 = vmatmul.bf16.vlgmr.msrb.gmra.mxu3 %v7185_v61  ;;  %v3384_v40 = vsel %vm9270_vm6, %v3382_v29, %v3383_v1  ;;  %v8336_v39 = vld [vmem:[%s11127_s3 + $0x3a8] sm:$0xff]  ;;  %v8327_v1 = vld [vmem:[%s11127_s3 + $0x360] sm:$0xff] }
 0x288   : > { %4579 = vmatpush.bf16.msra.mxu1 %v8321_v22  ;;  %v8263_v15 = vld [vmem:[#allocation4 + $0x5c] sm:$0xf0]  ;;  %3412 = vst [vmem:[#allocation4 + $0x48] sm:$0xf] %v3384_v40  ;;  %v7178_v32 = vld [vmem:[#allocation4 + $0x20] sm:$0xf0]  ;;  %v3294_v25 = vor.u32 %v3293_v38, %v3289_v26  ;;  %v3084_v61 = vadd.f32 %v9996_v42, %v9936_v41  ;;  %4646 = vmatpush.bf16.msra.mxu3 %v8336_v39 }
 0x289   : > { %3250 = vst [vmem:[#allocation4 + $0x80] sm:$0xf] %v10010_v53  ;;  %v3192_v10 = vmax.f32 %v3178_v43, 0.0  ;;  %v3386_v55 = vrot.slane %v10010_v53, 5  ;;  %v10047_v16 = vshll.u32 %v10010_v53, 16  ;;  %v7209_v13 = vor.u32 %v8263_v15, %v7208_v18  ;;  %v8345_v35 = vld [vmem:[%s11127_s3 + $0x3f0] sm:$0xff] }
 0x28a   : > { %v3113_v45 = vpop.f32.mrf.mxu2  ;;  %v10070_v7 = vshrl.u32 %v10010_v53, 16  ;;  %v3436_v41 = vrot.slane %v10037_v20, 6  ;;  %4678 = vmatpush.bf16.msrb.mxu0 %v8345_v35  ;;  %v8344_v18 = vld [vmem:[%s11127_s3 + $0x3e8] sm:$0xff]  ;;  %3357 = vst [vmem:[#allocation4 + $0x44] sm:$0xf] %v3290_v44  ;;  %v8335_v40 = vld [vmem:[%s11127_s3 + $0x3a0] sm:$0xff]  ;;  %4614 = vmatpush.bf16.msra.mxu2 %v8327_v1 }
 0x28b   : > { %v3203_v36 = vmul.f32 %v9843_v5, %v3192_v10  ;;  %v3114_v51 = vadd.f32 %v3113_v45, %v3081_v47  ;;  %v3387_v59 = vsel %vm9270_vm6, %v3385_v46, %v3386_v55  ;;  %v3299_v23 = vrot.slane %v10047_v16, 5  ;;  %4459 = vmatmul.bf16.gmra.mxu1 %v7209_v13  ;;  %v8343_v1 = vld [vmem:[%s11127_s3 + $0x3e0] sm:$0xff] }
 0x28c   : > { %v3085_v6 = vpop.f32.mrf.mxu1  ;;  %v7181_v47 = vor.u32 %v8251_v4, %v7178_v32  ;;  %3413 = vst [vmem:[#allocation4 + $0x68] sm:$0xf] %v3387_v59  ;;  %v3295_v10 = vrot.slane %v3294_v25, 4  ;;  %v3441_v42 = vrot.slane %v10047_v16, 6  ;;  %v3440_v4 = vrot.slane %v10070_v7, 5  ;;  %4580 = vmatpush.bf16.msra.mxu1 %v8320_v63  ;;  %4647 = vmatpush.bf16.msra.mxu3 %v8335_v40  ;;  %v8334_v40 = vld [vmem:[%s11127_s3 + $0x398] sm:$0xff] }
 0x28d   : > { %v3214_v57 = vadd.f32 %v9848_v17, %v3203_v36  ;;  %v3147_v43 = vadd.f32 %v3146_v31, %v3114_v51  ;;  %v3149_v37 = vpop.f32.mrf.mxu3  ;;  %v3435_v31 = vrot.slane %v10040_v30, 5  ;;  %v7186_v36 = vld [vmem:[#allocation4 + $0x28] sm:$0xf0]  ;;  %v3303_v50 = vrot.slane %v10070_v7, 4 }
 0x28e   : > { %v3231_v29 = vld [vmem:[#allocation3 + $0x2d] sm:$0xff]  ;;  %4487 = vmatmul.bf16.vlgmr.msrb.gmra.mxu2 %v7181_v47  ;;  %v3182_v8 = vpop.f32.mrf.mxu0  ;;  %v3300_v51 = vsel %vm9315_vm7, %v3295_v10, %v3299_v23  ;;  %v7189_v26 = vor.u32 %v8252_v33, %v7186_v36  ;;  %v10091_v32 = vor.u32 %v3441_v42, %v3440_v4  ;;  %4679 = vmatpush.bf16.msrb.mxu0 %v8344_v18 }
 0x28f   : > { %3223 = vst [vmem:[#allocation3 + $0x38] sm:$0xff] %v3214_v57  ;;  %v3180_v22 = vadd.f32 %v3179_v3, %v3147_v43  ;;  %v10083_v45 = vpack.c.bf16 %v3231_v29, %v3231_v29  ;;  %v3388_v3 = vrot.slane %v3386_v55, 4  ;;  %v3437_v15 = vor.u32 %v3436_v41, %v3435_v31  ;;  %v7216_v27 = vld [vmem:[#allocation4 + $0x48] sm:$0xf]  ;;  %v8319_v31 = vld [vmem:[%s11127_s3 + $0x320] sm:$0xff] }
 0x290   : > { %3358 = vst [vmem:[#allocation4 + $0x64] sm:$0xf] %v3300_v51  ;;  %4553 = vmatmul.bf16.vlgmr.msra.gmra.mxu0 %v7189_v26  ;;  %v3304_v43 = vor.u32 %v3303_v50, %v3299_v23  ;;  %v8326_v23 = vld [vmem:[%s11127_s3 + $0x358] sm:$0xff]  ;;  %4581 = vmatpush.bf16.msra.mxu1 %v8319_v31  ;;  %v7240_v36 = vld [vmem:[#allocation4 + $0x80] sm:$0xf] }
 0x291   : > { %v3193_v46 = vmax.f32 %v3180_v22, 0.0  ;;  %v3389_v55 = vrot.slane %v10083_v45, 5  ;;  %v10095_v6 = vshll.u32 %v10083_v45, 16  ;;  %v3438_v35 = vsel %vm9344_vm8, %v3434_v34, %v3437_v15  ;;  %3251 = vst [vmem:[#allocation4 + $0xa0] sm:$0xf] %v10083_v45  ;;  %4615 = vmatpush.bf16.msra.mxu2 %v8326_v23  ;;  %4648 = vmatpush.bf16.msra.mxu3 %v8334_v40 }
 0x292   : > { %v3116_v38 = vpop.f32.mrf.mxu2  ;;  %v3439_v39 = vrot.slane %v3437_v15, 4  ;;  %3476 = vst [vmem:[#allocation4 + $0x4c] sm:$0xf] %v3438_v35  ;;  %v3305_v10 = vrot.slane %v3304_v43, 4  ;;  %v10118_v41 = vshrl.u32 %v10083_v45, 16  ;;  %v3444_v15 = vrot.slane %v10091_v32, 4  ;;  %4680 = vmatpush.bf16.msrb.mxu0 %v8343_v1 }
 0x293   : > { %v3204_v13 = vmul.f32 %v9843_v5, %v3193_v46  ;;  %v3117_v59 = vadd.f32 %v3116_v38, %v3084_v61  ;;  %v8264_v57 = vld [vmem:[#allocation4 + $0x64] sm:$0xf0]  ;;  %v3390_v47 = vsel %vm9270_vm6, %v3388_v3, %v3389_v55  ;;  %v3309_v25 = vrot.slane %v10095_v6, 5  ;;  %v8259_v33 = vld [vmem:[#allocation4 + $0x44] sm:$0xf] }
 0x294   : > { %v3443_v44 = vsel %vm9344_vm8, %v3439_v39, %v10091_v32  ;;  %3414 = vst [vmem:[#allocation4 + $0x88] sm:$0xf] %v3390_v47  ;;  %v3391_v4 = vrot.slane %v3389_v55, 4  ;;  %v3446_v3 = vrot.slane %v10095_v6, 6  ;;  %v8318_v46 = vld [vmem:[%s11127_s3 + $0x318] sm:$0xff]  ;;  %v3445_v50 = vrot.slane %v10118_v41, 5 }
 0x295   : > { %v3215_v63 = vadd.f32 %v9848_v17, %v3204_v13  ;;  %v3150_v29 = vadd.f32 %v3149_v37, %v3117_v59  ;;  %v3151_v61 = vpop.f32.mrf.mxu3  ;;  %v7217_v37 = vor.u32 %v8264_v57, %v7216_v27  ;;  %3477 = vst [vmem:[#allocation4 + $0x6c] sm:$0xf] %v3443_v44  ;;  %v3310_v51 = vsel %vm9315_vm7, %v3305_v10, %v3309_v25 }
 0x296   : > { %v3232_v22 = vld [vmem:[#allocation3 + $0x35] sm:$0xff]  ;;  %v3184_v34 = vpop.f32.mrf.mxu0  ;;  %3359 = vst [vmem:[#allocation4 + $0x84] sm:$0xf] %v3310_v51  ;;  %4582 = vmatpush.bf16.msra.mxu1 %v8318_v46 }
 0x297   : > { %v10120_v42 = vpack.c.bf16 %v3232_v22, %v3232_v22  ;;  %3224 = vst [vmem:[#allocation3 + $0x40] sm:$0xff] %v3215_v63  ;;  %v3183_v18 = vadd.f32 %v3182_v8, %v3150_v29  ;;  %v3313_v8 = vrot.slane %v10118_v41, 4  ;;  %v7210_v38 = vld [vmem:[#allocation4 + $0x60] sm:$0xf0]  ;;  %4525 = vmatmul.bf16.gmra.mxu3 %v7217_v37  ;;  %v3447_v63 = vor.u32 %v3446_v3, %v3445_v50 }
 0x298   : > { %v7213_v13 = vor.u32 %v8259_v33, %v7210_v38  ;;  %v8271_v27 = vld [vmem:[#allocation4 + $0x9c] sm:$0xf0] }
 0x299   : > { %3252 = vst [vmem:[#allocation4 + $0xc0] sm:$0xf] %v10120_v42  ;;  %v3194_v26 = vmax.f32 %v3183_v18, 0.0  ;;  %v3392_v55 = vrot.slane %v10120_v42, 5  ;;  %v3314_v35 = vor.u32 %v3313_v8, %v3309_v25  ;;  %v10137_v39 = vshll.u32 %v10120_v42, 16 }
 0x29a   : > { %v3118_v59 = vpop.f32.mrf.mxu2  ;;  %v10140_v32 = vshrl.u32 %v10120_v42, 16  ;;  %v7241_v47 = vor.u32 %v8271_v27, %v7240_v36  ;;  %v3448_v31 = vsel %vm9344_vm8, %v3444_v15, %v3447_v63  ;;  %v8260_v37 = vld [vmem:[#allocation4 + $0x4c] sm:$0xf]  ;;  %v3449_v34 = vrot.slane %v3447_v63, 4 }
 0x29b   : > { %v3205_v57 = vmul.f32 %v9843_v5, %v3194_v26  ;;  %v3393_v43 = vsel %vm9270_vm6, %v3391_v4, %v3392_v55  ;;  %v3315_v29 = vrot.slane %v3314_v35, 4  ;;  %v3319_v61 = vrot.slane %v10137_v39, 5  ;;  %3478 = vst [vmem:[#allocation4 + $0x8c] sm:$0xf] %v3448_v31  ;;  %v7248_v59 = vld [vmem:[#allocation4 + $0x88] sm:$0xf] }
 0x29c   : > { %3415 = vst [vmem:[#allocation4 + $0xa8] sm:$0xf] %v3393_v43  ;;  %v7218_v44 = vld [vmem:[#allocation4 + $0x68] sm:$0xf0]  ;;  %v3450_v23 = vrot.slane %v10140_v32, 5  ;;  %4464 = vmatmul.bf16.gmra.mxu1 %v7241_v47  ;;  %v3451_v22 = vrot.slane %v10137_v39, 6 }
 0x29d   : > { %v3216_v25 = vadd.f32 %v9848_v17, %v3205_v57  ;;  %v3320_v5 = vsel %vm9315_vm7, %v3315_v29, %v3319_v61  ;;  %v3323_v17 = vrot.slane %v10140_v32, 4  ;;  %v7221_v18 = vor.u32 %v8260_v37, %v7218_v44  ;;  %v8342_v35 = vld [vmem:[%s11127_s3 + $0x3d8] sm:$0xff]  ;;  %v8333_v57 = vld [vmem:[%s11127_s3 + $0x390] sm:$0xff] }
 0x29e   : > { %v3233_v1 = vld [vmem:[#allocation3 + $0x3d] sm:$0xff]  ;;  %4492 = vmatmul.bf16.gmra.mxu2 %v7213_v13  ;;  %3360 = vst [vmem:[#allocation4 + $0xa4] sm:$0xf] %v3320_v5  ;;  %v3452_v4 = vor.u32 %v3451_v22, %v3450_v23  ;;  %v3394_v3 = vrot.slane %v3392_v55, 4  ;;  %v8325_v13 = vld [vmem:[%s11127_s3 + $0x350] sm:$0xff]  ;;  %4681 = vmatpush.bf16.msrb.mxu0 %v8342_v35 }
 0x29f   : > { %3225 = vst [vmem:[#allocation3 + $0x48] sm:$0x7] %v3216_v25  ;;  %v10153_v10 = vpack.c.bf16 %v3233_v1, %v3233_v1  ;;  %v3324_v46 = vor.u32 %v3323_v17, %v3319_v61  ;;  %4616 = vmatpush.bf16.msra.mxu2 %v8325_v13  ;;  %v8317_v29 = vld [vmem:[%s11127_s3 + $0x310] sm:$0xff]  ;;  %v8324_v61 = vld [vmem:[%s11127_s3 + $0x348] sm:$0xff]  ;;  %4649 = vmatpush.bf16.msra.mxu3 %v8333_v57 }
 0x2a0   : > { %v3453_v36 = vsel %vm9344_vm8, %v3449_v34, %v3452_v4  ;;  %4558 = vmatmul.bf16.gmra.mxu0 %v7221_v18  ;;  %v3254_v1 = vld [vmem:[#allocation4 + $0x100] sm:$0x3]  ;;  %v8267_v22 = vld [vmem:[#allocation4 + $0x84] sm:$0xf]  ;;  %v3454_v18 = vrot.slane %v3452_v4, 4  ;;  %4583 = vmatpush.bf16.msra.mxu1 %v8317_v29 }
 0x2a1   : > { %3253 = vst [vmem:[#allocation4 + $0xe0] sm:$0xf] %v10153_v10  ;;  %v3395_v40 = vrot.slane %v10153_v10, 5  ;;  %v10159_v33 = vshll.u32 %v10153_v10, 16  ;;  %v10164_v51 = vshrl.u32 %v10153_v10, 16  ;;  %v3325_v50 = vrot.slane %v3324_v46, 4 }
 0x2a2   : > { %3479 = vst [vmem:[#allocation4 + $0xac] sm:$0xf] %v3453_v36  ;;  %v8341_v5 = vld [vmem:[%s11127_s3 + $0x3d0] sm:$0xff] }
 0x2a3   : > { %v8272_v8 = vld [vmem:[#allocation4 + $0xa4] sm:$0xf0]  ;;  %v3396_v15 = vsel %vm9270_vm6, %v3394_v3, %v3395_v40  ;;  %v3329_v26 = vrot.slane %v10159_v33, 5  ;;  %v3333_v38 = vrot.slane %v10164_v51, 4  ;;  %v3455_v55 = vrot.slane %v10164_v51, 5  ;;  %4617 = vmatpush.bf16.msra.mxu2 %v8324_v61  ;;  %4682 = vmatpush.bf16.msrb.mxu0 %v8341_v5 }
 0x2a4   : > { %3416 = vst [vmem:[#allocation4 + $0xc8] sm:$0xf] %v3396_v15  ;;  %v3456_v27 = vrot.slane %v10159_v33, 6  ;;  %v7249_v43 = vor.u32 %v8272_v8, %v7248_v59  ;;  %v3397_v17 = vrot.slane %v3395_v40, 4  ;;  %v7272_v3 = vld [vmem:[#allocation4 + $0xc0] sm:$0xf] }
 0x2a5   : > { %v3330_v63 = vsel %vm9315_vm7, %v3325_v50, %v3329_v26  ;;  %v7242_v44 = vld [vmem:[#allocation4 + $0xa0] sm:$0xf0]  ;;  %v3334_v31 = vor.u32 %v3333_v38, %v3329_v26  ;;  %v3418_v40 = vld [vmem:[#allocation4 + $0x108] sm:$0x3]  ;;  %v8332_v26 = vld [vmem:[%s11127_s3 + $0x388] sm:$0xff] }
 0x2a6   : > { %v3234_v47 = vld [vmem:[#allocation3 + $0x45] sm:$0xff]  ;;  %3361 = vst [vmem:[#allocation4 + $0xc4] sm:$0xf] %v3330_v63  ;;  %v3457_v23 = vor.u32 %v3456_v27, %v3455_v55  ;;  %v7245_v34 = vor.u32 %v8267_v22, %v7242_v44  ;;  %4650 = vmatpush.bf16.msra.mxu3 %v8332_v26  ;;  %v3490_v26 = vrot.slane %v9928_v28, 6 }
 0x2a7   : > { %v10189_v25 = vpack.c.bf16 %v3234_v47, %v3234_v47  ;;  %4530 = vmatmul.bf16.gmra.mxu3 %v7249_v43  ;;  %v8316_v38 = vld [vmem:[%s11127_s3 + $0x308] sm:$0xff]  ;;  %v3335_v59 = vrot.slane %v3334_v31, 4 }
 0x2a8   : > { %v8279_v37 = vld [vmem:[#allocation4 + $0xdc] sm:$0xf0]  ;;  %v3458_v50 = vsel %vm9344_vm8, %v3454_v18, %v3457_v23  ;;  %4584 = vmatpush.bf16.msra.mxu1 %v8316_v38  ;;  %v3459_v44 = vrot.slane %v3457_v23, 4  ;;  %v3363_v18 = vld [vmem:[#allocation4 + $0x104] sm:$0x3]  ;;  %v8323_v38 = vld [vmem:[%s11127_s3 + $0x340] sm:$0xff] }
 0x2a9   : > { %v3398_v46 = vrot.slane %v10189_v25, 5  ;;  %v10196_v36 = vshll.u32 %v10189_v25, 16  ;;  %v10199_v8 = vshrl.u32 %v10189_v25, 16  ;;  %v7273_v15 = vor.u32 %v8279_v37, %v7272_v3  ;;  %3480 = vst [vmem:[#allocation4 + $0xcc] sm:$0xf] %v3458_v50  ;;  %4618 = vmatpush.bf16.msra.mxu2 %v8323_v38 }
 0x2aa   : > { %v3255_v4 = vsel %vm9530_vm11, %v10189_v25, %v3254_v1  ;;  %v7250_v43 = vld [vmem:[#allocation4 + $0xa8] sm:$0xf0] }
 0x2ab   : > { %v3399_v55 = vsel %vm9270_vm6, %v3397_v17, %v3398_v46  ;;  %v3400_v13 = vrot.slane %v3398_v46, 4  ;;  %v3339_v27 = vrot.slane %v10196_v36, 5  ;;  %v3343_v35 = vrot.slane %v10199_v8, 4  ;;  %3256 = vst [vmem:[#allocation4 + $0x100] sm:$0x3] %v3255_v4  ;;  %v8315_v4 = vld [vmem:[%s11127_s3 + $0x300] sm:$0xff] }
 0x2ac   : > { %3417 = vst [vmem:[#allocation4 + $0xe8] sm:$0xf] %v3399_v55  ;;  %v3460_v57 = vrot.slane %v10199_v8, 5  ;;  %v3461_v47 = vrot.slane %v10196_v36, 6  ;;  %4469 = vmatmul.bf16.gmra.mxu1 %v7273_v15  ;;  %v8268_v1 = vld [vmem:[#allocation4 + $0x8c] sm:$0xf] }
 0x2ad   : > { %v3340_v63 = vsel %vm9315_vm7, %v3335_v59, %v3339_v27  ;;  %v3419_v29 = vsel %vm9530_vm11, %v3400_v13, %v3418_v40  ;;  %v3344_v61 = vor.u32 %v3343_v35, %v3339_v27  ;;  %v7253_v5 = vor.u32 %v8268_v1, %v7250_v43  ;;  %v3482_v3 = vld [vmem:[#allocation4 + $0x10c] sm:$0x3]  ;;  %v7280_v23 = vld [vmem:[#allocation4 + $0xc8] sm:$0xf]  ;;  %v8340_v55 = vld [vmem:[%s11127_s3 + $0x3c8] sm:$0xff]  ;;  %4585 = vmatpush.bf16.msra.mxu1 %v8315_v4 }
 0x2ae   : > { %3362 = vst [vmem:[#allocation4 + $0xe4] sm:$0xf] %v3340_v63  ;;  %v3462_v31 = vor.u32 %v3461_v47, %v3460_v57  ;;  %4497 = vmatmul.bf16.gmra.mxu2 %v7245_v34  ;;  %v7042_v34 = vrot.slane %v9880_v2, 10  ;;  %v3487_v40 = vrot.slane %v9914_v54, 6  ;;  %v8331_v13 = vld [vmem:[%s11127_s3 + $0x380] sm:$0xff]  ;;  %v7043_v59 = vrot.slane %v9880_v2, 11  ;;  %4683 = vmatpush.bf16.msrb.mxu0 %v8340_v55 }
 0x2af   : > { %3420 = vst [vmem:[#allocation4 + $0x108] sm:$0x3] %v3419_v29  ;;  %v3345_v22 = vrot.slane %v3344_v61, 4  ;;  %v3598_v27 = vrot.slane %v9914_v54, 7  ;;  %v3601_v35 = vrot.slane %v9928_v28, 7  ;;  %v3531_v63 = vrot.slane %v9948_v52, 6  ;;  %4651 = vmatpush.bf16.msra.mxu3 %v8331_v13 }
 0x2b0   : > { %v3463_v37 = vsel %vm9344_vm8, %v3459_v44, %v3462_v31  ;;  %v3464_v17 = vrot.slane %v3462_v31, 4  ;;  %4563 = vmatmul.bf16.gmra.mxu0 %v7253_v5  ;;  %v3488_v47 = vsel %vm9555_vm13, %v7042_v34, %v3487_v40  ;;  %v3489_v43 = vrot.slane %v3487_v40, 4  ;;  %v8275_v31 = vld [vmem:[#allocation4 + $0xc4] sm:$0xf]  ;;  %v8276_v55 = vld [vmem:[#allocation4 + $0xcc] sm:$0xf] }
 0x2b1   : > { %3481 = vst [vmem:[#allocation4 + $0xec] sm:$0xf] %v3463_v37  ;;  %v3364_v46 = vsel %vm9530_vm11, %v3345_v22, %v3363_v18  ;;  %v3599_v29 = vsel %vm9587_vm0, %v7043_v59, %v3598_v27  ;;  %v3600_v2 = vrot.slane %v3598_v27, 4  ;;  %v3532_v54 = vrot.slane %v9951_v24, 7  ;;  %v8339_v24 = vld [vmem:[%s11127_s3 + $0x3c0] sm:$0xff] }
 0x2b2   : > { %v3483_v15 = vsel %vm9530_vm11, %v3464_v17, %v3482_v3  ;;  %3365 = vst [vmem:[#allocation4 + $0x104] sm:$0x3] %v3364_v46  ;;  %v3491_v44 = vsel %vm9555_vm13, %v3489_v43, %v3490_v26  ;;  %v3535_v37 = vrot.slane %v9958_v14, 6  ;;  %v3536_v3 = vrot.slane %v9955_v0, 7  ;;  %4684 = vmatpush.bf16.msrb.mxu0 %v8339_v24 }
 0x2b3   : > { %v8280_v50 = vld [vmem:[#allocation4 + $0xe4] sm:$0xf0]  ;;  %3484 = vst [vmem:[#allocation4 + $0x10c] sm:$0x3] %v3483_v15  ;;  %v3602_v1 = vsel %vm9587_vm0, %v3600_v2, %v3601_v35  ;;  %v3533_v5 = vor.u32 %v3532_v54, %v3531_v63  ;;  %v3540_v46 = vrot.slane %v9982_v62, 6  ;;  %v3541_v15 = vrot.slane %v9973_v49, 7 }
 0x2b4   : > { %v7281_v57 = vor.u32 %v8280_v50, %v7280_v23  ;;  %3520 = vst [vmem:[#allocation4 + $0x10] sm:$0xf] %v3488_v47  ;;  %v3537_v4 = vor.u32 %v3536_v3, %v3535_v37  ;;  %v3646_v40 = vrot.slane %v9958_v14, 7  ;;  %v7044_v27 = vrot.slane %v9948_v52, 11 }
 0x2b5   : > { %v7274_v61 = vld [vmem:[#allocation4 + $0xe0] sm:$0xf0]  ;;  %3633 = vst [vmem:[#allocation4 + $0x18] sm:$0xf] %v3599_v29  ;;  %v3534_v34 = vrot.slane %v3533_v5, 4  ;;  %v3542_v38 = vor.u32 %v3541_v15, %v3540_v46  ;;  %v3650_v63 = vrot.slane %v9982_v62, 7 }
 0x2b6   : > { %3521 = vst [vmem:[#allocation4 + $0x30] sm:$0xf] %v3491_v44  ;;  %v7277_v17 = vor.u32 %v8275_v31, %v7274_v61  ;;  %v3539_v59 = vrot.slane %v3537_v4, 4  ;;  %v3649_v2 = vrot.slane %v3646_v40, 4  ;;  %v3493_v62 = vrot.slane %v9993_v9, 6 }
 0x2b7   : > { %4535 = vmatmul.bf16.gmra.mxu3 %v7281_v57  ;;  %3634 = vst [vmem:[#allocation4 + $0x38] sm:$0xf] %v3602_v1  ;;  %v3538_v13 = vsel %vm9602_vm2, %v3534_v34, %v3537_v4  ;;  %v3647_v57 = vor.u32 %v3646_v40, %v9955_v0  ;;  %v3651_v54 = vor.u32 %v3650_v63, %v9973_v49  ;;  %v3492_v0 = vrot.slane %v3490_v26, 4 }
 0x2b8   : > { %v7282_v23 = vld [vmem:[#allocation4 + $0xe8] sm:$0xf0]  ;;  %3584 = vst [vmem:[#allocation4 + $0x14] sm:$0xf] %v3538_v13  ;;  %v3543_v14 = vsel %vm9602_vm2, %v3539_v59, %v3542_v38  ;;  %v3496_v44 = vrot.slane %v10010_v53, 6  ;;  %v3603_v31 = vrot.slane %v3601_v35, 4 }
 0x2b9   : > { %v10258_v22 = vld [vmem:[#allocation4 + $0x100] sm:$0x33]  ;;  %v7285_v47 = vor.u32 %v8276_v55, %v7282_v23  ;;  %v3648_v29 = vsel %vm9617_vm5, %v7044_v27, %v3647_v57  ;;  %3585 = vst [vmem:[#allocation4 + $0x34] sm:$0xf] %v3543_v14  ;;  %v3652_v52 = vsel %vm9617_vm5, %v3649_v2, %v3651_v54  ;;  %v3604_v1 = vrot.slane %v9993_v9, 7 }
 0x2ba   : > { %v3974_v18 = vunpack.c.l.b16 %v10258_v22  ;;  %v3739_v43 = vld [vmem:[#allocation4 + $0x108] sm:$0x33]  ;;  %3695 = vst [vmem:[#allocation4 + $0x1c] sm:$0xf] %v3648_v29  ;;  %v3607_v5 = vrot.slane %v10010_v53, 7  ;;  %v3494_v49 = vsel %vm9555_vm13, %v3492_v0, %v3493_v62  ;;  %v3495_v24 = vrot.slane %v3493_v62, 4 }
 0x2bb   : > { %v3976_v61 = vunpack.c.l.b16 %v3739_v43  ;;  %3696 = vst [vmem:[#allocation4 + $0x3c] sm:$0xf] %v3652_v52  ;;  %v3605_v37 = vsel %vm9587_vm0, %v3603_v31, %v3604_v1  ;;  %v3606_v28 = vrot.slane %v3604_v1, 4  ;;  %v3975_v35 = vunpack.c.h.b16 %v10258_v22  ;;  %v7192_v23 = vld [vmem:[#allocation4 + $0x10] sm:$0xf] }
 0x2bc   : > { %v4014_v50 = vpack.c.b16 %v3974_v18, %v3974_v18  ;;  %3522 = vst [vmem:[#allocation4 + $0x50] sm:$0xf] %v3494_v49  ;;  %v3545_v18 = vrot.slane %v10040_v30, 6  ;;  %v3546_v3 = vrot.slane %v10037_v20, 7  ;;  %v3550_v46 = vrot.slane %v10070_v7, 6 }
 0x2bd   : > { %v4016_v26 = vpack.c.b16 %v3976_v61, %v3976_v61  ;;  %3635 = vst [vmem:[#allocation4 + $0x58] sm:$0xf] %v3605_v37  ;;  %v3608_v9 = vsel %vm9587_vm0, %v3606_v28, %v3607_v5  ;;  %v8257_v53 = vld [vmem:[#allocation4 + $0x2c] sm:$0xf0]  ;;  %v3551_v15 = vrot.slane %v10047_v16, 7  ;;  %v4015_v4 = vpack.c.b16 %v3975_v35, %v3975_v35 }
 0x2be   : > { %4502 = vmatmul.bf16.gmra.mxu2 %v7277_v17  ;;  %4474 = vmatmul.bf16.gmra.mxu1 %v4014_v50  ;;  %v3497_v17 = vsel %vm9555_vm13, %v3495_v24, %v3496_v44  ;;  %3636 = vst [vmem:[#allocation4 + $0x78] sm:$0xf] %v3608_v9  ;;  %v3544_v50 = vrot.slane %v3542_v38, 4  ;;  %v3547_v34 = vor.u32 %v3546_v3, %v3545_v18  ;;  %v3654_v55 = vrot.slane %v10040_v30, 7  ;;  %v8258_v61 = vld [vmem:[#allocation4 + $0x34] sm:$0xf0] }
 0x2bf   : > { %3523 = vst [vmem:[#allocation4 + $0x70] sm:$0xf] %v3497_v17  ;;  %v7193_v22 = vor.u32 %v8257_v53, %v7192_v23  ;;  %v3552_v40 = vor.u32 %v3551_v15, %v3550_v46  ;;  %v3977_v13 = vunpack.c.h.b16 %v3739_v43  ;;  %v3653_v57 = vrot.slane %v3650_v63, 4  ;;  %v7200_v1 = vld [vmem:[#allocation4 + $0x18] sm:$0xf] }
 0x2c0   : > { %4568 = vmatmul.bf16.gmra.mxu0 %v7285_v47  ;;  %v3548_v59 = vsel %vm9602_vm2, %v3544_v50, %v3547_v34  ;;  %v3549_v27 = vrot.slane %v3547_v34, 4  ;;  %v3655_v47 = vor.u32 %v3654_v55, %v10037_v20  ;;  %v3658_v14 = vrot.slane %v10070_v7, 7  ;;  %v8253_v9 = vld [vmem:[#allocation4 + $0x14] sm:$0xf]  ;;  %v5006_v11 = vld [vmem:[#allocation4 + $0x10c] sm:$0x3] }
 0x2c1   : > { %3586 = vst [vmem:[#allocation4 + $0x54] sm:$0xf] %v3548_v59  ;;  %v3657_v43 = vrot.slane %v3654_v55, 4  ;;  %v4017_v2 = vpack.c.b16 %v3977_v13, %v3977_v13  ;;  %v3498_v20 = vrot.slane %v3496_v44, 4  ;;  %v3499_v7 = vrot.slane %v10083_v45, 6 }
 0x2c2   : > { %v3553_v38 = vsel %vm9602_vm2, %v3549_v27, %v3552_v40  ;;  %v3656_v30 = vsel %vm9617_vm5, %v3653_v57, %v3655_v47  ;;  %v3659_v29 = vor.u32 %v3658_v14, %v10047_v16  ;;  %v3502_v63 = vrot.slane %v10120_v42, 6  ;;  %v8254_v27 = vld [vmem:[#allocation4 + $0x1c] sm:$0xf] }
 0x2c3   : > { %3587 = vst [vmem:[#allocation4 + $0x74] sm:$0xf] %v3553_v38  ;;  %v3609_v52 = vrot.slane %v3607_v5, 4  ;;  %v3610_v0 = vrot.slane %v10083_v45, 7  ;;  %v3613_v62 = vrot.slane %v10120_v42, 7  ;;  %v3500_v16 = vsel %vm9555_vm13, %v3498_v20, %v3499_v7 }
 0x2c4   : > { %3697 = vst [vmem:[#allocation4 + $0x5c] sm:$0xf] %v3656_v30  ;;  %v3660_v54 = vsel %vm9617_vm5, %v3657_v43, %v3659_v29  ;;  %v3501_v31 = vrot.slane %v3499_v7, 4  ;;  %v7201_v24 = vor.u32 %v8258_v61, %v7200_v1  ;;  %v7194_v5 = vld [vmem:[#allocation4 + $0x30] sm:$0xf0]  ;;  %v3555_v28 = vrot.slane %v10118_v41, 6 }
 0x2c5   : > { %3698 = vst [vmem:[#allocation4 + $0x7c] sm:$0xf] %v3660_v54  ;;  %v3611_v49 = vsel %vm9587_vm0, %v3609_v52, %v3610_v0  ;;  %v3612_v44 = vrot.slane %v3610_v0, 4  ;;  %v3560_v17 = vrot.slane %v10140_v32, 6  ;;  %v3561_v35 = vrot.slane %v10137_v39, 7 }
 0x2c6   : > { %3524 = vst [vmem:[#allocation4 + $0x90] sm:$0xf] %v3500_v16  ;;  %v3503_v37 = vsel %vm9555_vm13, %v3501_v31, %v3502_v63  ;;  %v8265_v42 = vld [vmem:[#allocation4 + $0x6c] sm:$0xf0]  ;;  %v3554_v18 = vrot.slane %v3552_v40, 4  ;;  %v7197_v46 = vor.u32 %v8253_v9, %v7194_v5  ;;  %v3662_v50 = vrot.slane %v10118_v41, 7 }
 0x2c7   : > { %4540 = vmatmul.bf16.gmra.mxu3 %v4016_v26  ;;  %3637 = vst [vmem:[#allocation4 + $0x98] sm:$0xf] %v3611_v49  ;;  %v3614_v45 = vsel %vm9587_vm0, %v3612_v44, %v3613_v62  ;;  %v3556_v26 = vrot.slane %v10095_v6, 7  ;;  %v7224_v53 = vld [vmem:[#allocation4 + $0x50] sm:$0xf]  ;;  %v10328_v23 = vor.u32 %v3561_v35, %v3560_v17  ;;  %v3661_v55 = vrot.slane %v3658_v14, 4 }
 0x2c8   : > { %3525 = vst [vmem:[#allocation4 + $0xb0] sm:$0xf] %v3503_v37  ;;  %v7225_v15 = vor.u32 %v8265_v42, %v7224_v53  ;;  %v3663_v13 = vor.u32 %v3662_v50, %v10095_v6  ;;  %v3666_v40 = vrot.slane %v10140_v32, 7  ;;  %v3665_v57 = vrot.slane %v3662_v50, 4  ;;  %v8266_v43 = vld [vmem:[#allocation4 + $0x74] sm:$0xf0] }
 0x2c9   : > { %3638 = vst [vmem:[#allocation4 + $0xb8] sm:$0xf] %v3614_v45  ;;  %v3557_v3 = vor.u32 %v3556_v26, %v3555_v28  ;;  %v3504_v6 = vrot.slane %v3502_v63, 4  ;;  %v3505_v32 = vrot.slane %v10153_v10, 6  ;;  %v3508_v30 = vrot.slane %v10189_v25, 6 }
 0x2ca   : > { %v3664_v41 = vsel %vm9617_vm5, %v3661_v55, %v3663_v13  ;;  %v3667_v47 = vor.u32 %v3666_v40, %v10137_v39  ;;  %v3615_v29 = vrot.slane %v3613_v62, 4  ;;  %v3619_v54 = vrot.slane %v10189_v25, 7  ;;  %v7232_v7 = vld [vmem:[#allocation4 + $0x58] sm:$0xf]  ;;  %v7226_v62 = vld [vmem:[#allocation4 + $0x70] sm:$0xf0] }
 0x2cb   : > { %v3558_v34 = vsel %vm9602_vm2, %v3554_v18, %v3557_v3  ;;  %3699 = vst [vmem:[#allocation4 + $0x9c] sm:$0xf] %v3664_v41  ;;  %v3506_v39 = vsel %vm9555_vm13, %v3504_v6, %v3505_v32  ;;  %v3507_v20 = vrot.slane %v3505_v32, 4  ;;  %v7233_v52 = vor.u32 %v8266_v43, %v7232_v7  ;;  %v8261_v16 = vld [vmem:[#allocation4 + $0x54] sm:$0xf] }
 0x2cc   : > { %3588 = vst [vmem:[#allocation4 + $0x94] sm:$0xf] %v3558_v34  ;;  %v3668_v14 = vsel %vm9617_vm5, %v3665_v57, %v3667_v47  ;;  %v7229_v31 = vor.u32 %v8261_v16, %v7226_v62  ;;  %v3565_v44 = vrot.slane %v10164_v51, 6  ;;  %v3670_v37 = vrot.slane %v10164_v51, 7  ;;  %v7234_v5 = vld [vmem:[#allocation4 + $0x78] sm:$0xf0] }
 0x2cd   : > { %3700 = vst [vmem:[#allocation4 + $0xbc] sm:$0xf] %v3668_v14  ;;  %v3509_v0 = vsel %vm9555_vm13, %v3507_v20, %v3508_v30  ;;  %v7256_v1 = vld [vmem:[#allocation4 + $0x90] sm:$0xf]  ;;  %v3564_v45 = vrot.slane %v10328_v23, 4  ;;  %v3669_v26 = vrot.slane %v3666_v40, 4 }
 0x2ce   : > { %4507 = vmatmul.bf16.gmra.mxu2 %v4015_v4  ;;  %4586 = vmatmul.bf16.vlgmr.msra.gmra.mxu1 %v7193_v22  ;;  %v3559_v4 = vrot.slane %v3557_v3, 4  ;;  %v7202_v22 = vld [vmem:[#allocation4 + $0x38] sm:$0xf0]  ;;  %3526 = vst [vmem:[#allocation4 + $0xd0] sm:$0xf] %v3506_v39  ;;  %v3671_v28 = vor.u32 %v3670_v37, %v10159_v33  ;;  %v3510_v9 = vrot.slane %v3508_v30, 4 }
 0x2cf   : > { %v7205_v38 = vor.u32 %v8254_v27, %v7202_v22  ;;  %3527 = vst [vmem:[#allocation4 + $0xf0] sm:$0xf] %v3509_v0  ;;  %v8273_v25 = vld [vmem:[#allocation4 + $0xac] sm:$0xf0]  ;;  %v3235_v17 = vld [vmem:[#allocation3 + $0x4d] sm:$0x3] }
 0x2d0   : > { %4573 = vmatmul.bf16.gmra.mxu0 %v4017_v2  ;;  %v3563_v59 = vsel %vm9602_vm2, %v3559_v4, %v10328_v23  ;;  %v3616_v2 = vrot.slane %v10153_v10, 7  ;;  %v7257_v49 = vor.u32 %v8273_v25, %v7256_v1  ;;  %v8262_v35 = vld [vmem:[#allocation4 + $0x5c] sm:$0xf]  ;;  %v3570_v18 = vrot.slane %v10199_v8, 6  ;;  %v3528_v55 = vld [vmem:[#allocation4 + $0x110] sm:$0x3] }
 0x2d1   : > { %3589 = vst [vmem:[#allocation4 + $0xb4] sm:$0xf] %v3563_v59  ;;  %v7237_v3 = vor.u32 %v8262_v35, %v7234_v5  ;;  %v3571_v51 = vrot.slane %v10196_v36, 7  ;;  %v3621_v23 = vrot.slane %v3619_v54, 4  ;;  %v3673_v4 = vrot.slane %v3670_v37, 4 }
 0x2d2   : > { %v3617_v61 = vsel %vm9587_vm0, %v3615_v29, %v3616_v2  ;;  %v3618_v63 = vrot.slane %v3616_v2, 4  ;;  %v8274_v13 = vld [vmem:[#allocation4 + $0xb4] sm:$0xf0]  ;;  %v3529_v40 = vsel %vm9530_vm11, %v3510_v9, %v3528_v55  ;;  %v3592_v59 = vld [vmem:[#allocation4 + $0x114] sm:$0x3] }
 0x2d3   : > { %3639 = vst [vmem:[#allocation4 + $0xd8] sm:$0xf] %v3617_v61  ;;  %v3572_v34 = vor.u32 %v3571_v51, %v3570_v18  ;;  %v3641_v14 = vld [vmem:[#allocation4 + $0x118] sm:$0x3] }
 0x2d4   : > { %v3620_v10 = vsel %vm9587_vm0, %v3618_v63, %v3619_v54  ;;  %3530 = vst [vmem:[#allocation4 + $0x110] sm:$0x3] %v3529_v40  ;;  %v7264_v6 = vld [vmem:[#allocation4 + $0x98] sm:$0xf]  ;;  %v3703_v63 = vld [vmem:[#allocation4 + $0x11c] sm:$0x3] }
 0x2d5   : > { %3640 = vst [vmem:[#allocation4 + $0xf8] sm:$0xf] %v3620_v10  ;;  %v3574_v47 = vrot.slane %v3572_v34, 4  ;;  %v7265_v43 = vor.u32 %v8274_v13, %v7264_v6  ;;  %v7288_v0 = vld [vmem:[#allocation4 + $0xd0] sm:$0xf] }
 0x2d6   : > { %v8281_v7 = vld [vmem:[#allocation4 + $0xec] sm:$0xf0]  ;;  %v7266_v16 = vld [vmem:[#allocation4 + $0xb8] sm:$0xf0] }
 0x2d7   : > { %4652 = vmatmul.bf16.vlgmr.msra.gmra.mxu3 %v7201_v24  ;;  %v3566_v24 = vrot.slane %v10159_v33, 7  ;;  %v3245_v33 = vpack.c.bf16 %v3235_v17, %v3235_v17  ;;  %v3593_v2 = vsel %vm9530_vm11, %v3574_v47, %v3592_v59  ;;  %v7289_v25 = vor.u32 %v8281_v7, %v7288_v0  ;;  %v10389_v17 = vld [vmem:[%s11128_s4 + $0x4] ss:$0 sm:$0xff] }
 0x2d8   : > { %3594 = vst [vmem:[#allocation4 + $0x114] sm:$0x3] %v3593_v2  ;;  %v7258_v20 = vld [vmem:[#allocation4 + $0xb0] sm:$0xf0] }
 0x2d9   : > { %v3567_v42 = vor.u32 %v3566_v24, %v3565_v44  ;;  %v3622_v27 = vrot.slane %v3245_v33, 7  ;;  %v3679_v41 = vshrl.u32 %v3245_v33, 16  ;;  %v3682_v57 = vshll.u32 %v3245_v33, 16 }
 0x2da   : > { %v7296_v37 = vld [vmem:[#allocation4 + $0xd8] sm:$0xf] }
 0x2db   : > { %v3568_v53 = vsel %vm9602_vm2, %v3564_v45, %v3567_v42  ;;  %v3569_v50 = vrot.slane %v3567_v42, 4  ;;  %v3623_v32 = vsel %vm9587_vm0, %v3621_v23, %v3622_v27  ;;  %v3681_v30 = vrot.slane %v3679_v41, 7 }
 0x2dc   : > { %3590 = vst [vmem:[#allocation4 + $0xd4] sm:$0xf] %v3568_v53  ;;  %v3642_v54 = vsel %vm9530_vm11, %v3623_v32, %v3641_v14  ;;  %v8282_v44 = vld [vmem:[#allocation4 + $0xf4] sm:$0xf0] }
 0x2dd   : > { %v3684_v39 = vor.u32 %v3682_v57, %v3681_v30  ;;  %3643 = vst [vmem:[#allocation4 + $0x118] sm:$0x3] %v3642_v54  ;;  %v7297_v5 = vor.u32 %v8282_v44, %v7296_v37  ;;  %v8386_v54 = vld [vmem:[%s11127_s3 + $0x438] sm:$0xff]  ;;  %v8385_v44 = vld [vmem:[%s11127_s3 + $0x430] sm:$0xff] }
 0x2de   : > { %4619 = vmatmul.bf16.vlgmr.msra.gmra.mxu2 %v7197_v46  ;;  %4591 = vmatmul.bf16.gmra.mxu1 %v7225_v15  ;;  %v3672_v46 = vsel %vm9617_vm5, %v3669_v26, %v3671_v28  ;;  %v3674_v15 = vrot.slane %v10199_v8, 7  ;;  %v3573_v8 = vsel %vm9602_vm2, %v3569_v50, %v3572_v34  ;;  %v8410_v37 = vld [vmem:[%s11127_s3 + $0x4f8] sm:$0xff] }
 0x2df   : > { %3701 = vst [vmem:[#allocation4 + $0xdc] sm:$0xf] %v3672_v46  ;;  %v3740_v24 = vld [vmem:[#allocation4 + $0x110] sm:$0x33]  ;;  %5970 = vmatpush.bf16.msrb.mxu1 %v8386_v54  ;;  %6069 = vmatpush.bf16.msra.mxu0 %v8410_v37  ;;  %v8382_v37 = vld [vmem:[%s11127_s3 + $0x418] sm:$0xff] }
 0x2e0   : > { %4685 = vmatmul.bf16.vlgmr.msrb.gmra.mxu0 %v7205_v38  ;;  %v3675_v22 = vor.u32 %v3674_v15, %v10196_v36  ;;  %3591 = vst [vmem:[#allocation4 + $0xf4] sm:$0xf] %v3573_v8  ;;  %v3677_v36 = vrot.slane %v3674_v15, 4  ;;  %v3978_v45 = vunpack.c.l.b16 %v3740_v24  ;;  %v3979_v59 = vunpack.c.h.b16 %v3740_v24  ;;  %v8393_v24 = vld [vmem:[%s11127_s3 + $0x470] sm:$0xff]  ;;  %v8391_v54 = vld [vmem:[%s11127_s3 + $0x460] sm:$0xff] }
 0x2e2   : > { %v3676_v38 = vsel %vm9617_vm5, %v3673_v4, %v3675_v22  ;;  %v3685_v61 = vsel %vm9617_vm5, %v3677_v36, %v3684_v39  ;;  %v4018_v53 = vpack.c.b16 %v3978_v45, %v3978_v45  ;;  %v4019_v57 = vpack.c.b16 %v3979_v59, %v3979_v59  ;;  %v8394_v39 = vld [vmem:[%s11127_s3 + $0x478] sm:$0xff] }
 0x2e3   : > { %3702 = vst [vmem:[#allocation4 + $0xfc] sm:$0xf] %v3676_v38  ;;  %v3704_v62 = vsel %vm9530_vm11, %v3685_v61, %v3703_v63  ;;  %v8277_v26 = vld [vmem:[#allocation4 + $0xd4] sm:$0xf]  ;;  %6003 = vmatpush.bf16.msrb.mxu2 %v8394_v39  ;;  %v8402_v63 = vld [vmem:[%s11127_s3 + $0x4b8] sm:$0xff]  ;;  %5971 = vmatpush.bf16.msrb.mxu1 %v8385_v44  ;;  %v8408_v39 = vld [vmem:[%s11127_s3 + $0x4e8] sm:$0xff] }
 0x2e4   : > { %3705 = vst [vmem:[#allocation4 + $0x11c] sm:$0x3] %v3704_v62  ;;  %6036 = vmatpush.bf16.msrb.mxu3 %v8402_v63 }
 0x2e6   : > { %v8278_v46 = vld [vmem:[#allocation4 + $0xdc] sm:$0xf] }
 0x2e7   : > { %4657 = vmatmul.bf16.gmra.mxu3 %v7233_v52  ;;  %v8269_v52 = vld [vmem:[#allocation4 + $0x94] sm:$0xf]  ;;  %6004 = vmatpush.bf16.msrb.mxu2 %v8393_v24 }
 0x2e8   : > { %v7261_v10 = vor.u32 %v8269_v52, %v7258_v20  ;;  %v7290_v42 = vld [vmem:[#allocation4 + $0xf0] sm:$0xf0] }
 0x2e9   : > { %v7293_v35 = vor.u32 %v8277_v26, %v7290_v42  ;;  %v8392_v26 = vld [vmem:[%s11127_s3 + $0x468] sm:$0xff] }
 0x2ea   : > { %v7298_v18 = vld [vmem:[#allocation4 + $0xf8] sm:$0xf0] }
 0x2eb   : > { %v3741_v15 = vld [vmem:[#allocation4 + $0x118] sm:$0x33]  ;;  %v7301_v23 = vor.u32 %v8278_v46, %v7298_v18  ;;  %6005 = vmatpush.bf16.msrb.mxu2 %v8392_v26 }
 0x2ec   : > { %v3980_v4 = vunpack.c.l.b16 %v3741_v15  ;;  %v3981_v47 = vunpack.c.h.b16 %v3741_v15  ;;  %v8400_v46 = vld [vmem:[%s11127_s3 + $0x4a8] sm:$0xff] }
 0x2ee   : > { %4624 = vmatmul.bf16.gmra.mxu2 %v7229_v31  ;;  %4596 = vmatmul.bf16.gmra.mxu1 %v7257_v49  ;;  %v8270_v31 = vld [vmem:[#allocation4 + $0x9c] sm:$0xf]  ;;  %v4020_v13 = vpack.c.b16 %v3980_v4, %v3980_v4  ;;  %v4021_v6 = vpack.c.b16 %v3981_v47, %v3981_v47 }
 0x2ef   : > { %v7269_v49 = vor.u32 %v8270_v31, %v7266_v16  ;;  %6006 = vmatpush.bf16.msrb.mxu2 %v8391_v54 }
 0x2f0   : > { %4690 = vmatmul.bf16.gmra.mxu0 %v7237_v3 }
 0x2f7   : > { %4662 = vmatmul.bf16.gmra.mxu3 %v7265_v43 }
 0x2f8   : > { %v4455_v29 = vpop.f32.mrf.mxu1 }
 0x2f9   : > { %v4456_v3 = vadd.f32 %v10389_v17, %v4455_v29 }
 0x2fe   : > { %4629 = vmatmul.bf16.gmra.mxu2 %v7261_v10  ;;  %4601 = vmatmul.bf16.gmra.mxu1 %v7289_v25 }
 0x300   : > { %v10384_v1 = vpop.f32.mrf.mxu1  ;;  %4695 = vmatmul.bf16.gmra.mxu0 %v7269_v49 }
 0x307   : > { %4667 = vmatmul.bf16.gmra.mxu3 %v7297_v5  ;;  %v8401_v5 = vld [vmem:[%s11127_s3 + $0x4b0] sm:$0xff] }
 0x308   : > { %v4460_v28 = vpop.f32.mrf.mxu1  ;;  %6037 = vmatpush.bf16.msrb.mxu3 %v8401_v5  ;;  %v8390_v5 = vld [vmem:[%s11127_s3 + $0x458] sm:$0xff] }
 0x309   : > { %v4461_v38 = vadd.f32 %v10389_v17, %v4460_v28  ;;  %v8384_v28 = vld [vmem:[%s11127_s3 + $0x428] sm:$0xff]  ;;  %6007 = vmatpush.bf16.msrb.mxu2 %v8390_v5 }
 0x30a   : > { %v4521_v9 = vpop.f32.mrf.mxu3  ;;  %5972 = vmatpush.bf16.msrb.mxu1 %v8384_v28  ;;  %v8407_v28 = vld [vmem:[%s11127_s3 + $0x4e0] sm:$0xff] }
 0x30c   : > { %6038 = vmatpush.bf16.msrb.mxu3 %v8400_v46  ;;  %v10499_v46 = vld [vmem:[%s11128_s4 + $0x5] ss:$0 sm:$0xff] }
 0x30d   : > { %v4554_v51 = vpop.f32.mrf.mxu0 }
 0x30e   : > { %4634 = vmatmul.bf16.gmra.mxu2 %v7293_v35  ;;  %4606 = vmatmul.bf16.gmra.mxu1 %v4018_v53  ;;  %v8409_v35 = vld [vmem:[%s11127_s3 + $0x4f0] sm:$0xff] }
 0x30f   : > { %6070 = vmatpush.bf16.msra.mxu0 %v8409_v35 }
 0x310   : > { %v10392_v34 = vpop.f32.mrf.mxu1  ;;  %4700 = vmatmul.bf16.gmra.mxu0 %v7301_v23 }
 0x311   : > { %v4488_v33 = vpop.f32.mrf.mxu2 }
 0x312   : > { %v4489_v50 = vadd.f32 %v4488_v33, %v4456_v3  ;;  %v10394_v55 = vpop.f32.mrf.mxu3 }
 0x313   : > { %6071 = vmatpush.bf16.msra.mxu0 %v8408_v39 }
 0x314   : > { %v4522_v22 = vadd.f32 %v4521_v9, %v4489_v50 }
 0x315   : > { %v10396_v40 = vpop.f32.mrf.mxu0 }
 0x316   : > { %v4555_v49 = vadd.f32 %v4554_v51, %v4522_v22 }
 0x317   : > { %4672 = vmatmul.bf16.gmra.mxu3 %v4020_v13  ;;  %6072 = vmatpush.bf16.msra.mxu0 %v8407_v28 }
 0x319   : > { %v10398_v27 = vpop.f32.mrf.mxu2  ;;  %v4465_v41 = vpop.f32.mrf.mxu1 }
 0x31a   : > { %v4526_v8 = vpop.f32.mrf.mxu3  ;;  %v4466_v52 = vadd.f32 %v10389_v17, %v4465_v41 }
 0x31d   : > { %v4559_v14 = vpop.f32.mrf.mxu0 }
 0x31e   : > { %4639 = vmatmul.bf16.gmra.mxu2 %v4019_v57 }
 0x320   : > { %4705 = vmatmul.bf16.gmra.mxu0 %v4021_v6 }
 0x321   : > { %v4493_v36 = vpop.f32.mrf.mxu2  ;;  %v10401_v30 = vpop.f32.mrf.mxu1 }
 0x322   : > { %v4494_v32 = vadd.f32 %v4493_v36, %v4461_v38  ;;  %v10403_v29 = vpop.f32.mrf.mxu3 }
 0x324   : > { %v4527_v43 = vadd.f32 %v4526_v8, %v4494_v32 }
 0x325   : > { %v10405_v2 = vpop.f32.mrf.mxu0 }
 0x326   : > { %v10455_v15 = vadd.f32 %v4559_v14, %v4527_v43  ;;  %v8383_v43 = vld [vmem:[%s11127_s3 + $0x420] sm:$0xff] }
 0x327   : > { %5973 = vmatpush.bf16.msrb.mxu1 %v8383_v43 }
 0x329   : > { %v10413_v20 = vpop.f32.mrf.mxu2  ;;  %v4470_v7 = vpop.f32.mrf.mxu1 }
 0x32a   : > { %v4531_v61 = vpop.f32.mrf.mxu3  ;;  %v4471_v3 = vadd.f32 %v10389_v17, %v4470_v7 }
 0x32b   : > { %5974 = vmatpush.bf16.msrb.mxu1 %v8382_v37 }
 0x32d   : > { %v10419_v0 = vpop.f32.mrf.mxu0 }
 0x331   : > { %v4498_v62 = vpop.f32.mrf.mxu2  ;;  %v10421_v25 = vpop.f32.mrf.mxu1 }
 0x332   : > { %v4499_v10 = vadd.f32 %v4498_v62, %v4466_v52  ;;  %v10423_v31 = vpop.f32.mrf.mxu3  ;;  %v4458_v52 = vadd.f32 %v10389_v17, %v10384_v1 }
 0x334   : > { %v4532_v16 = vadd.f32 %v4531_v61, %v4499_v10  ;;  %v8399_v61 = vld [vmem:[%s11127_s3 + $0x4a0] sm:$0xff]  ;;  %v4491_v10 = vadd.f32 %v10398_v27, %v4458_v52 }
 0x335   : > { %v10437_v45 = vpop.f32.mrf.mxu0  ;;  %6039 = vmatpush.bf16.msrb.mxu3 %v8399_v61 }
 0x336   : > { %v10492_v26 = vadd.f32 %v10419_v0, %v4532_v16  ;;  %v4524_v27 = vadd.f32 %v10394_v55, %v4491_v10  ;;  %v10504_v0 = vld [vmem:[%s11128_s4 + $0x6] ss:$0 sm:$0xff] }
 0x339   : > { %v10439_v42 = vpop.f32.mrf.mxu2 }
 0x33a   : > { %v4536_v53 = vpop.f32.mrf.mxu3 }
 0x33b   : > { %v4475_v9 = vpop.f32.mrf.mxu1 }
 0x33c   : > { %v4476_v18 = vadd.f32 %v10389_v17, %v4475_v9 }
 0x33d   : > { %v4569_v51 = vpop.f32.mrf.mxu0 }
 0x341   : > { %v4503_v23 = vpop.f32.mrf.mxu2 }
 0x342   : > { %v4504_v33 = vadd.f32 %v4503_v23, %v4471_v3  ;;  %v10457_v22 = vpop.f32.mrf.mxu3 }
 0x343   : > { %v4477_v50 = vpop.f32.mrf.mxu1 }
 0x344   : > { %v4537_v4 = vadd.f32 %v4536_v53, %v4504_v33  ;;  %v8398_v33 = vld [vmem:[%s11127_s3 + $0x498] sm:$0xff]  ;;  %v8389_v50 = vld [vmem:[%s11127_s3 + $0x450] sm:$0xff] }
 0x345   : > { %v10459_v13 = vpop.f32.mrf.mxu0  ;;  %6040 = vmatpush.bf16.msrb.mxu3 %v8398_v33  ;;  %6008 = vmatpush.bf16.msrb.mxu2 %v8389_v50  ;;  %v8379_v33 = vld [vmem:[%s11127_s3 + $0x400] sm:$0xff]  ;;  %v8404_v50 = vld [vmem:[%s11127_s3 + $0x4c8] sm:$0xff] }
 0x349   : > { %v10461_v59 = vpop.f32.mrf.mxu2 }
 0x34a   : > { %v4541_v57 = vpop.f32.mrf.mxu3 }
 0x34b   : > { %v4587_v41 = vpop.f32.mrf.mxu1 }
 0x34c   : > { %v4588_v44 = vadd.f32 %v4587_v41, %v4555_v49  ;;  %v10515_v41 = vadd.f32 %v4569_v51, %v4537_v4  ;;  %v4463_v51 = vadd.f32 %v10389_v17, %v10392_v34 }
 0x34d   : > { %v10463_v8 = vpop.f32.mrf.mxu0 }
 0x34e   : > { %v4496_v39 = vadd.f32 %v10413_v20, %v4463_v51 }
 0x351   : > { %v4508_v47 = vpop.f32.mrf.mxu2 }
 0x352   : > { %v4509_v38 = vadd.f32 %v4508_v47, %v4476_v18  ;;  %v4543_v36 = vpop.f32.mrf.mxu3  ;;  %v4557_v18 = vadd.f32 %v10396_v40, %v4524_v27  ;;  %v8381_v40 = vld [vmem:[%s11127_s3 + $0x410] sm:$0xff]  ;;  %v8406_v47 = vld [vmem:[%s11127_s3 + $0x4d8] sm:$0xff] }
 0x353   : > { %v4589_v6 = vpop.f32.mrf.mxu1  ;;  %5975 = vmatpush.bf16.msrb.mxu1 %v8381_v40  ;;  %v8397_v36 = vld [vmem:[%s11127_s3 + $0x490] sm:$0xff]  ;;  %6073 = vmatpush.bf16.msra.mxu0 %v8406_v47  ;;  %v8387_v40 = vld [vmem:[%s11127_s3 + $0x440] sm:$0xff] }
 0x354   : > { %v10465_v14 = vadd.f32 %v4541_v57, %v4509_v38  ;;  %v4590_v55 = vadd.f32 %v4589_v6, %v4557_v18  ;;  %6041 = vmatpush.bf16.msrb.mxu3 %v8397_v36  ;;  %v8388_v18 = vld [vmem:[%s11127_s3 + $0x448] sm:$0xff] }
 0x355   : > { %v4576_v32 = vpop.f32.mrf.mxu0  ;;  %6009 = vmatpush.bf16.msrb.mxu2 %v8388_v18 }
 0x359   : > { %v4510_v7 = vpop.f32.mrf.mxu2  ;;  %6010 = vmatpush.bf16.msrb.mxu2 %v8387_v40  ;;  %v8434_v40 = vld [vmem:[%s11127_s3 + $0x5b8] sm:$0xff] }
 0x35a   : > { %v4653_v62 = vpop.f32.mrf.mxu3 }
 0x35b   : > { %v4592_v63 = vpop.f32.mrf.mxu1 }
 0x35c   : > { %v4593_v61 = vadd.f32 %v4592_v63, %v10455_v15 }
 0x35d   : > { %v4686_v24 = vpop.f32.mrf.mxu0 }
 0x361   : > { %v4620_v1 = vpop.f32.mrf.mxu2 }
 0x362   : > { %v4621_v49 = vadd.f32 %v4620_v1, %v4588_v44  ;;  %v4655_v53 = vpop.f32.mrf.mxu3  ;;  %v4529_v44 = vadd.f32 %v10403_v29, %v4496_v39 }
 0x363   : > { %v4594_v35 = vpop.f32.mrf.mxu1 }
 0x364   : > { %v4654_v9 = vadd.f32 %v4653_v62, %v4621_v49  ;;  %v4562_v49 = vadd.f32 %v10405_v2, %v4529_v44  ;;  %v10549_v2 = vadd.f32 %v10463_v8, %v10465_v14  ;;  %v4468_v8 = vadd.f32 %v10389_v17, %v10401_v30 }
 0x365   : > { %v4688_v23 = vpop.f32.mrf.mxu0 }
 0x366   : > { %v4687_v3 = vadd.f32 %v4686_v24, %v4654_v9  ;;  %v4595_v63 = vadd.f32 %v4594_v35, %v4562_v49  ;;  %v8396_v35 = vld [vmem:[%s11127_s3 + $0x488] sm:$0xff]  ;;  %v4501_v36 = vadd.f32 %v10439_v42, %v4468_v8 }
 0x367   : > { %6042 = vmatpush.bf16.msrb.mxu3 %v8396_v35 }
 0x368   : > { %v4710_v16 = vmax.f32 %v4687_v3, 0.0  ;;  %v8405_v3 = vld [vmem:[%s11127_s3 + $0x4d0] sm:$0xff]  ;;  %v4534_v42 = vadd.f32 %v10423_v31, %v4501_v36 }
 0x369   : > { %v4622_v57 = vpop.f32.mrf.mxu2  ;;  %6074 = vmatpush.bf16.msra.mxu0 %v8405_v3  ;;  %v8418_v3 = vld [vmem:[%s11127_s3 + $0x538] sm:$0xff] }
 0x36a   : > { %v4721_v38 = vmul.f32 %v10499_v46, %v4710_v16  ;;  %v4623_v6 = vadd.f32 %v4622_v57, %v4590_v55  ;;  %v4658_v54 = vpop.f32.mrf.mxu3  ;;  %v8395_v57 = vld [vmem:[%s11127_s3 + $0x480] sm:$0xff] }
 0x36b   : > { %v4597_v32 = vpop.f32.mrf.mxu1  ;;  %6043 = vmatpush.bf16.msrb.mxu3 %v8395_v57 }
 0x36c   : > { %v4732_v4 = vadd.f32 %v10504_v0, %v4721_v38  ;;  %v4656_v43 = vadd.f32 %v4655_v53, %v4623_v6  ;;  %v8380_v53 = vld [vmem:[%s11127_s3 + $0x408] sm:$0xff] }
 0x36d   : > { %v4691_v62 = vpop.f32.mrf.mxu0  ;;  %5976 = vmatpush.bf16.msrb.mxu1 %v8380_v53  ;;  %6075 = vmatpush.bf16.msra.mxu0 %v8404_v50 }
 0x36e   : > { %4741 = vst [vmem:[#allocation3 + $0x8] sm:$0xff] %v4732_v4  ;;  %v4689_v7 = vadd.f32 %v4688_v23, %v4656_v43  ;;  %v4598_v43 = vadd.f32 %v4597_v32, %v10492_v26  ;;  %v4567_v32 = vadd.f32 %v10437_v45, %v4534_v42 }
 0x36f   : > { %6168 = vmatpush.bf16.msra.mxu3 %v8434_v40 }
 0x370   : > { %v4711_v52 = vmax.f32 %v4689_v7, 0.0  ;;  %v4473_v7 = vadd.f32 %v10389_v17, %v10421_v25 }
 0x371   : > { %v4625_v10 = vpop.f32.mrf.mxu2  ;;  %5977 = vmatpush.bf16.msrb.mxu1 %v8379_v33 }
 0x372   : > { %v4722_v24 = vmul.f32 %v10499_v46, %v4711_v52  ;;  %v4626_v37 = vadd.f32 %v4625_v10, %v4593_v61  ;;  %v4660_v1 = vpop.f32.mrf.mxu3  ;;  %v4506_v10 = vadd.f32 %v10461_v59, %v4473_v7 }
 0x373   : > { %v10531_v34 = vpop.f32.mrf.mxu1 }
 0x374   : > { %v4733_v5 = vadd.f32 %v10504_v0, %v4722_v24  ;;  %v4659_v28 = vadd.f32 %v4658_v54, %v4626_v37  ;;  %v10589_v25 = vadd.f32 %v10457_v22, %v4506_v10  ;;  %v4600_v31 = vadd.f32 %v10531_v34, %v4567_v32 }
 0x375   : > { %v4750_v20 = vld [vmem:[#allocation3 + $0x5] sm:$0xff]  ;;  %v4693_v9 = vpop.f32.mrf.mxu0  ;;  %6102 = vmatpush.bf16.msra.mxu1 %v8418_v3 }
 0x376   : > { %v10534_v27 = vpack.c.bf16 %v4750_v20, %v4750_v20  ;;  %4742 = vst [vmem:[#allocation3 + $0x10] sm:$0xff] %v4733_v5  ;;  %v4692_v15 = vadd.f32 %v4691_v62, %v4659_v28 }
 0x378   : > { %4770 = vst [vmem:[#allocation4] sm:$0xf] %v10534_v27  ;;  %v4712_v29 = vmax.f32 %v4692_v15, 0.0  ;;  %v10600_v34 = vshrl.u32 %v10534_v27, 16  ;;  %v10603_v53 = vshll.u32 %v10534_v27, 16 }
 0x379   : > { %v4627_v55 = vpop.f32.mrf.mxu2 }
 0x37a   : > { %v4723_v16 = vmul.f32 %v10499_v46, %v4712_v29  ;;  %v4628_v23 = vadd.f32 %v4627_v55, %v4595_v63  ;;  %v4663_v6 = vpop.f32.mrf.mxu3  ;;  %v7560_v63 = vrot.slane %v10534_v27, 9  ;;  %v8403_v29 = vld [vmem:[%s11127_s3 + $0x4c0] sm:$0xff]  ;;  %v8426_v55 = vld [vmem:[%s11127_s3 + $0x578] sm:$0xff]  ;;  %v4784_v50 = vrot.slane %v10600_v34, 4 }
 0x37b   : > { %v10563_v14 = vpop.f32.mrf.mxu1  ;;  %6076 = vmatpush.bf16.msra.mxu0 %v8403_v29  ;;  %v4787_v57 = vrot.slane %v10603_v53, 5  ;;  %6135 = vmatpush.bf16.msra.mxu2 %v8426_v55 }
 0x37c   : > { %v4734_v47 = vadd.f32 %v10504_v0, %v4723_v16  ;;  %v4661_v38 = vadd.f32 %v4660_v1, %v4628_v23 }
 0x37d   : > { %v4751_v51 = vld [vmem:[#allocation3 + $0xd] sm:$0xff]  ;;  %v4696_v39 = vpop.f32.mrf.mxu0 }
 0x37e   : > { %v10573_v30 = vpack.c.bf16 %v4751_v51, %v4751_v51  ;;  %4743 = vst [vmem:[#allocation3 + $0x18] sm:$0xff] %v4734_v47  ;;  %v4694_v4 = vadd.f32 %v4693_v9, %v4661_v38 }
 0x37f   : > { %v7695_v1 = vld [vmem:[#allocation4] sm:$0xf] }
 0x380   : > { %4771 = vst [vmem:[#allocation4 + $0x20] sm:$0xf] %v10573_v30  ;;  %v4713_v54 = vmax.f32 %v4694_v4, 0.0  ;;  %v4901_v45 = vrot.slane %v10573_v30, 5  ;;  %v10606_v18 = vshll.u32 %v10573_v30, 16  ;;  %v10626_v38 = vshrl.u32 %v10573_v30, 16 }
 0x381   : > { %v4630_v61 = vpop.f32.mrf.mxu2 }
 0x382   : > { %v4724_v52 = vmul.f32 %v10499_v46, %v4713_v54  ;;  %v4631_v62 = vadd.f32 %v4630_v61, %v4598_v43  ;;  %v4665_v5 = vpop.f32.mrf.mxu3  ;;  %v4902_v23 = vsel %vm9270_vm6, %v7560_v63, %v4901_v45  ;;  %v4903_v33 = vrot.slane %v4901_v45, 4 }
 0x383   : > { %v10582_v44 = vpop.f32.mrf.mxu1  ;;  %4934 = vst [vmem:[#allocation4 + $0x8] sm:$0xf] %v4902_v23  ;;  %v4793_v47 = vrot.slane %v10606_v18, 5  ;;  %v4788_v54 = vor.u32 %v4787_v57, %v4784_v50  ;;  %v4946_v61 = vrot.slane %v10603_v53, 6 }
 0x384   : > { %v4735_v24 = vadd.f32 %v10504_v0, %v4724_v52  ;;  %v4664_v37 = vadd.f32 %v4663_v6, %v4631_v62  ;;  %v4603_v6 = vadd.f32 %v10563_v14, %v10515_v41  ;;  %v4945_v14 = vrot.slane %v10600_v34, 5 }
 0x385   : > { %v4752_v26 = vld [vmem:[#allocation3 + $0x15] sm:$0xff]  ;;  %v4698_v49 = vpop.f32.mrf.mxu0  ;;  %v4949_v52 = vrot.slane %v10626_v38, 5  ;;  %v4789_v10 = vrot.slane %v4788_v54, 4 }
 0x386   : > { %v10586_v28 = vpack.c.bf16 %v4752_v26, %v4752_v26  ;;  %4744 = vst [vmem:[#allocation3 + $0x20] sm:$0xff] %v4735_v24  ;;  %v4697_v17 = vadd.f32 %v4696_v39, %v4664_v37  ;;  %v4797_v39 = vrot.slane %v10626_v38, 4 }
 0x387   : > { %v8351_v59 = vld [vmem:[#allocation4 + $0x1c] sm:$0xf0] }
 0x388   : > { %4772 = vst [vmem:[#allocation4 + $0x40] sm:$0xf] %v10586_v28  ;;  %v4714_v20 = vmax.f32 %v4697_v17, 0.0  ;;  %v7696_v15 = vor.u32 %v8351_v59, %v7695_v1  ;;  %v4904_v22 = vrot.slane %v10586_v28, 5  ;;  %v10637_v7 = vshll.u32 %v10586_v28, 16 }
 0x389   : > { %v4632_v9 = vpop.f32.mrf.mxu2  ;;  %v10640_v42 = vshrl.u32 %v10586_v28, 16  ;;  %v4798_v24 = vor.u32 %v4797_v39, %v4793_v47  ;;  %v4947_v17 = vor.u32 %v4946_v61, %v4945_v14  ;;  %v8417_v39 = vld [vmem:[%s11127_s3 + $0x530] sm:$0xff] }
 0x38a   : > { %v4725_v35 = vmul.f32 %v10499_v46, %v4714_v20  ;;  %v4633_v16 = vadd.f32 %v4632_v9, %v4600_v31  ;;  %5978 = vmatmul.bf16.vlgmr.msrb.gmra.mxu1 %v7696_v15  ;;  %v4668_v4 = vpop.f32.mrf.mxu3  ;;  %v4905_v43 = vsel %vm9270_vm6, %v4903_v33, %v4904_v22  ;;  %v4803_v37 = vrot.slane %v10637_v7, 5  ;;  %v7703_v40 = vld [vmem:[#allocation4 + $0x8] sm:$0xf] }
 0x38b   : > { %v10620_v8 = vpop.f32.mrf.mxu1  ;;  %4935 = vst [vmem:[#allocation4 + $0x28] sm:$0xf] %v4905_v43  ;;  %v4954_v31 = vrot.slane %v10640_v42, 5  ;;  %v4955_v1 = vrot.slane %v10637_v7, 6  ;;  %v4794_v20 = vsel %vm9315_vm7, %v4789_v10, %v4793_v47  ;;  %v4948_v9 = vrot.slane %v4947_v17, 4  ;;  %6103 = vmatpush.bf16.msra.mxu1 %v8417_v39  ;;  %v8432_v39 = vld [vmem:[%s11127_s3 + $0x5a8] sm:$0xff] }
 0x38c   : > { %v4736_v36 = vadd.f32 %v10504_v0, %v4725_v35  ;;  %v4666_v51 = vadd.f32 %v4665_v5, %v4633_v16  ;;  %v4950_v5 = vrot.slane %v10606_v18, 6  ;;  %4879 = vst [vmem:[#allocation4 + $0x4] sm:$0xf] %v4794_v20 }
 0x38d   : > { %v4753_v62 = vld [vmem:[#allocation3 + $0x1d] sm:$0xff]  ;;  %v4701_v32 = vpop.f32.mrf.mxu0  ;;  %v10654_v3 = vor.u32 %v4955_v1, %v4954_v31  ;;  %v8416_v31 = vld [vmem:[%s11127_s3 + $0x528] sm:$0xff]  ;;  %v10705_v1 = vadd.f32 %v10620_v8, %v10549_v2 }
 0x38e   : > { %4745 = vst [vmem:[#allocation3 + $0x28] sm:$0xff] %v4736_v36  ;;  %v4699_v41 = vadd.f32 %v4698_v49, %v4666_v51  ;;  %v4799_v49 = vrot.slane %v4798_v24, 4  ;;  %v4951_v15 = vor.u32 %v4950_v5, %v4949_v52  ;;  %v10651_v63 = vpack.c.bf16 %v4753_v62, %v4753_v62  ;;  %v8433_v52 = vld [vmem:[%s11127_s3 + $0x5b0] sm:$0xff] }
 0x38f   : > { %v4572_v36 = vadd.f32 %v10459_v13, %v10589_v25  ;;  %v10680_v13 = vld [vmem:[%s11127_s3 + $0x5f8] sm:$0xff]  ;;  %v4906_v25 = vrot.slane %v4904_v22, 4  ;;  %v4807_v62 = vrot.slane %v10640_v42, 4  ;;  %6169 = vmatpush.bf16.msra.mxu3 %v8433_v52  ;;  %6104 = vmatpush.bf16.msra.mxu1 %v8416_v31 }
 0x390   : > { %v4715_v26 = vmax.f32 %v4699_v41, 0.0  ;;  %v4804_v55 = vsel %vm9315_vm7, %v4799_v49, %v4803_v37  ;;  %v4953_v16 = vrot.slane %v4951_v15, 4  ;;  %4773 = vst [vmem:[#allocation4 + $0x60] sm:$0xf] %v10651_v63  ;;  %v4952_v47 = vsel %vm9344_vm8, %v4948_v9, %v4951_v15  ;;  %v8425_v41 = vld [vmem:[%s11127_s3 + $0x570] sm:$0xff]  ;;  %6201 = vmatpush.bf16.msrb.mxu0 %v10680_v13 }
 0x391   : > { %v4635_v59 = vpop.f32.mrf.mxu2  ;;  %4880 = vst [vmem:[#allocation4 + $0x24] sm:$0xf] %v4804_v55  ;;  %v4907_v14 = vrot.slane %v10651_v63, 5  ;;  %v4605_v61 = vadd.f32 %v10582_v44, %v4572_v36  ;;  %v10691_v10 = vshll.u32 %v10651_v63, 16  ;;  %v10694_v24 = vshrl.u32 %v10651_v63, 16  ;;  %6136 = vmatpush.bf16.msra.mxu2 %v8425_v41  ;;  %v8415_v41 = vld [vmem:[%s11127_s3 + $0x520] sm:$0xff] }
 0x392   : > { %v4726_v45 = vmul.f32 %v10499_v46, %v4715_v26  ;;  %v4636_v29 = vadd.f32 %v4635_v59, %v4603_v6  ;;  %v8352_v50 = vld [vmem:[#allocation4 + $0x24] sm:$0xf0]  ;;  %v4670_v57 = vpop.f32.mrf.mxu3  ;;  %v4957_v43 = vsel %vm9344_vm8, %v4953_v16, %v10654_v3  ;;  %4998 = vst [vmem:[#allocation4 + $0xc] sm:$0xf] %v4952_v47  ;;  %v7727_v26 = vld [vmem:[#allocation4 + $0x40] sm:$0xf]  ;;  %v4808_v49 = vor.u32 %v4807_v62, %v4803_v37 }
 0x393   : > { %v4609_v35 = vpop.f32.mrf.mxu1  ;;  %v7704_v51 = vor.u32 %v8352_v50, %v7703_v40  ;;  %4999 = vst [vmem:[#allocation4 + $0x2c] sm:$0xf] %v4957_v43  ;;  %v4908_v44 = vsel %vm9270_vm6, %v4906_v25, %v4907_v14  ;;  %v8347_v59 = vld [vmem:[#allocation4 + $0x4] sm:$0xf]  ;;  %v4813_v15 = vrot.slane %v10691_v10, 5  ;;  %v8423_v62 = vld [vmem:[%s11127_s3 + $0x560] sm:$0xff]  ;;  %6170 = vmatpush.bf16.msra.mxu3 %v8432_v39  ;;  %6105 = vmatpush.bf16.msra.mxu1 %v8415_v41 }
 0x394   : > { %v4737_v23 = vadd.f32 %v10504_v0, %v4726_v45  ;;  %v4669_v33 = vadd.f32 %v4668_v4, %v4636_v29  ;;  %4936 = vst [vmem:[#allocation4 + $0x48] sm:$0xf] %v4908_v44  ;;  %v4817_v45 = vrot.slane %v10694_v24, 4  ;;  %v8424_v35 = vld [vmem:[%s11127_s3 + $0x568] sm:$0xff]  ;;  %v10724_v37 = vld [vmem:[%s11127_s3 + $0x5f0] sm:$0xff]  ;;  %v8422_v41 = vld [vmem:[%s11127_s3 + $0x558] sm:$0xff] }
 0x395   : > { %v4754_v6 = vld [vmem:[#allocation3 + $0x25] sm:$0xff]  ;;  %6044 = vmatmul.bf16.vlgmr.msrb.gmra.mxu3 %v7704_v51  ;;  %v4703_v5 = vpop.f32.mrf.mxu0  ;;  %6137 = vmatpush.bf16.msra.mxu2 %v8424_v35 }
 0x396   : > { %v10669_v54 = vpack.c.bf16 %v4754_v6, %v4754_v6  ;;  %4746 = vst [vmem:[#allocation3 + $0x30] sm:$0xff] %v4737_v23  ;;  %v4702_v4 = vadd.f32 %v4701_v32, %v4669_v33  ;;  %v4909_v32 = vrot.slane %v4907_v14, 4  ;;  %v4809_v33 = vrot.slane %v4808_v49, 4  ;;  %6202 = vmatpush.bf16.msrb.mxu0 %v10724_v37 }
 0x397   : > { %v8359_v55 = vld [vmem:[#allocation4 + $0x5c] sm:$0xf0]  ;;  %v4818_v40 = vor.u32 %v4817_v45, %v4813_v15 }
 0x398   : > { %4774 = vst [vmem:[#allocation4 + $0x80] sm:$0xf] %v10669_v54  ;;  %v4716_v22 = vmax.f32 %v4702_v4, 0.0  ;;  %v4910_v17 = vrot.slane %v10669_v54, 5  ;;  %v10716_v8 = vshll.u32 %v10669_v54, 16  ;;  %v7728_v23 = vor.u32 %v8359_v55, %v7727_v26 }
 0x399   : > { %v4637_v20 = vpop.f32.mrf.mxu2  ;;  %v7697_v16 = vld [vmem:[#allocation4 + $0x20] sm:$0xf0]  ;;  %v10727_v50 = vshrl.u32 %v10669_v54, 16  ;;  %v8348_v51 = vld [vmem:[#allocation4 + $0xc] sm:$0xf]  ;;  %v4814_v25 = vsel %vm9315_vm7, %v4809_v33, %v4813_v15  ;;  %v4819_v14 = vrot.slane %v4818_v40, 4  ;;  %6138 = vmatpush.bf16.msra.mxu2 %v8423_v62 }
 0x39a   : > { %v4727_v29 = vmul.f32 %v10499_v46, %v4716_v22  ;;  %v4638_v9 = vadd.f32 %v4637_v20, %v4605_v61  ;;  %v4911_v2 = vsel %vm9270_vm6, %v4909_v32, %v4910_v17  ;;  %v7700_v6 = vor.u32 %v8347_v59, %v7697_v16  ;;  %v4673_v43 = vpop.f32.mrf.mxu3  ;;  %5983 = vmatmul.bf16.gmra.mxu1 %v7728_v23  ;;  %v10748_v22 = vld [vmem:[%s11127_s3 + $0x5e8] sm:$0xff]  ;;  %v7705_v44 = vld [vmem:[#allocation4 + $0x28] sm:$0xf0] }
 0x39b   : > { %4937 = vst [vmem:[#allocation4 + $0x68] sm:$0xf] %v4911_v2  ;;  %v4823_v4 = vrot.slane %v10716_v8, 5  ;;  %v4959_v61 = vrot.slane %v10694_v24, 5  ;;  %v4964_v32 = vrot.slane %v10727_v50, 5  ;;  %v4965_v31 = vrot.slane %v10716_v8, 6  ;;  %6203 = vmatpush.bf16.msrb.mxu0 %v10748_v22 }
 0x39c   : > { %v4738_v47 = vadd.f32 %v10504_v0, %v4727_v29  ;;  %v4671_v36 = vadd.f32 %v4670_v57, %v4638_v9  ;;  %v4958_v57 = vrot.slane %v10654_v3, 4  ;;  %6011 = vmatmul.bf16.vlgmr.msrb.gmra.mxu2 %v7700_v6  ;;  %v4960_v3 = vrot.slane %v10691_v10, 6  ;;  %4881 = vst [vmem:[#allocation4 + $0x44] sm:$0xf] %v4814_v25  ;;  %v7735_v9 = vld [vmem:[#allocation4 + $0x48] sm:$0xf] }
 0x39d   : > { %v4755_v52 = vld [vmem:[#allocation3 + $0x2d] sm:$0xff]  ;;  %v7708_v59 = vor.u32 %v8348_v51, %v7705_v44  ;;  %v4824_v20 = vsel %vm9315_vm7, %v4819_v14, %v4823_v4  ;;  %v4912_v15 = vrot.slane %v4910_v17, 4  ;;  %v4706_v29 = vpop.f32.mrf.mxu0  ;;  %v10760_v2 = vor.u32 %v4965_v31, %v4964_v32  ;;  %v8414_v40 = vld [vmem:[%s11127_s3 + $0x518] sm:$0xff]  ;;  %v10785_v25 = vld [vmem:[%s11127_s3 + $0x5e0] sm:$0xff]  ;;  %6139 = vmatpush.bf16.msra.mxu2 %v8422_v41 }
 0x39e   : > { %4747 = vst [vmem:[#allocation3 + $0x38] sm:$0xff] %v4738_v47  ;;  %v4704_v26 = vadd.f32 %v4703_v5, %v4671_v36  ;;  %v10755_v49 = vpack.c.bf16 %v4755_v52, %v4755_v52  ;;  %v8431_v5 = vld [vmem:[%s11127_s3 + $0x5a0] sm:$0xff]  ;;  %v4961_v55 = vor.u32 %v4960_v3, %v4959_v61  ;;  %v4827_v35 = vrot.slane %v10727_v50, 4  ;;  %6106 = vmatpush.bf16.msra.mxu1 %v8414_v40 }
 0x39f   : > { %4882 = vst [vmem:[#allocation4 + $0x64] sm:$0xf] %v4824_v20  ;;  %6077 = vmatmul.bf16.vlgmr.msra.gmra.mxu0 %v7708_v59  ;;  %6171 = vmatpush.bf16.msra.mxu3 %v8431_v5  ;;  %v4968_v40 = vrot.slane %v10760_v2, 4 }
 0x3a0   : > { %v4717_v45 = vmax.f32 %v4704_v26, 0.0  ;;  %4775 = vst [vmem:[#allocation4 + $0xa0] sm:$0xf] %v10755_v49  ;;  %v4913_v17 = vrot.slane %v10755_v49, 5  ;;  %v10766_v23 = vshll.u32 %v10755_v49, 16  ;;  %v10769_v33 = vshrl.u32 %v10755_v49, 16  ;;  %6204 = vmatpush.bf16.msrb.mxu0 %v10785_v25 }
 0x3a1   : > { %v4640_v16 = vpop.f32.mrf.mxu2  ;;  %v4962_v51 = vsel %vm9344_vm8, %v4958_v57, %v4961_v55  ;;  %v4963_v39 = vrot.slane %v4961_v55, 4  ;;  %v4828_v61 = vor.u32 %v4827_v35, %v4823_v4  ;;  %v8430_v57 = vld [vmem:[%s11127_s3 + $0x598] sm:$0xff] }
 0x3a2   : > { %v4728_v47 = vmul.f32 %v10499_v46, %v4717_v45  ;;  %v4641_v6 = vadd.f32 %v4640_v16, %v10705_v1  ;;  %v8360_v36 = vld [vmem:[#allocation4 + $0x64] sm:$0xf0]  ;;  %5000 = vst [vmem:[#allocation4 + $0x4c] sm:$0xf] %v4962_v51  ;;  %v4914_v1 = vsel %vm9270_vm6, %v4912_v15, %v4913_v17  ;;  %v4675_v26 = vpop.f32.mrf.mxu3  ;;  %v4833_v3 = vrot.slane %v10766_v23, 5 }
 0x3a3   : > { %v7736_v14 = vor.u32 %v8360_v36, %v7735_v9  ;;  %v4967_v44 = vsel %vm9344_vm8, %v4963_v39, %v10760_v2  ;;  %4938 = vst [vmem:[#allocation4 + $0x88] sm:$0xf] %v4914_v1  ;;  %v4829_v31 = vrot.slane %v4828_v61, 4  ;;  %v4837_v4 = vrot.slane %v10769_v33, 4  ;;  %6172 = vmatpush.bf16.msra.mxu3 %v8430_v57  ;;  %v8355_v45 = vld [vmem:[#allocation4 + $0x44] sm:$0xf] }
 0x3a4   : > { %v4739_v52 = vadd.f32 %v10504_v0, %v4728_v47  ;;  %v4674_v62 = vadd.f32 %v4673_v43, %v4641_v6  ;;  %5001 = vst [vmem:[#allocation4 + $0x6c] sm:$0xf] %v4967_v44  ;;  %v7759_v43 = vld [vmem:[#allocation4 + $0x80] sm:$0xf]  ;;  %v4969_v15 = vrot.slane %v10769_v33, 5  ;;  %v4970_v5 = vrot.slane %v10766_v23, 6 }
 0x3a5   : > { %v4756_v32 = vld [vmem:[#allocation3 + $0x35] sm:$0xff]  ;;  %6049 = vmatmul.bf16.gmra.mxu3 %v7736_v14  ;;  %v4915_v55 = vrot.slane %v4913_v17, 4  ;;  %v4834_v35 = vsel %vm9315_vm7, %v4829_v31, %v4833_v3  ;;  %v4838_v16 = vor.u32 %v4837_v4, %v4833_v3  ;;  %v4708_v47 = vpop.f32.mrf.mxu0 }
 0x3a6   : > { %v10798_v59 = vpack.c.bf16 %v4756_v32, %v4756_v32  ;;  %4748 = vst [vmem:[#allocation3 + $0x40] sm:$0xff] %v4739_v52  ;;  %v4707_v20 = vadd.f32 %v4706_v29, %v4674_v62  ;;  %v7729_v9 = vld [vmem:[#allocation4 + $0x60] sm:$0xf0]  ;;  %v4971_v51 = vor.u32 %v4970_v5, %v4969_v15 }
 0x3a7   : > { %v8367_v6 = vld [vmem:[#allocation4 + $0x9c] sm:$0xf0]  ;;  %v7732_v39 = vor.u32 %v8355_v45, %v7729_v9  ;;  %4883 = vst [vmem:[#allocation4 + $0x84] sm:$0xf] %v4834_v35  ;;  %v4839_v57 = vrot.slane %v4838_v16, 4 }
 0x3a8   : > { %4776 = vst [vmem:[#allocation4 + $0xc0] sm:$0xf] %v10798_v59  ;;  %v4718_v29 = vmax.f32 %v4707_v20, 0.0  ;;  %v4916_v36 = vrot.slane %v10798_v59, 5  ;;  %v7760_v14 = vor.u32 %v8367_v6, %v7759_v43  ;;  %v10809_v1 = vshll.u32 %v10798_v59, 16  ;;  %v8413_v47 = vld [vmem:[%s11127_s3 + $0x510] sm:$0xff] }
 0x3a9   : > { %v4642_v41 = vpop.f32.mrf.mxu2  ;;  %v10812_v17 = vshrl.u32 %v10798_v59, 16  ;;  %v4972_v52 = vsel %vm9344_vm8, %v4968_v40, %v4971_v51  ;;  %v8356_v62 = vld [vmem:[#allocation4 + $0x4c] sm:$0xf]  ;;  %v4973_v15 = vrot.slane %v4971_v51, 4  ;;  %6107 = vmatpush.bf16.msra.mxu1 %v8413_v47 }
 0x3aa   : > { %v4729_v2 = vmul.f32 %v10499_v46, %v4718_v29  ;;  %v4917_v61 = vsel %vm9270_vm6, %v4915_v55, %v4916_v36  ;;  %v4843_v26 = vrot.slane %v10809_v1, 5  ;;  %v4975_v31 = vrot.slane %v10809_v1, 6  ;;  %5002 = vst [vmem:[#allocation4 + $0x8c] sm:$0xf] %v4972_v52  ;;  %5988 = vmatmul.bf16.gmra.mxu1 %v7760_v14  ;;  %v7767_v40 = vld [vmem:[#allocation4 + $0x88] sm:$0xf] }
 0x3ab   : > { %4939 = vst [vmem:[#allocation4 + $0xa8] sm:$0xf] %v4917_v61  ;;  %v4974_v44 = vrot.slane %v10812_v17, 5  ;;  %v7737_v32 = vld [vmem:[#allocation4 + $0x68] sm:$0xf0]  ;;  %v4847_v43 = vrot.slane %v10812_v17, 4 }
 0x3ac   : > { %v4740_v3 = vadd.f32 %v10504_v0, %v4729_v2  ;;  %v7740_v46 = vor.u32 %v8356_v62, %v7737_v32  ;;  %v4844_v4 = vsel %vm9315_vm7, %v4839_v57, %v4843_v26  ;;  %6016 = vmatmul.bf16.gmra.mxu2 %v7732_v39  ;;  %v4918_v55 = vrot.slane %v4916_v36, 4  ;;  %v8421_v14 = vld [vmem:[%s11127_s3 + $0x550] sm:$0xff]  ;;  %v10855_v62 = vld [vmem:[%s11127_s3 + $0x5d8] sm:$0xff] }
 0x3ad   : > { %v4757_v20 = vld [vmem:[#allocation3 + $0x3d] sm:$0xff]  ;;  %v4976_v5 = vor.u32 %v4975_v31, %v4974_v44  ;;  %4884 = vst [vmem:[#allocation4 + $0xa4] sm:$0xf] %v4844_v4  ;;  %v4848_v0 = vor.u32 %v4847_v43, %v4843_v26  ;;  %6140 = vmatpush.bf16.msra.mxu2 %v8421_v14  ;;  %v8429_v26 = vld [vmem:[%s11127_s3 + $0x590] sm:$0xff]  ;;  %v8412_v44 = vld [vmem:[%s11127_s3 + $0x508] sm:$0xff]  ;;  %6205 = vmatpush.bf16.msrb.mxu0 %v10855_v62 }
 0x3ae   : > { %4749 = vst [vmem:[#allocation3 + $0x48] sm:$0x7] %v4740_v3  ;;  %v10826_v45 = vpack.c.bf16 %v4757_v20, %v4757_v20  ;;  %v8420_v4 = vld [vmem:[%s11127_s3 + $0x548] sm:$0xff]  ;;  %6173 = vmatpush.bf16.msra.mxu3 %v8429_v26  ;;  %6108 = vmatpush.bf16.msra.mxu1 %v8412_v44  ;;  %v8363_v47 = vld [vmem:[#allocation4 + $0x84] sm:$0xf] }
 0x3af   : > { %v4977_v9 = vsel %vm9344_vm8, %v4973_v15, %v4976_v5  ;;  %6082 = vmatmul.bf16.gmra.mxu0 %v7740_v46  ;;  %v4849_v36 = vrot.slane %v4848_v0, 4  ;;  %v4978_v31 = vrot.slane %v4976_v5, 4  ;;  %v4778_v15 = vld [vmem:[#allocation4 + $0x100] sm:$0x3] }
 0x3b0   : > { %4777 = vst [vmem:[#allocation4 + $0xe0] sm:$0xf] %v10826_v45  ;;  %v4919_v35 = vrot.slane %v10826_v45, 5  ;;  %v10833_v16 = vshll.u32 %v10826_v45, 16  ;;  %v10836_v29 = vshrl.u32 %v10826_v45, 16  ;;  %v10872_v0 = vld [vmem:[%s11127_s3 + $0x5d0] sm:$0xff] }
 0x3b1   : > { %5003 = vst [vmem:[#allocation4 + $0xac] sm:$0xf] %v4977_v9  ;;  %v7791_v9 = vld [vmem:[#allocation4 + $0xc0] sm:$0xf]  ;;  %6141 = vmatpush.bf16.msra.mxu2 %v8420_v4  ;;  %6206 = vmatpush.bf16.msrb.mxu0 %v10872_v0  ;;  %v8364_v4 = vld [vmem:[#allocation4 + $0x8c] sm:$0xf] }
 0x3b2   : > { %v8368_v6 = vld [vmem:[#allocation4 + $0xa4] sm:$0xf0]  ;;  %v4920_v51 = vsel %vm9270_vm6, %v4918_v55, %v4919_v35  ;;  %v4853_v39 = vrot.slane %v10833_v16, 5  ;;  %v4980_v41 = vrot.slane %v10833_v16, 6  ;;  %v4857_v61 = vrot.slane %v10836_v29, 4 }
 0x3b3   : > { %v7768_v2 = vor.u32 %v8368_v6, %v7767_v40  ;;  %4940 = vst [vmem:[#allocation4 + $0xc8] sm:$0xf] %v4920_v51  ;;  %v4979_v57 = vrot.slane %v10836_v29, 5  ;;  %v8428_v40 = vld [vmem:[%s11127_s3 + $0x588] sm:$0xff]  ;;  %v4921_v6 = vrot.slane %v4919_v35, 4 }
 0x3b4   : > { %v4854_v52 = vsel %vm9315_vm7, %v4849_v36, %v4853_v39  ;;  %v4858_v32 = vor.u32 %v4857_v61, %v4853_v39  ;;  %v7761_v43 = vld [vmem:[#allocation4 + $0xa0] sm:$0xf0]  ;;  %6174 = vmatpush.bf16.msra.mxu3 %v8428_v40 }
 0x3b5   : > { %v4758_v3 = vld [vmem:[#allocation3 + $0x45] sm:$0xff]  ;;  %4885 = vst [vmem:[#allocation4 + $0xc4] sm:$0xf] %v4854_v52  ;;  %v4981_v46 = vor.u32 %v4980_v41, %v4979_v57  ;;  %6054 = vmatmul.bf16.gmra.mxu3 %v7768_v2  ;;  %v7764_v41 = vor.u32 %v8363_v47, %v7761_v43 }
 0x3b6   : > { %v10866_v20 = vpack.c.bf16 %v4758_v3, %v4758_v3  ;;  %v4859_v2 = vrot.slane %v4858_v32, 4 }
 0x3b7   : > { %v8375_v5 = vld [vmem:[#allocation4 + $0xdc] sm:$0xf0]  ;;  %v4982_v55 = vsel %vm9344_vm8, %v4978_v31, %v4981_v46  ;;  %v4942_v31 = vld [vmem:[#allocation4 + $0x108] sm:$0x3] }
 0x3b8   : > { %v4922_v51 = vrot.slane %v10866_v20, 5  ;;  %v10881_v36 = vshll.u32 %v10866_v20, 16  ;;  %v10884_v39 = vshrl.u32 %v10866_v20, 16  ;;  %v7792_v14 = vor.u32 %v8375_v5, %v7791_v9  ;;  %5004 = vst [vmem:[#allocation4 + $0xcc] sm:$0xf] %v4982_v55 }
 0x3b9   : > { %v4779_v61 = vsel %vm9530_vm11, %v10866_v20, %v4778_v15  ;;  %v7769_v57 = vld [vmem:[#allocation4 + $0xa8] sm:$0xf0]  ;;  %v4983_v5 = vrot.slane %v4981_v46, 4  ;;  %v5055_v46 = vrot.slane %v10600_v34, 6 }
 0x3ba   : > { %v4923_v35 = vsel %vm9270_vm6, %v4921_v6, %v4922_v51  ;;  %v4924_v52 = vrot.slane %v4922_v51, 4  ;;  %v4863_v26 = vrot.slane %v10881_v36, 5  ;;  %v4867_v44 = vrot.slane %v10884_v39, 4  ;;  %4780 = vst [vmem:[#allocation4 + $0x100] sm:$0x3] %v4779_v61  ;;  %5993 = vmatmul.bf16.gmra.mxu1 %v7792_v14 }
 0x3bb   : > { %4941 = vst [vmem:[#allocation4 + $0xe8] sm:$0xf] %v4923_v35  ;;  %v4984_v3 = vrot.slane %v10884_v39, 5  ;;  %v4985_v32 = vrot.slane %v10881_v36, 6  ;;  %v7772_v9 = vor.u32 %v8364_v4, %v7769_v57  ;;  %v4887_v51 = vld [vmem:[#allocation4 + $0x104] sm:$0x3] }
 0x3bc   : > { %v4864_v43 = vsel %vm9315_vm7, %v4859_v2, %v4863_v26  ;;  %v4868_v60 = vor.u32 %v4867_v44, %v4863_v26  ;;  %v4943_v15 = vsel %vm9530_vm11, %v4924_v52, %v4942_v31  ;;  %6021 = vmatmul.bf16.gmra.mxu2 %v7764_v41  ;;  %v7561_v2 = vrot.slane %v10534_v27, 10  ;;  %v7799_v61 = vld [vmem:[#allocation4 + $0xc8] sm:$0xf]  ;;  %v8411_v35 = vld [vmem:[%s11127_s3 + $0x500] sm:$0xff] }
 0x3bd   : > { %4886 = vst [vmem:[#allocation4 + $0xe4] sm:$0xf] %v4864_v43  ;;  %v4986_v55 = vor.u32 %v4985_v32, %v4984_v3  ;;  %v7562_v14 = vrot.slane %v10534_v27, 11  ;;  %v5056_v41 = vrot.slane %v10603_v53, 7  ;;  %v5011_v52 = vrot.slane %v10573_v30, 6  ;;  %v8419_v27 = vld [vmem:[%s11127_s3 + $0x540] sm:$0xff]  ;;  %6109 = vmatpush.bf16.msra.mxu1 %v8411_v35 }
 0x3be   : > { %v4869_v40 = vrot.slane %v4868_v60, 4  ;;  %4944 = vst [vmem:[#allocation4 + $0x108] sm:$0x3] %v4943_v15  ;;  %v5014_v26 = vrot.slane %v10586_v28, 6  ;;  %v10921_v53 = vld [vmem:[%s11127_s3 + $0x5c8] sm:$0xff]  ;;  %v8427_v3 = vld [vmem:[%s11127_s3 + $0x580] sm:$0xff]  ;;  %6142 = vmatpush.bf16.msra.mxu2 %v8419_v27 }
 0x3bf   : > { %v4987_v47 = vsel %vm9344_vm8, %v4983_v5, %v4986_v55  ;;  %v4988_v6 = vrot.slane %v4986_v55, 4  ;;  %6087 = vmatmul.bf16.gmra.mxu0 %v7772_v9  ;;  %v5012_v31 = vsel %vm9555_vm13, %v7561_v2, %v5011_v52  ;;  %v5013_v4 = vrot.slane %v5011_v52, 4  ;;  %6175 = vmatpush.bf16.msra.mxu3 %v8427_v3 }
 0x3c0   : > { %5005 = vst [vmem:[#allocation4 + $0xec] sm:$0xf] %v4987_v47  ;;  %v4888_v57 = vsel %vm9530_vm11, %v4869_v40, %v4887_v51  ;;  %v5122_v43 = vrot.slane %v10573_v30, 7  ;;  %6207 = vmatpush.bf16.msrb.mxu0 %v10921_v53  ;;  %v5125_v60 = vrot.slane %v10586_v28, 7  ;;  %v5057_v15 = vor.u32 %v5056_v41, %v5055_v46  ;;  %v10944_v51 = vld [vmem:[%s11127_s3 + $0x5c0] sm:$0xff] }
 0x3c1   : > { %4889 = vst [vmem:[#allocation4 + $0x104] sm:$0x3] %v4888_v57  ;;  %v5007_v58 = vsel %vm9530_vm11, %v4988_v6, %v5006_v11  ;;  %v5015_v9 = vsel %vm9555_vm13, %v5013_v4, %v5014_v26  ;;  %8443 = vmatpush.bf16.msrb.mxu1 %v10680_v13  ;;  %v5059_v40 = vrot.slane %v10626_v38, 6  ;;  %v5060_v30 = vrot.slane %v10606_v18, 7 }
 0x3c2   : > { %v8376_v44 = vld [vmem:[#allocation4 + $0xe4] sm:$0xf0]  ;;  %5008 = vst [vmem:[#allocation4 + $0x10c] sm:$0x3] %v5007_v58  ;;  %v5123_v5 = vsel %vm9587_vm0, %v7562_v14, %v5122_v43  ;;  %v5124_v55 = vrot.slane %v5122_v43, 4  ;;  %v5170_v47 = vrot.slane %v10626_v38, 7 }
 0x3c3   : > { %v7800_v32 = vor.u32 %v8376_v44, %v7799_v61  ;;  %5044 = vst [vmem:[#allocation4 + $0x10] sm:$0xf] %v5012_v31  ;;  %v5064_v13 = vrot.slane %v10640_v42, 6  ;;  %v5058_v2 = vrot.slane %v5057_v15, 4  ;;  %v5061_v61 = vor.u32 %v5060_v30, %v5059_v40  ;;  %v8371_v14 = vld [vmem:[#allocation4 + $0xc4] sm:$0xf] }
 0x3c4   : > { %5045 = vst [vmem:[#allocation4 + $0x30] sm:$0xf] %v5015_v9  ;;  %v7793_v6 = vld [vmem:[#allocation4 + $0xe0] sm:$0xf0]  ;;  %v5126_v28 = vsel %vm9587_vm0, %v5124_v55, %v5125_v60  ;;  %v5065_v38 = vrot.slane %v10637_v7, 7  ;;  %v5171_v57 = vor.u32 %v5170_v47, %v10606_v18  ;;  %6208 = vmatpush.bf16.msrb.mxu0 %v10944_v51  ;;  %v7563_v41 = vrot.slane %v10600_v34, 11 }
 0x3c5   : > { %6059 = vmatmul.bf16.gmra.mxu3 %v7800_v32  ;;  %5157 = vst [vmem:[#allocation4 + $0x18] sm:$0xf] %v5123_v5  ;;  %8444 = vmatpush.bf16.msrb.mxu1 %v10724_v37  ;;  %v7796_v58 = vor.u32 %v8371_v14, %v7793_v6  ;;  %v5062_v52 = vsel %vm9602_vm2, %v5058_v2, %v5061_v61  ;;  %v5063_v44 = vrot.slane %v5061_v61, 4  ;;  %v8372_v32 = vld [vmem:[#allocation4 + $0xcc] sm:$0xf]  ;;  %v5174_v37 = vrot.slane %v10640_v42, 7 }
 0x3c6   : > { %5158 = vst [vmem:[#allocation4 + $0x38] sm:$0xf] %v5126_v28  ;;  %v5066_v3 = vor.u32 %v5065_v38, %v5064_v13  ;;  %v5172_v18 = vsel %vm9617_vm5, %v7563_v41, %v5171_v57  ;;  %v5173_v43 = vrot.slane %v5170_v47, 4  ;;  %v5016_v5 = vrot.slane %v5014_v26, 4 }
 0x3c7   : > { %v7801_v35 = vld [vmem:[#allocation4 + $0xe8] sm:$0xf0]  ;;  %5108 = vst [vmem:[#allocation4 + $0x14] sm:$0xf] %v5062_v52  ;;  %v5175_v15 = vor.u32 %v5174_v37, %v10637_v7  ;;  %v5127_v55 = vrot.slane %v5125_v60, 4  ;;  %v5017_v30 = vrot.slane %v10651_v63, 6 }
 0x3c8   : > { %v10947_v11 = vld [vmem:[#allocation4 + $0x100] sm:$0x33]  ;;  %5219 = vst [vmem:[#allocation4 + $0x1c] sm:$0xf] %v5172_v18  ;;  %v7804_v31 = vor.u32 %v8372_v32, %v7801_v35  ;;  %v5067_v34 = vsel %vm9602_vm2, %v5063_v44, %v5066_v3  ;;  %v5020_v6 = vrot.slane %v10669_v54, 6  ;;  %v5128_v42 = vrot.slane %v10651_v63, 7 }
 0x3c9   : > { %v5498_v46 = vunpack.c.l.b16 %v10947_v11  ;;  %v5263_v4 = vld [vmem:[#allocation4 + $0x108] sm:$0x33]  ;;  %5109 = vst [vmem:[#allocation4 + $0x34] sm:$0xf] %v5067_v34  ;;  %8445 = vmatpush.bf16.msrb.mxu1 %v10748_v22  ;;  %v5176_v40 = vsel %vm9617_vm5, %v5173_v43, %v5175_v15  ;;  %v5131_v28 = vrot.slane %v10669_v54, 7  ;;  %v5018_v7 = vsel %vm9555_vm13, %v5016_v5, %v5017_v30 }
 0x3ca   : > { %v5500_v9 = vunpack.c.l.b16 %v5263_v4  ;;  %5220 = vst [vmem:[#allocation4 + $0x3c] sm:$0xf] %v5176_v40  ;;  %v5019_v22 = vrot.slane %v5017_v30, 4  ;;  %v5129_v26 = vsel %vm9587_vm0, %v5127_v55, %v5128_v42  ;;  %v5130_v60 = vrot.slane %v5128_v42, 4 }
 0x3cb   : > { %v5538_v27 = vpack.c.b16 %v5498_v46, %v5498_v46  ;;  %5046 = vst [vmem:[#allocation4 + $0x50] sm:$0xf] %v5018_v7  ;;  %v5069_v54 = vrot.slane %v10694_v24, 6  ;;  %v5178_v2 = vrot.slane %v10694_v24, 7  ;;  %v5068_v61 = vrot.slane %v5066_v3, 4 }
 0x3cc   : > { %6026 = vmatmul.bf16.gmra.mxu2 %v7796_v58  ;;  %v5540_v47 = vpack.c.b16 %v5500_v9, %v5500_v9  ;;  %v5021_v13 = vsel %vm9555_vm13, %v5019_v22, %v5020_v6  ;;  %v5132_v63 = vsel %vm9587_vm0, %v5130_v60, %v5131_v28  ;;  %5159 = vst [vmem:[#allocation4 + $0x58] sm:$0xf] %v5129_v26  ;;  %v5074_v57 = vrot.slane %v10727_v50, 6  ;;  %v8353_v41 = vld [vmem:[#allocation4 + $0x2c] sm:$0xf0] }
 0x3cd   : > { %5998 = vmatmul.bf16.gmra.mxu1 %v5538_v27  ;;  %5047 = vst [vmem:[#allocation4 + $0x70] sm:$0xf] %v5021_v13  ;;  %v5075_v14 = vrot.slane %v10716_v8, 7  ;;  %v5499_v46 = vunpack.c.h.b16 %v10947_v11  ;;  %v5177_v58 = vrot.slane %v5174_v37, 4  ;;  %v5179_v35 = vor.u32 %v5178_v2, %v10691_v10  ;;  %v7719_v55 = vld [vmem:[#allocation4 + $0x18] sm:$0xf] }
 0x3ce   : > { %8446 = vmatpush.bf16.msrb.mxu1 %v10785_v25  ;;  %v5070_v25 = vrot.slane %v10691_v10, 7  ;;  %5160 = vst [vmem:[#allocation4 + $0x78] sm:$0xf] %v5132_v63  ;;  %v5501_v3 = vunpack.c.h.b16 %v5263_v4  ;;  %v5182_v10 = vrot.slane %v10727_v50, 7  ;;  %v5181_v34 = vrot.slane %v5178_v2, 4 }
 0x3cf   : > { %6092 = vmatmul.bf16.gmra.mxu0 %v7804_v31  ;;  %v5076_v27 = vor.u32 %v5075_v14, %v5074_v57  ;;  %v5180_v44 = vsel %vm9617_vm5, %v5177_v58, %v5179_v35  ;;  %v5539_v32 = vpack.c.b16 %v5499_v46, %v5499_v46  ;;  %v5022_v43 = vrot.slane %v5020_v6, 4  ;;  %v8354_v4 = vld [vmem:[#allocation4 + $0x34] sm:$0xf0]  ;;  %v8349_v14 = vld [vmem:[#allocation4 + $0x14] sm:$0xf] }
 0x3d0   : > { %v5071_v38 = vor.u32 %v5070_v25, %v5069_v54  ;;  %5221 = vst [vmem:[#allocation4 + $0x5c] sm:$0xf] %v5180_v44  ;;  %v5541_v31 = vpack.c.b16 %v5501_v3, %v5501_v3  ;;  %v5183_v37 = vor.u32 %v5182_v10, %v10716_v8  ;;  %v5023_v9 = vrot.slane %v10755_v49, 6  ;;  %v7713_v25 = vld [vmem:[#allocation4 + $0x30] sm:$0xf0] }
 0x3d1   : > { %v5026_v5 = vrot.slane %v10798_v59, 6  ;;  %v5134_v50 = vrot.slane %v10755_v49, 7  ;;  %v7720_v42 = vor.u32 %v8354_v4, %v7719_v55  ;;  %v5186_v7 = vrot.slane %v10769_v33, 7  ;;  %v7721_v58 = vld [vmem:[#allocation4 + $0x38] sm:$0xf0] }
 0x3d2   : > { %8447 = vmatpush.bf16.msrb.mxu1 %v10855_v62  ;;  %v5072_v52 = vsel %vm9602_vm2, %v5068_v61, %v5071_v38  ;;  %v5073_v24 = vrot.slane %v5071_v38, 4  ;;  %v7711_v62 = vld [vmem:[#allocation4 + $0x10] sm:$0xf]  ;;  %v5184_v15 = vsel %vm9617_vm5, %v5181_v34, %v5183_v37  ;;  %v5024_v8 = vsel %vm9555_vm13, %v5022_v43, %v5023_v9 }
 0x3d3   : > { %5110 = vst [vmem:[#allocation4 + $0x54] sm:$0xf] %v5072_v52  ;;  %v7712_v18 = vor.u32 %v8353_v41, %v7711_v62  ;;  %v5025_v40 = vrot.slane %v5023_v9, 4  ;;  %v5136_v6 = vrot.slane %v5134_v50, 4  ;;  %v5078_v22 = vrot.slane %v5076_v27, 4 }
 0x3d4   : > { %v5077_v11 = vsel %vm9602_vm2, %v5073_v24, %v5076_v27  ;;  %5222 = vst [vmem:[#allocation4 + $0x7c] sm:$0xf] %v5184_v15  ;;  %v8361_v60 = vld [vmem:[#allocation4 + $0x6c] sm:$0xf0]  ;;  %v5085_v13 = vrot.slane %v10809_v1, 7  ;;  %v5185_v63 = vrot.slane %v5182_v10, 4  ;;  %v5187_v54 = vor.u32 %v5186_v7, %v10766_v23 }
 0x3d5   : > { %6064 = vmatmul.bf16.gmra.mxu3 %v5540_v47  ;;  %5111 = vst [vmem:[#allocation4 + $0x74] sm:$0xf] %v5077_v11  ;;  %v5084_v47 = vrot.slane %v10812_v17, 6  ;;  %v7743_v61 = vld [vmem:[#allocation4 + $0x50] sm:$0xf]  ;;  %v7716_v41 = vor.u32 %v8349_v14, %v7713_v25  ;;  %v5189_v27 = vrot.slane %v5186_v7, 4 }
 0x3d6   : > { %8448 = vmatpush.bf16.msrb.mxu1 %v10872_v0  ;;  %v5133_v0 = vrot.slane %v5131_v28, 4  ;;  %5048 = vst [vmem:[#allocation4 + $0x90] sm:$0xf] %v5024_v8  ;;  %v5027_v28 = vsel %vm9555_vm13, %v5025_v40, %v5026_v5  ;;  %v7744_v46 = vor.u32 %v8361_v60, %v7743_v61  ;;  %v8350_v52 = vld [vmem:[#allocation4 + $0x1c] sm:$0xf]  ;;  %v5028_v44 = vrot.slane %v5026_v5, 4 }
 0x3d7   : > { %5049 = vst [vmem:[#allocation4 + $0xb0] sm:$0xf] %v5027_v28  ;;  %v5086_v57 = vor.u32 %v5085_v13, %v5084_v47  ;;  %v7724_v24 = vor.u32 %v8350_v52, %v7721_v58  ;;  %v5029_v11 = vrot.slane %v10826_v45, 6  ;;  %v5140_v10 = vrot.slane %v10826_v45, 7  ;;  %v7751_v43 = vld [vmem:[#allocation4 + $0x58] sm:$0xf] }
 0x3d8   : > { %v5135_v30 = vsel %vm9587_vm0, %v5133_v0, %v5134_v50  ;;  %v5089_v45 = vrot.slane %v10836_v29, 6  ;;  %v5090_v9 = vrot.slane %v10833_v16, 7  ;;  %v5194_v5 = vrot.slane %v10836_v29, 7  ;;  %v4759_v40 = vld [vmem:[#allocation3 + $0x4d] sm:$0x3] }
 0x3d9   : > { %5161 = vst [vmem:[#allocation4 + $0x98] sm:$0xf] %v5135_v30  ;;  %v5030_v34 = vsel %vm9555_vm13, %v5028_v44, %v5029_v11  ;;  %v5142_v0 = vrot.slane %v5140_v10, 4  ;;  %v5088_v50 = vrot.slane %v5086_v57, 4  ;;  %v5094_v47 = vrot.slane %v10884_v39, 6 }
 0x3da   : > { %8449 = vmatpush.bf16.msrb.mxu1 %v10921_v53  ;;  %v5137_v53 = vrot.slane %v10798_v59, 7  ;;  %v5079_v59 = vrot.slane %v10769_v33, 6  ;;  %v5188_v33 = vsel %vm9617_vm5, %v5185_v63, %v5187_v54  ;;  %5050 = vst [vmem:[#allocation4 + $0xd0] sm:$0xf] %v5030_v34  ;;  %v5195_v12 = vor.u32 %v5194_v5, %v10833_v16  ;;  %v8357_v28 = vld [vmem:[#allocation4 + $0x54] sm:$0xf] }
 0x3db   : > { %5223 = vst [vmem:[#allocation4 + $0x9c] sm:$0xf] %v5188_v33  ;;  %v8358_v16 = vld [vmem:[#allocation4 + $0x5c] sm:$0xf]  ;;  %v5095_v13 = vrot.slane %v10881_v36, 7  ;;  %v5198_v63 = vrot.slane %v10884_v39, 7 }
 0x3dc   : > { %6031 = vmatmul.bf16.gmra.mxu2 %v5539_v32  ;;  %v5138_v49 = vsel %vm9587_vm0, %v5136_v6, %v5137_v53  ;;  %v5139_v3 = vrot.slane %v5137_v53, 4  ;;  %v5032_v32 = vrot.slane %v10866_v20, 6  ;;  %v5091_v53 = vor.u32 %v5090_v9, %v5089_v45  ;;  %v7745_v30 = vld [vmem:[#allocation4 + $0x70] sm:$0xf0] }
 0x3dd   : > { %6110 = vmatmul.bf16.vlgmr.msra.gmra.mxu1 %v7712_v18  ;;  %5162 = vst [vmem:[#allocation4 + $0xb8] sm:$0xf] %v5138_v49  ;;  %v7775_v49 = vld [vmem:[#allocation4 + $0x90] sm:$0xf]  ;;  %v5096_v33 = vor.u32 %v5095_v13, %v5094_v47  ;;  %v5199_v14 = vor.u32 %v5198_v63, %v10881_v36  ;;  %v5116_v36 = vld [vmem:[#allocation4 + $0x114] sm:$0x3] }
 0x3de   : > { %8450 = vmatpush.bf16.msrb.mxu1 %v10944_v51  ;;  %v5080_v51 = vrot.slane %v10766_v23, 7  ;;  %v5190_v23 = vrot.slane %v10812_v17, 7  ;;  %v5143_v17 = vrot.slane %v10866_v20, 7  ;;  %v5141_v37 = vsel %vm9587_vm0, %v5139_v3, %v5140_v10  ;;  %v8369_v55 = vld [vmem:[#allocation4 + $0xac] sm:$0xf0] }
 0x3df   : > { %6097 = vmatmul.bf16.gmra.mxu0 %v5541_v31  ;;  %v8362_v31 = vld [vmem:[#allocation4 + $0x74] sm:$0xf0]  ;;  %5163 = vst [vmem:[#allocation4 + $0xd8] sm:$0xf] %v5141_v37  ;;  %v5092_v6 = vsel %vm9602_vm2, %v5088_v50, %v5091_v53  ;;  %v5227_v3 = vld [vmem:[#allocation4 + $0x11c] sm:$0x3] }
 0x3e0   : > { %v5081_v26 = vor.u32 %v5080_v51, %v5079_v59  ;;  %v5191_v62 = vor.u32 %v5190_v23, %v10809_v1  ;;  %v5031_v1 = vrot.slane %v5029_v11, 4  ;;  %v7752_v4 = vor.u32 %v8362_v31, %v7751_v43  ;;  %5114 = vst [vmem:[#allocation4 + $0xd4] sm:$0xf] %v5092_v6  ;;  %v7753_v59 = vld [vmem:[#allocation4 + $0x78] sm:$0xf0] }
 0x3e1   : > { %v5144_v20 = vsel %vm9587_vm0, %v5142_v0, %v5143_v17  ;;  %v5193_v8 = vrot.slane %v5190_v23, 4  ;;  %v7776_v51 = vor.u32 %v8369_v55, %v7775_v49  ;;  %v5145_v60 = vrot.slane %v5143_v17, 4  ;;  %v5165_v23 = vld [vmem:[#allocation4 + $0x118] sm:$0x3]  ;;  %v7807_v34 = vld [vmem:[#allocation4 + $0xd0] sm:$0xf] }
 0x3e2   : > { %v5082_v2 = vsel %vm9602_vm2, %v5078_v22, %v5081_v26  ;;  %v5083_v38 = vrot.slane %v5081_v26, 4  ;;  %v5192_v18 = vsel %vm9617_vm5, %v5189_v27, %v5191_v62  ;;  %v5033_v15 = vsel %vm9555_vm13, %v5031_v1, %v5032_v32  ;;  %5164 = vst [vmem:[#allocation4 + $0xf8] sm:$0xf] %v5144_v20  ;;  %v7783_v11 = vld [vmem:[#allocation4 + $0x98] sm:$0xf] }
 0x3e3   : > { %5112 = vst [vmem:[#allocation4 + $0x94] sm:$0xf] %v5082_v2  ;;  %v5196_v29 = vsel %vm9617_vm5, %v5193_v8, %v5195_v12  ;;  %v7748_v22 = vor.u32 %v8357_v28, %v7745_v30  ;;  %v5034_v26 = vrot.slane %v5032_v32, 4  ;;  %v7756_v25 = vor.u32 %v8358_v16, %v7753_v59  ;;  %v8366_v0 = vld [vmem:[#allocation4 + $0x9c] sm:$0xf] }
 0x3e4   : > { %v5087_v35 = vsel %vm9602_vm2, %v5083_v38, %v5086_v57  ;;  %5224 = vst [vmem:[#allocation4 + $0xbc] sm:$0xf] %v5192_v18  ;;  %v5197_v2 = vrot.slane %v5194_v5, 4  ;;  %v5093_v57 = vrot.slane %v5091_v53, 4  ;;  %v8370_v62 = vld [vmem:[#allocation4 + $0xb4] sm:$0xf0] }
 0x3e5   : > { %6176 = vmatmul.bf16.vlgmr.msra.gmra.mxu3 %v7720_v42  ;;  %5113 = vst [vmem:[#allocation4 + $0xb4] sm:$0xf] %v5087_v35  ;;  %v4769_v42 = vpack.c.bf16 %v4759_v40, %v4759_v40  ;;  %v7784_v32 = vor.u32 %v8370_v62, %v7783_v11  ;;  %v11071_v40 = vld [vmem:[%s11128_s4 + $0x8] ss:$0 sm:$0xff] }
 0x3e6   : > { %5051 = vst [vmem:[#allocation4 + $0xf0] sm:$0xf] %v5033_v15  ;;  %v5097_v52 = vsel %vm9602_vm2, %v5093_v57, %v5096_v33  ;;  %v5200_v27 = vsel %vm9617_vm5, %v5197_v2, %v5199_v14  ;;  %v7815_v45 = vld [vmem:[#allocation4 + $0xd8] sm:$0xf] }
 0x3e7   : > { %5225 = vst [vmem:[#allocation4 + $0xdc] sm:$0xf] %v5196_v29  ;;  %v5203_v7 = vshrl.u32 %v4769_v42, 16  ;;  %v5146_v54 = vrot.slane %v4769_v42, 7  ;;  %v5206_v38 = vshll.u32 %v4769_v42, 16 }
 0x3e8   : > { %5115 = vst [vmem:[#allocation4 + $0xf4] sm:$0xf] %v5097_v52  ;;  %v8373_v8 = vld [vmem:[#allocation4 + $0xd4] sm:$0xf] }
 0x3e9   : > { %v5205_v61 = vrot.slane %v5203_v7, 7  ;;  %v5147_v35 = vsel %vm9587_vm0, %v5145_v60, %v5146_v54  ;;  %5226 = vst [vmem:[#allocation4 + $0xfc] sm:$0xf] %v5200_v27  ;;  %v8378_v15 = vld [vmem:[#allocation4 + $0xf4] sm:$0xf0] }
 0x3ea   : > { %v5166_v44 = vsel %vm9530_vm11, %v5147_v35, %v5165_v23  ;;  %v8365_v19 = vld [vmem:[#allocation4 + $0x94] sm:$0xf]  ;;  %v7816_v20 = vor.u32 %v8378_v15, %v7815_v45 }
 0x3eb   : > { %v5208_v39 = vor.u32 %v5206_v38, %v5205_v61  ;;  %5167 = vst [vmem:[#allocation4 + $0x118] sm:$0x3] %v5166_v44  ;;  %v7785_v43 = vld [vmem:[#allocation4 + $0xb8] sm:$0xf0] }
 0x3ec   : > { %6143 = vmatmul.bf16.vlgmr.msra.gmra.mxu2 %v7716_v41  ;;  %v5052_v41 = vld [vmem:[#allocation4 + $0x110] sm:$0x3]  ;;  %v7777_v17 = vld [vmem:[#allocation4 + $0xb0] sm:$0xf0] }
 0x3ed   : > { %6115 = vmatmul.bf16.gmra.mxu1 %v7744_v46  ;;  %v5201_v46 = vrot.slane %v5198_v63, 4  ;;  %v5053_v58 = vsel %vm9530_vm11, %v5034_v26, %v5052_v41  ;;  %v8377_v31 = vld [vmem:[#allocation4 + $0xec] sm:$0xf0]  ;;  %v7780_v37 = vor.u32 %v8365_v19, %v7777_v17 }
 0x3ee   : > { %5054 = vst [vmem:[#allocation4 + $0x110] sm:$0x3] %v5053_v58  ;;  %v7808_v1 = vor.u32 %v8377_v31, %v7807_v34  ;;  %v8374_v28 = vld [vmem:[#allocation4 + $0xdc] sm:$0xf] }
 0x3ef   : > { %6209 = vmatmul.bf16.vlgmr.msrb.gmra.mxu0 %v7724_v24  ;;  %v5098_v24 = vrot.slane %v5096_v33, 4  ;;  %v5209_v48 = vsel %vm9617_vm5, %v5201_v46, %v5208_v39  ;;  %v7809_v50 = vld [vmem:[#allocation4 + $0xf0] sm:$0xf0] }
 0x3f0   : > { %v5228_v18 = vsel %vm9530_vm11, %v5209_v48, %v5227_v3  ;;  %v7812_v30 = vor.u32 %v8373_v8, %v7809_v50  ;;  %v7817_v6 = vld [vmem:[#allocation4 + $0xf8] sm:$0xf0] }
 0x3f1   : > { %v5117_v21 = vsel %vm9530_vm11, %v5098_v24, %v5116_v36  ;;  %5229 = vst [vmem:[#allocation4 + $0x11c] sm:$0x3] %v5228_v18  ;;  %v7820_v29 = vor.u32 %v8374_v28, %v7817_v6 }
 0x3f2   : > { %5118 = vst [vmem:[#allocation4 + $0x114] sm:$0x3] %v5117_v21 }
 0x3f5   : > { %6181 = vmatmul.bf16.gmra.mxu3 %v7752_v4  ;;  %v7788_v4 = vor.u32 %v8366_v0, %v7785_v43 }
 0x3f8   : > { %v5265_v49 = vld [vmem:[#allocation4 + $0x118] sm:$0x33] }
 0x3f9   : > { %v5264_v9 = vld [vmem:[#allocation4 + $0x110] sm:$0x33]  ;;  %v5504_v7 = vunpack.c.l.b16 %v5265_v49  ;;  %v5505_v63 = vunpack.c.h.b16 %v5265_v49 }
 0x3fa   : > { %v5502_v5 = vunpack.c.l.b16 %v5264_v9 }
 0x3fb   : > { %v5544_v47 = vpack.c.b16 %v5504_v7, %v5504_v7  ;;  %v5545_v33 = vpack.c.b16 %v5505_v63, %v5505_v63 }
 0x3fc   : > { %6148 = vmatmul.bf16.gmra.mxu2 %v7748_v22  ;;  %v5542_v12 = vpack.c.b16 %v5502_v5, %v5502_v5 }
 0x3fd   : > { %6120 = vmatmul.bf16.gmra.mxu1 %v7776_v51 }
 0x3ff   : > { %6214 = vmatmul.bf16.gmra.mxu0 %v7756_v25  ;;  %v5503_v25 = vunpack.c.h.b16 %v5264_v9 }
 0x401   : > { %v5543_v46 = vpack.c.b16 %v5503_v25, %v5503_v25 }
 0x405   : > { %6186 = vmatmul.bf16.gmra.mxu3 %v7784_v32 }
 0x407   : > { %v5979_v10 = vpop.f32.mrf.mxu1 }
 0x408   : > { %v5980_v59 = vadd.f32 %v11071_v40, %v5979_v10 }
 0x40c   : > { %6153 = vmatmul.bf16.gmra.mxu2 %v7780_v37 }
 0x40d   : > { %6125 = vmatmul.bf16.gmra.mxu1 %v7808_v1 }
 0x40f   : > { %v5981_v56 = vpop.f32.mrf.mxu1  ;;  %6219 = vmatmul.bf16.gmra.mxu0 %v7788_v4 }
 0x410   : > { %v5982_v54 = vadd.f32 %v11071_v40, %v5981_v56 }
 0x415   : > { %6191 = vmatmul.bf16.gmra.mxu3 %v7816_v20 }
 0x417   : > { %v5984_v53 = vpop.f32.mrf.mxu1 }
 0x418   : > { %v6045_v55 = vpop.f32.mrf.mxu3  ;;  %v5985_v58 = vadd.f32 %v11071_v40, %v5984_v53 }
 0x41c   : > { %v6078_v42 = vpop.f32.mrf.mxu0  ;;  %6158 = vmatmul.bf16.gmra.mxu2 %v7812_v30 }
 0x41d   : > { %6130 = vmatmul.bf16.gmra.mxu1 %v5542_v12 }
 0x41f   : > { %6224 = vmatmul.bf16.gmra.mxu0 %v7820_v29  ;;  %v6012_v51 = vpop.f32.mrf.mxu2  ;;  %v5986_v26 = vpop.f32.mrf.mxu1 }
 0x420   : > { %v6013_v22 = vadd.f32 %v6012_v51, %v5980_v59  ;;  %v6047_v60 = vpop.f32.mrf.mxu3  ;;  %v5987_v36 = vadd.f32 %v11071_v40, %v5986_v26 }
 0x422   : > { %v6046_v16 = vadd.f32 %v6045_v55, %v6013_v22 }
 0x424   : > { %v6080_v13 = vpop.f32.mrf.mxu0  ;;  %v6079_v19 = vadd.f32 %v6078_v42, %v6046_v16 }
 0x425   : > { %6196 = vmatmul.bf16.gmra.mxu3 %v5544_v47 }
 0x427   : > { %v6014_v2 = vpop.f32.mrf.mxu2  ;;  %v5989_v38 = vpop.f32.mrf.mxu1 }
 0x428   : > { %v6015_v61 = vadd.f32 %v6014_v2, %v5982_v54  ;;  %v6050_v57 = vpop.f32.mrf.mxu3  ;;  %v5990_v11 = vadd.f32 %v11071_v40, %v5989_v38 }
 0x42a   : > { %v6048_v14 = vadd.f32 %v6047_v60, %v6015_v61 }
 0x42c   : > { %v6083_v41 = vpop.f32.mrf.mxu0  ;;  %6163 = vmatmul.bf16.gmra.mxu2 %v5543_v46  ;;  %v6081_v0 = vadd.f32 %v6080_v13, %v6048_v14 }
 0x42d   : > { %6229 = vmatmul.bf16.vlgmr.msrb.gmra.mxu1 %v5545_v33 }
 0x42f   : > { %v6017_v35 = vpop.f32.mrf.mxu2  ;;  %v5991_v39 = vpop.f32.mrf.mxu1 }
 0x430   : > { %v6018_v23 = vadd.f32 %v6017_v35, %v5985_v58  ;;  %v6052_v52 = vpop.f32.mrf.mxu3  ;;  %v5992_v37 = vadd.f32 %v11071_v40, %v5991_v39 }
 0x432   : > { %v6051_v24 = vadd.f32 %v6050_v57, %v6018_v23  ;;  %v11085_v23 = vld [vmem:[%s11128_s4 + $0x9] ss:$0 sm:$0xff] }
 0x434   : > { %v6085_v27 = vpop.f32.mrf.mxu0  ;;  %v6084_v5 = vadd.f32 %v6083_v41, %v6051_v24 }
 0x437   : > { %v6019_v62 = vpop.f32.mrf.mxu2  ;;  %v5994_v48 = vpop.f32.mrf.mxu1 }
 0x438   : > { %v6020_v44 = vadd.f32 %v6019_v62, %v5987_v36  ;;  %v6055_v3 = vpop.f32.mrf.mxu3  ;;  %v5995_v50 = vadd.f32 %v11071_v40, %v5994_v48 }
 0x43a   : > { %v6053_v21 = vadd.f32 %v6052_v52, %v6020_v44 }
 0x43c   : > { %v6088_v18 = vpop.f32.mrf.mxu0  ;;  %v6086_v22 = vadd.f32 %v6085_v27, %v6053_v21  ;;  %v11090_v27 = vld [vmem:[%s11128_s4 + $0xa] ss:$0 sm:$0xff] }
 0x43f   : > { %v6022_v32 = vpop.f32.mrf.mxu2  ;;  %v5996_v31 = vpop.f32.mrf.mxu1 }
 0x440   : > { %v6023_v10 = vadd.f32 %v6022_v32, %v5990_v11  ;;  %v6057_v17 = vpop.f32.mrf.mxu3  ;;  %v5997_v42 = vadd.f32 %v11071_v40, %v5996_v31 }
 0x442   : > { %v6056_v34 = vadd.f32 %v6055_v3, %v6023_v10 }
 0x444   : > { %v6090_v1 = vpop.f32.mrf.mxu0  ;;  %v6089_v54 = vadd.f32 %v6088_v18, %v6056_v34 }
 0x447   : > { %v6024_v43 = vpop.f32.mrf.mxu2 }
 0x448   : > { %v6025_v4 = vadd.f32 %v6024_v43, %v5992_v37  ;;  %v6060_v56 = vpop.f32.mrf.mxu3 }
 0x44a   : > { %v5999_v15 = vpop.f32.mrf.mxu1  ;;  %v6058_v9 = vadd.f32 %v6057_v17, %v6025_v4 }
 0x44b   : > { %v6000_v45 = vadd.f32 %v11071_v40, %v5999_v15 }
 0x44c   : > { %v6093_v20 = vpop.f32.mrf.mxu0  ;;  %v6091_v57 = vadd.f32 %v6090_v1, %v6058_v9 }
 0x44f   : > { %v6027_v53 = vpop.f32.mrf.mxu2 }
 0x450   : > { %v6028_v55 = vadd.f32 %v6027_v53, %v5995_v50  ;;  %v6062_v8 = vpop.f32.mrf.mxu3 }
 0x452   : > { %v6001_v12 = vpop.f32.mrf.mxu1  ;;  %v6061_v30 = vadd.f32 %v6060_v56, %v6028_v55 }
 0x454   : > { %v6095_v6 = vpop.f32.mrf.mxu0  ;;  %v6094_v4 = vadd.f32 %v6093_v20, %v6061_v30 }
 0x457   : > { %v6029_v28 = vpop.f32.mrf.mxu2 }
 0x458   : > { %v6030_v49 = vadd.f32 %v6029_v28, %v5997_v42  ;;  %v6065_v29 = vpop.f32.mrf.mxu3 }
 0x45a   : > { %v6111_v59 = vpop.f32.mrf.mxu1  ;;  %v6063_v51 = vadd.f32 %v6062_v8, %v6030_v49 }
 0x45b   : > { %v6112_v40 = vadd.f32 %v6111_v59, %v6079_v19 }
 0x45c   : > { %v6098_v7 = vpop.f32.mrf.mxu0  ;;  %v6096_v56 = vadd.f32 %v6095_v6, %v6063_v51 }
 0x45f   : > { %v6032_v26 = vpop.f32.mrf.mxu2 }
 0x460   : > { %v6033_v60 = vadd.f32 %v6032_v26, %v6000_v45  ;;  %v6067_v16 = vpop.f32.mrf.mxu3 }
 0x462   : > { %v6113_v47 = vpop.f32.mrf.mxu1  ;;  %v6066_v13 = vadd.f32 %v6065_v29, %v6033_v60 }
 0x463   : > { %v6114_v52 = vadd.f32 %v6113_v47, %v6081_v0 }
 0x464   : > { %v6100_v63 = vpop.f32.mrf.mxu0  ;;  %v11096_v9 = vadd.f32 %v6098_v7, %v6066_v13 }
 0x467   : > { %v6034_v25 = vpop.f32.mrf.mxu2 }
 0x468   : > { %v6177_v2 = vpop.f32.mrf.mxu3 }
 0x46a   : > { %v6116_v61 = vpop.f32.mrf.mxu1 }
 0x46b   : > { %v6117_v10 = vadd.f32 %v6116_v61, %v6084_v5 }
 0x46c   : > { %v6210_v38 = vpop.f32.mrf.mxu0 }
 0x46f   : > { %v6144_v33 = vpop.f32.mrf.mxu2 }
 0x470   : > { %v6145_v14 = vadd.f32 %v6144_v33, %v6112_v40  ;;  %v6179_v46 = vpop.f32.mrf.mxu3 }
 0x472   : > { %v6118_v41 = vpop.f32.mrf.mxu1  ;;  %v6178_v58 = vadd.f32 %v6177_v2, %v6145_v14 }
 0x473   : > { %v6119_v50 = vadd.f32 %v6118_v41, %v6086_v22 }
 0x474   : > { %v6211_v35 = vadd.f32 %v6210_v38, %v6178_v58  ;;  %v6212_v39 = vpop.f32.mrf.mxu0 }
 0x476   : > { %v6234_v24 = vmax.f32 %v6211_v35, 0.0 }
 0x477   : > { %v6146_v36 = vpop.f32.mrf.mxu2 }
 0x478   : > { %v6245_v62 = vmul.f32 %v11085_v23, %v6234_v24  ;;  %v6147_v44 = vadd.f32 %v6146_v36, %v6114_v52  ;;  %v6182_v48 = vpop.f32.mrf.mxu3 }
 0x47a   : > { %v6121_v3 = vpop.f32.mrf.mxu1  ;;  %v6256_v21 = vadd.f32 %v11090_v27, %v6245_v62  ;;  %v6180_v18 = vadd.f32 %v6179_v46, %v6147_v44 }
 0x47b   : > { %v6122_v30 = vadd.f32 %v6121_v3, %v6089_v54 }
 0x47c   : > { %6265 = vst [vmem:[#allocation3 + $0x8] sm:$0xff] %v6256_v21  ;;  %v6213_v11 = vadd.f32 %v6212_v39, %v6180_v18  ;;  %v6215_v32 = vpop.f32.mrf.mxu0 }
 0x47e   : > { %v6235_v31 = vmax.f32 %v6213_v11, 0.0 }
 0x47f   : > { %v6149_v17 = vpop.f32.mrf.mxu2 }
 0x480   : > { %v6246_v34 = vmul.f32 %v11085_v23, %v6235_v31  ;;  %v6150_v19 = vadd.f32 %v6149_v17, %v6117_v10  ;;  %v6184_v1 = vpop.f32.mrf.mxu3 }
 0x482   : > { %v6123_v37 = vpop.f32.mrf.mxu1  ;;  %v6257_v43 = vadd.f32 %v11090_v27, %v6246_v34  ;;  %v6183_v0 = vadd.f32 %v6182_v48, %v6150_v19 }
 0x483   : > { %v6124_v13 = vadd.f32 %v6123_v37, %v6091_v57 }
 0x484   : > { %6266 = vst [vmem:[#allocation3 + $0x10] sm:$0xff] %v6257_v43  ;;  %v6216_v15 = vadd.f32 %v6215_v32, %v6183_v0  ;;  %v6217_v45 = vpop.f32.mrf.mxu0 }
 0x486   : > { %v6236_v53 = vmax.f32 %v6216_v15, 0.0 }
 0x487   : > { %v6151_v5 = vpop.f32.mrf.mxu2 }
 0x488   : > { %v6247_v55 = vmul.f32 %v11085_v23, %v6236_v53  ;;  %v6152_v8 = vadd.f32 %v6151_v5, %v6119_v50  ;;  %v6187_v12 = vpop.f32.mrf.mxu3 }
 0x48a   : > { %v6126_v42 = vpop.f32.mrf.mxu1  ;;  %v6258_v28 = vadd.f32 %v11090_v27, %v6247_v55  ;;  %v6185_v49 = vadd.f32 %v6184_v1, %v6152_v8 }
 0x48b   : > { %v6127_v57 = vadd.f32 %v6126_v42, %v6094_v4 }
 0x48c   : > { %6267 = vst [vmem:[#allocation3 + $0x18] sm:$0xff] %v6258_v28  ;;  %v6218_v29 = vadd.f32 %v6217_v45, %v6185_v49  ;;  %v6220_v20 = vpop.f32.mrf.mxu0 }
 0x48e   : > { %v6237_v6 = vmax.f32 %v6218_v29, 0.0 }
 0x48f   : > { %v6154_v59 = vpop.f32.mrf.mxu2 }
 0x490   : > { %v6248_v51 = vmul.f32 %v11085_v23, %v6237_v6  ;;  %v6155_v7 = vadd.f32 %v6154_v59, %v6122_v30  ;;  %v6189_v22 = vpop.f32.mrf.mxu3 }
 0x492   : > { %v6128_v26 = vpop.f32.mrf.mxu1  ;;  %v6259_v60 = vadd.f32 %v11090_v27, %v6248_v51  ;;  %v6188_v16 = vadd.f32 %v6187_v12, %v6155_v7 }
 0x493   : > { %v6129_v17 = vadd.f32 %v6128_v26, %v6096_v56 }
 0x494   : > { %6268 = vst [vmem:[#allocation3 + $0x20] sm:$0xff] %v6259_v60  ;;  %v6221_v47 = vadd.f32 %v6220_v20, %v6188_v16  ;;  %v6222_v25 = vpop.f32.mrf.mxu0 }
 0x496   : > { %v6238_v63 = vmax.f32 %v6221_v47, 0.0 }
 0x497   : > { %v6156_v2 = vpop.f32.mrf.mxu2 }
 0x498   : > { %v6249_v61 = vmul.f32 %v11085_v23, %v6238_v63  ;;  %v6157_v54 = vadd.f32 %v6156_v2, %v6124_v13  ;;  %v6192_v38 = vpop.f32.mrf.mxu3 }
 0x49a   : > { %v6131_v40 = vpop.f32.mrf.mxu1  ;;  %v6260_v33 = vadd.f32 %v11090_v27, %v6249_v61  ;;  %v6190_v14 = vadd.f32 %v6189_v22, %v6157_v54 }
 0x49b   : > { %v6275_v46 = vld [vmem:[#allocation3 + $0x8] ss:$4 sm:$0xff]  ;;  %v6279_v41 = vld [vmem:[#allocation3 + $0x9] ss:$4 sm:$0xff]  ;;  %v6285_v39 = vld [vmem:[#allocation3 + $0xa] ss:$4 sm:$0xff]  ;;  %v6132_v53 = vadd.f32 %v6131_v40, %v11096_v9 }
 0x49c   : > { %v6282_v58 = vmax.f32 %v6275_v46, %v6279_v41  ;;  %6269 = vst [vmem:[#allocation3 + $0x28] sm:$0xff] %v6260_v33  ;;  %v6223_v35 = vadd.f32 %v6222_v25, %v6190_v14  ;;  %v6291_v36 = vld [vmem:[#allocation3 + $0xb] ss:$4 sm:$0xff]  ;;  %v6225_v11 = vpop.f32.mrf.mxu0 }
 0x49e   : > { %v6288_v52 = vmax.f32 %v6282_v58, %v6285_v39  ;;  %v6239_v24 = vmax.f32 %v6223_v35, 0.0 }
 0x49f   : > { %v6159_v62 = vpop.f32.mrf.mxu2 }
 0x4a0   : > { %v6294_v44 = vmax.f32 %v6288_v52, %v6291_v36  ;;  %v6250_v48 = vmul.f32 %v11085_v23, %v6239_v24  ;;  %v6160_v3 = vadd.f32 %v6159_v62, %v6127_v57  ;;  %v6194_v21 = vpop.f32.mrf.mxu3 }
 0x4a2   : > { %v6133_v18 = vpop.f32.mrf.mxu1  ;;  %6296 = vst [vmem:[%s11108_s9] sm:$0xff] %v6294_v44  ;;  %v6261_v32 = vadd.f32 %v11090_v27, %v6250_v48  ;;  %v6193_v10 = vadd.f32 %v6192_v38, %v6160_v3 }
 0x4a4   : > { %6270 = vst [vmem:[#allocation3 + $0x30] sm:$0xff] %v6261_v32  ;;  %v6226_v31 = vadd.f32 %v6225_v11, %v6193_v10  ;;  %v6227_v45 = vpop.f32.mrf.mxu0 }
 0x4a6   : > { %v6240_v34 = vmax.f32 %v6226_v31, 0.0 }
 0x4a7   : > { %v6161_v19 = vpop.f32.mrf.mxu2 }
 0x4a8   : > { %v6251_v1 = vmul.f32 %v11085_v23, %v6240_v34  ;;  %v6162_v37 = vadd.f32 %v6161_v19, %v6129_v17  ;;  %v6197_v43 = vpop.f32.mrf.mxu3 }
 0x4aa   : > { %v6230_v0 = vpop.f32.mrf.mxu1  ;;  %v6262_v4 = vadd.f32 %v11090_v27, %v6251_v1  ;;  %v6195_v15 = vadd.f32 %v6194_v21, %v6162_v37 }
 0x4ac   : > { %6271 = vst [vmem:[#allocation3 + $0x38] sm:$0xff] %v6262_v4  ;;  %v6228_v50 = vadd.f32 %v6227_v45, %v6195_v15 }
 0x4ae   : > { %v6241_v5 = vmax.f32 %v6228_v50, 0.0 }
 0x4af   : > { %v6164_v55 = vpop.f32.mrf.mxu2 }
 0x4b0   : > { %v6252_v8 = vmul.f32 %v11085_v23, %v6241_v5  ;;  %v6165_v56 = vadd.f32 %v6164_v55, %v6132_v53  ;;  %v6199_v12 = vpop.f32.mrf.mxu3 }
 0x4b2   : > { %v6232_v42 = vpop.f32.mrf.mxu1  ;;  %v6263_v28 = vadd.f32 %v11090_v27, %v6252_v8  ;;  %v6198_v49 = vadd.f32 %v6197_v43, %v6165_v56 }
 0x4b4   : > { %6272 = vst [vmem:[#allocation3 + $0x40] sm:$0xff] %v6263_v28  ;;  %v6231_v29 = vadd.f32 %v6230_v0, %v6198_v49 }
 0x4b6   : > { %v6242_v20 = vmax.f32 %v6231_v29, 0.0 }
 0x4b7   : > { %v6166_v30 = vpop.f32.mrf.mxu2 }
 0x4b8   : > { %v6253_v6 = vmul.f32 %v11085_v23, %v6242_v20 }
 0x4ba   : > { %v6264_v59 = vadd.f32 %v11090_v27, %v6253_v6 }
 0x4bb   : > { %v6277_v9 = vld [vmem:[#allocation3 + $0x28] ss:$4 sm:$0xff]  ;;  %v6281_v51 = vld [vmem:[#allocation3 + $0x29] ss:$4 sm:$0xff]  ;;  %v6287_v22 = vld [vmem:[#allocation3 + $0x2a] ss:$4 sm:$0xff] }
 0x4bc   : > { %v6283_v7 = vmax.f32 %v6277_v9, %v6281_v51  ;;  %6273 = vst [vmem:[#allocation3 + $0x48] sm:$0x7] %v6264_v59  ;;  %v6293_v60 = vld [vmem:[#allocation3 + $0x2b] ss:$4 sm:$0xff] }
 0x4be   : > { %v6289_v26 = vmax.f32 %v6283_v7, %v6287_v22 }
 0x4c0   : > { %v6295_v16 = vmax.f32 %v6289_v26, %v6293_v60 }
 0x4c2   : > { %6297 = vst [vmem:[%s11108_s9 + $0x8] sm:$0xff] %v6295_v16 }
 0x4c3 PF: > { %s15_s18 = sadd.s32 1, %s8492_s18  }
 0x4c4   : > { %p12_p4 = scmp.ge.s32.totalorder %s15_s18, 4  }
 0x4c6   :  { %14 = sbr.rel (!%p12_p4) target bundleno = 1 (0x1), region = 154 }

</bundles_post_ra>
